<compile_context>
chip_gen: v7x
topology: tpu7x:2x2x1
jax: 0.10.0
libtpu: 0.0.40
codegen_flags: <defaults>
</compile_context>

<pallas_src>
import functools

import jax
import jax.numpy as jnp
from jax.experimental import pallas as pl
from jax.experimental.pallas import tpu as pltpu


def _round_up(x, m):
    return -(-x // m) * m


def _tpu_vmem_capacity():
    try:
        return int(pltpu.get_tpu_info().vmem_capacity_bytes)
    except Exception:
        return 0


_PHYS_VMEM = _tpu_vmem_capacity()
if _PHYS_VMEM:
    _VMEM_LIMIT = min(max(32 * 1024 * 1024, _PHYS_VMEM * 3 // 4),
                      _PHYS_VMEM, 96 * 1024 * 1024)
    _TILE_M = 512 if _PHYS_VMEM >= 100 * 1024 * 1024 else 256
else:
    _VMEM_LIMIT = 32 * 1024 * 1024
    _TILE_M = 256


# ----------------------------------------------------------------------------
# Tiled dense matmul kernel:  y = x @ w + b   (bf16 operands, fp32 accumulation)
# ----------------------------------------------------------------------------
def _matmul_kernel(x_ref, w_ref, b_ref, o_ref, acc_ref):
    k = pl.program_id(2)

    @pl.when(k == 0)
    def _():
        acc_ref[...] = jnp.zeros_like(acc_ref)

    acc_ref[...] += jnp.dot(x_ref[...], w_ref[...],
                            preferred_element_type=jnp.float32)

    @pl.when(k == pl.num_programs(2) - 1)
    def _():
        o_ref[...] = (acc_ref[...] + b_ref[...]).astype(o_ref.dtype)


def dense(x, w, b, out_dtype=jnp.float32, tile_m=None, tile_n=256, tile_k=512):
    """y = x @ w + b; M/N/K tiled, lane-dense padded, bf16 operands, fp32 accumulation."""
    M, K = x.shape
    N = w.shape[1]
    if tile_m is None:
        tile_m = _TILE_M
    tm = min(tile_m, _round_up(M, 8))
    tn = min(tile_n, _round_up(N, 128))
    tk = min(tile_k, _round_up(K, 128))
    Mp, Kp, Np = _round_up(M, tm), _round_up(K, tk), _round_up(N, tn)
    xp = jnp.pad(x, ((0, Mp - M), (0, Kp - K))).astype(jnp.bfloat16)
    wp = jnp.pad(w, ((0, Kp - K), (0, Np - N))).astype(jnp.bfloat16)
    bp = jnp.pad(b.astype(jnp.float32), (0, Np - N)).reshape(1, Np)
    out = pl.pallas_call(
        _matmul_kernel,
        out_shape=jax.ShapeDtypeStruct((Mp, Np), out_dtype),
        grid=(Mp // tm, Np // tn, Kp // tk),
        in_specs=[
            pl.BlockSpec((tm, tk), lambda i, j, k: (i, k)),
            pl.BlockSpec((tk, tn), lambda i, j, k: (k, j)),
            pl.BlockSpec((1, tn), lambda i, j, k: (0, j)),
        ],
        out_specs=pl.BlockSpec((tm, tn), lambda i, j, k: (i, j)),
        scratch_shapes=[pltpu.VMEM((tm, tn), jnp.float32)],
        compiler_params=pltpu.CompilerParams(
            dimension_semantics=("parallel", "parallel", "arbitrary"),
            vmem_limit_bytes=_VMEM_LIMIT,
        ),
    )(xp, wp, bp)
    return out[:M, :N]


# ----------------------------------------------------------------------------
# Fused Conv3x3 + bias + ReLU + MaxPool2x2 kernel (taps built in VMEM, one image per step)
# ----------------------------------------------------------------------------
def _conv_pool_kernel(xe_ref, xo_ref, w_ref, b_ref, o_ref, *, Ho):
    # xe/xo: (H+2, Wo, 3*Cin) bf16 (even / odd output columns, horizontal taps pre-gathered)
    # w:     (3, 3*Cin, Cout) bf16 (one (3*Cin, Cout) slice per vertical tap ky)
    # b:     (1, Cout) f32;   o: (Ho, Wo, Cout) f32
    wks = [w_ref[ky] for ky in range(3)]
    bias = b_ref[...]
    nrows = 2 * Ho + 2
    rows_e = [xe_ref[y] for y in range(nrows)]
    rows_o = [xo_ref[y] for y in range(nrows)]

    def conv_row(rows, h):
        acc = jnp.dot(rows[h], wks[0], preferred_element_type=jnp.float32)
        acc += jnp.dot(rows[h + 1], wks[1], preferred_element_type=jnp.float32)
        acc += jnp.dot(rows[h + 2], wks[2], preferred_element_type=jnp.float32)
        return jnp.maximum(acc + bias, 0.0)           # conv + bias + ReLU, (Wo, Cout) f32

    for r in range(Ho):
        p00 = conv_row(rows_e, 2 * r)                 # conv row 2r,   even cols
        p01 = conv_row(rows_o, 2 * r)                 # conv row 2r,   odd cols
        p10 = conv_row(rows_e, 2 * r + 1)             # conv row 2r+1, even cols
        p11 = conv_row(rows_o, 2 * r + 1)             # conv row 2r+1, odd cols
        o_ref[r] = jnp.maximum(jnp.maximum(p00, p01),
                               jnp.maximum(p10, p11)).astype(o_ref.dtype)


def conv3x3_relu_pool(x, w, b):
    """Conv2d(3x3, padding=1) + ReLU + MaxPool2d(2) on NHWC input, one fused Pallas call.

    x: (B, H, W, Cin) NHWC.  w: (Cout, Cin, 3, 3) torch layout.  -> (B, H//2, W//2, Cout).
    """
    B, H, W, Cin = x.shape
    Cout = w.shape[0]
    Ho, Wo = H // 2, W // 2                           # floor, like nn.MaxPool2d((2, 2))
    xp = jnp.pad(x, ((0, 0), (1, 1), (1, 1), (0, 0)))
    # Horizontal im2col restricted to the two pooling column parities; column order (kx, cin).
    x_even = jnp.concatenate(
        [xp[:, :, kx:kx + 2 * Wo:2, :] for kx in range(3)], axis=-1).astype(jnp.bfloat16)
    x_odd = jnp.concatenate(
        [xp[:, :, kx + 1:kx + 1 + 2 * Wo:2, :] for kx in range(3)], axis=-1).astype(jnp.bfloat16)
    # Weights: (ky, kx*Cin+ci, co) to match the tap column order above.
    wk = jnp.transpose(w, (2, 3, 1, 0)).reshape(3, 3 * Cin, Cout).astype(jnp.bfloat16)
    bm = b.astype(jnp.float32).reshape(1, Cout)

    x_spec = pl.BlockSpec((None, H + 2, Wo, 3 * Cin), lambda bi: (bi, 0, 0, 0))
    return pl.pallas_call(
        functools.partial(_conv_pool_kernel, Ho=Ho),
        out_shape=jax.ShapeDtypeStruct((B, Ho, Wo, Cout), jnp.float32),
        grid=(B,),
        in_specs=[x_spec, x_spec,
                  pl.BlockSpec((3, 3 * Cin, Cout), lambda bi: (0, 0, 0)),
                  pl.BlockSpec((1, Cout), lambda bi: (0, 0))],
        out_specs=pl.BlockSpec((None, Ho, Wo, Cout), lambda bi: (bi, 0, 0, 0)),
        compiler_params=pltpu.CompilerParams(
            dimension_semantics=("parallel",),
            vmem_limit_bytes=_VMEM_LIMIT,
        ),
    )(x_even, x_odd, wk, bm)


# ----------------------------------------------------------------------------
# Bidirectional GRU recurrence: fwd/bwd chains interleaved in one body, grid = (time-chunk,)
# ----------------------------------------------------------------------------
def _bigru_kernel(xf_ref, xb_ref, whh_ref, bhh_ref, of_ref, ob_ref, hf_ref, hb_ref,
                  *, tc, hidden, t_valid, t_padded, nchunks):
    c = pl.program_id(0)

    @pl.when(c == 0)
    def _():
        hf_ref[...] = jnp.zeros_like(hf_ref)
        hb_ref[...] = jnp.zeros_like(hb_ref)

    H = hidden
    whh_f = whh_ref[0]            # (H, 3H) bf16
    whh_b = whh_ref[1]
    bhh_f = bhh_ref[0]            # (1, 3H) f32
    bhh_b = bhh_ref[1]
    need_mask = t_padded != t_valid   # compile-time constant

    for i in range(tc):
        tf = i                    # forward walks the chunk left->right
        tb = tc - 1 - i           # backward walks its (reversed-index) chunk right->left
        # ---- forward step ----
        hf = hf_ref[...]
        xg = xf_ref[:, tf, :].astype(jnp.float32)                       # (B, 3H)
        hg = jnp.dot(hf.astype(jnp.bfloat16), whh_f,
                     preferred_element_type=jnp.float32) + bhh_f
        r = jax.nn.sigmoid(xg[:, :H] + hg[:, :H])
        z = jax.nn.sigmoid(xg[:, H:2 * H] + hg[:, H:2 * H])
        n = jnp.tanh(xg[:, 2 * H:] + r * hg[:, 2 * H:])
        hf_new = (1.0 - z) * n + z * hf
        hf_ref[...] = hf_new
        of_ref[:, tf, :] = hf_new
        # ---- backward step (independent chain, interleaved with the forward one) ----
        hb = hb_ref[...]
        xgb = xb_ref[:, tb, :].astype(jnp.float32)
        hgb = jnp.dot(hb.astype(jnp.bfloat16), whh_b,
                      preferred_element_type=jnp.float32) + bhh_b
        rb = jax.nn.sigmoid(xgb[:, :H] + hgb[:, :H])
        zb = jax.nn.sigmoid(xgb[:, H:2 * H] + hgb[:, H:2 * H])
        nb = jnp.tanh(xgb[:, 2 * H:] + rb * hgb[:, 2 * H:])
        hb_new = (1.0 - zb) * nb + zb * hb
        if need_mask:
            # Only the backward chain hits padded timesteps before real ones.
            t_abs = (nchunks - 1 - c) * tc + tb
            valid = (t_abs < t_valid).astype(jnp.float32)
            hb_new = valid * hb_new + (1.0 - valid) * hb
        hb_ref[...] = hb_new
        ob_ref[:, tb, :] = hb_new


def bidir_gru(x, p):
    """x: (B, T, F) batch-first -> (B, T, 2H), PyTorch nn.GRU(bidirectional=True) semantics."""
    B, T, F = x.shape
    H = p["whh_f"].shape[0]
    G = 3 * H
    # Fused input projection for both directions: one 6H-wide matmul, stored bf16.
    wih = jnp.concatenate([p["wih_f"], p["wih_r"]], axis=1)                 # (F, 6H)
    bih = jnp.concatenate([p["bih_f"], p["bih_r"]], axis=0)                 # (6H,)
    g = dense(x.reshape(B * T, F), wih, bih, out_dtype=jnp.bfloat16)        # (B*T, 6H)
    g = g.reshape(B, T, 2 * G)                                              # (B, T, 6H)

    tc = T if T <= 32 else 32
    Tp = _round_up(T, tc)
    if Tp != T:
        g = jnp.pad(g, ((0, 0), (0, Tp - T), (0, 0)))
    nchunks = Tp // tc

    whh = jnp.stack([p["whh_f"], p["whh_r"]]).astype(jnp.bfloat16)          # (2, H, 3H)
    bhh = jnp.stack([p["bhh_f"].reshape(1, G),
                     p["bhh_r"].reshape(1, G)]).astype(jnp.float32)         # (2, 1, 3H)

    out_f, out_b = pl.pallas_call(
        functools.partial(_bigru_kernel, tc=tc, hidden=H, t_valid=T,
                          t_padded=Tp, nchunks=nchunks),
        out_shape=(jax.ShapeDtypeStruct((B, Tp, H), jnp.float32),
                   jax.ShapeDtypeStruct((B, Tp, H), jnp.float32)),
        grid=(nchunks,),
        in_specs=[
            # forward gates: chunk c, columns [0:3H]
            pl.BlockSpec((B, tc, G), lambda c: (0, c, 0)),
            # backward gates: chunk nchunks-1-c, columns [3H:6H] — selected purely by index_map
            pl.BlockSpec((B, tc, G), lambda c: (0, nchunks - 1 - c, 1)),
            pl.BlockSpec((2, H, G), lambda c: (0, 0, 0)),
            pl.BlockSpec((2, 1, G), lambda c: (0, 0, 0)),
        ],
        out_specs=(
            pl.BlockSpec((B, tc, H), lambda c: (0, c, 0)),
            pl.BlockSpec((B, tc, H), lambda c: (0, nchunks - 1 - c, 0)),
        ),
        scratch_shapes=[pltpu.VMEM((B, H), jnp.float32),
                        pltpu.VMEM((B, H), jnp.float32)],
        compiler_params=pltpu.CompilerParams(
            dimension_semantics=("arbitrary",),
            vmem_limit_bytes=_VMEM_LIMIT,
        ),
    )(g, g, whh, bhh)

    return jnp.concatenate([out_f[:, :T, :], out_b[:, :T, :]], axis=-1)     # (B, T, 2H)


# ----------------------------------------------------------------------------
# Full forward pass
# ----------------------------------------------------------------------------
def crnn_forward(params, x):
    """x: (B, 1, n_mels, T) NCHW float32 -> (B, T//4, n_classes)."""
    x = jnp.transpose(x, (0, 2, 3, 1))                               # NCHW -> NHWC
    x = conv3x3_relu_pool(x, params["conv1_w"], params["conv1_b"])   # (B, H/2, W/2, 32)
    x = conv3x3_relu_pool(x, params["conv2_w"], params["conv2_b"])   # (B, H/4, W/4, 64)

    b, h, w, c = x.shape
    # matches torch: x.permute(0, 3, 1, 2).reshape(b, w, c*h)  (features c-major, h-minor)
    x = jnp.transpose(x, (0, 2, 3, 1)).reshape(b, w, c * h)          # (b, w, c*h)

    x = bidir_gru(x, params["gru"])                                  # (b, w, 256)

    out = dense(x.reshape(b * w, x.shape[-1]), params["fc_w"], params["fc_b"])
    return out.reshape(b, w, -1)


# ----------------------------------------------------------------------------
# Deterministic parameter init (shapes follow the PyTorch module __init__)
# ----------------------------------------------------------------------------
def init_params(key, n_mels, n_classes, hidden=128):
    feat = n_mels // 4 * 64
    ks = jax.random.split(key, 16)

    def u(k, shape, scale=0.1):
        return jax.random.uniform(k, shape, jnp.float32, -scale, scale)

    gru = {
        "wih_f": u(ks[4], (feat, 3 * hidden)),     # weight_ih_l0.T
        "whh_f": u(ks[5], (hidden, 3 * hidden)),   # weight_hh_l0.T
        "bih_f": u(ks[6], (3 * hidden,)),
        "bhh_f": u(ks[7], (3 * hidden,)),
        "wih_r": u(ks[8], (feat, 3 * hidden)),     # weight_ih_l0_reverse.T
        "whh_r": u(ks[9], (hidden, 3 * hidden)),   # weight_hh_l0_reverse.T
        "bih_r": u(ks[10], (3 * hidden,)),
        "bhh_r": u(ks[11], (3 * hidden,)),
    }
    return {
        "conv1_w": u(ks[0], (32, 1, 3, 3)),
        "conv1_b": u(ks[1], (32,)),
        "conv2_w": u(ks[2], (64, 32, 3, 3)),
        "conv2_b": u(ks[3], (64,)),
        "gru": gru,
        "fc_w": u(ks[12], (2 * hidden, n_classes)),  # fc.weight.T
        "fc_b": u(ks[13], (n_classes,)),
    }


if __name__ == "__main__":
    n_mels, n_classes = 16, 8
    B, T_in = 2, 16

    x = jax.random.normal(jax.random.PRNGKey(0), (B, 1, n_mels, T_in), jnp.float32)
    params = init_params(jax.random.PRNGKey(42), n_mels, n_classes)

    fwd = jax.jit(crnn_forward)
    out = jax.block_until_ready(fwd(params, x))

    assert out.shape == (B, T_in // 4, n_classes), out.shape
    assert out.dtype == jnp.float32
    print("KERNEL_OK")
</pallas_src>

<mosaic_0001>
module attributes {stable_mosaic.version = 11 : i64} {
  func.func @_conv_pool_kernel(%arg0: i32, %arg1: memref<1x18x8x3xbf16, #tpu.memory_space<vmem>>, %arg2: memref<1x18x8x3xbf16, #tpu.memory_space<vmem>>, %arg3: memref<3x3x32xbf16, #tpu.memory_space<vmem>>, %arg4: memref<1x32xf32, #tpu.memory_space<vmem>>, %arg5: memref<1x8x8x32xf32, #tpu.memory_space<vmem>>) attributes {dimension_semantics = [#tpu.dimension_semantics<parallel>], iteration_bounds = array<i64: 2>, scalar_prefetch = 0 : i64, scratch_operands = 0 : i64, tpu.core_type = #tpu.core_type<tc>, window_params = [{transform_indices = @transform_0, window_bounds = array<i64: 1, 18, 8, 3>}, {transform_indices = @transform_1, window_bounds = array<i64: 1, 18, 8, 3>}, {pipeline_mode = #tpu.pipeline_mode<synchronous>, transform_indices = @transform_2, window_bounds = array<i64: 3, 3, 32>}, {pipeline_mode = #tpu.pipeline_mode<synchronous>, transform_indices = @transform_3, window_bounds = array<i64: 1, 32>}, {transform_indices = @transform_4, window_bounds = array<i64: 1, 8, 8, 32>}]} {
    %c0 = arith.constant 0 : index
    %c0_0 = arith.constant 0 : index
    %c0_1 = arith.constant 0 : index
    %0 = vector.load %arg3[%c0, %c0_0, %c0_1] : memref<3x3x32xbf16, #tpu.memory_space<vmem>>, vector<1x3x32xbf16>
    %1 = vector.shape_cast %0 : vector<1x3x32xbf16> to vector<3x32xbf16>
    %c1 = arith.constant 1 : index
    %c0_2 = arith.constant 0 : index
    %c0_3 = arith.constant 0 : index
    %2 = vector.load %arg3[%c1, %c0_2, %c0_3] : memref<3x3x32xbf16, #tpu.memory_space<vmem>>, vector<1x3x32xbf16>
    %3 = vector.shape_cast %2 : vector<1x3x32xbf16> to vector<3x32xbf16>
    %c2 = arith.constant 2 : index
    %c0_4 = arith.constant 0 : index
    %c0_5 = arith.constant 0 : index
    %4 = vector.load %arg3[%c2, %c0_4, %c0_5] : memref<3x3x32xbf16, #tpu.memory_space<vmem>>, vector<1x3x32xbf16>
    %5 = vector.shape_cast %4 : vector<1x3x32xbf16> to vector<3x32xbf16>
    %c0_6 = arith.constant 0 : index
    %c0_7 = arith.constant 0 : index
    %6 = vector.load %arg4[%c0_6, %c0_7] : memref<1x32xf32, #tpu.memory_space<vmem>>, vector<1x32xf32>
    %c0_8 = arith.constant 0 : index
    %c0_9 = arith.constant 0 : index
    %c0_10 = arith.constant 0 : index
    %c0_11 = arith.constant 0 : index
    %7 = vector.load %arg1[%c0_8, %c0_9, %c0_10, %c0_11] : memref<1x18x8x3xbf16, #tpu.memory_space<vmem>>, vector<1x1x8x3xbf16>
    %8 = vector.shape_cast %7 : vector<1x1x8x3xbf16> to vector<8x3xbf16>
    %c0_12 = arith.constant 0 : index
    %c1_13 = arith.constant 1 : index
    %c0_14 = arith.constant 0 : index
    %c0_15 = arith.constant 0 : index
    %9 = vector.load %arg1[%c0_12, %c1_13, %c0_14, %c0_15] : memref<1x18x8x3xbf16, #tpu.memory_space<vmem>>, vector<1x1x8x3xbf16>
    %10 = vector.shape_cast %9 : vector<1x1x8x3xbf16> to vector<8x3xbf16>
    %c0_16 = arith.constant 0 : index
    %c2_17 = arith.constant 2 : index
    %c0_18 = arith.constant 0 : index
    %c0_19 = arith.constant 0 : index
    %11 = vector.load %arg1[%c0_16, %c2_17, %c0_18, %c0_19] : memref<1x18x8x3xbf16, #tpu.memory_space<vmem>>, vector<1x1x8x3xbf16>
    %12 = vector.shape_cast %11 : vector<1x1x8x3xbf16> to vector<8x3xbf16>
    %c0_20 = arith.constant 0 : index
    %c3 = arith.constant 3 : index
    %c0_21 = arith.constant 0 : index
    %c0_22 = arith.constant 0 : index
    %13 = vector.load %arg1[%c0_20, %c3, %c0_21, %c0_22] : memref<1x18x8x3xbf16, #tpu.memory_space<vmem>>, vector<1x1x8x3xbf16>
    %14 = vector.shape_cast %13 : vector<1x1x8x3xbf16> to vector<8x3xbf16>
    %c0_23 = arith.constant 0 : index
    %c4 = arith.constant 4 : index
    %c0_24 = arith.constant 0 : index
    %c0_25 = arith.constant 0 : index
    %15 = vector.load %arg1[%c0_23, %c4, %c0_24, %c0_25] : memref<1x18x8x3xbf16, #tpu.memory_space<vmem>>, vector<1x1x8x3xbf16>
    %16 = vector.shape_cast %15 : vector<1x1x8x3xbf16> to vector<8x3xbf16>
    %c0_26 = arith.constant 0 : index
    %c5 = arith.constant 5 : index
    %c0_27 = arith.constant 0 : index
    %c0_28 = arith.constant 0 : index
    %17 = vector.load %arg1[%c0_26, %c5, %c0_27, %c0_28] : memref<1x18x8x3xbf16, #tpu.memory_space<vmem>>, vector<1x1x8x3xbf16>
    %18 = vector.shape_cast %17 : vector<1x1x8x3xbf16> to vector<8x3xbf16>
    %c0_29 = arith.constant 0 : index
    %c6 = arith.constant 6 : index
    %c0_30 = arith.constant 0 : index
    %c0_31 = arith.constant 0 : index
    %19 = vector.load %arg1[%c0_29, %c6, %c0_30, %c0_31] : memref<1x18x8x3xbf16, #tpu.memory_space<vmem>>, vector<1x1x8x3xbf16>
    %20 = vector.shape_cast %19 : vector<1x1x8x3xbf16> to vector<8x3xbf16>
    %c0_32 = arith.constant 0 : index
    %c7 = arith.constant 7 : index
    %c0_33 = arith.constant 0 : index
    %c0_34 = arith.constant 0 : index
    %21 = vector.load %arg1[%c0_32, %c7, %c0_33, %c0_34] : memref<1x18x8x3xbf16, #tpu.memory_space<vmem>>, vector<1x1x8x3xbf16>
    %22 = vector.shape_cast %21 : vector<1x1x8x3xbf16> to vector<8x3xbf16>
    %c0_35 = arith.constant 0 : index
    %c8 = arith.constant 8 : index
    %c0_36 = arith.constant 0 : index
    %c0_37 = arith.constant 0 : index
    %23 = vector.load %arg1[%c0_35, %c8, %c0_36, %c0_37] : memref<1x18x8x3xbf16, #tpu.memory_space<vmem>>, vector<1x1x8x3xbf16>
    %24 = vector.shape_cast %23 : vector<1x1x8x3xbf16> to vector<8x3xbf16>
    %c0_38 = arith.constant 0 : index
    %c9 = arith.constant 9 : index
    %c0_39 = arith.constant 0 : index
    %c0_40 = arith.constant 0 : index
    %25 = vector.load %arg1[%c0_38, %c9, %c0_39, %c0_40] : memref<1x18x8x3xbf16, #tpu.memory_space<vmem>>, vector<1x1x8x3xbf16>
    %26 = vector.shape_cast %25 : vector<1x1x8x3xbf16> to vector<8x3xbf16>
    %c0_41 = arith.constant 0 : index
    %c10 = arith.constant 10 : index
    %c0_42 = arith.constant 0 : index
    %c0_43 = arith.constant 0 : index
    %27 = vector.load %arg1[%c0_41, %c10, %c0_42, %c0_43] : memref<1x18x8x3xbf16, #tpu.memory_space<vmem>>, vector<1x1x8x3xbf16>
    %28 = vector.shape_cast %27 : vector<1x1x8x3xbf16> to vector<8x3xbf16>
    %c0_44 = arith.constant 0 : index
    %c11 = arith.constant 11 : index
    %c0_45 = arith.constant 0 : index
    %c0_46 = arith.constant 0 : index
    %29 = vector.load %arg1[%c0_44, %c11, %c0_45, %c0_46] : memref<1x18x8x3xbf16, #tpu.memory_space<vmem>>, vector<1x1x8x3xbf16>
    %30 = vector.shape_cast %29 : vector<1x1x8x3xbf16> to vector<8x3xbf16>
    %c0_47 = arith.constant 0 : index
    %c12 = arith.constant 12 : index
    %c0_48 = arith.constant 0 : index
    %c0_49 = arith.constant 0 : index
    %31 = vector.load %arg1[%c0_47, %c12, %c0_48, %c0_49] : memref<1x18x8x3xbf16, #tpu.memory_space<vmem>>, vector<1x1x8x3xbf16>
    %32 = vector.shape_cast %31 : vector<1x1x8x3xbf16> to vector<8x3xbf16>
    %c0_50 = arith.constant 0 : index
    %c13 = arith.constant 13 : index
    %c0_51 = arith.constant 0 : index
    %c0_52 = arith.constant 0 : index
    %33 = vector.load %arg1[%c0_50, %c13, %c0_51, %c0_52] : memref<1x18x8x3xbf16, #tpu.memory_space<vmem>>, vector<1x1x8x3xbf16>
    %34 = vector.shape_cast %33 : vector<1x1x8x3xbf16> to vector<8x3xbf16>
    %c0_53 = arith.constant 0 : index
    %c14 = arith.constant 14 : index
    %c0_54 = arith.constant 0 : index
    %c0_55 = arith.constant 0 : index
    %35 = vector.load %arg1[%c0_53, %c14, %c0_54, %c0_55] : memref<1x18x8x3xbf16, #tpu.memory_space<vmem>>, vector<1x1x8x3xbf16>
    %36 = vector.shape_cast %35 : vector<1x1x8x3xbf16> to vector<8x3xbf16>
    %c0_56 = arith.constant 0 : index
    %c15 = arith.constant 15 : index
    %c0_57 = arith.constant 0 : index
    %c0_58 = arith.constant 0 : index
    %37 = vector.load %arg1[%c0_56, %c15, %c0_57, %c0_58] : memref<1x18x8x3xbf16, #tpu.memory_space<vmem>>, vector<1x1x8x3xbf16>
    %38 = vector.shape_cast %37 : vector<1x1x8x3xbf16> to vector<8x3xbf16>
    %c0_59 = arith.constant 0 : index
    %c16 = arith.constant 16 : index
    %c0_60 = arith.constant 0 : index
    %c0_61 = arith.constant 0 : index
    %39 = vector.load %arg1[%c0_59, %c16, %c0_60, %c0_61] : memref<1x18x8x3xbf16, #tpu.memory_space<vmem>>, vector<1x1x8x3xbf16>
    %40 = vector.shape_cast %39 : vector<1x1x8x3xbf16> to vector<8x3xbf16>
    %c0_62 = arith.constant 0 : index
    %c17 = arith.constant 17 : index
    %c0_63 = arith.constant 0 : index
    %c0_64 = arith.constant 0 : index
    %41 = vector.load %arg1[%c0_62, %c17, %c0_63, %c0_64] : memref<1x18x8x3xbf16, #tpu.memory_space<vmem>>, vector<1x1x8x3xbf16>
    %42 = vector.shape_cast %41 : vector<1x1x8x3xbf16> to vector<8x3xbf16>
    %c0_65 = arith.constant 0 : index
    %c0_66 = arith.constant 0 : index
    %c0_67 = arith.constant 0 : index
    %c0_68 = arith.constant 0 : index
    %43 = vector.load %arg2[%c0_65, %c0_66, %c0_67, %c0_68] : memref<1x18x8x3xbf16, #tpu.memory_space<vmem>>, vector<1x1x8x3xbf16>
    %44 = vector.shape_cast %43 : vector<1x1x8x3xbf16> to vector<8x3xbf16>
    %c0_69 = arith.constant 0 : index
    %c1_70 = arith.constant 1 : index
    %c0_71 = arith.constant 0 : index
    %c0_72 = arith.constant 0 : index
    %45 = vector.load %arg2[%c0_69, %c1_70, %c0_71, %c0_72] : memref<1x18x8x3xbf16, #tpu.memory_space<vmem>>, vector<1x1x8x3xbf16>
    %46 = vector.shape_cast %45 : vector<1x1x8x3xbf16> to vector<8x3xbf16>
    %c0_73 = arith.constant 0 : index
    %c2_74 = arith.constant 2 : index
    %c0_75 = arith.constant 0 : index
    %c0_76 = arith.constant 0 : index
    %47 = vector.load %arg2[%c0_73, %c2_74, %c0_75, %c0_76] : memref<1x18x8x3xbf16, #tpu.memory_space<vmem>>, vector<1x1x8x3xbf16>
    %48 = vector.shape_cast %47 : vector<1x1x8x3xbf16> to vector<8x3xbf16>
    %c0_77 = arith.constant 0 : index
    %c3_78 = arith.constant 3 : index
    %c0_79 = arith.constant 0 : index
    %c0_80 = arith.constant 0 : index
    %49 = vector.load %arg2[%c0_77, %c3_78, %c0_79, %c0_80] : memref<1x18x8x3xbf16, #tpu.memory_space<vmem>>, vector<1x1x8x3xbf16>
    %50 = vector.shape_cast %49 : vector<1x1x8x3xbf16> to vector<8x3xbf16>
    %c0_81 = arith.constant 0 : index
    %c4_82 = arith.constant 4 : index
    %c0_83 = arith.constant 0 : index
    %c0_84 = arith.constant 0 : index
    %51 = vector.load %arg2[%c0_81, %c4_82, %c0_83, %c0_84] : memref<1x18x8x3xbf16, #tpu.memory_space<vmem>>, vector<1x1x8x3xbf16>
    %52 = vector.shape_cast %51 : vector<1x1x8x3xbf16> to vector<8x3xbf16>
    %c0_85 = arith.constant 0 : index
    %c5_86 = arith.constant 5 : index
    %c0_87 = arith.constant 0 : index
    %c0_88 = arith.constant 0 : index
    %53 = vector.load %arg2[%c0_85, %c5_86, %c0_87, %c0_88] : memref<1x18x8x3xbf16, #tpu.memory_space<vmem>>, vector<1x1x8x3xbf16>
    %54 = vector.shape_cast %53 : vector<1x1x8x3xbf16> to vector<8x3xbf16>
    %c0_89 = arith.constant 0 : index
    %c6_90 = arith.constant 6 : index
    %c0_91 = arith.constant 0 : index
    %c0_92 = arith.constant 0 : index
    %55 = vector.load %arg2[%c0_89, %c6_90, %c0_91, %c0_92] : memref<1x18x8x3xbf16, #tpu.memory_space<vmem>>, vector<1x1x8x3xbf16>
    %56 = vector.shape_cast %55 : vector<1x1x8x3xbf16> to vector<8x3xbf16>
    %c0_93 = arith.constant 0 : index
    %c7_94 = arith.constant 7 : index
    %c0_95 = arith.constant 0 : index
    %c0_96 = arith.constant 0 : index
    %57 = vector.load %arg2[%c0_93, %c7_94, %c0_95, %c0_96] : memref<1x18x8x3xbf16, #tpu.memory_space<vmem>>, vector<1x1x8x3xbf16>
    %58 = vector.shape_cast %57 : vector<1x1x8x3xbf16> to vector<8x3xbf16>
    %c0_97 = arith.constant 0 : index
    %c8_98 = arith.constant 8 : index
    %c0_99 = arith.constant 0 : index
    %c0_100 = arith.constant 0 : index
    %59 = vector.load %arg2[%c0_97, %c8_98, %c0_99, %c0_100] : memref<1x18x8x3xbf16, #tpu.memory_space<vmem>>, vector<1x1x8x3xbf16>
    %60 = vector.shape_cast %59 : vector<1x1x8x3xbf16> to vector<8x3xbf16>
    %c0_101 = arith.constant 0 : index
    %c9_102 = arith.constant 9 : index
    %c0_103 = arith.constant 0 : index
    %c0_104 = arith.constant 0 : index
    %61 = vector.load %arg2[%c0_101, %c9_102, %c0_103, %c0_104] : memref<1x18x8x3xbf16, #tpu.memory_space<vmem>>, vector<1x1x8x3xbf16>
    %62 = vector.shape_cast %61 : vector<1x1x8x3xbf16> to vector<8x3xbf16>
    %c0_105 = arith.constant 0 : index
    %c10_106 = arith.constant 10 : index
    %c0_107 = arith.constant 0 : index
    %c0_108 = arith.constant 0 : index
    %63 = vector.load %arg2[%c0_105, %c10_106, %c0_107, %c0_108] : memref<1x18x8x3xbf16, #tpu.memory_space<vmem>>, vector<1x1x8x3xbf16>
    %64 = vector.shape_cast %63 : vector<1x1x8x3xbf16> to vector<8x3xbf16>
    %c0_109 = arith.constant 0 : index
    %c11_110 = arith.constant 11 : index
    %c0_111 = arith.constant 0 : index
    %c0_112 = arith.constant 0 : index
    %65 = vector.load %arg2[%c0_109, %c11_110, %c0_111, %c0_112] : memref<1x18x8x3xbf16, #tpu.memory_space<vmem>>, vector<1x1x8x3xbf16>
    %66 = vector.shape_cast %65 : vector<1x1x8x3xbf16> to vector<8x3xbf16>
    %c0_113 = arith.constant 0 : index
    %c12_114 = arith.constant 12 : index
    %c0_115 = arith.constant 0 : index
    %c0_116 = arith.constant 0 : index
    %67 = vector.load %arg2[%c0_113, %c12_114, %c0_115, %c0_116] : memref<1x18x8x3xbf16, #tpu.memory_space<vmem>>, vector<1x1x8x3xbf16>
    %68 = vector.shape_cast %67 : vector<1x1x8x3xbf16> to vector<8x3xbf16>
    %c0_117 = arith.constant 0 : index
    %c13_118 = arith.constant 13 : index
    %c0_119 = arith.constant 0 : index
    %c0_120 = arith.constant 0 : index
    %69 = vector.load %arg2[%c0_117, %c13_118, %c0_119, %c0_120] : memref<1x18x8x3xbf16, #tpu.memory_space<vmem>>, vector<1x1x8x3xbf16>
    %70 = vector.shape_cast %69 : vector<1x1x8x3xbf16> to vector<8x3xbf16>
    %c0_121 = arith.constant 0 : index
    %c14_122 = arith.constant 14 : index
    %c0_123 = arith.constant 0 : index
    %c0_124 = arith.constant 0 : index
    %71 = vector.load %arg2[%c0_121, %c14_122, %c0_123, %c0_124] : memref<1x18x8x3xbf16, #tpu.memory_space<vmem>>, vector<1x1x8x3xbf16>
    %72 = vector.shape_cast %71 : vector<1x1x8x3xbf16> to vector<8x3xbf16>
    %c0_125 = arith.constant 0 : index
    %c15_126 = arith.constant 15 : index
    %c0_127 = arith.constant 0 : index
    %c0_128 = arith.constant 0 : index
    %73 = vector.load %arg2[%c0_125, %c15_126, %c0_127, %c0_128] : memref<1x18x8x3xbf16, #tpu.memory_space<vmem>>, vector<1x1x8x3xbf16>
    %74 = vector.shape_cast %73 : vector<1x1x8x3xbf16> to vector<8x3xbf16>
    %c0_129 = arith.constant 0 : index
    %c16_130 = arith.constant 16 : index
    %c0_131 = arith.constant 0 : index
    %c0_132 = arith.constant 0 : index
    %75 = vector.load %arg2[%c0_129, %c16_130, %c0_131, %c0_132] : memref<1x18x8x3xbf16, #tpu.memory_space<vmem>>, vector<1x1x8x3xbf16>
    %76 = vector.shape_cast %75 : vector<1x1x8x3xbf16> to vector<8x3xbf16>
    %c0_133 = arith.constant 0 : index
    %c17_134 = arith.constant 17 : index
    %c0_135 = arith.constant 0 : index
    %c0_136 = arith.constant 0 : index
    %77 = vector.load %arg2[%c0_133, %c17_134, %c0_135, %c0_136] : memref<1x18x8x3xbf16, #tpu.memory_space<vmem>>, vector<1x1x8x3xbf16>
    %78 = vector.shape_cast %77 : vector<1x1x8x3xbf16> to vector<8x3xbf16>
    %cst = arith.constant dense<0.000000e+00> : vector<8x32xf32>
    %79 = tpu.matmul %8, %1, %cst {dimension_numbers = #tpu.dot_dimension_numbers<[1], [0], [0], [1], [0, 0, 1, 1], [], []>} : vector<8x3xbf16>, vector<3x32xbf16>, vector<8x32xf32> -> vector<8x32xf32>
    %cst_137 = arith.constant dense<0.000000e+00> : vector<8x32xf32>
    %80 = tpu.matmul %10, %3, %cst_137 {dimension_numbers = #tpu.dot_dimension_numbers<[1], [0], [0], [1], [0, 0, 1, 1], [], []>} : vector<8x3xbf16>, vector<3x32xbf16>, vector<8x32xf32> -> vector<8x32xf32>
    %81 = arith.addf %79, %80 : vector<8x32xf32>
    %cst_138 = arith.constant dense<0.000000e+00> : vector<8x32xf32>
    %82 = tpu.matmul %12, %5, %cst_138 {dimension_numbers = #tpu.dot_dimension_numbers<[1], [0], [0], [1], [0, 0, 1, 1], [], []>} : vector<8x3xbf16>, vector<3x32xbf16>, vector<8x32xf32> -> vector<8x32xf32>
    %83 = arith.addf %81, %82 : vector<8x32xf32>
    %84 = vector.broadcast %6 : vector<1x32xf32> to vector<8x32xf32>
    %85 = arith.addf %83, %84 : vector<8x32xf32>
    %cst_139 = arith.constant 0.000000e+00 : f32
    %86 = vector.broadcast %cst_139 : f32 to vector<8x32xf32>
    %87 = arith.maximumf %85, %86 : vector<8x32xf32>
    %cst_140 = arith.constant dense<0.000000e+00> : vector<8x32xf32>
    %88 = tpu.matmul %44, %1, %cst_140 {dimension_numbers = #tpu.dot_dimension_numbers<[1], [0], [0], [1], [0, 0, 1, 1], [], []>} : vector<8x3xbf16>, vector<3x32xbf16>, vector<8x32xf32> -> vector<8x32xf32>
    %cst_141 = arith.constant dense<0.000000e+00> : vector<8x32xf32>
    %89 = tpu.matmul %46, %3, %cst_141 {dimension_numbers = #tpu.dot_dimension_numbers<[1], [0], [0], [1], [0, 0, 1, 1], [], []>} : vector<8x3xbf16>, vector<3x32xbf16>, vector<8x32xf32> -> vector<8x32xf32>
    %90 = arith.addf %88, %89 : vector<8x32xf32>
    %cst_142 = arith.constant dense<0.000000e+00> : vector<8x32xf32>
    %91 = tpu.matmul %48, %5, %cst_142 {dimension_numbers = #tpu.dot_dimension_numbers<[1], [0], [0], [1], [0, 0, 1, 1], [], []>} : vector<8x3xbf16>, vector<3x32xbf16>, vector<8x32xf32> -> vector<8x32xf32>
    %92 = arith.addf %90, %91 : vector<8x32xf32>
    %93 = vector.broadcast %6 : vector<1x32xf32> to vector<8x32xf32>
    %94 = arith.addf %92, %93 : vector<8x32xf32>
    %cst_143 = arith.constant 0.000000e+00 : f32
    %95 = vector.broadcast %cst_143 : f32 to vector<8x32xf32>
    %96 = arith.maximumf %94, %95 : vector<8x32xf32>
    %cst_144 = arith.constant dense<0.000000e+00> : vector<8x32xf32>
    %97 = tpu.matmul %10, %1, %cst_144 {dimension_numbers = #tpu.dot_dimension_numbers<[1], [0], [0], [1], [0, 0, 1, 1], [], []>} : vector<8x3xbf16>, vector<3x32xbf16>, vector<8x32xf32> -> vector<8x32xf32>
    %cst_145 = arith.constant dense<0.000000e+00> : vector<8x32xf32>
    %98 = tpu.matmul %12, %3, %cst_145 {dimension_numbers = #tpu.dot_dimension_numbers<[1], [0], [0], [1], [0, 0, 1, 1], [], []>} : vector<8x3xbf16>, vector<3x32xbf16>, vector<8x32xf32> -> vector<8x32xf32>
    %99 = arith.addf %97, %98 : vector<8x32xf32>
    %cst_146 = arith.constant dense<0.000000e+00> : vector<8x32xf32>
    %100 = tpu.matmul %14, %5, %cst_146 {dimension_numbers = #tpu.dot_dimension_numbers<[1], [0], [0], [1], [0, 0, 1, 1], [], []>} : vector<8x3xbf16>, vector<3x32xbf16>, vector<8x32xf32> -> vector<8x32xf32>
    %101 = arith.addf %99, %100 : vector<8x32xf32>
    %102 = vector.broadcast %6 : vector<1x32xf32> to vector<8x32xf32>
    %103 = arith.addf %101, %102 : vector<8x32xf32>
    %cst_147 = arith.constant 0.000000e+00 : f32
    %104 = vector.broadcast %cst_147 : f32 to vector<8x32xf32>
    %105 = arith.maximumf %103, %104 : vector<8x32xf32>
    %cst_148 = arith.constant dense<0.000000e+00> : vector<8x32xf32>
    %106 = tpu.matmul %46, %1, %cst_148 {dimension_numbers = #tpu.dot_dimension_numbers<[1], [0], [0], [1], [0, 0, 1, 1], [], []>} : vector<8x3xbf16>, vector<3x32xbf16>, vector<8x32xf32> -> vector<8x32xf32>
    %cst_149 = arith.constant dense<0.000000e+00> : vector<8x32xf32>
    %107 = tpu.matmul %48, %3, %cst_149 {dimension_numbers = #tpu.dot_dimension_numbers<[1], [0], [0], [1], [0, 0, 1, 1], [], []>} : vector<8x3xbf16>, vector<3x32xbf16>, vector<8x32xf32> -> vector<8x32xf32>
    %108 = arith.addf %106, %107 : vector<8x32xf32>
    %cst_150 = arith.constant dense<0.000000e+00> : vector<8x32xf32>
    %109 = tpu.matmul %50, %5, %cst_150 {dimension_numbers = #tpu.dot_dimension_numbers<[1], [0], [0], [1], [0, 0, 1, 1], [], []>} : vector<8x3xbf16>, vector<3x32xbf16>, vector<8x32xf32> -> vector<8x32xf32>
    %110 = arith.addf %108, %109 : vector<8x32xf32>
    %111 = vector.broadcast %6 : vector<1x32xf32> to vector<8x32xf32>
    %112 = arith.addf %110, %111 : vector<8x32xf32>
    %cst_151 = arith.constant 0.000000e+00 : f32
    %113 = vector.broadcast %cst_151 : f32 to vector<8x32xf32>
    %114 = arith.maximumf %112, %113 : vector<8x32xf32>
    %115 = arith.maximumf %87, %96 : vector<8x32xf32>
    %116 = arith.maximumf %105, %114 : vector<8x32xf32>
    %117 = arith.maximumf %115, %116 : vector<8x32xf32>
    %c0_152 = arith.constant 0 : index
    %c0_153 = arith.constant 0 : index
    %c0_154 = arith.constant 0 : index
    %c0_155 = arith.constant 0 : index
    %118 = vector.load %arg5[%c0_152, %c0_153, %c0_154, %c0_155] : memref<1x8x8x32xf32, #tpu.memory_space<vmem>>, vector<1x1x8x32xf32>
    %119 = vector.shape_cast %118 : vector<1x1x8x32xf32> to vector<8x32xf32>
    %120 = vector.shape_cast %117 : vector<8x32xf32> to vector<1x1x8x32xf32>
    tpu.vector_store %arg5[%c0_152, %c0_153, %c0_154, %c0_155], %120 {strides = array<i32>} : memref<1x8x8x32xf32, #tpu.memory_space<vmem>>, vector<1x1x8x32xf32>,
    %cst_156 = arith.constant dense<0.000000e+00> : vector<8x32xf32>
    %121 = tpu.matmul %12, %1, %cst_156 {dimension_numbers = #tpu.dot_dimension_numbers<[1], [0], [0], [1], [0, 0, 1, 1], [], []>} : vector<8x3xbf16>, vector<3x32xbf16>, vector<8x32xf32> -> vector<8x32xf32>
    %cst_157 = arith.constant dense<0.000000e+00> : vector<8x32xf32>
    %122 = tpu.matmul %14, %3, %cst_157 {dimension_numbers = #tpu.dot_dimension_numbers<[1], [0], [0], [1], [0, 0, 1, 1], [], []>} : vector<8x3xbf16>, vector<3x32xbf16>, vector<8x32xf32> -> vector<8x32xf32>
    %123 = arith.addf %121, %122 : vector<8x32xf32>
    %cst_158 = arith.constant dense<0.000000e+00> : vector<8x32xf32>
    %124 = tpu.matmul %16, %5, %cst_158 {dimension_numbers = #tpu.dot_dimension_numbers<[1], [0], [0], [1], [0, 0, 1, 1], [], []>} : vector<8x3xbf16>, vector<3x32xbf16>, vector<8x32xf32> -> vector<8x32xf32>
    %125 = arith.addf %123, %124 : vector<8x32xf32>
    %126 = vector.broadcast %6 : vector<1x32xf32> to vector<8x32xf32>
    %127 = arith.addf %125, %126 : vector<8x32xf32>
    %cst_159 = arith.constant 0.000000e+00 : f32
    %128 = vector.broadcast %cst_159 : f32 to vector<8x32xf32>
    %129 = arith.maximumf %127, %128 : vector<8x32xf32>
    %cst_160 = arith.constant dense<0.000000e+00> : vector<8x32xf32>
    %130 = tpu.matmul %48, %1, %cst_160 {dimension_numbers = #tpu.dot_dimension_numbers<[1], [0], [0], [1], [0, 0, 1, 1], [], []>} : vector<8x3xbf16>, vector<3x32xbf16>, vector<8x32xf32> -> vector<8x32xf32>
    %cst_161 = arith.constant dense<0.000000e+00> : vector<8x32xf32>
    %131 = tpu.matmul %50, %3, %cst_161 {dimension_numbers = #tpu.dot_dimension_numbers<[1], [0], [0], [1], [0, 0, 1, 1], [], []>} : vector<8x3xbf16>, vector<3x32xbf16>, vector<8x32xf32> -> vector<8x32xf32>
    %132 = arith.addf %130, %131 : vector<8x32xf32>
    %cst_162 = arith.constant dense<0.000000e+00> : vector<8x32xf32>
    %133 = tpu.matmul %52, %5, %cst_162 {dimension_numbers = #tpu.dot_dimension_numbers<[1], [0], [0], [1], [0, 0, 1, 1], [], []>} : vector<8x3xbf16>, vector<3x32xbf16>, vector<8x32xf32> -> vector<8x32xf32>
    %134 = arith.addf %132, %133 : vector<8x32xf32>
    %135 = vector.broadcast %6 : vector<1x32xf32> to vector<8x32xf32>
    %136 = arith.addf %134, %135 : vector<8x32xf32>
    %cst_163 = arith.constant 0.000000e+00 : f32
    %137 = vector.broadcast %cst_163 : f32 to vector<8x32xf32>
    %138 = arith.maximumf %136, %137 : vector<8x32xf32>
    %cst_164 = arith.constant dense<0.000000e+00> : vector<8x32xf32>
    %139 = tpu.matmul %14, %1, %cst_164 {dimension_numbers = #tpu.dot_dimension_numbers<[1], [0], [0], [1], [0, 0, 1, 1], [], []>} : vector<8x3xbf16>, vector<3x32xbf16>, vector<8x32xf32> -> vector<8x32xf32>
    %cst_165 = arith.constant dense<0.000000e+00> : vector<8x32xf32>
    %140 = tpu.matmul %16, %3, %cst_165 {dimension_numbers = #tpu.dot_dimension_numbers<[1], [0], [0], [1], [0, 0, 1, 1], [], []>} : vector<8x3xbf16>, vector<3x32xbf16>, vector<8x32xf32> -> vector<8x32xf32>
    %141 = arith.addf %139, %140 : vector<8x32xf32>
    %cst_166 = arith.constant dense<0.000000e+00> : vector<8x32xf32>
    %142 = tpu.matmul %18, %5, %cst_166 {dimension_numbers = #tpu.dot_dimension_numbers<[1], [0], [0], [1], [0, 0, 1, 1], [], []>} : vector<8x3xbf16>, vector<3x32xbf16>, vector<8x32xf32> -> vector<8x32xf32>
    %143 = arith.addf %141, %142 : vector<8x32xf32>
    %144 = vector.broadcast %6 : vector<1x32xf32> to vector<8x32xf32>
    %145 = arith.addf %143, %144 : vector<8x32xf32>
    %cst_167 = arith.constant 0.000000e+00 : f32
    %146 = vector.broadcast %cst_167 : f32 to vector<8x32xf32>
    %147 = arith.maximumf %145, %146 : vector<8x32xf32>
    %cst_168 = arith.constant dense<0.000000e+00> : vector<8x32xf32>
    %148 = tpu.matmul %50, %1, %cst_168 {dimension_numbers = #tpu.dot_dimension_numbers<[1], [0], [0], [1], [0, 0, 1, 1], [], []>} : vector<8x3xbf16>, vector<3x32xbf16>, vector<8x32xf32> -> vector<8x32xf32>
    %cst_169 = arith.constant dense<0.000000e+00> : vector<8x32xf32>
    %149 = tpu.matmul %52, %3, %cst_169 {dimension_numbers = #tpu.dot_dimension_numbers<[1], [0], [0], [1], [0, 0, 1, 1], [], []>} : vector<8x3xbf16>, vector<3x32xbf16>, vector<8x32xf32> -> vector<8x32xf32>
    %150 = arith.addf %148, %149 : vector<8x32xf32>
    %cst_170 = arith.constant dense<0.000000e+00> : vector<8x32xf32>
    %151 = tpu.matmul %54, %5, %cst_170 {dimension_numbers = #tpu.dot_dimension_numbers<[1], [0], [0], [1], [0, 0, 1, 1], [], []>} : vector<8x3xbf16>, vector<3x32xbf16>, vector<8x32xf32> -> vector<8x32xf32>
    %152 = arith.addf %150, %151 : vector<8x32xf32>
    %153 = vector.broadcast %6 : vector<1x32xf32> to vector<8x32xf32>
    %154 = arith.addf %152, %153 : vector<8x32xf32>
    %cst_171 = arith.constant 0.000000e+00 : f32
    %155 = vector.broadcast %cst_171 : f32 to vector<8x32xf32>
    %156 = arith.maximumf %154, %155 : vector<8x32xf32>
    %157 = arith.maximumf %129, %138 : vector<8x32xf32>
    %158 = arith.maximumf %147, %156 : vector<8x32xf32>
    %159 = arith.maximumf %157, %158 : vector<8x32xf32>
    %c0_172 = arith.constant 0 : index
    %c1_173 = arith.constant 1 : index
    %c0_174 = arith.constant 0 : index
    %c0_175 = arith.constant 0 : index
    %160 = vector.load %arg5[%c0_172, %c1_173, %c0_174, %c0_175] : memref<1x8x8x32xf32, #tpu.memory_space<vmem>>, vector<1x1x8x32xf32>
    %161 = vector.shape_cast %160 : vector<1x1x8x32xf32> to vector<8x32xf32>
    %162 = vector.shape_cast %159 : vector<8x32xf32> to vector<1x1x8x32xf32>
    tpu.vector_store %arg5[%c0_172, %c1_173, %c0_174, %c0_175], %162 {strides = array<i32>} : memref<1x8x8x32xf32, #tpu.memory_space<vmem>>, vector<1x1x8x32xf32>,
    %cst_176 = arith.constant dense<0.000000e+00> : vector<8x32xf32>
    %163 = tpu.matmul %16, %1, %cst_176 {dimension_numbers = #tpu.dot_dimension_numbers<[1], [0], [0], [1], [0, 0, 1, 1], [], []>} : vector<8x3xbf16>, vector<3x32xbf16>, vector<8x32xf32> -> vector<8x32xf32>
    %cst_177 = arith.constant dense<0.000000e+00> : vector<8x32xf32>
    %164 = tpu.matmul %18, %3, %cst_177 {dimension_numbers = #tpu.dot_dimension_numbers<[1], [0], [0], [1], [0, 0, 1, 1], [], []>} : vector<8x3xbf16>, vector<3x32xbf16>, vector<8x32xf32> -> vector<8x32xf32>
    %165 = arith.addf %163, %164 : vector<8x32xf32>
    %cst_178 = arith.constant dense<0.000000e+00> : vector<8x32xf32>
    %166 = tpu.matmul %20, %5, %cst_178 {dimension_numbers = #tpu.dot_dimension_numbers<[1], [0], [0], [1], [0, 0, 1, 1], [], []>} : vector<8x3xbf16>, vector<3x32xbf16>, vector<8x32xf32> -> vector<8x32xf32>
    %167 = arith.addf %165, %166 : vector<8x32xf32>
    %168 = vector.broadcast %6 : vector<1x32xf32> to vector<8x32xf32>
    %169 = arith.addf %167, %168 : vector<8x32xf32>
    %cst_179 = arith.constant 0.000000e+00 : f32
    %170 = vector.broadcast %cst_179 : f32 to vector<8x32xf32>
    %171 = arith.maximumf %169, %170 : vector<8x32xf32>
    %cst_180 = arith.constant dense<0.000000e+00> : vector<8x32xf32>
    %172 = tpu.matmul %52, %1, %cst_180 {dimension_numbers = #tpu.dot_dimension_numbers<[1], [0], [0], [1], [0, 0, 1, 1], [], []>} : vector<8x3xbf16>, vector<3x32xbf16>, vector<8x32xf32> -> vector<8x32xf32>
    %cst_181 = arith.constant dense<0.000000e+00> : vector<8x32xf32>
    %173 = tpu.matmul %54, %3, %cst_181 {dimension_numbers = #tpu.dot_dimension_numbers<[1], [0], [0], [1], [0, 0, 1, 1], [], []>} : vector<8x3xbf16>, vector<3x32xbf16>, vector<8x32xf32> -> vector<8x32xf32>
    %174 = arith.addf %172, %173 : vector<8x32xf32>
    %cst_182 = arith.constant dense<0.000000e+00> : vector<8x32xf32>
    %175 = tpu.matmul %56, %5, %cst_182 {dimension_numbers = #tpu.dot_dimension_numbers<[1], [0], [0], [1], [0, 0, 1, 1], [], []>} : vector<8x3xbf16>, vector<3x32xbf16>, vector<8x32xf32> -> vector<8x32xf32>
    %176 = arith.addf %174, %175 : vector<8x32xf32>
    %177 = vector.broadcast %6 : vector<1x32xf32> to vector<8x32xf32>
    %178 = arith.addf %176, %177 : vector<8x32xf32>
    %cst_183 = arith.constant 0.000000e+00 : f32
    %179 = vector.broadcast %cst_183 : f32 to vector<8x32xf32>
    %180 = arith.maximumf %178, %179 : vector<8x32xf32>
    %cst_184 = arith.constant dense<0.000000e+00> : vector<8x32xf32>
    %181 = tpu.matmul %18, %1, %cst_184 {dimension_numbers = #tpu.dot_dimension_numbers<[1], [0], [0], [1], [0, 0, 1, 1], [], []>} : vector<8x3xbf16>, vector<3x32xbf16>, vector<8x32xf32> -> vector<8x32xf32>
    %cst_185 = arith.constant dense<0.000000e+00> : vector<8x32xf32>
    %182 = tpu.matmul %20, %3, %cst_185 {dimension_numbers = #tpu.dot_dimension_numbers<[1], [0], [0], [1], [0, 0, 1, 1], [], []>} : vector<8x3xbf16>, vector<3x32xbf16>, vector<8x32xf32> -> vector<8x32xf32>
    %183 = arith.addf %181, %182 : vector<8x32xf32>
    %cst_186 = arith.constant dense<0.000000e+00> : vector<8x32xf32>
    %184 = tpu.matmul %22, %5, %cst_186 {dimension_numbers = #tpu.dot_dimension_numbers<[1], [0], [0], [1], [0, 0, 1, 1], [], []>} : vector<8x3xbf16>, vector<3x32xbf16>, vector<8x32xf32> -> vector<8x32xf32>
    %185 = arith.addf %183, %184 : vector<8x32xf32>
    %186 = vector.broadcast %6 : vector<1x32xf32> to vector<8x32xf32>
    %187 = arith.addf %185, %186 : vector<8x32xf32>
    %cst_187 = arith.constant 0.000000e+00 : f32
    %188 = vector.broadcast %cst_187 : f32 to vector<8x32xf32>
    %189 = arith.maximumf %187, %188 : vector<8x32xf32>
    %cst_188 = arith.constant dense<0.000000e+00> : vector<8x32xf32>
    %190 = tpu.matmul %54, %1, %cst_188 {dimension_numbers = #tpu.dot_dimension_numbers<[1], [0], [0], [1], [0, 0, 1, 1], [], []>} : vector<8x3xbf16>, vector<3x32xbf16>, vector<8x32xf32> -> vector<8x32xf32>
    %cst_189 = arith.constant dense<0.000000e+00> : vector<8x32xf32>
    %191 = tpu.matmul %56, %3, %cst_189 {dimension_numbers = #tpu.dot_dimension_numbers<[1], [0], [0], [1], [0, 0, 1, 1], [], []>} : vector<8x3xbf16>, vector<3x32xbf16>, vector<8x32xf32> -> vector<8x32xf32>
    %192 = arith.addf %190, %191 : vector<8x32xf32>
    %cst_190 = arith.constant dense<0.000000e+00> : vector<8x32xf32>
    %193 = tpu.matmul %58, %5, %cst_190 {dimension_numbers = #tpu.dot_dimension_numbers<[1], [0], [0], [1], [0, 0, 1, 1], [], []>} : vector<8x3xbf16>, vector<3x32xbf16>, vector<8x32xf32> -> vector<8x32xf32>
    %194 = arith.addf %192, %193 : vector<8x32xf32>
    %195 = vector.broadcast %6 : vector<1x32xf32> to vector<8x32xf32>
    %196 = arith.addf %194, %195 : vector<8x32xf32>
    %cst_191 = arith.constant 0.000000e+00 : f32
    %197 = vector.broadcast %cst_191 : f32 to vector<8x32xf32>
    %198 = arith.maximumf %196, %197 : vector<8x32xf32>
    %199 = arith.maximumf %171, %180 : vector<8x32xf32>
    %200 = arith.maximumf %189, %198 : vector<8x32xf32>
    %201 = arith.maximumf %199, %200 : vector<8x32xf32>
    %c0_192 = arith.constant 0 : index
    %c2_193 = arith.constant 2 : index
    %c0_194 = arith.constant 0 : index
    %c0_195 = arith.constant 0 : index
    %202 = vector.load %arg5[%c0_192, %c2_193, %c0_194, %c0_195] : memref<1x8x8x32xf32, #tpu.memory_space<vmem>>, vector<1x1x8x32xf32>
    %203 = vector.shape_cast %202 : vector<1x1x8x32xf32> to vector<8x32xf32>
    %204 = vector.shape_cast %201 : vector<8x32xf32> to vector<1x1x8x32xf32>
    tpu.vector_store %arg5[%c0_192, %c2_193, %c0_194, %c0_195], %204 {strides = array<i32>} : memref<1x8x8x32xf32, #tpu.memory_space<vmem>>, vector<1x1x8x32xf32>,
    %cst_196 = arith.constant dense<0.000000e+00> : vector<8x32xf32>
    %205 = tpu.matmul %20, %1, %cst_196 {dimension_numbers = #tpu.dot_dimension_numbers<[1], [0], [0], [1], [0, 0, 1, 1], [], []>} : vector<8x3xbf16>, vector<3x32xbf16>, vector<8x32xf32> -> vector<8x32xf32>
    %cst_197 = arith.constant dense<0.000000e+00> : vector<8x32xf32>
    %206 = tpu.matmul %22, %3, %cst_197 {dimension_numbers = #tpu.dot_dimension_numbers<[1], [0], [0], [1], [0, 0, 1, 1], [], []>} : vector<8x3xbf16>, vector<3x32xbf16>, vector<8x32xf32> -> vector<8x32xf32>
    %207 = arith.addf %205, %206 : vector<8x32xf32>
    %cst_198 = arith.constant dense<0.000000e+00> : vector<8x32xf32>
    %208 = tpu.matmul %24, %5, %cst_198 {dimension_numbers = #tpu.dot_dimension_numbers<[1], [0], [0], [1], [0, 0, 1, 1], [], []>} : vector<8x3xbf16>, vector<3x32xbf16>, vector<8x32xf32> -> vector<8x32xf32>
    %209 = arith.addf %207, %208 : vector<8x32xf32>
    %210 = vector.broadcast %6 : vector<1x32xf32> to vector<8x32xf32>
    %211 = arith.addf %209, %210 : vector<8x32xf32>
    %cst_199 = arith.constant 0.000000e+00 : f32
    %212 = vector.broadcast %cst_199 : f32 to vector<8x32xf32>
    %213 = arith.maximumf %211, %212 : vector<8x32xf32>
    %cst_200 = arith.constant dense<0.000000e+00> : vector<8x32xf32>
    %214 = tpu.matmul %56, %1, %cst_200 {dimension_numbers = #tpu.dot_dimension_numbers<[1], [0], [0], [1], [0, 0, 1, 1], [], []>} : vector<8x3xbf16>, vector<3x32xbf16>, vector<8x32xf32> -> vector<8x32xf32>
    %cst_201 = arith.constant dense<0.000000e+00> : vector<8x32xf32>
    %215 = tpu.matmul %58, %3, %cst_201 {dimension_numbers = #tpu.dot_dimension_numbers<[1], [0], [0], [1], [0, 0, 1, 1], [], []>} : vector<8x3xbf16>, vector<3x32xbf16>, vector<8x32xf32> -> vector<8x32xf32>
    %216 = arith.addf %214, %215 : vector<8x32xf32>
    %cst_202 = arith.constant dense<0.000000e+00> : vector<8x32xf32>
    %217 = tpu.matmul %60, %5, %cst_202 {dimension_numbers = #tpu.dot_dimension_numbers<[1], [0], [0], [1], [0, 0, 1, 1], [], []>} : vector<8x3xbf16>, vector<3x32xbf16>, vector<8x32xf32> -> vector<8x32xf32>
    %218 = arith.addf %216, %217 : vector<8x32xf32>
    %219 = vector.broadcast %6 : vector<1x32xf32> to vector<8x32xf32>
    %220 = arith.addf %218, %219 : vector<8x32xf32>
    %cst_203 = arith.constant 0.000000e+00 : f32
    %221 = vector.broadcast %cst_203 : f32 to vector<8x32xf32>
    %222 = arith.maximumf %220, %221 : vector<8x32xf32>
    %cst_204 = arith.constant dense<0.000000e+00> : vector<8x32xf32>
    %223 = tpu.matmul %22, %1, %cst_204 {dimension_numbers = #tpu.dot_dimension_numbers<[1], [0], [0], [1], [0, 0, 1, 1], [], []>} : vector<8x3xbf16>, vector<3x32xbf16>, vector<8x32xf32> -> vector<8x32xf32>
    %cst_205 = arith.constant dense<0.000000e+00> : vector<8x32xf32>
    %224 = tpu.matmul %24, %3, %cst_205 {dimension_numbers = #tpu.dot_dimension_numbers<[1], [0], [0], [1], [0, 0, 1, 1], [], []>} : vector<8x3xbf16>, vector<3x32xbf16>, vector<8x32xf32> -> vector<8x32xf32>
    %225 = arith.addf %223, %224 : vector<8x32xf32>
    %cst_206 = arith.constant dense<0.000000e+00> : vector<8x32xf32>
    %226 = tpu.matmul %26, %5, %cst_206 {dimension_numbers = #tpu.dot_dimension_numbers<[1], [0], [0], [1], [0, 0, 1, 1], [], []>} : vector<8x3xbf16>, vector<3x32xbf16>, vector<8x32xf32> -> vector<8x32xf32>
    %227 = arith.addf %225, %226 : vector<8x32xf32>
    %228 = vector.broadcast %6 : vector<1x32xf32> to vector<8x32xf32>
    %229 = arith.addf %227, %228 : vector<8x32xf32>
    %cst_207 = arith.constant 0.000000e+00 : f32
    %230 = vector.broadcast %cst_207 : f32 to vector<8x32xf32>
    %231 = arith.maximumf %229, %230 : vector<8x32xf32>
    %cst_208 = arith.constant dense<0.000000e+00> : vector<8x32xf32>
    %232 = tpu.matmul %58, %1, %cst_208 {dimension_numbers = #tpu.dot_dimension_numbers<[1], [0], [0], [1], [0, 0, 1, 1], [], []>} : vector<8x3xbf16>, vector<3x32xbf16>, vector<8x32xf32> -> vector<8x32xf32>
    %cst_209 = arith.constant dense<0.000000e+00> : vector<8x32xf32>
    %233 = tpu.matmul %60, %3, %cst_209 {dimension_numbers = #tpu.dot_dimension_numbers<[1], [0], [0], [1], [0, 0, 1, 1], [], []>} : vector<8x3xbf16>, vector<3x32xbf16>, vector<8x32xf32> -> vector<8x32xf32>
    %234 = arith.addf %232, %233 : vector<8x32xf32>
    %cst_210 = arith.constant dense<0.000000e+00> : vector<8x32xf32>
    %235 = tpu.matmul %62, %5, %cst_210 {dimension_numbers = #tpu.dot_dimension_numbers<[1], [0], [0], [1], [0, 0, 1, 1], [], []>} : vector<8x3xbf16>, vector<3x32xbf16>, vector<8x32xf32> -> vector<8x32xf32>
    %236 = arith.addf %234, %235 : vector<8x32xf32>
    %237 = vector.broadcast %6 : vector<1x32xf32> to vector<8x32xf32>
    %238 = arith.addf %236, %237 : vector<8x32xf32>
    %cst_211 = arith.constant 0.000000e+00 : f32
    %239 = vector.broadcast %cst_211 : f32 to vector<8x32xf32>
    %240 = arith.maximumf %238, %239 : vector<8x32xf32>
    %241 = arith.maximumf %213, %222 : vector<8x32xf32>
    %242 = arith.maximumf %231, %240 : vector<8x32xf32>
    %243 = arith.maximumf %241, %242 : vector<8x32xf32>
    %c0_212 = arith.constant 0 : index
    %c3_213 = arith.constant 3 : index
    %c0_214 = arith.constant 0 : index
    %c0_215 = arith.constant 0 : index
    %244 = vector.load %arg5[%c0_212, %c3_213, %c0_214, %c0_215] : memref<1x8x8x32xf32, #tpu.memory_space<vmem>>, vector<1x1x8x32xf32>
    %245 = vector.shape_cast %244 : vector<1x1x8x32xf32> to vector<8x32xf32>
    %246 = vector.shape_cast %243 : vector<8x32xf32> to vector<1x1x8x32xf32>
    tpu.vector_store %arg5[%c0_212, %c3_213, %c0_214, %c0_215], %246 {strides = array<i32>} : memref<1x8x8x32xf32, #tpu.memory_space<vmem>>, vector<1x1x8x32xf32>,
    %cst_216 = arith.constant dense<0.000000e+00> : vector<8x32xf32>
    %247 = tpu.matmul %24, %1, %cst_216 {dimension_numbers = #tpu.dot_dimension_numbers<[1], [0], [0], [1], [0, 0, 1, 1], [], []>} : vector<8x3xbf16>, vector<3x32xbf16>, vector<8x32xf32> -> vector<8x32xf32>
    %cst_217 = arith.constant dense<0.000000e+00> : vector<8x32xf32>
    %248 = tpu.matmul %26, %3, %cst_217 {dimension_numbers = #tpu.dot_dimension_numbers<[1], [0], [0], [1], [0, 0, 1, 1], [], []>} : vector<8x3xbf16>, vector<3x32xbf16>, vector<8x32xf32> -> vector<8x32xf32>
    %249 = arith.addf %247, %248 : vector<8x32xf32>
    %cst_218 = arith.constant dense<0.000000e+00> : vector<8x32xf32>
    %250 = tpu.matmul %28, %5, %cst_218 {dimension_numbers = #tpu.dot_dimension_numbers<[1], [0], [0], [1], [0, 0, 1, 1], [], []>} : vector<8x3xbf16>, vector<3x32xbf16>, vector<8x32xf32> -> vector<8x32xf32>
    %251 = arith.addf %249, %250 : vector<8x32xf32>
    %252 = vector.broadcast %6 : vector<1x32xf32> to vector<8x32xf32>
    %253 = arith.addf %251, %252 : vector<8x32xf32>
    %cst_219 = arith.constant 0.000000e+00 : f32
    %254 = vector.broadcast %cst_219 : f32 to vector<8x32xf32>
    %255 = arith.maximumf %253, %254 : vector<8x32xf32>
    %cst_220 = arith.constant dense<0.000000e+00> : vector<8x32xf32>
    %256 = tpu.matmul %60, %1, %cst_220 {dimension_numbers = #tpu.dot_dimension_numbers<[1], [0], [0], [1], [0, 0, 1, 1], [], []>} : vector<8x3xbf16>, vector<3x32xbf16>, vector<8x32xf32> -> vector<8x32xf32>
    %cst_221 = arith.constant dense<0.000000e+00> : vector<8x32xf32>
    %257 = tpu.matmul %62, %3, %cst_221 {dimension_numbers = #tpu.dot_dimension_numbers<[1], [0], [0], [1], [0, 0, 1, 1], [], []>} : vector<8x3xbf16>, vector<3x32xbf16>, vector<8x32xf32> -> vector<8x32xf32>
    %258 = arith.addf %256, %257 : vector<8x32xf32>
    %cst_222 = arith.constant dense<0.000000e+00> : vector<8x32xf32>
    %259 = tpu.matmul %64, %5, %cst_222 {dimension_numbers = #tpu.dot_dimension_numbers<[1], [0], [0], [1], [0, 0, 1, 1], [], []>} : vector<8x3xbf16>, vector<3x32xbf16>, vector<8x32xf32> -> vector<8x32xf32>
    %260 = arith.addf %258, %259 : vector<8x32xf32>
    %261 = vector.broadcast %6 : vector<1x32xf32> to vector<8x32xf32>
    %262 = arith.addf %260, %261 : vector<8x32xf32>
    %cst_223 = arith.constant 0.000000e+00 : f32
    %263 = vector.broadcast %cst_223 : f32 to vector<8x32xf32>
    %264 = arith.maximumf %262, %263 : vector<8x32xf32>
    %cst_224 = arith.constant dense<0.000000e+00> : vector<8x32xf32>
    %265 = tpu.matmul %26, %1, %cst_224 {dimension_numbers = #tpu.dot_dimension_numbers<[1], [0], [0], [1], [0, 0, 1, 1], [], []>} : vector<8x3xbf16>, vector<3x32xbf16>, vector<8x32xf32> -> vector<8x32xf32>
    %cst_225 = arith.constant dense<0.000000e+00> : vector<8x32xf32>
    %266 = tpu.matmul %28, %3, %cst_225 {dimension_numbers = #tpu.dot_dimension_numbers<[1], [0], [0], [1], [0, 0, 1, 1], [], []>} : vector<8x3xbf16>, vector<3x32xbf16>, vector<8x32xf32> -> vector<8x32xf32>
    %267 = arith.addf %265, %266 : vector<8x32xf32>
    %cst_226 = arith.constant dense<0.000000e+00> : vector<8x32xf32>
    %268 = tpu.matmul %30, %5, %cst_226 {dimension_numbers = #tpu.dot_dimension_numbers<[1], [0], [0], [1], [0, 0, 1, 1], [], []>} : vector<8x3xbf16>, vector<3x32xbf16>, vector<8x32xf32> -> vector<8x32xf32>
    %269 = arith.addf %267, %268 : vector<8x32xf32>
    %270 = vector.broadcast %6 : vector<1x32xf32> to vector<8x32xf32>
    %271 = arith.addf %269, %270 : vector<8x32xf32>
    %cst_227 = arith.constant 0.000000e+00 : f32
    %272 = vector.broadcast %cst_227 : f32 to vector<8x32xf32>
    %273 = arith.maximumf %271, %272 : vector<8x32xf32>
    %cst_228 = arith.constant dense<0.000000e+00> : vector<8x32xf32>
    %274 = tpu.matmul %62, %1, %cst_228 {dimension_numbers = #tpu.dot_dimension_numbers<[1], [0], [0], [1], [0, 0, 1, 1], [], []>} : vector<8x3xbf16>, vector<3x32xbf16>, vector<8x32xf32> -> vector<8x32xf32>
    %cst_229 = arith.constant dense<0.000000e+00> : vector<8x32xf32>
    %275 = tpu.matmul %64, %3, %cst_229 {dimension_numbers = #tpu.dot_dimension_numbers<[1], [0], [0], [1], [0, 0, 1, 1], [], []>} : vector<8x3xbf16>, vector<3x32xbf16>, vector<8x32xf32> -> vector<8x32xf32>
    %276 = arith.addf %274, %275 : vector<8x32xf32>
    %cst_230 = arith.constant dense<0.000000e+00> : vector<8x32xf32>
    %277 = tpu.matmul %66, %5, %cst_230 {dimension_numbers = #tpu.dot_dimension_numbers<[1], [0], [0], [1], [0, 0, 1, 1], [], []>} : vector<8x3xbf16>, vector<3x32xbf16>, vector<8x32xf32> -> vector<8x32xf32>
    %278 = arith.addf %276, %277 : vector<8x32xf32>
    %279 = vector.broadcast %6 : vector<1x32xf32> to vector<8x32xf32>
    %280 = arith.addf %278, %279 : vector<8x32xf32>
    %cst_231 = arith.constant 0.000000e+00 : f32
    %281 = vector.broadcast %cst_231 : f32 to vector<8x32xf32>
    %282 = arith.maximumf %280, %281 : vector<8x32xf32>
    %283 = arith.maximumf %255, %264 : vector<8x32xf32>
    %284 = arith.maximumf %273, %282 : vector<8x32xf32>
    %285 = arith.maximumf %283, %284 : vector<8x32xf32>
    %c0_232 = arith.constant 0 : index
    %c4_233 = arith.constant 4 : index
    %c0_234 = arith.constant 0 : index
    %c0_235 = arith.constant 0 : index
    %286 = vector.load %arg5[%c0_232, %c4_233, %c0_234, %c0_235] : memref<1x8x8x32xf32, #tpu.memory_space<vmem>>, vector<1x1x8x32xf32>
    %287 = vector.shape_cast %286 : vector<1x1x8x32xf32> to vector<8x32xf32>
    %288 = vector.shape_cast %285 : vector<8x32xf32> to vector<1x1x8x32xf32>
    tpu.vector_store %arg5[%c0_232, %c4_233, %c0_234, %c0_235], %288 {strides = array<i32>} : memref<1x8x8x32xf32, #tpu.memory_space<vmem>>, vector<1x1x8x32xf32>,
    %cst_236 = arith.constant dense<0.000000e+00> : vector<8x32xf32>
    %289 = tpu.matmul %28, %1, %cst_236 {dimension_numbers = #tpu.dot_dimension_numbers<[1], [0], [0], [1], [0, 0, 1, 1], [], []>} : vector<8x3xbf16>, vector<3x32xbf16>, vector<8x32xf32> -> vector<8x32xf32>
    %cst_237 = arith.constant dense<0.000000e+00> : vector<8x32xf32>
    %290 = tpu.matmul %30, %3, %cst_237 {dimension_numbers = #tpu.dot_dimension_numbers<[1], [0], [0], [1], [0, 0, 1, 1], [], []>} : vector<8x3xbf16>, vector<3x32xbf16>, vector<8x32xf32> -> vector<8x32xf32>
    %291 = arith.addf %289, %290 : vector<8x32xf32>
    %cst_238 = arith.constant dense<0.000000e+00> : vector<8x32xf32>
    %292 = tpu.matmul %32, %5, %cst_238 {dimension_numbers = #tpu.dot_dimension_numbers<[1], [0], [0], [1], [0, 0, 1, 1], [], []>} : vector<8x3xbf16>, vector<3x32xbf16>, vector<8x32xf32> -> vector<8x32xf32>
    %293 = arith.addf %291, %292 : vector<8x32xf32>
    %294 = vector.broadcast %6 : vector<1x32xf32> to vector<8x32xf32>
    %295 = arith.addf %293, %294 : vector<8x32xf32>
    %cst_239 = arith.constant 0.000000e+00 : f32
    %296 = vector.broadcast %cst_239 : f32 to vector<8x32xf32>
    %297 = arith.maximumf %295, %296 : vector<8x32xf32>
    %cst_240 = arith.constant dense<0.000000e+00> : vector<8x32xf32>
    %298 = tpu.matmul %64, %1, %cst_240 {dimension_numbers = #tpu.dot_dimension_numbers<[1], [0], [0], [1], [0, 0, 1, 1], [], []>} : vector<8x3xbf16>, vector<3x32xbf16>, vector<8x32xf32> -> vector<8x32xf32>
    %cst_241 = arith.constant dense<0.000000e+00> : vector<8x32xf32>
    %299 = tpu.matmul %66, %3, %cst_241 {dimension_numbers = #tpu.dot_dimension_numbers<[1], [0], [0], [1], [0, 0, 1, 1], [], []>} : vector<8x3xbf16>, vector<3x32xbf16>, vector<8x32xf32> -> vector<8x32xf32>
    %300 = arith.addf %298, %299 : vector<8x32xf32>
    %cst_242 = arith.constant dense<0.000000e+00> : vector<8x32xf32>
    %301 = tpu.matmul %68, %5, %cst_242 {dimension_numbers = #tpu.dot_dimension_numbers<[1], [0], [0], [1], [0, 0, 1, 1], [], []>} : vector<8x3xbf16>, vector<3x32xbf16>, vector<8x32xf32> -> vector<8x32xf32>
    %302 = arith.addf %300, %301 : vector<8x32xf32>
    %303 = vector.broadcast %6 : vector<1x32xf32> to vector<8x32xf32>
    %304 = arith.addf %302, %303 : vector<8x32xf32>
    %cst_243 = arith.constant 0.000000e+00 : f32
    %305 = vector.broadcast %cst_243 : f32 to vector<8x32xf32>
    %306 = arith.maximumf %304, %305 : vector<8x32xf32>
    %cst_244 = arith.constant dense<0.000000e+00> : vector<8x32xf32>
    %307 = tpu.matmul %30, %1, %cst_244 {dimension_numbers = #tpu.dot_dimension_numbers<[1], [0], [0], [1], [0, 0, 1, 1], [], []>} : vector<8x3xbf16>, vector<3x32xbf16>, vector<8x32xf32> -> vector<8x32xf32>
    %cst_245 = arith.constant dense<0.000000e+00> : vector<8x32xf32>
    %308 = tpu.matmul %32, %3, %cst_245 {dimension_numbers = #tpu.dot_dimension_numbers<[1], [0], [0], [1], [0, 0, 1, 1], [], []>} : vector<8x3xbf16>, vector<3x32xbf16>, vector<8x32xf32> -> vector<8x32xf32>
    %309 = arith.addf %307, %308 : vector<8x32xf32>
    %cst_246 = arith.constant dense<0.000000e+00> : vector<8x32xf32>
    %310 = tpu.matmul %34, %5, %cst_246 {dimension_numbers = #tpu.dot_dimension_numbers<[1], [0], [0], [1], [0, 0, 1, 1], [], []>} : vector<8x3xbf16>, vector<3x32xbf16>, vector<8x32xf32> -> vector<8x32xf32>
    %311 = arith.addf %309, %310 : vector<8x32xf32>
    %312 = vector.broadcast %6 : vector<1x32xf32> to vector<8x32xf32>
    %313 = arith.addf %311, %312 : vector<8x32xf32>
    %cst_247 = arith.constant 0.000000e+00 : f32
    %314 = vector.broadcast %cst_247 : f32 to vector<8x32xf32>
    %315 = arith.maximumf %313, %314 : vector<8x32xf32>
    %cst_248 = arith.constant dense<0.000000e+00> : vector<8x32xf32>
    %316 = tpu.matmul %66, %1, %cst_248 {dimension_numbers = #tpu.dot_dimension_numbers<[1], [0], [0], [1], [0, 0, 1, 1], [], []>} : vector<8x3xbf16>, vector<3x32xbf16>, vector<8x32xf32> -> vector<8x32xf32>
    %cst_249 = arith.constant dense<0.000000e+00> : vector<8x32xf32>
    %317 = tpu.matmul %68, %3, %cst_249 {dimension_numbers = #tpu.dot_dimension_numbers<[1], [0], [0], [1], [0, 0, 1, 1], [], []>} : vector<8x3xbf16>, vector<3x32xbf16>, vector<8x32xf32> -> vector<8x32xf32>
    %318 = arith.addf %316, %317 : vector<8x32xf32>
    %cst_250 = arith.constant dense<0.000000e+00> : vector<8x32xf32>
    %319 = tpu.matmul %70, %5, %cst_250 {dimension_numbers = #tpu.dot_dimension_numbers<[1], [0], [0], [1], [0, 0, 1, 1], [], []>} : vector<8x3xbf16>, vector<3x32xbf16>, vector<8x32xf32> -> vector<8x32xf32>
    %320 = arith.addf %318, %319 : vector<8x32xf32>
    %321 = vector.broadcast %6 : vector<1x32xf32> to vector<8x32xf32>
    %322 = arith.addf %320, %321 : vector<8x32xf32>
    %cst_251 = arith.constant 0.000000e+00 : f32
    %323 = vector.broadcast %cst_251 : f32 to vector<8x32xf32>
    %324 = arith.maximumf %322, %323 : vector<8x32xf32>
    %325 = arith.maximumf %297, %306 : vector<8x32xf32>
    %326 = arith.maximumf %315, %324 : vector<8x32xf32>
    %327 = arith.maximumf %325, %326 : vector<8x32xf32>
    %c0_252 = arith.constant 0 : index
    %c5_253 = arith.constant 5 : index
    %c0_254 = arith.constant 0 : index
    %c0_255 = arith.constant 0 : index
    %328 = vector.load %arg5[%c0_252, %c5_253, %c0_254, %c0_255] : memref<1x8x8x32xf32, #tpu.memory_space<vmem>>, vector<1x1x8x32xf32>
    %329 = vector.shape_cast %328 : vector<1x1x8x32xf32> to vector<8x32xf32>
    %330 = vector.shape_cast %327 : vector<8x32xf32> to vector<1x1x8x32xf32>
    tpu.vector_store %arg5[%c0_252, %c5_253, %c0_254, %c0_255], %330 {strides = array<i32>} : memref<1x8x8x32xf32, #tpu.memory_space<vmem>>, vector<1x1x8x32xf32>,
    %cst_256 = arith.constant dense<0.000000e+00> : vector<8x32xf32>
    %331 = tpu.matmul %32, %1, %cst_256 {dimension_numbers = #tpu.dot_dimension_numbers<[1], [0], [0], [1], [0, 0, 1, 1], [], []>} : vector<8x3xbf16>, vector<3x32xbf16>, vector<8x32xf32> -> vector<8x32xf32>
    %cst_257 = arith.constant dense<0.000000e+00> : vector<8x32xf32>
    %332 = tpu.matmul %34, %3, %cst_257 {dimension_numbers = #tpu.dot_dimension_numbers<[1], [0], [0], [1], [0, 0, 1, 1], [], []>} : vector<8x3xbf16>, vector<3x32xbf16>, vector<8x32xf32> -> vector<8x32xf32>
    %333 = arith.addf %331, %332 : vector<8x32xf32>
    %cst_258 = arith.constant dense<0.000000e+00> : vector<8x32xf32>
    %334 = tpu.matmul %36, %5, %cst_258 {dimension_numbers = #tpu.dot_dimension_numbers<[1], [0], [0], [1], [0, 0, 1, 1], [], []>} : vector<8x3xbf16>, vector<3x32xbf16>, vector<8x32xf32> -> vector<8x32xf32>
    %335 = arith.addf %333, %334 : vector<8x32xf32>
    %336 = vector.broadcast %6 : vector<1x32xf32> to vector<8x32xf32>
    %337 = arith.addf %335, %336 : vector<8x32xf32>
    %cst_259 = arith.constant 0.000000e+00 : f32
    %338 = vector.broadcast %cst_259 : f32 to vector<8x32xf32>
    %339 = arith.maximumf %337, %338 : vector<8x32xf32>
    %cst_260 = arith.constant dense<0.000000e+00> : vector<8x32xf32>
    %340 = tpu.matmul %68, %1, %cst_260 {dimension_numbers = #tpu.dot_dimension_numbers<[1], [0], [0], [1], [0, 0, 1, 1], [], []>} : vector<8x3xbf16>, vector<3x32xbf16>, vector<8x32xf32> -> vector<8x32xf32>
    %cst_261 = arith.constant dense<0.000000e+00> : vector<8x32xf32>
    %341 = tpu.matmul %70, %3, %cst_261 {dimension_numbers = #tpu.dot_dimension_numbers<[1], [0], [0], [1], [0, 0, 1, 1], [], []>} : vector<8x3xbf16>, vector<3x32xbf16>, vector<8x32xf32> -> vector<8x32xf32>
    %342 = arith.addf %340, %341 : vector<8x32xf32>
    %cst_262 = arith.constant dense<0.000000e+00> : vector<8x32xf32>
    %343 = tpu.matmul %72, %5, %cst_262 {dimension_numbers = #tpu.dot_dimension_numbers<[1], [0], [0], [1], [0, 0, 1, 1], [], []>} : vector<8x3xbf16>, vector<3x32xbf16>, vector<8x32xf32> -> vector<8x32xf32>
    %344 = arith.addf %342, %343 : vector<8x32xf32>
    %345 = vector.broadcast %6 : vector<1x32xf32> to vector<8x32xf32>
    %346 = arith.addf %344, %345 : vector<8x32xf32>
    %cst_263 = arith.constant 0.000000e+00 : f32
    %347 = vector.broadcast %cst_263 : f32 to vector<8x32xf32>
    %348 = arith.maximumf %346, %347 : vector<8x32xf32>
    %cst_264 = arith.constant dense<0.000000e+00> : vector<8x32xf32>
    %349 = tpu.matmul %34, %1, %cst_264 {dimension_numbers = #tpu.dot_dimension_numbers<[1], [0], [0], [1], [0, 0, 1, 1], [], []>} : vector<8x3xbf16>, vector<3x32xbf16>, vector<8x32xf32> -> vector<8x32xf32>
    %cst_265 = arith.constant dense<0.000000e+00> : vector<8x32xf32>
    %350 = tpu.matmul %36, %3, %cst_265 {dimension_numbers = #tpu.dot_dimension_numbers<[1], [0], [0], [1], [0, 0, 1, 1], [], []>} : vector<8x3xbf16>, vector<3x32xbf16>, vector<8x32xf32> -> vector<8x32xf32>
    %351 = arith.addf %349, %350 : vector<8x32xf32>
    %cst_266 = arith.constant dense<0.000000e+00> : vector<8x32xf32>
    %352 = tpu.matmul %38, %5, %cst_266 {dimension_numbers = #tpu.dot_dimension_numbers<[1], [0], [0], [1], [0, 0, 1, 1], [], []>} : vector<8x3xbf16>, vector<3x32xbf16>, vector<8x32xf32> -> vector<8x32xf32>
    %353 = arith.addf %351, %352 : vector<8x32xf32>
    %354 = vector.broadcast %6 : vector<1x32xf32> to vector<8x32xf32>
    %355 = arith.addf %353, %354 : vector<8x32xf32>
    %cst_267 = arith.constant 0.000000e+00 : f32
    %356 = vector.broadcast %cst_267 : f32 to vector<8x32xf32>
    %357 = arith.maximumf %355, %356 : vector<8x32xf32>
    %cst_268 = arith.constant dense<0.000000e+00> : vector<8x32xf32>
    %358 = tpu.matmul %70, %1, %cst_268 {dimension_numbers = #tpu.dot_dimension_numbers<[1], [0], [0], [1], [0, 0, 1, 1], [], []>} : vector<8x3xbf16>, vector<3x32xbf16>, vector<8x32xf32> -> vector<8x32xf32>
    %cst_269 = arith.constant dense<0.000000e+00> : vector<8x32xf32>
    %359 = tpu.matmul %72, %3, %cst_269 {dimension_numbers = #tpu.dot_dimension_numbers<[1], [0], [0], [1], [0, 0, 1, 1], [], []>} : vector<8x3xbf16>, vector<3x32xbf16>, vector<8x32xf32> -> vector<8x32xf32>
    %360 = arith.addf %358, %359 : vector<8x32xf32>
    %cst_270 = arith.constant dense<0.000000e+00> : vector<8x32xf32>
    %361 = tpu.matmul %74, %5, %cst_270 {dimension_numbers = #tpu.dot_dimension_numbers<[1], [0], [0], [1], [0, 0, 1, 1], [], []>} : vector<8x3xbf16>, vector<3x32xbf16>, vector<8x32xf32> -> vector<8x32xf32>
    %362 = arith.addf %360, %361 : vector<8x32xf32>
    %363 = vector.broadcast %6 : vector<1x32xf32> to vector<8x32xf32>
    %364 = arith.addf %362, %363 : vector<8x32xf32>
    %cst_271 = arith.constant 0.000000e+00 : f32
    %365 = vector.broadcast %cst_271 : f32 to vector<8x32xf32>
    %366 = arith.maximumf %364, %365 : vector<8x32xf32>
    %367 = arith.maximumf %339, %348 : vector<8x32xf32>
    %368 = arith.maximumf %357, %366 : vector<8x32xf32>
    %369 = arith.maximumf %367, %368 : vector<8x32xf32>
    %c0_272 = arith.constant 0 : index
    %c6_273 = arith.constant 6 : index
    %c0_274 = arith.constant 0 : index
    %c0_275 = arith.constant 0 : index
    %370 = vector.load %arg5[%c0_272, %c6_273, %c0_274, %c0_275] : memref<1x8x8x32xf32, #tpu.memory_space<vmem>>, vector<1x1x8x32xf32>
    %371 = vector.shape_cast %370 : vector<1x1x8x32xf32> to vector<8x32xf32>
    %372 = vector.shape_cast %369 : vector<8x32xf32> to vector<1x1x8x32xf32>
    tpu.vector_store %arg5[%c0_272, %c6_273, %c0_274, %c0_275], %372 {strides = array<i32>} : memref<1x8x8x32xf32, #tpu.memory_space<vmem>>, vector<1x1x8x32xf32>,
    %cst_276 = arith.constant dense<0.000000e+00> : vector<8x32xf32>
    %373 = tpu.matmul %36, %1, %cst_276 {dimension_numbers = #tpu.dot_dimension_numbers<[1], [0], [0], [1], [0, 0, 1, 1], [], []>} : vector<8x3xbf16>, vector<3x32xbf16>, vector<8x32xf32> -> vector<8x32xf32>
    %cst_277 = arith.constant dense<0.000000e+00> : vector<8x32xf32>
    %374 = tpu.matmul %38, %3, %cst_277 {dimension_numbers = #tpu.dot_dimension_numbers<[1], [0], [0], [1], [0, 0, 1, 1], [], []>} : vector<8x3xbf16>, vector<3x32xbf16>, vector<8x32xf32> -> vector<8x32xf32>
    %375 = arith.addf %373, %374 : vector<8x32xf32>
    %cst_278 = arith.constant dense<0.000000e+00> : vector<8x32xf32>
    %376 = tpu.matmul %40, %5, %cst_278 {dimension_numbers = #tpu.dot_dimension_numbers<[1], [0], [0], [1], [0, 0, 1, 1], [], []>} : vector<8x3xbf16>, vector<3x32xbf16>, vector<8x32xf32> -> vector<8x32xf32>
    %377 = arith.addf %375, %376 : vector<8x32xf32>
    %378 = vector.broadcast %6 : vector<1x32xf32> to vector<8x32xf32>
    %379 = arith.addf %377, %378 : vector<8x32xf32>
    %cst_279 = arith.constant 0.000000e+00 : f32
    %380 = vector.broadcast %cst_279 : f32 to vector<8x32xf32>
    %381 = arith.maximumf %379, %380 : vector<8x32xf32>
    %cst_280 = arith.constant dense<0.000000e+00> : vector<8x32xf32>
    %382 = tpu.matmul %72, %1, %cst_280 {dimension_numbers = #tpu.dot_dimension_numbers<[1], [0], [0], [1], [0, 0, 1, 1], [], []>} : vector<8x3xbf16>, vector<3x32xbf16>, vector<8x32xf32> -> vector<8x32xf32>
    %cst_281 = arith.constant dense<0.000000e+00> : vector<8x32xf32>
    %383 = tpu.matmul %74, %3, %cst_281 {dimension_numbers = #tpu.dot_dimension_numbers<[1], [0], [0], [1], [0, 0, 1, 1], [], []>} : vector<8x3xbf16>, vector<3x32xbf16>, vector<8x32xf32> -> vector<8x32xf32>
    %384 = arith.addf %382, %383 : vector<8x32xf32>
    %cst_282 = arith.constant dense<0.000000e+00> : vector<8x32xf32>
    %385 = tpu.matmul %76, %5, %cst_282 {dimension_numbers = #tpu.dot_dimension_numbers<[1], [0], [0], [1], [0, 0, 1, 1], [], []>} : vector<8x3xbf16>, vector<3x32xbf16>, vector<8x32xf32> -> vector<8x32xf32>
    %386 = arith.addf %384, %385 : vector<8x32xf32>
    %387 = vector.broadcast %6 : vector<1x32xf32> to vector<8x32xf32>
    %388 = arith.addf %386, %387 : vector<8x32xf32>
    %cst_283 = arith.constant 0.000000e+00 : f32
    %389 = vector.broadcast %cst_283 : f32 to vector<8x32xf32>
    %390 = arith.maximumf %388, %389 : vector<8x32xf32>
    %cst_284 = arith.constant dense<0.000000e+00> : vector<8x32xf32>
    %391 = tpu.matmul %38, %1, %cst_284 {dimension_numbers = #tpu.dot_dimension_numbers<[1], [0], [0], [1], [0, 0, 1, 1], [], []>} : vector<8x3xbf16>, vector<3x32xbf16>, vector<8x32xf32> -> vector<8x32xf32>
    %cst_285 = arith.constant dense<0.000000e+00> : vector<8x32xf32>
    %392 = tpu.matmul %40, %3, %cst_285 {dimension_numbers = #tpu.dot_dimension_numbers<[1], [0], [0], [1], [0, 0, 1, 1], [], []>} : vector<8x3xbf16>, vector<3x32xbf16>, vector<8x32xf32> -> vector<8x32xf32>
    %393 = arith.addf %391, %392 : vector<8x32xf32>
    %cst_286 = arith.constant dense<0.000000e+00> : vector<8x32xf32>
    %394 = tpu.matmul %42, %5, %cst_286 {dimension_numbers = #tpu.dot_dimension_numbers<[1], [0], [0], [1], [0, 0, 1, 1], [], []>} : vector<8x3xbf16>, vector<3x32xbf16>, vector<8x32xf32> -> vector<8x32xf32>
    %395 = arith.addf %393, %394 : vector<8x32xf32>
    %396 = vector.broadcast %6 : vector<1x32xf32> to vector<8x32xf32>
    %397 = arith.addf %395, %396 : vector<8x32xf32>
    %cst_287 = arith.constant 0.000000e+00 : f32
    %398 = vector.broadcast %cst_287 : f32 to vector<8x32xf32>
    %399 = arith.maximumf %397, %398 : vector<8x32xf32>
    %cst_288 = arith.constant dense<0.000000e+00> : vector<8x32xf32>
    %400 = tpu.matmul %74, %1, %cst_288 {dimension_numbers = #tpu.dot_dimension_numbers<[1], [0], [0], [1], [0, 0, 1, 1], [], []>} : vector<8x3xbf16>, vector<3x32xbf16>, vector<8x32xf32> -> vector<8x32xf32>
    %cst_289 = arith.constant dense<0.000000e+00> : vector<8x32xf32>
    %401 = tpu.matmul %76, %3, %cst_289 {dimension_numbers = #tpu.dot_dimension_numbers<[1], [0], [0], [1], [0, 0, 1, 1], [], []>} : vector<8x3xbf16>, vector<3x32xbf16>, vector<8x32xf32> -> vector<8x32xf32>
    %402 = arith.addf %400, %401 : vector<8x32xf32>
    %cst_290 = arith.constant dense<0.000000e+00> : vector<8x32xf32>
    %403 = tpu.matmul %78, %5, %cst_290 {dimension_numbers = #tpu.dot_dimension_numbers<[1], [0], [0], [1], [0, 0, 1, 1], [], []>} : vector<8x3xbf16>, vector<3x32xbf16>, vector<8x32xf32> -> vector<8x32xf32>
    %404 = arith.addf %402, %403 : vector<8x32xf32>
    %405 = vector.broadcast %6 : vector<1x32xf32> to vector<8x32xf32>
    %406 = arith.addf %404, %405 : vector<8x32xf32>
    %cst_291 = arith.constant 0.000000e+00 : f32
    %407 = vector.broadcast %cst_291 : f32 to vector<8x32xf32>
    %408 = arith.maximumf %406, %407 : vector<8x32xf32>
    %409 = arith.maximumf %381, %390 : vector<8x32xf32>
    %410 = arith.maximumf %399, %408 : vector<8x32xf32>
    %411 = arith.maximumf %409, %410 : vector<8x32xf32>
    %c0_292 = arith.constant 0 : index
    %c7_293 = arith.constant 7 : index
    %c0_294 = arith.constant 0 : index
    %c0_295 = arith.constant 0 : index
    %412 = vector.load %arg5[%c0_292, %c7_293, %c0_294, %c0_295] : memref<1x8x8x32xf32, #tpu.memory_space<vmem>>, vector<1x1x8x32xf32>
    %413 = vector.shape_cast %412 : vector<1x1x8x32xf32> to vector<8x32xf32>
    %414 = vector.shape_cast %411 : vector<8x32xf32> to vector<1x1x8x32xf32>
    tpu.vector_store %arg5[%c0_292, %c7_293, %c0_294, %c0_295], %414 {strides = array<i32>} : memref<1x8x8x32xf32, #tpu.memory_space<vmem>>, vector<1x1x8x32xf32>,
    return
  }
  func.func @transform_0(%arg0: i32) -> (i32, i32, i32, i32) {
    %c0_i32 = arith.constant 0 : i32
    %c0_i32_0 = arith.constant 0 : i32
    %c0_i32_1 = arith.constant 0 : i32
    %c0_i32_2 = arith.constant 0 : i32
    return %arg0, %c0_i32, %c0_i32_0, %c0_i32_1 : i32, i32, i32, i32
  }
  func.func @transform_1(%arg0: i32) -> (i32, i32, i32, i32) {
    %c0_i32 = arith.constant 0 : i32
    %c0_i32_0 = arith.constant 0 : i32
    %c0_i32_1 = arith.constant 0 : i32
    %c0_i32_2 = arith.constant 0 : i32
    return %arg0, %c0_i32, %c0_i32_0, %c0_i32_1 : i32, i32, i32, i32
  }
  func.func @transform_2(%arg0: i32) -> (i32, i32, i32) {
    %c0_i32 = arith.constant 0 : i32
    %c0_i32_0 = arith.constant 0 : i32
    %c0_i32_1 = arith.constant 0 : i32
    %c0_i32_2 = arith.constant 0 : i32
    return %c0_i32, %c0_i32_0, %c0_i32_1 : i32, i32, i32
  }
  func.func @transform_3(%arg0: i32) -> (i32, i32) {
    %c0_i32 = arith.constant 0 : i32
    %c0_i32_0 = arith.constant 0 : i32
    %c0_i32_1 = arith.constant 0 : i32
    return %c0_i32, %c0_i32_0 : i32, i32
  }
  func.func @transform_4(%arg0: i32) -> (i32, i32, i32, i32) {
    %c0_i32 = arith.constant 0 : i32
    %c0_i32_0 = arith.constant 0 : i32
    %c0_i32_1 = arith.constant 0 : i32
    %c0_i32_2 = arith.constant 0 : i32
    return %arg0, %c0_i32, %c0_i32_0, %c0_i32_1 : i32, i32, i32, i32
  }
}

module attributes {stable_mosaic.version = 11 : i64} {
  func.func @_conv_pool_kernel(%arg0: i32, %arg1: memref<1x10x4x96xbf16, #tpu.memory_space<vmem>>, %arg2: memref<1x10x4x96xbf16, #tpu.memory_space<vmem>>, %arg3: memref<3x96x64xbf16, #tpu.memory_space<vmem>>, %arg4: memref<1x64xf32, #tpu.memory_space<vmem>>, %arg5: memref<1x4x4x64xf32, #tpu.memory_space<vmem>>) attributes {dimension_semantics = [#tpu.dimension_semantics<parallel>], iteration_bounds = array<i64: 2>, scalar_prefetch = 0 : i64, scratch_operands = 0 : i64, tpu.core_type = #tpu.core_type<tc>, window_params = [{transform_indices = @transform_0, window_bounds = array<i64: 1, 10, 4, 96>}, {transform_indices = @transform_1, window_bounds = array<i64: 1, 10, 4, 96>}, {pipeline_mode = #tpu.pipeline_mode<synchronous>, transform_indices = @transform_2, window_bounds = array<i64: 3, 96, 64>}, {pipeline_mode = #tpu.pipeline_mode<synchronous>, transform_indices = @transform_3, window_bounds = array<i64: 1, 64>}, {transform_indices = @transform_4, window_bounds = array<i64: 1, 4, 4, 64>}]} {
    %c0 = arith.constant 0 : index
    %c0_0 = arith.constant 0 : index
    %c0_1 = arith.constant 0 : index
    %0 = vector.load %arg3[%c0, %c0_0, %c0_1] : memref<3x96x64xbf16, #tpu.memory_space<vmem>>, vector<1x96x64xbf16>
    %1 = vector.shape_cast %0 : vector<1x96x64xbf16> to vector<96x64xbf16>
    %c1 = arith.constant 1 : index
    %c0_2 = arith.constant 0 : index
    %c0_3 = arith.constant 0 : index
    %2 = vector.load %arg3[%c1, %c0_2, %c0_3] : memref<3x96x64xbf16, #tpu.memory_space<vmem>>, vector<1x96x64xbf16>
    %3 = vector.shape_cast %2 : vector<1x96x64xbf16> to vector<96x64xbf16>
    %c2 = arith.constant 2 : index
    %c0_4 = arith.constant 0 : index
    %c0_5 = arith.constant 0 : index
    %4 = vector.load %arg3[%c2, %c0_4, %c0_5] : memref<3x96x64xbf16, #tpu.memory_space<vmem>>, vector<1x96x64xbf16>
    %5 = vector.shape_cast %4 : vector<1x96x64xbf16> to vector<96x64xbf16>
    %c0_6 = arith.constant 0 : index
    %c0_7 = arith.constant 0 : index
    %6 = vector.load %arg4[%c0_6, %c0_7] : memref<1x64xf32, #tpu.memory_space<vmem>>, vector<1x64xf32>
    %c0_8 = arith.constant 0 : index
    %c0_9 = arith.constant 0 : index
    %c0_10 = arith.constant 0 : index
    %c0_11 = arith.constant 0 : index
    %7 = vector.load %arg1[%c0_8, %c0_9, %c0_10, %c0_11] : memref<1x10x4x96xbf16, #tpu.memory_space<vmem>>, vector<1x1x4x96xbf16>
    %8 = vector.shape_cast %7 : vector<1x1x4x96xbf16> to vector<4x96xbf16>
    %c0_12 = arith.constant 0 : index
    %c1_13 = arith.constant 1 : index
    %c0_14 = arith.constant 0 : index
    %c0_15 = arith.constant 0 : index
    %9 = vector.load %arg1[%c0_12, %c1_13, %c0_14, %c0_15] : memref<1x10x4x96xbf16, #tpu.memory_space<vmem>>, vector<1x1x4x96xbf16>
    %10 = vector.shape_cast %9 : vector<1x1x4x96xbf16> to vector<4x96xbf16>
    %c0_16 = arith.constant 0 : index
    %c2_17 = arith.constant 2 : index
    %c0_18 = arith.constant 0 : index
    %c0_19 = arith.constant 0 : index
    %11 = vector.load %arg1[%c0_16, %c2_17, %c0_18, %c0_19] : memref<1x10x4x96xbf16, #tpu.memory_space<vmem>>, vector<1x1x4x96xbf16>
    %12 = vector.shape_cast %11 : vector<1x1x4x96xbf16> to vector<4x96xbf16>
    %c0_20 = arith.constant 0 : index
    %c3 = arith.constant 3 : index
    %c0_21 = arith.constant 0 : index
    %c0_22 = arith.constant 0 : index
    %13 = vector.load %arg1[%c0_20, %c3, %c0_21, %c0_22] : memref<1x10x4x96xbf16, #tpu.memory_space<vmem>>, vector<1x1x4x96xbf16>
    %14 = vector.shape_cast %13 : vector<1x1x4x96xbf16> to vector<4x96xbf16>
    %c0_23 = arith.constant 0 : index
    %c4 = arith.constant 4 : index
    %c0_24 = arith.constant 0 : index
    %c0_25 = arith.constant 0 : index
    %15 = vector.load %arg1[%c0_23, %c4, %c0_24, %c0_25] : memref<1x10x4x96xbf16, #tpu.memory_space<vmem>>, vector<1x1x4x96xbf16>
    %16 = vector.shape_cast %15 : vector<1x1x4x96xbf16> to vector<4x96xbf16>
    %c0_26 = arith.constant 0 : index
    %c5 = arith.constant 5 : index
    %c0_27 = arith.constant 0 : index
    %c0_28 = arith.constant 0 : index
    %17 = vector.load %arg1[%c0_26, %c5, %c0_27, %c0_28] : memref<1x10x4x96xbf16, #tpu.memory_space<vmem>>, vector<1x1x4x96xbf16>
    %18 = vector.shape_cast %17 : vector<1x1x4x96xbf16> to vector<4x96xbf16>
    %c0_29 = arith.constant 0 : index
    %c6 = arith.constant 6 : index
    %c0_30 = arith.constant 0 : index
    %c0_31 = arith.constant 0 : index
    %19 = vector.load %arg1[%c0_29, %c6, %c0_30, %c0_31] : memref<1x10x4x96xbf16, #tpu.memory_space<vmem>>, vector<1x1x4x96xbf16>
    %20 = vector.shape_cast %19 : vector<1x1x4x96xbf16> to vector<4x96xbf16>
    %c0_32 = arith.constant 0 : index
    %c7 = arith.constant 7 : index
    %c0_33 = arith.constant 0 : index
    %c0_34 = arith.constant 0 : index
    %21 = vector.load %arg1[%c0_32, %c7, %c0_33, %c0_34] : memref<1x10x4x96xbf16, #tpu.memory_space<vmem>>, vector<1x1x4x96xbf16>
    %22 = vector.shape_cast %21 : vector<1x1x4x96xbf16> to vector<4x96xbf16>
    %c0_35 = arith.constant 0 : index
    %c8 = arith.constant 8 : index
    %c0_36 = arith.constant 0 : index
    %c0_37 = arith.constant 0 : index
    %23 = vector.load %arg1[%c0_35, %c8, %c0_36, %c0_37] : memref<1x10x4x96xbf16, #tpu.memory_space<vmem>>, vector<1x1x4x96xbf16>
    %24 = vector.shape_cast %23 : vector<1x1x4x96xbf16> to vector<4x96xbf16>
    %c0_38 = arith.constant 0 : index
    %c9 = arith.constant 9 : index
    %c0_39 = arith.constant 0 : index
    %c0_40 = arith.constant 0 : index
    %25 = vector.load %arg1[%c0_38, %c9, %c0_39, %c0_40] : memref<1x10x4x96xbf16, #tpu.memory_space<vmem>>, vector<1x1x4x96xbf16>
    %26 = vector.shape_cast %25 : vector<1x1x4x96xbf16> to vector<4x96xbf16>
    %c0_41 = arith.constant 0 : index
    %c0_42 = arith.constant 0 : index
    %c0_43 = arith.constant 0 : index
    %c0_44 = arith.constant 0 : index
    %27 = vector.load %arg2[%c0_41, %c0_42, %c0_43, %c0_44] : memref<1x10x4x96xbf16, #tpu.memory_space<vmem>>, vector<1x1x4x96xbf16>
    %28 = vector.shape_cast %27 : vector<1x1x4x96xbf16> to vector<4x96xbf16>
    %c0_45 = arith.constant 0 : index
    %c1_46 = arith.constant 1 : index
    %c0_47 = arith.constant 0 : index
    %c0_48 = arith.constant 0 : index
    %29 = vector.load %arg2[%c0_45, %c1_46, %c0_47, %c0_48] : memref<1x10x4x96xbf16, #tpu.memory_space<vmem>>, vector<1x1x4x96xbf16>
    %30 = vector.shape_cast %29 : vector<1x1x4x96xbf16> to vector<4x96xbf16>
    %c0_49 = arith.constant 0 : index
    %c2_50 = arith.constant 2 : index
    %c0_51 = arith.constant 0 : index
    %c0_52 = arith.constant 0 : index
    %31 = vector.load %arg2[%c0_49, %c2_50, %c0_51, %c0_52] : memref<1x10x4x96xbf16, #tpu.memory_space<vmem>>, vector<1x1x4x96xbf16>
    %32 = vector.shape_cast %31 : vector<1x1x4x96xbf16> to vector<4x96xbf16>
    %c0_53 = arith.constant 0 : index
    %c3_54 = arith.constant 3 : index
    %c0_55 = arith.constant 0 : index
    %c0_56 = arith.constant 0 : index
    %33 = vector.load %arg2[%c0_53, %c3_54, %c0_55, %c0_56] : memref<1x10x4x96xbf16, #tpu.memory_space<vmem>>, vector<1x1x4x96xbf16>
    %34 = vector.shape_cast %33 : vector<1x1x4x96xbf16> to vector<4x96xbf16>
    %c0_57 = arith.constant 0 : index
    %c4_58 = arith.constant 4 : index
    %c0_59 = arith.constant 0 : index
    %c0_60 = arith.constant 0 : index
    %35 = vector.load %arg2[%c0_57, %c4_58, %c0_59, %c0_60] : memref<1x10x4x96xbf16, #tpu.memory_space<vmem>>, vector<1x1x4x96xbf16>
    %36 = vector.shape_cast %35 : vector<1x1x4x96xbf16> to vector<4x96xbf16>
    %c0_61 = arith.constant 0 : index
    %c5_62 = arith.constant 5 : index
    %c0_63 = arith.constant 0 : index
    %c0_64 = arith.constant 0 : index
    %37 = vector.load %arg2[%c0_61, %c5_62, %c0_63, %c0_64] : memref<1x10x4x96xbf16, #tpu.memory_space<vmem>>, vector<1x1x4x96xbf16>
    %38 = vector.shape_cast %37 : vector<1x1x4x96xbf16> to vector<4x96xbf16>
    %c0_65 = arith.constant 0 : index
    %c6_66 = arith.constant 6 : index
    %c0_67 = arith.constant 0 : index
    %c0_68 = arith.constant 0 : index
    %39 = vector.load %arg2[%c0_65, %c6_66, %c0_67, %c0_68] : memref<1x10x4x96xbf16, #tpu.memory_space<vmem>>, vector<1x1x4x96xbf16>
    %40 = vector.shape_cast %39 : vector<1x1x4x96xbf16> to vector<4x96xbf16>
    %c0_69 = arith.constant 0 : index
    %c7_70 = arith.constant 7 : index
    %c0_71 = arith.constant 0 : index
    %c0_72 = arith.constant 0 : index
    %41 = vector.load %arg2[%c0_69, %c7_70, %c0_71, %c0_72] : memref<1x10x4x96xbf16, #tpu.memory_space<vmem>>, vector<1x1x4x96xbf16>
    %42 = vector.shape_cast %41 : vector<1x1x4x96xbf16> to vector<4x96xbf16>
    %c0_73 = arith.constant 0 : index
    %c8_74 = arith.constant 8 : index
    %c0_75 = arith.constant 0 : index
    %c0_76 = arith.constant 0 : index
    %43 = vector.load %arg2[%c0_73, %c8_74, %c0_75, %c0_76] : memref<1x10x4x96xbf16, #tpu.memory_space<vmem>>, vector<1x1x4x96xbf16>
    %44 = vector.shape_cast %43 : vector<1x1x4x96xbf16> to vector<4x96xbf16>
    %c0_77 = arith.constant 0 : index
    %c9_78 = arith.constant 9 : index
    %c0_79 = arith.constant 0 : index
    %c0_80 = arith.constant 0 : index
    %45 = vector.load %arg2[%c0_77, %c9_78, %c0_79, %c0_80] : memref<1x10x4x96xbf16, #tpu.memory_space<vmem>>, vector<1x1x4x96xbf16>
    %46 = vector.shape_cast %45 : vector<1x1x4x96xbf16> to vector<4x96xbf16>
    %cst = arith.constant dense<0.000000e+00> : vector<4x64xf32>
    %47 = tpu.matmul %8, %1, %cst {dimension_numbers = #tpu.dot_dimension_numbers<[1], [0], [0], [1], [0, 0, 1, 1], [], []>} : vector<4x96xbf16>, vector<96x64xbf16>, vector<4x64xf32> -> vector<4x64xf32>
    %cst_81 = arith.constant dense<0.000000e+00> : vector<4x64xf32>
    %48 = tpu.matmul %10, %3, %cst_81 {dimension_numbers = #tpu.dot_dimension_numbers<[1], [0], [0], [1], [0, 0, 1, 1], [], []>} : vector<4x96xbf16>, vector<96x64xbf16>, vector<4x64xf32> -> vector<4x64xf32>
    %49 = arith.addf %47, %48 : vector<4x64xf32>
    %cst_82 = arith.constant dense<0.000000e+00> : vector<4x64xf32>
    %50 = tpu.matmul %12, %5, %cst_82 {dimension_numbers = #tpu.dot_dimension_numbers<[1], [0], [0], [1], [0, 0, 1, 1], [], []>} : vector<4x96xbf16>, vector<96x64xbf16>, vector<4x64xf32> -> vector<4x64xf32>
    %51 = arith.addf %49, %50 : vector<4x64xf32>
    %52 = vector.broadcast %6 : vector<1x64xf32> to vector<4x64xf32>
    %53 = arith.addf %51, %52 : vector<4x64xf32>
    %cst_83 = arith.constant 0.000000e+00 : f32
    %54 = vector.broadcast %cst_83 : f32 to vector<4x64xf32>
    %55 = arith.maximumf %53, %54 : vector<4x64xf32>
    %cst_84 = arith.constant dense<0.000000e+00> : vector<4x64xf32>
    %56 = tpu.matmul %28, %1, %cst_84 {dimension_numbers = #tpu.dot_dimension_numbers<[1], [0], [0], [1], [0, 0, 1, 1], [], []>} : vector<4x96xbf16>, vector<96x64xbf16>, vector<4x64xf32> -> vector<4x64xf32>
    %cst_85 = arith.constant dense<0.000000e+00> : vector<4x64xf32>
    %57 = tpu.matmul %30, %3, %cst_85 {dimension_numbers = #tpu.dot_dimension_numbers<[1], [0], [0], [1], [0, 0, 1, 1], [], []>} : vector<4x96xbf16>, vector<96x64xbf16>, vector<4x64xf32> -> vector<4x64xf32>
    %58 = arith.addf %56, %57 : vector<4x64xf32>
    %cst_86 = arith.constant dense<0.000000e+00> : vector<4x64xf32>
    %59 = tpu.matmul %32, %5, %cst_86 {dimension_numbers = #tpu.dot_dimension_numbers<[1], [0], [0], [1], [0, 0, 1, 1], [], []>} : vector<4x96xbf16>, vector<96x64xbf16>, vector<4x64xf32> -> vector<4x64xf32>
    %60 = arith.addf %58, %59 : vector<4x64xf32>
    %61 = vector.broadcast %6 : vector<1x64xf32> to vector<4x64xf32>
    %62 = arith.addf %60, %61 : vector<4x64xf32>
    %cst_87 = arith.constant 0.000000e+00 : f32
    %63 = vector.broadcast %cst_87 : f32 to vector<4x64xf32>
    %64 = arith.maximumf %62, %63 : vector<4x64xf32>
    %cst_88 = arith.constant dense<0.000000e+00> : vector<4x64xf32>
    %65 = tpu.matmul %10, %1, %cst_88 {dimension_numbers = #tpu.dot_dimension_numbers<[1], [0], [0], [1], [0, 0, 1, 1], [], []>} : vector<4x96xbf16>, vector<96x64xbf16>, vector<4x64xf32> -> vector<4x64xf32>
    %cst_89 = arith.constant dense<0.000000e+00> : vector<4x64xf32>
    %66 = tpu.matmul %12, %3, %cst_89 {dimension_numbers = #tpu.dot_dimension_numbers<[1], [0], [0], [1], [0, 0, 1, 1], [], []>} : vector<4x96xbf16>, vector<96x64xbf16>, vector<4x64xf32> -> vector<4x64xf32>
    %67 = arith.addf %65, %66 : vector<4x64xf32>
    %cst_90 = arith.constant dense<0.000000e+00> : vector<4x64xf32>
    %68 = tpu.matmul %14, %5, %cst_90 {dimension_numbers = #tpu.dot_dimension_numbers<[1], [0], [0], [1], [0, 0, 1, 1], [], []>} : vector<4x96xbf16>, vector<96x64xbf16>, vector<4x64xf32> -> vector<4x64xf32>
    %69 = arith.addf %67, %68 : vector<4x64xf32>
    %70 = vector.broadcast %6 : vector<1x64xf32> to vector<4x64xf32>
    %71 = arith.addf %69, %70 : vector<4x64xf32>
    %cst_91 = arith.constant 0.000000e+00 : f32
    %72 = vector.broadcast %cst_91 : f32 to vector<4x64xf32>
    %73 = arith.maximumf %71, %72 : vector<4x64xf32>
    %cst_92 = arith.constant dense<0.000000e+00> : vector<4x64xf32>
    %74 = tpu.matmul %30, %1, %cst_92 {dimension_numbers = #tpu.dot_dimension_numbers<[1], [0], [0], [1], [0, 0, 1, 1], [], []>} : vector<4x96xbf16>, vector<96x64xbf16>, vector<4x64xf32> -> vector<4x64xf32>
    %cst_93 = arith.constant dense<0.000000e+00> : vector<4x64xf32>
    %75 = tpu.matmul %32, %3, %cst_93 {dimension_numbers = #tpu.dot_dimension_numbers<[1], [0], [0], [1], [0, 0, 1, 1], [], []>} : vector<4x96xbf16>, vector<96x64xbf16>, vector<4x64xf32> -> vector<4x64xf32>
    %76 = arith.addf %74, %75 : vector<4x64xf32>
    %cst_94 = arith.constant dense<0.000000e+00> : vector<4x64xf32>
    %77 = tpu.matmul %34, %5, %cst_94 {dimension_numbers = #tpu.dot_dimension_numbers<[1], [0], [0], [1], [0, 0, 1, 1], [], []>} : vector<4x96xbf16>, vector<96x64xbf16>, vector<4x64xf32> -> vector<4x64xf32>
    %78 = arith.addf %76, %77 : vector<4x64xf32>
    %79 = vector.broadcast %6 : vector<1x64xf32> to vector<4x64xf32>
    %80 = arith.addf %78, %79 : vector<4x64xf32>
    %cst_95 = arith.constant 0.000000e+00 : f32
    %81 = vector.broadcast %cst_95 : f32 to vector<4x64xf32>
    %82 = arith.maximumf %80, %81 : vector<4x64xf32>
    %83 = arith.maximumf %55, %64 : vector<4x64xf32>
    %84 = arith.maximumf %73, %82 : vector<4x64xf32>
    %85 = arith.maximumf %83, %84 : vector<4x64xf32>
    %c0_96 = arith.constant 0 : index
    %c0_97 = arith.constant 0 : index
    %c0_98 = arith.constant 0 : index
    %c0_99 = arith.constant 0 : index
    %86 = vector.load %arg5[%c0_96, %c0_97, %c0_98, %c0_99] : memref<1x4x4x64xf32, #tpu.memory_space<vmem>>, vector<1x1x4x64xf32>
    %87 = vector.shape_cast %86 : vector<1x1x4x64xf32> to vector<4x64xf32>
    %88 = vector.shape_cast %85 : vector<4x64xf32> to vector<1x1x4x64xf32>
    tpu.vector_store %arg5[%c0_96, %c0_97, %c0_98, %c0_99], %88 {strides = array<i32>} : memref<1x4x4x64xf32, #tpu.memory_space<vmem>>, vector<1x1x4x64xf32>,
    %cst_100 = arith.constant dense<0.000000e+00> : vector<4x64xf32>
    %89 = tpu.matmul %12, %1, %cst_100 {dimension_numbers = #tpu.dot_dimension_numbers<[1], [0], [0], [1], [0, 0, 1, 1], [], []>} : vector<4x96xbf16>, vector<96x64xbf16>, vector<4x64xf32> -> vector<4x64xf32>
    %cst_101 = arith.constant dense<0.000000e+00> : vector<4x64xf32>
    %90 = tpu.matmul %14, %3, %cst_101 {dimension_numbers = #tpu.dot_dimension_numbers<[1], [0], [0], [1], [0, 0, 1, 1], [], []>} : vector<4x96xbf16>, vector<96x64xbf16>, vector<4x64xf32> -> vector<4x64xf32>
    %91 = arith.addf %89, %90 : vector<4x64xf32>
    %cst_102 = arith.constant dense<0.000000e+00> : vector<4x64xf32>
    %92 = tpu.matmul %16, %5, %cst_102 {dimension_numbers = #tpu.dot_dimension_numbers<[1], [0], [0], [1], [0, 0, 1, 1], [], []>} : vector<4x96xbf16>, vector<96x64xbf16>, vector<4x64xf32> -> vector<4x64xf32>
    %93 = arith.addf %91, %92 : vector<4x64xf32>
    %94 = vector.broadcast %6 : vector<1x64xf32> to vector<4x64xf32>
    %95 = arith.addf %93, %94 : vector<4x64xf32>
    %cst_103 = arith.constant 0.000000e+00 : f32
    %96 = vector.broadcast %cst_103 : f32 to vector<4x64xf32>
    %97 = arith.maximumf %95, %96 : vector<4x64xf32>
    %cst_104 = arith.constant dense<0.000000e+00> : vector<4x64xf32>
    %98 = tpu.matmul %32, %1, %cst_104 {dimension_numbers = #tpu.dot_dimension_numbers<[1], [0], [0], [1], [0, 0, 1, 1], [], []>} : vector<4x96xbf16>, vector<96x64xbf16>, vector<4x64xf32> -> vector<4x64xf32>
    %cst_105 = arith.constant dense<0.000000e+00> : vector<4x64xf32>
    %99 = tpu.matmul %34, %3, %cst_105 {dimension_numbers = #tpu.dot_dimension_numbers<[1], [0], [0], [1], [0, 0, 1, 1], [], []>} : vector<4x96xbf16>, vector<96x64xbf16>, vector<4x64xf32> -> vector<4x64xf32>
    %100 = arith.addf %98, %99 : vector<4x64xf32>
    %cst_106 = arith.constant dense<0.000000e+00> : vector<4x64xf32>
    %101 = tpu.matmul %36, %5, %cst_106 {dimension_numbers = #tpu.dot_dimension_numbers<[1], [0], [0], [1], [0, 0, 1, 1], [], []>} : vector<4x96xbf16>, vector<96x64xbf16>, vector<4x64xf32> -> vector<4x64xf32>
    %102 = arith.addf %100, %101 : vector<4x64xf32>
    %103 = vector.broadcast %6 : vector<1x64xf32> to vector<4x64xf32>
    %104 = arith.addf %102, %103 : vector<4x64xf32>
    %cst_107 = arith.constant 0.000000e+00 : f32
    %105 = vector.broadcast %cst_107 : f32 to vector<4x64xf32>
    %106 = arith.maximumf %104, %105 : vector<4x64xf32>
    %cst_108 = arith.constant dense<0.000000e+00> : vector<4x64xf32>
    %107 = tpu.matmul %14, %1, %cst_108 {dimension_numbers = #tpu.dot_dimension_numbers<[1], [0], [0], [1], [0, 0, 1, 1], [], []>} : vector<4x96xbf16>, vector<96x64xbf16>, vector<4x64xf32> -> vector<4x64xf32>
    %cst_109 = arith.constant dense<0.000000e+00> : vector<4x64xf32>
    %108 = tpu.matmul %16, %3, %cst_109 {dimension_numbers = #tpu.dot_dimension_numbers<[1], [0], [0], [1], [0, 0, 1, 1], [], []>} : vector<4x96xbf16>, vector<96x64xbf16>, vector<4x64xf32> -> vector<4x64xf32>
    %109 = arith.addf %107, %108 : vector<4x64xf32>
    %cst_110 = arith.constant dense<0.000000e+00> : vector<4x64xf32>
    %110 = tpu.matmul %18, %5, %cst_110 {dimension_numbers = #tpu.dot_dimension_numbers<[1], [0], [0], [1], [0, 0, 1, 1], [], []>} : vector<4x96xbf16>, vector<96x64xbf16>, vector<4x64xf32> -> vector<4x64xf32>
    %111 = arith.addf %109, %110 : vector<4x64xf32>
    %112 = vector.broadcast %6 : vector<1x64xf32> to vector<4x64xf32>
    %113 = arith.addf %111, %112 : vector<4x64xf32>
    %cst_111 = arith.constant 0.000000e+00 : f32
    %114 = vector.broadcast %cst_111 : f32 to vector<4x64xf32>
    %115 = arith.maximumf %113, %114 : vector<4x64xf32>
    %cst_112 = arith.constant dense<0.000000e+00> : vector<4x64xf32>
    %116 = tpu.matmul %34, %1, %cst_112 {dimension_numbers = #tpu.dot_dimension_numbers<[1], [0], [0], [1], [0, 0, 1, 1], [], []>} : vector<4x96xbf16>, vector<96x64xbf16>, vector<4x64xf32> -> vector<4x64xf32>
    %cst_113 = arith.constant dense<0.000000e+00> : vector<4x64xf32>
    %117 = tpu.matmul %36, %3, %cst_113 {dimension_numbers = #tpu.dot_dimension_numbers<[1], [0], [0], [1], [0, 0, 1, 1], [], []>} : vector<4x96xbf16>, vector<96x64xbf16>, vector<4x64xf32> -> vector<4x64xf32>
    %118 = arith.addf %116, %117 : vector<4x64xf32>
    %cst_114 = arith.constant dense<0.000000e+00> : vector<4x64xf32>
    %119 = tpu.matmul %38, %5, %cst_114 {dimension_numbers = #tpu.dot_dimension_numbers<[1], [0], [0], [1], [0, 0, 1, 1], [], []>} : vector<4x96xbf16>, vector<96x64xbf16>, vector<4x64xf32> -> vector<4x64xf32>
    %120 = arith.addf %118, %119 : vector<4x64xf32>
    %121 = vector.broadcast %6 : vector<1x64xf32> to vector<4x64xf32>
    %122 = arith.addf %120, %121 : vector<4x64xf32>
    %cst_115 = arith.constant 0.000000e+00 : f32
    %123 = vector.broadcast %cst_115 : f32 to vector<4x64xf32>
    %124 = arith.maximumf %122, %123 : vector<4x64xf32>
    %125 = arith.maximumf %97, %106 : vector<4x64xf32>
    %126 = arith.maximumf %115, %124 : vector<4x64xf32>
    %127 = arith.maximumf %125, %126 : vector<4x64xf32>
    %c0_116 = arith.constant 0 : index
    %c1_117 = arith.constant 1 : index
    %c0_118 = arith.constant 0 : index
    %c0_119 = arith.constant 0 : index
    %128 = vector.load %arg5[%c0_116, %c1_117, %c0_118, %c0_119] : memref<1x4x4x64xf32, #tpu.memory_space<vmem>>, vector<1x1x4x64xf32>
    %129 = vector.shape_cast %128 : vector<1x1x4x64xf32> to vector<4x64xf32>
    %130 = vector.shape_cast %127 : vector<4x64xf32> to vector<1x1x4x64xf32>
    tpu.vector_store %arg5[%c0_116, %c1_117, %c0_118, %c0_119], %130 {strides = array<i32>} : memref<1x4x4x64xf32, #tpu.memory_space<vmem>>, vector<1x1x4x64xf32>,
    %cst_120 = arith.constant dense<0.000000e+00> : vector<4x64xf32>
    %131 = tpu.matmul %16, %1, %cst_120 {dimension_numbers = #tpu.dot_dimension_numbers<[1], [0], [0], [1], [0, 0, 1, 1], [], []>} : vector<4x96xbf16>, vector<96x64xbf16>, vector<4x64xf32> -> vector<4x64xf32>
    %cst_121 = arith.constant dense<0.000000e+00> : vector<4x64xf32>
    %132 = tpu.matmul %18, %3, %cst_121 {dimension_numbers = #tpu.dot_dimension_numbers<[1], [0], [0], [1], [0, 0, 1, 1], [], []>} : vector<4x96xbf16>, vector<96x64xbf16>, vector<4x64xf32> -> vector<4x64xf32>
    %133 = arith.addf %131, %132 : vector<4x64xf32>
    %cst_122 = arith.constant dense<0.000000e+00> : vector<4x64xf32>
    %134 = tpu.matmul %20, %5, %cst_122 {dimension_numbers = #tpu.dot_dimension_numbers<[1], [0], [0], [1], [0, 0, 1, 1], [], []>} : vector<4x96xbf16>, vector<96x64xbf16>, vector<4x64xf32> -> vector<4x64xf32>
    %135 = arith.addf %133, %134 : vector<4x64xf32>
    %136 = vector.broadcast %6 : vector<1x64xf32> to vector<4x64xf32>
    %137 = arith.addf %135, %136 : vector<4x64xf32>
    %cst_123 = arith.constant 0.000000e+00 : f32
    %138 = vector.broadcast %cst_123 : f32 to vector<4x64xf32>
    %139 = arith.maximumf %137, %138 : vector<4x64xf32>
    %cst_124 = arith.constant dense<0.000000e+00> : vector<4x64xf32>
    %140 = tpu.matmul %36, %1, %cst_124 {dimension_numbers = #tpu.dot_dimension_numbers<[1], [0], [0], [1], [0, 0, 1, 1], [], []>} : vector<4x96xbf16>, vector<96x64xbf16>, vector<4x64xf32> -> vector<4x64xf32>
    %cst_125 = arith.constant dense<0.000000e+00> : vector<4x64xf32>
    %141 = tpu.matmul %38, %3, %cst_125 {dimension_numbers = #tpu.dot_dimension_numbers<[1], [0], [0], [1], [0, 0, 1, 1], [], []>} : vector<4x96xbf16>, vector<96x64xbf16>, vector<4x64xf32> -> vector<4x64xf32>
    %142 = arith.addf %140, %141 : vector<4x64xf32>
    %cst_126 = arith.constant dense<0.000000e+00> : vector<4x64xf32>
    %143 = tpu.matmul %40, %5, %cst_126 {dimension_numbers = #tpu.dot_dimension_numbers<[1], [0], [0], [1], [0, 0, 1, 1], [], []>} : vector<4x96xbf16>, vector<96x64xbf16>, vector<4x64xf32> -> vector<4x64xf32>
    %144 = arith.addf %142, %143 : vector<4x64xf32>
    %145 = vector.broadcast %6 : vector<1x64xf32> to vector<4x64xf32>
    %146 = arith.addf %144, %145 : vector<4x64xf32>
    %cst_127 = arith.constant 0.000000e+00 : f32
    %147 = vector.broadcast %cst_127 : f32 to vector<4x64xf32>
    %148 = arith.maximumf %146, %147 : vector<4x64xf32>
    %cst_128 = arith.constant dense<0.000000e+00> : vector<4x64xf32>
    %149 = tpu.matmul %18, %1, %cst_128 {dimension_numbers = #tpu.dot_dimension_numbers<[1], [0], [0], [1], [0, 0, 1, 1], [], []>} : vector<4x96xbf16>, vector<96x64xbf16>, vector<4x64xf32> -> vector<4x64xf32>
    %cst_129 = arith.constant dense<0.000000e+00> : vector<4x64xf32>
    %150 = tpu.matmul %20, %3, %cst_129 {dimension_numbers = #tpu.dot_dimension_numbers<[1], [0], [0], [1], [0, 0, 1, 1], [], []>} : vector<4x96xbf16>, vector<96x64xbf16>, vector<4x64xf32> -> vector<4x64xf32>
    %151 = arith.addf %149, %150 : vector<4x64xf32>
    %cst_130 = arith.constant dense<0.000000e+00> : vector<4x64xf32>
    %152 = tpu.matmul %22, %5, %cst_130 {dimension_numbers = #tpu.dot_dimension_numbers<[1], [0], [0], [1], [0, 0, 1, 1], [], []>} : vector<4x96xbf16>, vector<96x64xbf16>, vector<4x64xf32> -> vector<4x64xf32>
    %153 = arith.addf %151, %152 : vector<4x64xf32>
    %154 = vector.broadcast %6 : vector<1x64xf32> to vector<4x64xf32>
    %155 = arith.addf %153, %154 : vector<4x64xf32>
    %cst_131 = arith.constant 0.000000e+00 : f32
    %156 = vector.broadcast %cst_131 : f32 to vector<4x64xf32>
    %157 = arith.maximumf %155, %156 : vector<4x64xf32>
    %cst_132 = arith.constant dense<0.000000e+00> : vector<4x64xf32>
    %158 = tpu.matmul %38, %1, %cst_132 {dimension_numbers = #tpu.dot_dimension_numbers<[1], [0], [0], [1], [0, 0, 1, 1], [], []>} : vector<4x96xbf16>, vector<96x64xbf16>, vector<4x64xf32> -> vector<4x64xf32>
    %cst_133 = arith.constant dense<0.000000e+00> : vector<4x64xf32>
    %159 = tpu.matmul %40, %3, %cst_133 {dimension_numbers = #tpu.dot_dimension_numbers<[1], [0], [0], [1], [0, 0, 1, 1], [], []>} : vector<4x96xbf16>, vector<96x64xbf16>, vector<4x64xf32> -> vector<4x64xf32>
    %160 = arith.addf %158, %159 : vector<4x64xf32>
    %cst_134 = arith.constant dense<0.000000e+00> : vector<4x64xf32>
    %161 = tpu.matmul %42, %5, %cst_134 {dimension_numbers = #tpu.dot_dimension_numbers<[1], [0], [0], [1], [0, 0, 1, 1], [], []>} : vector<4x96xbf16>, vector<96x64xbf16>, vector<4x64xf32> -> vector<4x64xf32>
    %162 = arith.addf %160, %161 : vector<4x64xf32>
    %163 = vector.broadcast %6 : vector<1x64xf32> to vector<4x64xf32>
    %164 = arith.addf %162, %163 : vector<4x64xf32>
    %cst_135 = arith.constant 0.000000e+00 : f32
    %165 = vector.broadcast %cst_135 : f32 to vector<4x64xf32>
    %166 = arith.maximumf %164, %165 : vector<4x64xf32>
    %167 = arith.maximumf %139, %148 : vector<4x64xf32>
    %168 = arith.maximumf %157, %166 : vector<4x64xf32>
    %169 = arith.maximumf %167, %168 : vector<4x64xf32>
    %c0_136 = arith.constant 0 : index
    %c2_137 = arith.constant 2 : index
    %c0_138 = arith.constant 0 : index
    %c0_139 = arith.constant 0 : index
    %170 = vector.load %arg5[%c0_136, %c2_137, %c0_138, %c0_139] : memref<1x4x4x64xf32, #tpu.memory_space<vmem>>, vector<1x1x4x64xf32>
    %171 = vector.shape_cast %170 : vector<1x1x4x64xf32> to vector<4x64xf32>
    %172 = vector.shape_cast %169 : vector<4x64xf32> to vector<1x1x4x64xf32>
    tpu.vector_store %arg5[%c0_136, %c2_137, %c0_138, %c0_139], %172 {strides = array<i32>} : memref<1x4x4x64xf32, #tpu.memory_space<vmem>>, vector<1x1x4x64xf32>,
    %cst_140 = arith.constant dense<0.000000e+00> : vector<4x64xf32>
    %173 = tpu.matmul %20, %1, %cst_140 {dimension_numbers = #tpu.dot_dimension_numbers<[1], [0], [0], [1], [0, 0, 1, 1], [], []>} : vector<4x96xbf16>, vector<96x64xbf16>, vector<4x64xf32> -> vector<4x64xf32>
    %cst_141 = arith.constant dense<0.000000e+00> : vector<4x64xf32>
    %174 = tpu.matmul %22, %3, %cst_141 {dimension_numbers = #tpu.dot_dimension_numbers<[1], [0], [0], [1], [0, 0, 1, 1], [], []>} : vector<4x96xbf16>, vector<96x64xbf16>, vector<4x64xf32> -> vector<4x64xf32>
    %175 = arith.addf %173, %174 : vector<4x64xf32>
    %cst_142 = arith.constant dense<0.000000e+00> : vector<4x64xf32>
    %176 = tpu.matmul %24, %5, %cst_142 {dimension_numbers = #tpu.dot_dimension_numbers<[1], [0], [0], [1], [0, 0, 1, 1], [], []>} : vector<4x96xbf16>, vector<96x64xbf16>, vector<4x64xf32> -> vector<4x64xf32>
    %177 = arith.addf %175, %176 : vector<4x64xf32>
    %178 = vector.broadcast %6 : vector<1x64xf32> to vector<4x64xf32>
    %179 = arith.addf %177, %178 : vector<4x64xf32>
    %cst_143 = arith.constant 0.000000e+00 : f32
    %180 = vector.broadcast %cst_143 : f32 to vector<4x64xf32>
    %181 = arith.maximumf %179, %180 : vector<4x64xf32>
    %cst_144 = arith.constant dense<0.000000e+00> : vector<4x64xf32>
    %182 = tpu.matmul %40, %1, %cst_144 {dimension_numbers = #tpu.dot_dimension_numbers<[1], [0], [0], [1], [0, 0, 1, 1], [], []>} : vector<4x96xbf16>, vector<96x64xbf16>, vector<4x64xf32> -> vector<4x64xf32>
    %cst_145 = arith.constant dense<0.000000e+00> : vector<4x64xf32>
    %183 = tpu.matmul %42, %3, %cst_145 {dimension_numbers = #tpu.dot_dimension_numbers<[1], [0], [0], [1], [0, 0, 1, 1], [], []>} : vector<4x96xbf16>, vector<96x64xbf16>, vector<4x64xf32> -> vector<4x64xf32>
    %184 = arith.addf %182, %183 : vector<4x64xf32>
    %cst_146 = arith.constant dense<0.000000e+00> : vector<4x64xf32>
    %185 = tpu.matmul %44, %5, %cst_146 {dimension_numbers = #tpu.dot_dimension_numbers<[1], [0], [0], [1], [0, 0, 1, 1], [], []>} : vector<4x96xbf16>, vector<96x64xbf16>, vector<4x64xf32> -> vector<4x64xf32>
    %186 = arith.addf %184, %185 : vector<4x64xf32>
    %187 = vector.broadcast %6 : vector<1x64xf32> to vector<4x64xf32>
    %188 = arith.addf %186, %187 : vector<4x64xf32>
    %cst_147 = arith.constant 0.000000e+00 : f32
    %189 = vector.broadcast %cst_147 : f32 to vector<4x64xf32>
    %190 = arith.maximumf %188, %189 : vector<4x64xf32>
    %cst_148 = arith.constant dense<0.000000e+00> : vector<4x64xf32>
    %191 = tpu.matmul %22, %1, %cst_148 {dimension_numbers = #tpu.dot_dimension_numbers<[1], [0], [0], [1], [0, 0, 1, 1], [], []>} : vector<4x96xbf16>, vector<96x64xbf16>, vector<4x64xf32> -> vector<4x64xf32>
    %cst_149 = arith.constant dense<0.000000e+00> : vector<4x64xf32>
    %192 = tpu.matmul %24, %3, %cst_149 {dimension_numbers = #tpu.dot_dimension_numbers<[1], [0], [0], [1], [0, 0, 1, 1], [], []>} : vector<4x96xbf16>, vector<96x64xbf16>, vector<4x64xf32> -> vector<4x64xf32>
    %193 = arith.addf %191, %192 : vector<4x64xf32>
    %cst_150 = arith.constant dense<0.000000e+00> : vector<4x64xf32>
    %194 = tpu.matmul %26, %5, %cst_150 {dimension_numbers = #tpu.dot_dimension_numbers<[1], [0], [0], [1], [0, 0, 1, 1], [], []>} : vector<4x96xbf16>, vector<96x64xbf16>, vector<4x64xf32> -> vector<4x64xf32>
    %195 = arith.addf %193, %194 : vector<4x64xf32>
    %196 = vector.broadcast %6 : vector<1x64xf32> to vector<4x64xf32>
    %197 = arith.addf %195, %196 : vector<4x64xf32>
    %cst_151 = arith.constant 0.000000e+00 : f32
    %198 = vector.broadcast %cst_151 : f32 to vector<4x64xf32>
    %199 = arith.maximumf %197, %198 : vector<4x64xf32>
    %cst_152 = arith.constant dense<0.000000e+00> : vector<4x64xf32>
    %200 = tpu.matmul %42, %1, %cst_152 {dimension_numbers = #tpu.dot_dimension_numbers<[1], [0], [0], [1], [0, 0, 1, 1], [], []>} : vector<4x96xbf16>, vector<96x64xbf16>, vector<4x64xf32> -> vector<4x64xf32>
    %cst_153 = arith.constant dense<0.000000e+00> : vector<4x64xf32>
    %201 = tpu.matmul %44, %3, %cst_153 {dimension_numbers = #tpu.dot_dimension_numbers<[1], [0], [0], [1], [0, 0, 1, 1], [], []>} : vector<4x96xbf16>, vector<96x64xbf16>, vector<4x64xf32> -> vector<4x64xf32>
    %202 = arith.addf %200, %201 : vector<4x64xf32>
    %cst_154 = arith.constant dense<0.000000e+00> : vector<4x64xf32>
    %203 = tpu.matmul %46, %5, %cst_154 {dimension_numbers = #tpu.dot_dimension_numbers<[1], [0], [0], [1], [0, 0, 1, 1], [], []>} : vector<4x96xbf16>, vector<96x64xbf16>, vector<4x64xf32> -> vector<4x64xf32>
    %204 = arith.addf %202, %203 : vector<4x64xf32>
    %205 = vector.broadcast %6 : vector<1x64xf32> to vector<4x64xf32>
    %206 = arith.addf %204, %205 : vector<4x64xf32>
    %cst_155 = arith.constant 0.000000e+00 : f32
    %207 = vector.broadcast %cst_155 : f32 to vector<4x64xf32>
    %208 = arith.maximumf %206, %207 : vector<4x64xf32>
    %209 = arith.maximumf %181, %190 : vector<4x64xf32>
    %210 = arith.maximumf %199, %208 : vector<4x64xf32>
    %211 = arith.maximumf %209, %210 : vector<4x64xf32>
    %c0_156 = arith.constant 0 : index
    %c3_157 = arith.constant 3 : index
    %c0_158 = arith.constant 0 : index
    %c0_159 = arith.constant 0 : index
    %212 = vector.load %arg5[%c0_156, %c3_157, %c0_158, %c0_159] : memref<1x4x4x64xf32, #tpu.memory_space<vmem>>, vector<1x1x4x64xf32>
    %213 = vector.shape_cast %212 : vector<1x1x4x64xf32> to vector<4x64xf32>
    %214 = vector.shape_cast %211 : vector<4x64xf32> to vector<1x1x4x64xf32>
    tpu.vector_store %arg5[%c0_156, %c3_157, %c0_158, %c0_159], %214 {strides = array<i32>} : memref<1x4x4x64xf32, #tpu.memory_space<vmem>>, vector<1x1x4x64xf32>,
    return
  }
  func.func @transform_0(%arg0: i32) -> (i32, i32, i32, i32) {
    %c0_i32 = arith.constant 0 : i32
    %c0_i32_0 = arith.constant 0 : i32
    %c0_i32_1 = arith.constant 0 : i32
    %c0_i32_2 = arith.constant 0 : i32
    return %arg0, %c0_i32, %c0_i32_0, %c0_i32_1 : i32, i32, i32, i32
  }
  func.func @transform_1(%arg0: i32) -> (i32, i32, i32, i32) {
    %c0_i32 = arith.constant 0 : i32
    %c0_i32_0 = arith.constant 0 : i32
    %c0_i32_1 = arith.constant 0 : i32
    %c0_i32_2 = arith.constant 0 : i32
    return %arg0, %c0_i32, %c0_i32_0, %c0_i32_1 : i32, i32, i32, i32
  }
  func.func @transform_2(%arg0: i32) -> (i32, i32, i32) {
    %c0_i32 = arith.constant 0 : i32
    %c0_i32_0 = arith.constant 0 : i32
    %c0_i32_1 = arith.constant 0 : i32
    %c0_i32_2 = arith.constant 0 : i32
    return %c0_i32, %c0_i32_0, %c0_i32_1 : i32, i32, i32
  }
  func.func @transform_3(%arg0: i32) -> (i32, i32) {
    %c0_i32 = arith.constant 0 : i32
    %c0_i32_0 = arith.constant 0 : i32
    %c0_i32_1 = arith.constant 0 : i32
    return %c0_i32, %c0_i32_0 : i32, i32
  }
  func.func @transform_4(%arg0: i32) -> (i32, i32, i32, i32) {
    %c0_i32 = arith.constant 0 : i32
    %c0_i32_0 = arith.constant 0 : i32
    %c0_i32_1 = arith.constant 0 : i32
    %c0_i32_2 = arith.constant 0 : i32
    return %arg0, %c0_i32, %c0_i32_0, %c0_i32_1 : i32, i32, i32, i32
  }
}

module attributes {stable_mosaic.version = 11 : i64} {
  func.func @_matmul_kernel(%arg0: i32, %arg1: i32, %arg2: i32, %arg3: memref<8x256xbf16, #tpu.memory_space<vmem>>, %arg4: memref<256x256xbf16, #tpu.memory_space<vmem>>, %arg5: memref<1x256xf32, #tpu.memory_space<vmem>>, %arg6: memref<8x256xbf16, #tpu.memory_space<vmem>>, %arg7: memref<8x256xf32, #tpu.memory_space<vmem>>) attributes {dimension_semantics = [#tpu.dimension_semantics<parallel>, #tpu.dimension_semantics<parallel>, #tpu.dimension_semantics<arbitrary>], iteration_bounds = array<i64: 1, 3, 1>, scalar_prefetch = 0 : i64, scratch_operands = 1 : i64, tpu.core_type = #tpu.core_type<tc>, window_params = [{transform_indices = @transform_0, window_bounds = array<i64: 8, 256>}, {transform_indices = @transform_1, window_bounds = array<i64: 256, 256>}, {transform_indices = @transform_2, window_bounds = array<i64: 1, 256>}, {transform_indices = @transform_3, window_bounds = array<i64: 8, 256>}]} {
    %c0_i32 = arith.constant 0 : i32
    %0 = arith.cmpi eq, %arg2, %c0_i32 : i32
    %1 = arith.extui %0 : i1 to i32
    %c0_i32_0 = arith.constant 0 : i32
    %2 = arith.cmpi ne, %1, %c0_i32_0 : i32
    scf.if %2 {
      %cst_10 = arith.constant 0.000000e+00 : f32
      %12 = vector.broadcast %cst_10 : f32 to vector<8x256xf32>
      %c0_11 = arith.constant 0 : index
      %c0_12 = arith.constant 0 : index
      %13 = vector.load %arg7[%c0_11, %c0_12] : memref<8x256xf32, #tpu.memory_space<vmem>>, vector<8x256xf32>
      tpu.vector_store %arg7[%c0_11, %c0_12], %12 {strides = array<i32>} : memref<8x256xf32, #tpu.memory_space<vmem>>, vector<8x256xf32>,
    } else {
    }
    %c0 = arith.constant 0 : index
    %c0_1 = arith.constant 0 : index
    %3 = vector.load %arg7[%c0, %c0_1] : memref<8x256xf32, #tpu.memory_space<vmem>>, vector<8x256xf32>
    %c0_2 = arith.constant 0 : index
    %c0_3 = arith.constant 0 : index
    %4 = vector.load %arg3[%c0_2, %c0_3] : memref<8x256xbf16, #tpu.memory_space<vmem>>, vector<8x256xbf16>
    %c0_4 = arith.constant 0 : index
    %c0_5 = arith.constant 0 : index
    %5 = vector.load %arg4[%c0_4, %c0_5] : memref<256x256xbf16, #tpu.memory_space<vmem>>, vector<256x256xbf16>
    %cst = arith.constant dense<0.000000e+00> : vector<8x256xf32>
    %6 = tpu.matmul %4, %5, %cst {dimension_numbers = #tpu.dot_dimension_numbers<[1], [0], [0], [1], [0, 0, 1, 1], [], []>} : vector<8x256xbf16>, vector<256x256xbf16>, vector<8x256xf32> -> vector<8x256xf32>
    %7 = arith.addf %3, %6 : vector<8x256xf32>
    %c0_6 = arith.constant 0 : index
    %c0_7 = arith.constant 0 : index
    %8 = vector.load %arg7[%c0_6, %c0_7] : memref<8x256xf32, #tpu.memory_space<vmem>>, vector<8x256xf32>
    tpu.vector_store %arg7[%c0_6, %c0_7], %7 {strides = array<i32>} : memref<8x256xf32, #tpu.memory_space<vmem>>, vector<8x256xf32>,
    %c0_i32_8 = arith.constant 0 : i32
    %9 = arith.cmpi eq, %arg2, %c0_i32_8 : i32
    %10 = arith.extui %9 : i1 to i32
    %c0_i32_9 = arith.constant 0 : i32
    %11 = arith.cmpi ne, %10, %c0_i32_9 : i32
    scf.if %11 {
      %c0_10 = arith.constant 0 : index
      %c0_11 = arith.constant 0 : index
      %12 = vector.load %arg7[%c0_10, %c0_11] : memref<8x256xf32, #tpu.memory_space<vmem>>, vector<8x256xf32>
      %c0_12 = arith.constant 0 : index
      %c0_13 = arith.constant 0 : index
      %13 = vector.load %arg5[%c0_12, %c0_13] : memref<1x256xf32, #tpu.memory_space<vmem>>, vector<1x256xf32>
      %14 = vector.broadcast %13 : vector<1x256xf32> to vector<8x256xf32>
      %15 = arith.addf %12, %14 : vector<8x256xf32>
      %16 = arith.truncf %15 : vector<8x256xf32> to vector<8x256xbf16>
      %c0_14 = arith.constant 0 : index
      %c0_15 = arith.constant 0 : index
      %17 = vector.load %arg6[%c0_14, %c0_15] : memref<8x256xbf16, #tpu.memory_space<vmem>>, vector<8x256xbf16>
      tpu.vector_store %arg6[%c0_14, %c0_15], %16 {strides = array<i32>} : memref<8x256xbf16, #tpu.memory_space<vmem>>, vector<8x256xbf16>,
    } else {
    }
    return
  }
  func.func @transform_0(%arg0: i32, %arg1: i32, %arg2: i32) -> (i32, i32) {
    %c0_i32 = arith.constant 0 : i32
    return %arg0, %arg2 : i32, i32
  }
  func.func @transform_1(%arg0: i32, %arg1: i32, %arg2: i32) -> (i32, i32) {
    %c0_i32 = arith.constant 0 : i32
    return %arg2, %arg1 : i32, i32
  }
  func.func @transform_2(%arg0: i32, %arg1: i32, %arg2: i32) -> (i32, i32) {
    %c0_i32 = arith.constant 0 : i32
    %c0_i32_0 = arith.constant 0 : i32
    return %c0_i32, %arg1 : i32, i32
  }
  func.func @transform_3(%arg0: i32, %arg1: i32, %arg2: i32) -> (i32, i32) {
    %c0_i32 = arith.constant 0 : i32
    return %arg0, %arg1 : i32, i32
  }
}

module attributes {stable_mosaic.version = 11 : i64} {
  func.func @_bigru_kernel(%arg0: i32, %arg1: memref<2x4x384xbf16, #tpu.memory_space<vmem>>, %arg2: memref<2x4x384xbf16, #tpu.memory_space<vmem>>, %arg3: memref<2x128x384xbf16, #tpu.memory_space<vmem>>, %arg4: memref<2x1x384xf32, #tpu.memory_space<vmem>>, %arg5: memref<2x4x128xf32, #tpu.memory_space<vmem>>, %arg6: memref<2x4x128xf32, #tpu.memory_space<vmem>>, %arg7: memref<2x128xf32, #tpu.memory_space<vmem>>, %arg8: memref<2x128xf32, #tpu.memory_space<vmem>>) attributes {dimension_semantics = [#tpu.dimension_semantics<arbitrary>], iteration_bounds = array<i64: 1>, scalar_prefetch = 0 : i64, scratch_operands = 2 : i64, tpu.core_type = #tpu.core_type<tc>, window_params = [{transform_indices = @transform_0, window_bounds = array<i64: 2, 4, 384>}, {transform_indices = @transform_1, window_bounds = array<i64: 2, 4, 384>}, {pipeline_mode = #tpu.pipeline_mode<synchronous>, transform_indices = @transform_2, window_bounds = array<i64: 2, 128, 384>}, {pipeline_mode = #tpu.pipeline_mode<synchronous>, transform_indices = @transform_3, window_bounds = array<i64: 2, 1, 384>}, {transform_indices = @transform_4, window_bounds = array<i64: 2, 4, 128>}, {transform_indices = @transform_5, window_bounds = array<i64: 2, 4, 128>}]} {
    %c0_i32 = arith.constant 0 : i32
    %0 = arith.cmpi eq, %arg0, %c0_i32 : i32
    %1 = arith.extui %0 : i1 to i32
    %c0_i32_0 = arith.constant 0 : i32
    %2 = arith.cmpi ne, %1, %c0_i32_0 : i32
    scf.if %2 {
      %cst_120 = arith.constant 0.000000e+00 : f32
      %315 = vector.broadcast %cst_120 : f32 to vector<2x128xf32>
      %c0_121 = arith.constant 0 : index
      %c0_122 = arith.constant 0 : index
      %316 = vector.load %arg7[%c0_121, %c0_122] : memref<2x128xf32, #tpu.memory_space<vmem>>, vector<2x128xf32>
      tpu.vector_store %arg7[%c0_121, %c0_122], %315 {strides = array<i32>} : memref<2x128xf32, #tpu.memory_space<vmem>>, vector<2x128xf32>,
      %cst_123 = arith.constant 0.000000e+00 : f32
      %317 = vector.broadcast %cst_123 : f32 to vector<2x128xf32>
      %c0_124 = arith.constant 0 : index
      %c0_125 = arith.constant 0 : index
      %318 = vector.load %arg8[%c0_124, %c0_125] : memref<2x128xf32, #tpu.memory_space<vmem>>, vector<2x128xf32>
      tpu.vector_store %arg8[%c0_124, %c0_125], %317 {strides = array<i32>} : memref<2x128xf32, #tpu.memory_space<vmem>>, vector<2x128xf32>,
    } else {
    }
    %c0 = arith.constant 0 : index
    %c0_1 = arith.constant 0 : index
    %c0_2 = arith.constant 0 : index
    %3 = vector.load %arg3[%c0, %c0_1, %c0_2] : memref<2x128x384xbf16, #tpu.memory_space<vmem>>, vector<1x128x384xbf16>
    %4 = vector.shape_cast %3 : vector<1x128x384xbf16> to vector<128x384xbf16>
    %c1 = arith.constant 1 : index
    %c0_3 = arith.constant 0 : index
    %c0_4 = arith.constant 0 : index
    %5 = vector.load %arg3[%c1, %c0_3, %c0_4] : memref<2x128x384xbf16, #tpu.memory_space<vmem>>, vector<1x128x384xbf16>
    %6 = vector.shape_cast %5 : vector<1x128x384xbf16> to vector<128x384xbf16>
    %c0_5 = arith.constant 0 : index
    %c0_6 = arith.constant 0 : index
    %c0_7 = arith.constant 0 : index
    %7 = vector.load %arg4[%c0_5, %c0_6, %c0_7] : memref<2x1x384xf32, #tpu.memory_space<vmem>>, vector<1x1x384xf32>
    %8 = vector.shape_cast %7 : vector<1x1x384xf32> to vector<1x384xf32>
    %c1_8 = arith.constant 1 : index
    %c0_9 = arith.constant 0 : index
    %c0_10 = arith.constant 0 : index
    %9 = vector.load %arg4[%c1_8, %c0_9, %c0_10] : memref<2x1x384xf32, #tpu.memory_space<vmem>>, vector<1x1x384xf32>
    %10 = vector.shape_cast %9 : vector<1x1x384xf32> to vector<1x384xf32>
    %c0_11 = arith.constant 0 : index
    %c0_12 = arith.constant 0 : index
    %11 = vector.load %arg7[%c0_11, %c0_12] : memref<2x128xf32, #tpu.memory_space<vmem>>, vector<2x128xf32>
    %c0_13 = arith.constant 0 : index
    %c0_14 = arith.constant 0 : index
    %c0_15 = arith.constant 0 : index
    %12 = vector.load %arg1[%c0_13, %c0_14, %c0_15] : memref<2x4x384xbf16, #tpu.memory_space<vmem>>, vector<2x1x384xbf16>
    %13 = vector.shape_cast %12 : vector<2x1x384xbf16> to vector<2x384xbf16>
    %14 = arith.extf %13 : vector<2x384xbf16> to vector<2x384xf32>
    %15 = arith.truncf %11 : vector<2x128xf32> to vector<2x128xbf16>
    %cst = arith.constant dense<0.000000e+00> : vector<2x384xf32>
    %16 = tpu.matmul %15, %4, %cst {dimension_numbers = #tpu.dot_dimension_numbers<[1], [0], [0], [1], [0, 0, 1, 1], [], []>} : vector<2x128xbf16>, vector<128x384xbf16>, vector<2x384xf32> -> vector<2x384xf32>
    %17 = vector.broadcast %8 : vector<1x384xf32> to vector<2x384xf32>
    %18 = arith.addf %16, %17 : vector<2x384xf32>
    %19 = vector.extract_strided_slice %14 {offsets = [0, 0], sizes = [2, 128], strides = [1, 1]} : vector<2x384xf32> to vector<2x128xf32>
    %20 = vector.extract_strided_slice %18 {offsets = [0, 0], sizes = [2, 128], strides = [1, 1]} : vector<2x384xf32> to vector<2x128xf32>
    %21 = arith.addf %19, %20 : vector<2x128xf32>
    %22 = arith.negf %21 : vector<2x128xf32>
    %23 = math.exp %22 : vector<2x128xf32>
    %cst_16 = arith.constant 1.000000e+00 : f32
    %24 = vector.broadcast %cst_16 : f32 to vector<2x128xf32>
    %25 = arith.addf %24, %23 : vector<2x128xf32>
    %26 = arith.divf %24, %25 : vector<2x128xf32>
    %27 = vector.extract_strided_slice %14 {offsets = [0, 128], sizes = [2, 128], strides = [1, 1]} : vector<2x384xf32> to vector<2x128xf32>
    %28 = vector.extract_strided_slice %18 {offsets = [0, 128], sizes = [2, 128], strides = [1, 1]} : vector<2x384xf32> to vector<2x128xf32>
    %29 = arith.addf %27, %28 : vector<2x128xf32>
    %30 = arith.negf %29 : vector<2x128xf32>
    %31 = math.exp %30 : vector<2x128xf32>
    %cst_17 = arith.constant 1.000000e+00 : f32
    %32 = vector.broadcast %cst_17 : f32 to vector<2x128xf32>
    %33 = arith.addf %32, %31 : vector<2x128xf32>
    %34 = arith.divf %32, %33 : vector<2x128xf32>
    %35 = vector.extract_strided_slice %14 {offsets = [0, 256], sizes = [2, 128], strides = [1, 1]} : vector<2x384xf32> to vector<2x128xf32>
    %36 = vector.extract_strided_slice %18 {offsets = [0, 256], sizes = [2, 128], strides = [1, 1]} : vector<2x384xf32> to vector<2x128xf32>
    %37 = arith.mulf %26, %36 : vector<2x128xf32>
    %38 = arith.addf %35, %37 : vector<2x128xf32>
    %39 = math.tanh %38 : vector<2x128xf32>
    %cst_18 = arith.constant 1.000000e+00 : f32
    %40 = vector.broadcast %cst_18 : f32 to vector<2x128xf32>
    %41 = arith.subf %40, %34 : vector<2x128xf32>
    %42 = arith.mulf %41, %39 : vector<2x128xf32>
    %43 = arith.mulf %34, %11 : vector<2x128xf32>
    %44 = arith.addf %42, %43 : vector<2x128xf32>
    %c0_19 = arith.constant 0 : index
    %c0_20 = arith.constant 0 : index
    %45 = vector.load %arg7[%c0_19, %c0_20] : memref<2x128xf32, #tpu.memory_space<vmem>>, vector<2x128xf32>
    tpu.vector_store %arg7[%c0_19, %c0_20], %44 {strides = array<i32>} : memref<2x128xf32, #tpu.memory_space<vmem>>, vector<2x128xf32>,
    %c0_21 = arith.constant 0 : index
    %c0_22 = arith.constant 0 : index
    %c0_23 = arith.constant 0 : index
    %46 = vector.load %arg5[%c0_21, %c0_22, %c0_23] : memref<2x4x128xf32, #tpu.memory_space<vmem>>, vector<2x1x128xf32>
    %47 = vector.shape_cast %46 : vector<2x1x128xf32> to vector<2x128xf32>
    %48 = vector.shape_cast %44 : vector<2x128xf32> to vector<2x1x128xf32>
    tpu.vector_store %arg5[%c0_21, %c0_22, %c0_23], %48 {strides = array<i32>} : memref<2x4x128xf32, #tpu.memory_space<vmem>>, vector<2x1x128xf32>,
    %c0_24 = arith.constant 0 : index
    %c0_25 = arith.constant 0 : index
    %49 = vector.load %arg8[%c0_24, %c0_25] : memref<2x128xf32, #tpu.memory_space<vmem>>, vector<2x128xf32>
    %c0_26 = arith.constant 0 : index
    %c3 = arith.constant 3 : index
    %c0_27 = arith.constant 0 : index
    %50 = vector.load %arg2[%c0_26, %c3, %c0_27] : memref<2x4x384xbf16, #tpu.memory_space<vmem>>, vector<2x1x384xbf16>
    %51 = vector.shape_cast %50 : vector<2x1x384xbf16> to vector<2x384xbf16>
    %52 = arith.extf %51 : vector<2x384xbf16> to vector<2x384xf32>
    %53 = arith.truncf %49 : vector<2x128xf32> to vector<2x128xbf16>
    %cst_28 = arith.constant dense<0.000000e+00> : vector<2x384xf32>
    %54 = tpu.matmul %53, %6, %cst_28 {dimension_numbers = #tpu.dot_dimension_numbers<[1], [0], [0], [1], [0, 0, 1, 1], [], []>} : vector<2x128xbf16>, vector<128x384xbf16>, vector<2x384xf32> -> vector<2x384xf32>
    %55 = vector.broadcast %10 : vector<1x384xf32> to vector<2x384xf32>
    %56 = arith.addf %54, %55 : vector<2x384xf32>
    %57 = vector.extract_strided_slice %52 {offsets = [0, 0], sizes = [2, 128], strides = [1, 1]} : vector<2x384xf32> to vector<2x128xf32>
    %58 = vector.extract_strided_slice %56 {offsets = [0, 0], sizes = [2, 128], strides = [1, 1]} : vector<2x384xf32> to vector<2x128xf32>
    %59 = arith.addf %57, %58 : vector<2x128xf32>
    %60 = arith.negf %59 : vector<2x128xf32>
    %61 = math.exp %60 : vector<2x128xf32>
    %cst_29 = arith.constant 1.000000e+00 : f32
    %62 = vector.broadcast %cst_29 : f32 to vector<2x128xf32>
    %63 = arith.addf %62, %61 : vector<2x128xf32>
    %64 = arith.divf %62, %63 : vector<2x128xf32>
    %65 = vector.extract_strided_slice %52 {offsets = [0, 128], sizes = [2, 128], strides = [1, 1]} : vector<2x384xf32> to vector<2x128xf32>
    %66 = vector.extract_strided_slice %56 {offsets = [0, 128], sizes = [2, 128], strides = [1, 1]} : vector<2x384xf32> to vector<2x128xf32>
    %67 = arith.addf %65, %66 : vector<2x128xf32>
    %68 = arith.negf %67 : vector<2x128xf32>
    %69 = math.exp %68 : vector<2x128xf32>
    %cst_30 = arith.constant 1.000000e+00 : f32
    %70 = vector.broadcast %cst_30 : f32 to vector<2x128xf32>
    %71 = arith.addf %70, %69 : vector<2x128xf32>
    %72 = arith.divf %70, %71 : vector<2x128xf32>
    %73 = vector.extract_strided_slice %52 {offsets = [0, 256], sizes = [2, 128], strides = [1, 1]} : vector<2x384xf32> to vector<2x128xf32>
    %74 = vector.extract_strided_slice %56 {offsets = [0, 256], sizes = [2, 128], strides = [1, 1]} : vector<2x384xf32> to vector<2x128xf32>
    %75 = arith.mulf %64, %74 : vector<2x128xf32>
    %76 = arith.addf %73, %75 : vector<2x128xf32>
    %77 = math.tanh %76 : vector<2x128xf32>
    %cst_31 = arith.constant 1.000000e+00 : f32
    %78 = vector.broadcast %cst_31 : f32 to vector<2x128xf32>
    %79 = arith.subf %78, %72 : vector<2x128xf32>
    %80 = arith.mulf %79, %77 : vector<2x128xf32>
    %81 = arith.mulf %72, %49 : vector<2x128xf32>
    %82 = arith.addf %80, %81 : vector<2x128xf32>
    %c0_32 = arith.constant 0 : index
    %c0_33 = arith.constant 0 : index
    %83 = vector.load %arg8[%c0_32, %c0_33] : memref<2x128xf32, #tpu.memory_space<vmem>>, vector<2x128xf32>
    tpu.vector_store %arg8[%c0_32, %c0_33], %82 {strides = array<i32>} : memref<2x128xf32, #tpu.memory_space<vmem>>, vector<2x128xf32>,
    %c0_34 = arith.constant 0 : index
    %c3_35 = arith.constant 3 : index
    %c0_36 = arith.constant 0 : index
    %84 = vector.load %arg6[%c0_34, %c3_35, %c0_36] : memref<2x4x128xf32, #tpu.memory_space<vmem>>, vector<2x1x128xf32>
    %85 = vector.shape_cast %84 : vector<2x1x128xf32> to vector<2x128xf32>
    %86 = vector.shape_cast %82 : vector<2x128xf32> to vector<2x1x128xf32>
    tpu.vector_store %arg6[%c0_34, %c3_35, %c0_36], %86 {strides = array<i32>} : memref<2x4x128xf32, #tpu.memory_space<vmem>>, vector<2x1x128xf32>,
    %c0_37 = arith.constant 0 : index
    %c0_38 = arith.constant 0 : index
    %87 = vector.load %arg7[%c0_37, %c0_38] : memref<2x128xf32, #tpu.memory_space<vmem>>, vector<2x128xf32>
    %c0_39 = arith.constant 0 : index
    %c1_40 = arith.constant 1 : index
    %c0_41 = arith.constant 0 : index
    %88 = vector.load %arg1[%c0_39, %c1_40, %c0_41] : memref<2x4x384xbf16, #tpu.memory_space<vmem>>, vector<2x1x384xbf16>
    %89 = vector.shape_cast %88 : vector<2x1x384xbf16> to vector<2x384xbf16>
    %90 = arith.extf %89 : vector<2x384xbf16> to vector<2x384xf32>
    %91 = arith.truncf %87 : vector<2x128xf32> to vector<2x128xbf16>
    %cst_42 = arith.constant dense<0.000000e+00> : vector<2x384xf32>
    %92 = tpu.matmul %91, %4, %cst_42 {dimension_numbers = #tpu.dot_dimension_numbers<[1], [0], [0], [1], [0, 0, 1, 1], [], []>} : vector<2x128xbf16>, vector<128x384xbf16>, vector<2x384xf32> -> vector<2x384xf32>
    %93 = vector.broadcast %8 : vector<1x384xf32> to vector<2x384xf32>
    %94 = arith.addf %92, %93 : vector<2x384xf32>
    %95 = vector.extract_strided_slice %90 {offsets = [0, 0], sizes = [2, 128], strides = [1, 1]} : vector<2x384xf32> to vector<2x128xf32>
    %96 = vector.extract_strided_slice %94 {offsets = [0, 0], sizes = [2, 128], strides = [1, 1]} : vector<2x384xf32> to vector<2x128xf32>
    %97 = arith.addf %95, %96 : vector<2x128xf32>
    %98 = arith.negf %97 : vector<2x128xf32>
    %99 = math.exp %98 : vector<2x128xf32>
    %cst_43 = arith.constant 1.000000e+00 : f32
    %100 = vector.broadcast %cst_43 : f32 to vector<2x128xf32>
    %101 = arith.addf %100, %99 : vector<2x128xf32>
    %102 = arith.divf %100, %101 : vector<2x128xf32>
    %103 = vector.extract_strided_slice %90 {offsets = [0, 128], sizes = [2, 128], strides = [1, 1]} : vector<2x384xf32> to vector<2x128xf32>
    %104 = vector.extract_strided_slice %94 {offsets = [0, 128], sizes = [2, 128], strides = [1, 1]} : vector<2x384xf32> to vector<2x128xf32>
    %105 = arith.addf %103, %104 : vector<2x128xf32>
    %106 = arith.negf %105 : vector<2x128xf32>
    %107 = math.exp %106 : vector<2x128xf32>
    %cst_44 = arith.constant 1.000000e+00 : f32
    %108 = vector.broadcast %cst_44 : f32 to vector<2x128xf32>
    %109 = arith.addf %108, %107 : vector<2x128xf32>
    %110 = arith.divf %108, %109 : vector<2x128xf32>
    %111 = vector.extract_strided_slice %90 {offsets = [0, 256], sizes = [2, 128], strides = [1, 1]} : vector<2x384xf32> to vector<2x128xf32>
    %112 = vector.extract_strided_slice %94 {offsets = [0, 256], sizes = [2, 128], strides = [1, 1]} : vector<2x384xf32> to vector<2x128xf32>
    %113 = arith.mulf %102, %112 : vector<2x128xf32>
    %114 = arith.addf %111, %113 : vector<2x128xf32>
    %115 = math.tanh %114 : vector<2x128xf32>
    %cst_45 = arith.constant 1.000000e+00 : f32
    %116 = vector.broadcast %cst_45 : f32 to vector<2x128xf32>
    %117 = arith.subf %116, %110 : vector<2x128xf32>
    %118 = arith.mulf %117, %115 : vector<2x128xf32>
    %119 = arith.mulf %110, %87 : vector<2x128xf32>
    %120 = arith.addf %118, %119 : vector<2x128xf32>
    %c0_46 = arith.constant 0 : index
    %c0_47 = arith.constant 0 : index
    %121 = vector.load %arg7[%c0_46, %c0_47] : memref<2x128xf32, #tpu.memory_space<vmem>>, vector<2x128xf32>
    tpu.vector_store %arg7[%c0_46, %c0_47], %120 {strides = array<i32>} : memref<2x128xf32, #tpu.memory_space<vmem>>, vector<2x128xf32>,
    %c0_48 = arith.constant 0 : index
    %c1_49 = arith.constant 1 : index
    %c0_50 = arith.constant 0 : index
    %122 = vector.load %arg5[%c0_48, %c1_49, %c0_50] : memref<2x4x128xf32, #tpu.memory_space<vmem>>, vector<2x1x128xf32>
    %123 = vector.shape_cast %122 : vector<2x1x128xf32> to vector<2x128xf32>
    %124 = vector.shape_cast %120 : vector<2x128xf32> to vector<2x1x128xf32>
    tpu.vector_store %arg5[%c0_48, %c1_49, %c0_50], %124 {strides = array<i32>} : memref<2x4x128xf32, #tpu.memory_space<vmem>>, vector<2x1x128xf32>,
    %c0_51 = arith.constant 0 : index
    %c0_52 = arith.constant 0 : index
    %125 = vector.load %arg8[%c0_51, %c0_52] : memref<2x128xf32, #tpu.memory_space<vmem>>, vector<2x128xf32>
    %c0_53 = arith.constant 0 : index
    %c2 = arith.constant 2 : index
    %c0_54 = arith.constant 0 : index
    %126 = vector.load %arg2[%c0_53, %c2, %c0_54] : memref<2x4x384xbf16, #tpu.memory_space<vmem>>, vector<2x1x384xbf16>
    %127 = vector.shape_cast %126 : vector<2x1x384xbf16> to vector<2x384xbf16>
    %128 = arith.extf %127 : vector<2x384xbf16> to vector<2x384xf32>
    %129 = arith.truncf %125 : vector<2x128xf32> to vector<2x128xbf16>
    %cst_55 = arith.constant dense<0.000000e+00> : vector<2x384xf32>
    %130 = tpu.matmul %129, %6, %cst_55 {dimension_numbers = #tpu.dot_dimension_numbers<[1], [0], [0], [1], [0, 0, 1, 1], [], []>} : vector<2x128xbf16>, vector<128x384xbf16>, vector<2x384xf32> -> vector<2x384xf32>
    %131 = vector.broadcast %10 : vector<1x384xf32> to vector<2x384xf32>
    %132 = arith.addf %130, %131 : vector<2x384xf32>
    %133 = vector.extract_strided_slice %128 {offsets = [0, 0], sizes = [2, 128], strides = [1, 1]} : vector<2x384xf32> to vector<2x128xf32>
    %134 = vector.extract_strided_slice %132 {offsets = [0, 0], sizes = [2, 128], strides = [1, 1]} : vector<2x384xf32> to vector<2x128xf32>
    %135 = arith.addf %133, %134 : vector<2x128xf32>
    %136 = arith.negf %135 : vector<2x128xf32>
    %137 = math.exp %136 : vector<2x128xf32>
    %cst_56 = arith.constant 1.000000e+00 : f32
    %138 = vector.broadcast %cst_56 : f32 to vector<2x128xf32>
    %139 = arith.addf %138, %137 : vector<2x128xf32>
    %140 = arith.divf %138, %139 : vector<2x128xf32>
    %141 = vector.extract_strided_slice %128 {offsets = [0, 128], sizes = [2, 128], strides = [1, 1]} : vector<2x384xf32> to vector<2x128xf32>
    %142 = vector.extract_strided_slice %132 {offsets = [0, 128], sizes = [2, 128], strides = [1, 1]} : vector<2x384xf32> to vector<2x128xf32>
    %143 = arith.addf %141, %142 : vector<2x128xf32>
    %144 = arith.negf %143 : vector<2x128xf32>
    %145 = math.exp %144 : vector<2x128xf32>
    %cst_57 = arith.constant 1.000000e+00 : f32
    %146 = vector.broadcast %cst_57 : f32 to vector<2x128xf32>
    %147 = arith.addf %146, %145 : vector<2x128xf32>
    %148 = arith.divf %146, %147 : vector<2x128xf32>
    %149 = vector.extract_strided_slice %128 {offsets = [0, 256], sizes = [2, 128], strides = [1, 1]} : vector<2x384xf32> to vector<2x128xf32>
    %150 = vector.extract_strided_slice %132 {offsets = [0, 256], sizes = [2, 128], strides = [1, 1]} : vector<2x384xf32> to vector<2x128xf32>
    %151 = arith.mulf %140, %150 : vector<2x128xf32>
    %152 = arith.addf %149, %151 : vector<2x128xf32>
    %153 = math.tanh %152 : vector<2x128xf32>
    %cst_58 = arith.constant 1.000000e+00 : f32
    %154 = vector.broadcast %cst_58 : f32 to vector<2x128xf32>
    %155 = arith.subf %154, %148 : vector<2x128xf32>
    %156 = arith.mulf %155, %153 : vector<2x128xf32>
    %157 = arith.mulf %148, %125 : vector<2x128xf32>
    %158 = arith.addf %156, %157 : vector<2x128xf32>
    %c0_59 = arith.constant 0 : index
    %c0_60 = arith.constant 0 : index
    %159 = vector.load %arg8[%c0_59, %c0_60] : memref<2x128xf32, #tpu.memory_space<vmem>>, vector<2x128xf32>
    tpu.vector_store %arg8[%c0_59, %c0_60], %158 {strides = array<i32>} : memref<2x128xf32, #tpu.memory_space<vmem>>, vector<2x128xf32>,
    %c0_61 = arith.constant 0 : index
    %c2_62 = arith.constant 2 : index
    %c0_63 = arith.constant 0 : index
    %160 = vector.load %arg6[%c0_61, %c2_62, %c0_63] : memref<2x4x128xf32, #tpu.memory_space<vmem>>, vector<2x1x128xf32>
    %161 = vector.shape_cast %160 : vector<2x1x128xf32> to vector<2x128xf32>
    %162 = vector.shape_cast %158 : vector<2x128xf32> to vector<2x1x128xf32>
    tpu.vector_store %arg6[%c0_61, %c2_62, %c0_63], %162 {strides = array<i32>} : memref<2x4x128xf32, #tpu.memory_space<vmem>>, vector<2x1x128xf32>,
    %c0_64 = arith.constant 0 : index
    %c0_65 = arith.constant 0 : index
    %163 = vector.load %arg7[%c0_64, %c0_65] : memref<2x128xf32, #tpu.memory_space<vmem>>, vector<2x128xf32>
    %c0_66 = arith.constant 0 : index
    %c2_67 = arith.constant 2 : index
    %c0_68 = arith.constant 0 : index
    %164 = vector.load %arg1[%c0_66, %c2_67, %c0_68] : memref<2x4x384xbf16, #tpu.memory_space<vmem>>, vector<2x1x384xbf16>
    %165 = vector.shape_cast %164 : vector<2x1x384xbf16> to vector<2x384xbf16>
    %166 = arith.extf %165 : vector<2x384xbf16> to vector<2x384xf32>
    %167 = arith.truncf %163 : vector<2x128xf32> to vector<2x128xbf16>
    %cst_69 = arith.constant dense<0.000000e+00> : vector<2x384xf32>
    %168 = tpu.matmul %167, %4, %cst_69 {dimension_numbers = #tpu.dot_dimension_numbers<[1], [0], [0], [1], [0, 0, 1, 1], [], []>} : vector<2x128xbf16>, vector<128x384xbf16>, vector<2x384xf32> -> vector<2x384xf32>
    %169 = vector.broadcast %8 : vector<1x384xf32> to vector<2x384xf32>
    %170 = arith.addf %168, %169 : vector<2x384xf32>
    %171 = vector.extract_strided_slice %166 {offsets = [0, 0], sizes = [2, 128], strides = [1, 1]} : vector<2x384xf32> to vector<2x128xf32>
    %172 = vector.extract_strided_slice %170 {offsets = [0, 0], sizes = [2, 128], strides = [1, 1]} : vector<2x384xf32> to vector<2x128xf32>
    %173 = arith.addf %171, %172 : vector<2x128xf32>
    %174 = arith.negf %173 : vector<2x128xf32>
    %175 = math.exp %174 : vector<2x128xf32>
    %cst_70 = arith.constant 1.000000e+00 : f32
    %176 = vector.broadcast %cst_70 : f32 to vector<2x128xf32>
    %177 = arith.addf %176, %175 : vector<2x128xf32>
    %178 = arith.divf %176, %177 : vector<2x128xf32>
    %179 = vector.extract_strided_slice %166 {offsets = [0, 128], sizes = [2, 128], strides = [1, 1]} : vector<2x384xf32> to vector<2x128xf32>
    %180 = vector.extract_strided_slice %170 {offsets = [0, 128], sizes = [2, 128], strides = [1, 1]} : vector<2x384xf32> to vector<2x128xf32>
    %181 = arith.addf %179, %180 : vector<2x128xf32>
    %182 = arith.negf %181 : vector<2x128xf32>
    %183 = math.exp %182 : vector<2x128xf32>
    %cst_71 = arith.constant 1.000000e+00 : f32
    %184 = vector.broadcast %cst_71 : f32 to vector<2x128xf32>
    %185 = arith.addf %184, %183 : vector<2x128xf32>
    %186 = arith.divf %184, %185 : vector<2x128xf32>
    %187 = vector.extract_strided_slice %166 {offsets = [0, 256], sizes = [2, 128], strides = [1, 1]} : vector<2x384xf32> to vector<2x128xf32>
    %188 = vector.extract_strided_slice %170 {offsets = [0, 256], sizes = [2, 128], strides = [1, 1]} : vector<2x384xf32> to vector<2x128xf32>
    %189 = arith.mulf %178, %188 : vector<2x128xf32>
    %190 = arith.addf %187, %189 : vector<2x128xf32>
    %191 = math.tanh %190 : vector<2x128xf32>
    %cst_72 = arith.constant 1.000000e+00 : f32
    %192 = vector.broadcast %cst_72 : f32 to vector<2x128xf32>
    %193 = arith.subf %192, %186 : vector<2x128xf32>
    %194 = arith.mulf %193, %191 : vector<2x128xf32>
    %195 = arith.mulf %186, %163 : vector<2x128xf32>
    %196 = arith.addf %194, %195 : vector<2x128xf32>
    %c0_73 = arith.constant 0 : index
    %c0_74 = arith.constant 0 : index
    %197 = vector.load %arg7[%c0_73, %c0_74] : memref<2x128xf32, #tpu.memory_space<vmem>>, vector<2x128xf32>
    tpu.vector_store %arg7[%c0_73, %c0_74], %196 {strides = array<i32>} : memref<2x128xf32, #tpu.memory_space<vmem>>, vector<2x128xf32>,
    %c0_75 = arith.constant 0 : index
    %c2_76 = arith.constant 2 : index
    %c0_77 = arith.constant 0 : index
    %198 = vector.load %arg5[%c0_75, %c2_76, %c0_77] : memref<2x4x128xf32, #tpu.memory_space<vmem>>, vector<2x1x128xf32>
    %199 = vector.shape_cast %198 : vector<2x1x128xf32> to vector<2x128xf32>
    %200 = vector.shape_cast %196 : vector<2x128xf32> to vector<2x1x128xf32>
    tpu.vector_store %arg5[%c0_75, %c2_76, %c0_77], %200 {strides = array<i32>} : memref<2x4x128xf32, #tpu.memory_space<vmem>>, vector<2x1x128xf32>,
    %c0_78 = arith.constant 0 : index
    %c0_79 = arith.constant 0 : index
    %201 = vector.load %arg8[%c0_78, %c0_79] : memref<2x128xf32, #tpu.memory_space<vmem>>, vector<2x128xf32>
    %c0_80 = arith.constant 0 : index
    %c1_81 = arith.constant 1 : index
    %c0_82 = arith.constant 0 : index
    %202 = vector.load %arg2[%c0_80, %c1_81, %c0_82] : memref<2x4x384xbf16, #tpu.memory_space<vmem>>, vector<2x1x384xbf16>
    %203 = vector.shape_cast %202 : vector<2x1x384xbf16> to vector<2x384xbf16>
    %204 = arith.extf %203 : vector<2x384xbf16> to vector<2x384xf32>
    %205 = arith.truncf %201 : vector<2x128xf32> to vector<2x128xbf16>
    %cst_83 = arith.constant dense<0.000000e+00> : vector<2x384xf32>
    %206 = tpu.matmul %205, %6, %cst_83 {dimension_numbers = #tpu.dot_dimension_numbers<[1], [0], [0], [1], [0, 0, 1, 1], [], []>} : vector<2x128xbf16>, vector<128x384xbf16>, vector<2x384xf32> -> vector<2x384xf32>
    %207 = vector.broadcast %10 : vector<1x384xf32> to vector<2x384xf32>
    %208 = arith.addf %206, %207 : vector<2x384xf32>
    %209 = vector.extract_strided_slice %204 {offsets = [0, 0], sizes = [2, 128], strides = [1, 1]} : vector<2x384xf32> to vector<2x128xf32>
    %210 = vector.extract_strided_slice %208 {offsets = [0, 0], sizes = [2, 128], strides = [1, 1]} : vector<2x384xf32> to vector<2x128xf32>
    %211 = arith.addf %209, %210 : vector<2x128xf32>
    %212 = arith.negf %211 : vector<2x128xf32>
    %213 = math.exp %212 : vector<2x128xf32>
    %cst_84 = arith.constant 1.000000e+00 : f32
    %214 = vector.broadcast %cst_84 : f32 to vector<2x128xf32>
    %215 = arith.addf %214, %213 : vector<2x128xf32>
    %216 = arith.divf %214, %215 : vector<2x128xf32>
    %217 = vector.extract_strided_slice %204 {offsets = [0, 128], sizes = [2, 128], strides = [1, 1]} : vector<2x384xf32> to vector<2x128xf32>
    %218 = vector.extract_strided_slice %208 {offsets = [0, 128], sizes = [2, 128], strides = [1, 1]} : vector<2x384xf32> to vector<2x128xf32>
    %219 = arith.addf %217, %218 : vector<2x128xf32>
    %220 = arith.negf %219 : vector<2x128xf32>
    %221 = math.exp %220 : vector<2x128xf32>
    %cst_85 = arith.constant 1.000000e+00 : f32
    %222 = vector.broadcast %cst_85 : f32 to vector<2x128xf32>
    %223 = arith.addf %222, %221 : vector<2x128xf32>
    %224 = arith.divf %222, %223 : vector<2x128xf32>
    %225 = vector.extract_strided_slice %204 {offsets = [0, 256], sizes = [2, 128], strides = [1, 1]} : vector<2x384xf32> to vector<2x128xf32>
    %226 = vector.extract_strided_slice %208 {offsets = [0, 256], sizes = [2, 128], strides = [1, 1]} : vector<2x384xf32> to vector<2x128xf32>
    %227 = arith.mulf %216, %226 : vector<2x128xf32>
    %228 = arith.addf %225, %227 : vector<2x128xf32>
    %229 = math.tanh %228 : vector<2x128xf32>
    %cst_86 = arith.constant 1.000000e+00 : f32
    %230 = vector.broadcast %cst_86 : f32 to vector<2x128xf32>
    %231 = arith.subf %230, %224 : vector<2x128xf32>
    %232 = arith.mulf %231, %229 : vector<2x128xf32>
    %233 = arith.mulf %224, %201 : vector<2x128xf32>
    %234 = arith.addf %232, %233 : vector<2x128xf32>
    %c0_87 = arith.constant 0 : index
    %c0_88 = arith.constant 0 : index
    %235 = vector.load %arg8[%c0_87, %c0_88] : memref<2x128xf32, #tpu.memory_space<vmem>>, vector<2x128xf32>
    tpu.vector_store %arg8[%c0_87, %c0_88], %234 {strides = array<i32>} : memref<2x128xf32, #tpu.memory_space<vmem>>, vector<2x128xf32>,
    %c0_89 = arith.constant 0 : index
    %c1_90 = arith.constant 1 : index
    %c0_91 = arith.constant 0 : index
    %236 = vector.load %arg6[%c0_89, %c1_90, %c0_91] : memref<2x4x128xf32, #tpu.memory_space<vmem>>, vector<2x1x128xf32>
    %237 = vector.shape_cast %236 : vector<2x1x128xf32> to vector<2x128xf32>
    %238 = vector.shape_cast %234 : vector<2x128xf32> to vector<2x1x128xf32>
    tpu.vector_store %arg6[%c0_89, %c1_90, %c0_91], %238 {strides = array<i32>} : memref<2x4x128xf32, #tpu.memory_space<vmem>>, vector<2x1x128xf32>,
    %c0_92 = arith.constant 0 : index
    %c0_93 = arith.constant 0 : index
    %239 = vector.load %arg7[%c0_92, %c0_93] : memref<2x128xf32, #tpu.memory_space<vmem>>, vector<2x128xf32>
    %c0_94 = arith.constant 0 : index
    %c3_95 = arith.constant 3 : index
    %c0_96 = arith.constant 0 : index
    %240 = vector.load %arg1[%c0_94, %c3_95, %c0_96] : memref<2x4x384xbf16, #tpu.memory_space<vmem>>, vector<2x1x384xbf16>
    %241 = vector.shape_cast %240 : vector<2x1x384xbf16> to vector<2x384xbf16>
    %242 = arith.extf %241 : vector<2x384xbf16> to vector<2x384xf32>
    %243 = arith.truncf %239 : vector<2x128xf32> to vector<2x128xbf16>
    %cst_97 = arith.constant dense<0.000000e+00> : vector<2x384xf32>
    %244 = tpu.matmul %243, %4, %cst_97 {dimension_numbers = #tpu.dot_dimension_numbers<[1], [0], [0], [1], [0, 0, 1, 1], [], []>} : vector<2x128xbf16>, vector<128x384xbf16>, vector<2x384xf32> -> vector<2x384xf32>
    %245 = vector.broadcast %8 : vector<1x384xf32> to vector<2x384xf32>
    %246 = arith.addf %244, %245 : vector<2x384xf32>
    %247 = vector.extract_strided_slice %242 {offsets = [0, 0], sizes = [2, 128], strides = [1, 1]} : vector<2x384xf32> to vector<2x128xf32>
    %248 = vector.extract_strided_slice %246 {offsets = [0, 0], sizes = [2, 128], strides = [1, 1]} : vector<2x384xf32> to vector<2x128xf32>
    %249 = arith.addf %247, %248 : vector<2x128xf32>
    %250 = arith.negf %249 : vector<2x128xf32>
    %251 = math.exp %250 : vector<2x128xf32>
    %cst_98 = arith.constant 1.000000e+00 : f32
    %252 = vector.broadcast %cst_98 : f32 to vector<2x128xf32>
    %253 = arith.addf %252, %251 : vector<2x128xf32>
    %254 = arith.divf %252, %253 : vector<2x128xf32>
    %255 = vector.extract_strided_slice %242 {offsets = [0, 128], sizes = [2, 128], strides = [1, 1]} : vector<2x384xf32> to vector<2x128xf32>
    %256 = vector.extract_strided_slice %246 {offsets = [0, 128], sizes = [2, 128], strides = [1, 1]} : vector<2x384xf32> to vector<2x128xf32>
    %257 = arith.addf %255, %256 : vector<2x128xf32>
    %258 = arith.negf %257 : vector<2x128xf32>
    %259 = math.exp %258 : vector<2x128xf32>
    %cst_99 = arith.constant 1.000000e+00 : f32
    %260 = vector.broadcast %cst_99 : f32 to vector<2x128xf32>
    %261 = arith.addf %260, %259 : vector<2x128xf32>
    %262 = arith.divf %260, %261 : vector<2x128xf32>
    %263 = vector.extract_strided_slice %242 {offsets = [0, 256], sizes = [2, 128], strides = [1, 1]} : vector<2x384xf32> to vector<2x128xf32>
    %264 = vector.extract_strided_slice %246 {offsets = [0, 256], sizes = [2, 128], strides = [1, 1]} : vector<2x384xf32> to vector<2x128xf32>
    %265 = arith.mulf %254, %264 : vector<2x128xf32>
    %266 = arith.addf %263, %265 : vector<2x128xf32>
    %267 = math.tanh %266 : vector<2x128xf32>
    %cst_100 = arith.constant 1.000000e+00 : f32
    %268 = vector.broadcast %cst_100 : f32 to vector<2x128xf32>
    %269 = arith.subf %268, %262 : vector<2x128xf32>
    %270 = arith.mulf %269, %267 : vector<2x128xf32>
    %271 = arith.mulf %262, %239 : vector<2x128xf32>
    %272 = arith.addf %270, %271 : vector<2x128xf32>
    %c0_101 = arith.constant 0 : index
    %c0_102 = arith.constant 0 : index
    %273 = vector.load %arg7[%c0_101, %c0_102] : memref<2x128xf32, #tpu.memory_space<vmem>>, vector<2x128xf32>
    tpu.vector_store %arg7[%c0_101, %c0_102], %272 {strides = array<i32>} : memref<2x128xf32, #tpu.memory_space<vmem>>, vector<2x128xf32>,
    %c0_103 = arith.constant 0 : index
    %c3_104 = arith.constant 3 : index
    %c0_105 = arith.constant 0 : index
    %274 = vector.load %arg5[%c0_103, %c3_104, %c0_105] : memref<2x4x128xf32, #tpu.memory_space<vmem>>, vector<2x1x128xf32>
    %275 = vector.shape_cast %274 : vector<2x1x128xf32> to vector<2x128xf32>
    %276 = vector.shape_cast %272 : vector<2x128xf32> to vector<2x1x128xf32>
    tpu.vector_store %arg5[%c0_103, %c3_104, %c0_105], %276 {strides = array<i32>} : memref<2x4x128xf32, #tpu.memory_space<vmem>>, vector<2x1x128xf32>,
    %c0_106 = arith.constant 0 : index
    %c0_107 = arith.constant 0 : index
    %277 = vector.load %arg8[%c0_106, %c0_107] : memref<2x128xf32, #tpu.memory_space<vmem>>, vector<2x128xf32>
    %c0_108 = arith.constant 0 : index
    %c0_109 = arith.constant 0 : index
    %c0_110 = arith.constant 0 : index
    %278 = vector.load %arg2[%c0_108, %c0_109, %c0_110] : memref<2x4x384xbf16, #tpu.memory_space<vmem>>, vector<2x1x384xbf16>
    %279 = vector.shape_cast %278 : vector<2x1x384xbf16> to vector<2x384xbf16>
    %280 = arith.extf %279 : vector<2x384xbf16> to vector<2x384xf32>
    %281 = arith.truncf %277 : vector<2x128xf32> to vector<2x128xbf16>
    %cst_111 = arith.constant dense<0.000000e+00> : vector<2x384xf32>
    %282 = tpu.matmul %281, %6, %cst_111 {dimension_numbers = #tpu.dot_dimension_numbers<[1], [0], [0], [1], [0, 0, 1, 1], [], []>} : vector<2x128xbf16>, vector<128x384xbf16>, vector<2x384xf32> -> vector<2x384xf32>
    %283 = vector.broadcast %10 : vector<1x384xf32> to vector<2x384xf32>
    %284 = arith.addf %282, %283 : vector<2x384xf32>
    %285 = vector.extract_strided_slice %280 {offsets = [0, 0], sizes = [2, 128], strides = [1, 1]} : vector<2x384xf32> to vector<2x128xf32>
    %286 = vector.extract_strided_slice %284 {offsets = [0, 0], sizes = [2, 128], strides = [1, 1]} : vector<2x384xf32> to vector<2x128xf32>
    %287 = arith.addf %285, %286 : vector<2x128xf32>
    %288 = arith.negf %287 : vector<2x128xf32>
    %289 = math.exp %288 : vector<2x128xf32>
    %cst_112 = arith.constant 1.000000e+00 : f32
    %290 = vector.broadcast %cst_112 : f32 to vector<2x128xf32>
    %291 = arith.addf %290, %289 : vector<2x128xf32>
    %292 = arith.divf %290, %291 : vector<2x128xf32>
    %293 = vector.extract_strided_slice %280 {offsets = [0, 128], sizes = [2, 128], strides = [1, 1]} : vector<2x384xf32> to vector<2x128xf32>
    %294 = vector.extract_strided_slice %284 {offsets = [0, 128], sizes = [2, 128], strides = [1, 1]} : vector<2x384xf32> to vector<2x128xf32>
    %295 = arith.addf %293, %294 : vector<2x128xf32>
    %296 = arith.negf %295 : vector<2x128xf32>
    %297 = math.exp %296 : vector<2x128xf32>
    %cst_113 = arith.constant 1.000000e+00 : f32
    %298 = vector.broadcast %cst_113 : f32 to vector<2x128xf32>
    %299 = arith.addf %298, %297 : vector<2x128xf32>
    %300 = arith.divf %298, %299 : vector<2x128xf32>
    %301 = vector.extract_strided_slice %280 {offsets = [0, 256], sizes = [2, 128], strides = [1, 1]} : vector<2x384xf32> to vector<2x128xf32>
    %302 = vector.extract_strided_slice %284 {offsets = [0, 256], sizes = [2, 128], strides = [1, 1]} : vector<2x384xf32> to vector<2x128xf32>
    %303 = arith.mulf %292, %302 : vector<2x128xf32>
    %304 = arith.addf %301, %303 : vector<2x128xf32>
    %305 = math.tanh %304 : vector<2x128xf32>
    %cst_114 = arith.constant 1.000000e+00 : f32
    %306 = vector.broadcast %cst_114 : f32 to vector<2x128xf32>
    %307 = arith.subf %306, %300 : vector<2x128xf32>
    %308 = arith.mulf %307, %305 : vector<2x128xf32>
    %309 = arith.mulf %300, %277 : vector<2x128xf32>
    %310 = arith.addf %308, %309 : vector<2x128xf32>
    %c0_115 = arith.constant 0 : index
    %c0_116 = arith.constant 0 : index
    %311 = vector.load %arg8[%c0_115, %c0_116] : memref<2x128xf32, #tpu.memory_space<vmem>>, vector<2x128xf32>
    tpu.vector_store %arg8[%c0_115, %c0_116], %310 {strides = array<i32>} : memref<2x128xf32, #tpu.memory_space<vmem>>, vector<2x128xf32>,
    %c0_117 = arith.constant 0 : index
    %c0_118 = arith.constant 0 : index
    %c0_119 = arith.constant 0 : index
    %312 = vector.load %arg6[%c0_117, %c0_118, %c0_119] : memref<2x4x128xf32, #tpu.memory_space<vmem>>, vector<2x1x128xf32>
    %313 = vector.shape_cast %312 : vector<2x1x128xf32> to vector<2x128xf32>
    %314 = vector.shape_cast %310 : vector<2x128xf32> to vector<2x1x128xf32>
    tpu.vector_store %arg6[%c0_117, %c0_118, %c0_119], %314 {strides = array<i32>} : memref<2x4x128xf32, #tpu.memory_space<vmem>>, vector<2x1x128xf32>,
    return
  }
  func.func @transform_0(%arg0: i32) -> (i32, i32, i32) {
    %c0_i32 = arith.constant 0 : i32
    %c0_i32_0 = arith.constant 0 : i32
    %c0_i32_1 = arith.constant 0 : i32
    return %c0_i32, %arg0, %c0_i32_0 : i32, i32, i32
  }
  func.func @transform_1(%arg0: i32) -> (i32, i32, i32) {
    %c0_i32 = arith.constant 0 : i32
    %0 = arith.subi %c0_i32, %arg0 : i32
    %c0_i32_0 = arith.constant 0 : i32
    %c1_i32 = arith.constant 1 : i32
    %c0_i32_1 = arith.constant 0 : i32
    return %c0_i32_0, %0, %c1_i32 : i32, i32, i32
  }
  func.func @transform_2(%arg0: i32) -> (i32, i32, i32) {
    %c0_i32 = arith.constant 0 : i32
    %c0_i32_0 = arith.constant 0 : i32
    %c0_i32_1 = arith.constant 0 : i32
    %c0_i32_2 = arith.constant 0 : i32
    return %c0_i32, %c0_i32_0, %c0_i32_1 : i32, i32, i32
  }
  func.func @transform_3(%arg0: i32) -> (i32, i32, i32) {
    %c0_i32 = arith.constant 0 : i32
    %c0_i32_0 = arith.constant 0 : i32
    %c0_i32_1 = arith.constant 0 : i32
    %c0_i32_2 = arith.constant 0 : i32
    return %c0_i32, %c0_i32_0, %c0_i32_1 : i32, i32, i32
  }
  func.func @transform_4(%arg0: i32) -> (i32, i32, i32) {
    %c0_i32 = arith.constant 0 : i32
    %c0_i32_0 = arith.constant 0 : i32
    %c0_i32_1 = arith.constant 0 : i32
    return %c0_i32, %arg0, %c0_i32_0 : i32, i32, i32
  }
  func.func @transform_5(%arg0: i32) -> (i32, i32, i32) {
    %c0_i32 = arith.constant 0 : i32
    %0 = arith.subi %c0_i32, %arg0 : i32
    %c0_i32_0 = arith.constant 0 : i32
    %c0_i32_1 = arith.constant 0 : i32
    %c0_i32_2 = arith.constant 0 : i32
    return %c0_i32_0, %0, %c0_i32_1 : i32, i32, i32
  }
}

module attributes {stable_mosaic.version = 11 : i64} {
  func.func @_matmul_kernel(%arg0: i32, %arg1: i32, %arg2: i32, %arg3: memref<8x256xbf16, #tpu.memory_space<vmem>>, %arg4: memref<256x128xbf16, #tpu.memory_space<vmem>>, %arg5: memref<1x128xf32, #tpu.memory_space<vmem>>, %arg6: memref<8x128xf32, #tpu.memory_space<vmem>>, %arg7: memref<8x128xf32, #tpu.memory_space<vmem>>) attributes {dimension_semantics = [#tpu.dimension_semantics<parallel>, #tpu.dimension_semantics<parallel>, #tpu.dimension_semantics<arbitrary>], iteration_bounds = array<i64: 1, 1, 1>, scalar_prefetch = 0 : i64, scratch_operands = 1 : i64, tpu.core_type = #tpu.core_type<tc>, window_params = [{transform_indices = @transform_0, window_bounds = array<i64: 8, 256>}, {transform_indices = @transform_1, window_bounds = array<i64: 256, 128>}, {transform_indices = @transform_2, window_bounds = array<i64: 1, 128>}, {transform_indices = @transform_3, window_bounds = array<i64: 8, 128>}]} {
    %c0_i32 = arith.constant 0 : i32
    %0 = arith.cmpi eq, %arg2, %c0_i32 : i32
    %1 = arith.extui %0 : i1 to i32
    %c0_i32_0 = arith.constant 0 : i32
    %2 = arith.cmpi ne, %1, %c0_i32_0 : i32
    scf.if %2 {
      %cst_10 = arith.constant 0.000000e+00 : f32
      %12 = vector.broadcast %cst_10 : f32 to vector<8x128xf32>
      %c0_11 = arith.constant 0 : index
      %c0_12 = arith.constant 0 : index
      %13 = vector.load %arg7[%c0_11, %c0_12] : memref<8x128xf32, #tpu.memory_space<vmem>>, vector<8x128xf32>
      tpu.vector_store %arg7[%c0_11, %c0_12], %12 {strides = array<i32>} : memref<8x128xf32, #tpu.memory_space<vmem>>, vector<8x128xf32>,
    } else {
    }
    %c0 = arith.constant 0 : index
    %c0_1 = arith.constant 0 : index
    %3 = vector.load %arg7[%c0, %c0_1] : memref<8x128xf32, #tpu.memory_space<vmem>>, vector<8x128xf32>
    %c0_2 = arith.constant 0 : index
    %c0_3 = arith.constant 0 : index
    %4 = vector.load %arg3[%c0_2, %c0_3] : memref<8x256xbf16, #tpu.memory_space<vmem>>, vector<8x256xbf16>
    %c0_4 = arith.constant 0 : index
    %c0_5 = arith.constant 0 : index
    %5 = vector.load %arg4[%c0_4, %c0_5] : memref<256x128xbf16, #tpu.memory_space<vmem>>, vector<256x128xbf16>
    %cst = arith.constant dense<0.000000e+00> : vector<8x128xf32>
    %6 = tpu.matmul %4, %5, %cst {dimension_numbers = #tpu.dot_dimension_numbers<[1], [0], [0], [1], [0, 0, 1, 1], [], []>} : vector<8x256xbf16>, vector<256x128xbf16>, vector<8x128xf32> -> vector<8x128xf32>
    %7 = arith.addf %3, %6 : vector<8x128xf32>
    %c0_6 = arith.constant 0 : index
    %c0_7 = arith.constant 0 : index
    %8 = vector.load %arg7[%c0_6, %c0_7] : memref<8x128xf32, #tpu.memory_space<vmem>>, vector<8x128xf32>
    tpu.vector_store %arg7[%c0_6, %c0_7], %7 {strides = array<i32>} : memref<8x128xf32, #tpu.memory_space<vmem>>, vector<8x128xf32>,
    %c0_i32_8 = arith.constant 0 : i32
    %9 = arith.cmpi eq, %arg2, %c0_i32_8 : i32
    %10 = arith.extui %9 : i1 to i32
    %c0_i32_9 = arith.constant 0 : i32
    %11 = arith.cmpi ne, %10, %c0_i32_9 : i32
    scf.if %11 {
      %c0_10 = arith.constant 0 : index
      %c0_11 = arith.constant 0 : index
      %12 = vector.load %arg7[%c0_10, %c0_11] : memref<8x128xf32, #tpu.memory_space<vmem>>, vector<8x128xf32>
      %c0_12 = arith.constant 0 : index
      %c0_13 = arith.constant 0 : index
      %13 = vector.load %arg5[%c0_12, %c0_13] : memref<1x128xf32, #tpu.memory_space<vmem>>, vector<1x128xf32>
      %14 = vector.broadcast %13 : vector<1x128xf32> to vector<8x128xf32>
      %15 = arith.addf %12, %14 : vector<8x128xf32>
      %c0_14 = arith.constant 0 : index
      %c0_15 = arith.constant 0 : index
      %16 = vector.load %arg6[%c0_14, %c0_15] : memref<8x128xf32, #tpu.memory_space<vmem>>, vector<8x128xf32>
      tpu.vector_store %arg6[%c0_14, %c0_15], %15 {strides = array<i32>} : memref<8x128xf32, #tpu.memory_space<vmem>>, vector<8x128xf32>,
    } else {
    }
    return
  }
  func.func @transform_0(%arg0: i32, %arg1: i32, %arg2: i32) -> (i32, i32) {
    %c0_i32 = arith.constant 0 : i32
    return %arg0, %arg2 : i32, i32
  }
  func.func @transform_1(%arg0: i32, %arg1: i32, %arg2: i32) -> (i32, i32) {
    %c0_i32 = arith.constant 0 : i32
    return %arg2, %arg1 : i32, i32
  }
  func.func @transform_2(%arg0: i32, %arg1: i32, %arg2: i32) -> (i32, i32) {
    %c0_i32 = arith.constant 0 : i32
    %c0_i32_0 = arith.constant 0 : i32
    return %c0_i32, %arg1 : i32, i32
  }
  func.func @transform_3(%arg0: i32, %arg1: i32, %arg2: i32) -> (i32, i32) {
    %c0_i32 = arith.constant 0 : i32
    return %arg0, %arg1 : i32, i32
  }
}

</mosaic_0001>

<bundles_post_ra>
// kernel: crnn_forward.6
= control target key start
LH: loop header
LB: loop body
LE: loop exit
PB: predicated region body
PF: predicated region fallthrough
CT: control target
= control target key end

     0   :  { %s3837_s15 = smov 0   ;;  %s4911_s0 = inlined_call_operand.vmem [shape: bf16[2,10,4,96], index: 0, kind: input, shape index: {}]   ;;  %s4912_s1 = inlined_call_operand.vmem [shape: bf16[2,10,4,96], index: 1, kind: input, shape index: {}]   ;;  %s4913_s2 = inlined_call_operand.vmem [shape: bf16[3,96,64], index: 2, kind: input, shape index: {}]   ;;  %s4914_s3 = inlined_call_operand.vmem [shape: f32[1,64], index: 3, kind: input, shape index: {}]   ;;  %s4915_s4 = inlined_call_operand.vmem [shape: f32[2,4,4,64], index: 4, kind: output, shape index: {}]  }
   0x1 LB: > { %s2526_s16 = sadd.s32 4294967295, %s3808_s15   ;;  %p2530_p0 = scmp.ge.s32.totalorder %s3808_s15, 1  ;;  %s3808_s15 = sphi %s3837_s15, %s14_s15  }
   0x2   : > { %p172_p1 = scmp.lt.s32.totalorder %s3808_s15, 3 }
   0x4   : > { %p173_p2 = pnand %p2530_p0, %p172_p1 }
   0x5   : > { %v3848_v0 = vld [vmem:[%s4913_s2 + $0x30] sm:$0xff] (!%p173_p2)   ;;  %v3810_v1 = vmov (!%p173_p2), 0.0   ;;  %v3855_v2 = vld [vmem:[%s4913_s2] sm:$0xff] (!%p173_p2)   ;;  %v3861_v3 = vld [vmem:[%s4913_s2 + $0x38] sm:$0xff] (!%p173_p2)   ;;  %vm3811_vm0 = vmmov (!%p173_p2), 0   ;;  %p203_p3 = scmp.lt.s32.totalorder (!%p173_p2), %s2526_s16, 1 }
   0x6   : > { %176 = sbr.rel (%p173_p2) target bundleno = 807 (0x327), region = 36  ;;  %2986 = vmatprep.subr.bf16.mxu0 (!%p173_p2), %v3810_v1  ;;  %3002 = vmatprep.subr.bf16.mxu1 (!%p173_p2), %v3810_v1  ;;  %v3870_v4 = vld [vmem:[%s4913_s2 + $0x8] sm:$0xff] (!%p173_p2)   ;;  %v3879_v5 = vld [vmem:[%s4913_s2 + $0x40] sm:$0xff] (!%p173_p2)   ;;  %v3886_v6 = vld [vmem:[%s4913_s2 + $0x10] sm:$0xff] (!%p173_p2)   ;;  %vm332_vm1 = vcmask (!%p173_p2), 785408   ;;  %vm930_vm2 = vcmask (!%p173_p2), 519168  }
   0x7   : > { %2987 = vmatpush3.bf16.msra.mxu0 (!%p173_p2), %v3848_v0  ;;  %2998 = vmatprep.mubr.msk.bf16.mxu0 (!%p173_p2), %vm3811_vm0, %v3810_v1  ;;  %v3895_v7 = vld [vmem:[%s4913_s2 + $0x48] sm:$0xff] (!%p173_p2)   ;;  %v3902_v8 = vld [vmem:[%s4913_s2 + $0x18] sm:$0xff] (!%p173_p2)   ;;  %v3913_v9 = vld [vmem:[%s4913_s2 + $0x50] sm:$0xff] (!%p173_p2)  }
   0x8   : > { %3003 = vmatpush3.bf16.msra.mxu1 (!%p173_p2), %v3855_v2  ;;  %2988 = vmatprep.subr.bf16.mxu0 (!%p173_p2), %v3810_v1  ;;  %v3920_v10 = vld [vmem:[%s4913_s2 + $0x20] sm:$0xff] (!%p173_p2)   ;;  %v3928_v11 = vld [vmem:[%s4913_s2 + $0x58] sm:$0xff] (!%p173_p2)   ;;  %v3935_v12 = vld [vmem:[%s4913_s2 + $0x28] sm:$0xff] (!%p173_p2)  }
   0x9   : > { %3004 = vmatprep.subr.bf16.mxu1 (!%p173_p2), %v3810_v1  ;;  %3014 = vmatprep.mubr.msk.bf16.mxu1 (!%p173_p2), %vm3811_vm0, %v3810_v1  ;;  %v3952_v14 = vld [vmem:[%s4913_s2 + $0x60] sm:$0xff] (!%p173_p2)   ;;  %v3965_v16 = vld [vmem:[%s4913_s2 + $0x68] sm:$0xff] (!%p173_p2)   ;;  %v3978_v17 = vld [vmem:[%s4913_s2 + $0x70] sm:$0xff] (!%p173_p2)  }
   0xa   : > { %v3987_v18 = vld [vmem:[%s4913_s2 + $0x78] sm:$0xff] (!%p173_p2)   ;;  %v3996_v19 = vld [vmem:[%s4913_s2 + $0x80] sm:$0xff] (!%p173_p2)   ;;  %v4005_v20 = vld [vmem:[%s4913_s2 + $0x88] sm:$0xff] (!%p173_p2)  }
   0xb   : > { %2989 = vmatpush3.bf16.msra.mxu0 (!%p173_p2), %v3861_v3  ;;  %v4363_v48 = vld [vmem:[%s4914_s3] ss:$0 sm:$0xff] (!%p173_p2) }
   0xc   : > { %3005 = vmatpush3.bf16.msra.mxu1 (!%p173_p2), %v3870_v4  ;;  %2990 = vmatprep.subr.bf16.mxu0 (!%p173_p2), %v3810_v1 }
   0xd   : > { %3006 = vmatprep.subr.bf16.mxu1 %v3810_v1  ;;  %s4917_s16 = smov (!%p203_p3, %s2526_s16), 1 }
   0xe   : > { %s3754_s11 = smul.u32 20, %s4917_s16  ;;  %s2649_s18 = sshll.u32 %s4917_s16, 4 }
   0xf   : > { %2991 = vmatpush3.bf16.msra.mxu0 %v3879_v5  ;;  %s4507_s22 = scalar_lea.vmem %s4915_s4, %s2649_s18 }
  0x10   : > { %3007 = vmatpush3.bf16.msra.mxu1 %v3886_v6  ;;  %2992 = vmatprep.subr.bf16.mxu0 %v3810_v1  ;;  %s3942_s20 = scalar_lea.vmem %s4911_s0, %s3754_s11  ;;  %s4015_s9 = scalar_lea.vmem %s4912_s1, %s3754_s11 }
  0x11   : > { %3008 = vmatprep.subr.bf16.mxu1 %v3810_v1  ;;  %v3947_v13 = vld [vmem:[%s3942_s20 + $0x2] sm:$0x3]  ;;  %v258_v15 = vld [vmem:[%s3942_s20] sm:$0x3]  ;;  %v4019_v21 = vld [vmem:[%s3942_s20 + $0x4] sm:$0x3] }
  0x12   : > { %v4023_v22 = vld [vmem:[%s4015_s9 + $0x2] sm:$0x3]  ;;  %v277_v23 = vld [vmem:[%s4015_s9] sm:$0x3]  ;;  %v4059_v24 = vld [vmem:[%s4015_s9 + $0x4] sm:$0x3] }
  0x13   : > { %2993 = vmatpush3.bf16.msra.mxu0 %v3895_v7  ;;  %v4124_v25 = vld [vmem:[%s3942_s20 + $0x6] sm:$0x3]  ;;  %v4226_v27 = vld [vmem:[%s3942_s20 + $0x8] sm:$0x3]  ;;  %v4328_v44 = vld [vmem:[%s3942_s20 + $0xa] sm:$0x3] }
  0x14   : > { %3009 = vmatpush3.bf16.msra.mxu1 %v3902_v8  ;;  %2994 = vmatprep.subr.bf16.mxu0 %v3810_v1  ;;  %v4160_v26 = vld [vmem:[%s4015_s9 + $0x6] sm:$0x3]  ;;  %v4262_v28 = vld [vmem:[%s4015_s9 + $0x8] sm:$0x3]  ;;  %v4370_v59 = vld [vmem:[%s4015_s9 + $0xa] sm:$0x3] }
  0x15   : > { %3010 = vmatprep.subr.bf16.mxu1 %v3810_v1 }
  0x17   : > { %2995 = vmatpush3.bf16.msra.mxu0 %v3913_v9 }
  0x18   : > { %3011 = vmatpush3.bf16.msra.mxu1 %v3920_v10  ;;  %2996 = vmatprep.subr.bf16.mxu0 %v3810_v1 }
  0x19   : > { %3012 = vmatprep.subr.bf16.mxu1 %v3810_v1 }
  0x1b   : > { %2997 = vmatpush3.bf16.msra.mxu0 %v3928_v11 }
  0x1c   : > { %3013 = vmatpush3.bf16.msra.mxu1 %v3935_v12  ;;  %3018 = vmatprep.subr.bf16.mxu0 %v3810_v1 }
  0x1d   : > { %3034 = vmatprep.subr.bf16.mxu1 %v3810_v1 }
  0x1e   : > { %2999 = vmatmul.mubr.msk.bf16.vlgmr.msra.gmra.mrb[0].mxu0 %vm332_vm1, %v3947_v13 }
  0x1f   : > { %3015 = vmatmul.mubr.msk.bf16.vlgmr.msra.gmra.mrb[0].mxu1 %vm332_vm1, %v258_v15  ;;  %3019 = vmatpush3.bf16.msra.mxu0 %v3952_v14 }
  0x20   : > { %3035 = vmatpush3.bf16.msra.mxu1 %v3848_v0  ;;  %3020 = vmatprep.subr.bf16.mxu0 %v3810_v1 }
  0x21   : > { %3036 = vmatprep.subr.bf16.mxu1 %v3810_v1  ;;  %3030 = vmatprep.mubr.msk.bf16.mxu0 %vm3811_vm0, %v3810_v1 }
  0x22   : > { %3046 = vmatprep.mubr.msk.bf16.mxu1 %vm3811_vm0, %v3810_v1 }
  0x23   : > { %3021 = vmatpush3.bf16.msra.mxu0 %v3965_v16 }
  0x24   : > { %3037 = vmatpush3.bf16.msra.mxu1 %v3861_v3  ;;  %3022 = vmatprep.subr.bf16.mxu0 %v3810_v1 }
  0x25   : > { %3038 = vmatprep.subr.bf16.mxu1 %v3810_v1 }
  0x27   : > { %3023 = vmatpush3.bf16.msra.mxu0 %v3978_v17 }
  0x28   : > { %3039 = vmatpush3.bf16.msra.mxu1 %v3879_v5  ;;  %3024 = vmatprep.subr.bf16.mxu0 %v3810_v1 }
  0x29   : > { %3040 = vmatprep.subr.bf16.mxu1 %v3810_v1 }
  0x2b   : > { %3025 = vmatpush3.bf16.msra.mxu0 %v3987_v18 }
  0x2c   : > { %3041 = vmatpush3.bf16.msra.mxu1 %v3895_v7  ;;  %3026 = vmatprep.subr.bf16.mxu0 %v3810_v1 }
  0x2d   : > { %3042 = vmatprep.subr.bf16.mxu1 %v3810_v1 }
  0x2f   : > { %3027 = vmatpush3.bf16.msra.mxu0 %v3996_v19 }
  0x30   : > { %3043 = vmatpush3.bf16.msra.mxu1 %v3913_v9  ;;  %3028 = vmatprep.subr.bf16.mxu0 %v3810_v1 }
  0x31   : > { %3044 = vmatprep.subr.bf16.mxu1 %v3810_v1 }
  0x33   : > { %3029 = vmatpush3.bf16.msra.mxu0 %v4005_v20 }
  0x34   : > { %3045 = vmatpush3.bf16.msra.mxu1 %v3928_v11  ;;  %3050 = vmatprep.subr.bf16.mxu0 %v3810_v1 }
  0x35   : > { %3066 = vmatprep.subr.bf16.mxu1 %v3810_v1 }
  0x36   : > { %3031 = vmatmul.mubr.msk.bf16.vlgmr.msra.gmra.mrb[4].mxu0 %vm332_vm1, %v4019_v21 }
  0x37   : > { %3047 = vmatmul.mubr.msk.bf16.vlgmr.msra.gmra.mrb[4].mxu1 %vm332_vm1, %v4023_v22  ;;  %3051 = vmatpush3.bf16.msra.mxu0 %v3855_v2 }
  0x38   : > { %3067 = vmatpush3.bf16.msra.mxu1 %v3952_v14  ;;  %3052 = vmatprep.subr.bf16.mxu0 %v3810_v1 }
  0x39   : > { %3068 = vmatprep.subr.bf16.mxu1 %v3810_v1  ;;  %3062 = vmatprep.mubr.msk.bf16.mxu0 %vm3811_vm0, %v3810_v1 }
  0x3a   : > { %3078 = vmatprep.mubr.msk.bf16.mxu1 %vm3811_vm0, %v3810_v1 }
  0x3b   : > { %3053 = vmatpush3.bf16.msra.mxu0 %v3870_v4 }
  0x3c   : > { %3069 = vmatpush3.bf16.msra.mxu1 %v3965_v16  ;;  %3054 = vmatprep.subr.bf16.mxu0 %v3810_v1 }
  0x3d   : > { %3070 = vmatprep.subr.bf16.mxu1 %v3810_v1 }
  0x3f   : > { %3055 = vmatpush3.bf16.msra.mxu0 %v3886_v6 }
  0x40   : > { %3071 = vmatpush3.bf16.msra.mxu1 %v3978_v17  ;;  %3056 = vmatprep.subr.bf16.mxu0 %v3810_v1 }
  0x41   : > { %3072 = vmatprep.subr.bf16.mxu1 %v3810_v1 }
  0x43   : > { %3057 = vmatpush3.bf16.msra.mxu0 %v3902_v8 }
  0x44   : > { %3073 = vmatpush3.bf16.msra.mxu1 %v3987_v18  ;;  %3058 = vmatprep.subr.bf16.mxu0 %v3810_v1 }
  0x45   : > { %3074 = vmatprep.subr.bf16.mxu1 %v3810_v1 }
  0x47   : > { %3059 = vmatpush3.bf16.msra.mxu0 %v3920_v10 }
  0x48   : > { %3075 = vmatpush3.bf16.msra.mxu1 %v3996_v19  ;;  %3060 = vmatprep.subr.bf16.mxu0 %v3810_v1 }
  0x49   : > { %3076 = vmatprep.subr.bf16.mxu1 %v3810_v1 }
  0x4b   : > { %3061 = vmatpush3.bf16.msra.mxu0 %v3935_v12 }
  0x4c   : > { %3077 = vmatpush3.bf16.msra.mxu1 %v4005_v20  ;;  %3082 = vmatprep.subr.bf16.mxu0 %v3810_v1 }
  0x4d   : > { %3098 = vmatprep.subr.bf16.mxu1 %v3810_v1 }
  0x4e   : > { %3063 = vmatmul.mubr.msk.bf16.vlgmr.msra.gmra.mrb[8].mxu0 %vm332_vm1, %v277_v23 }
  0x4f   : > { %3079 = vmatmul.mubr.msk.bf16.vlgmr.msra.gmra.mrb[8].mxu1 %vm332_vm1, %v4059_v24  ;;  %3083 = vmatpush3.bf16.msra.mxu0 %v3848_v0 }
  0x50   : > { %3099 = vmatpush3.bf16.msra.mxu1 %v3855_v2  ;;  %3084 = vmatprep.subr.bf16.mxu0 %v3810_v1 }
  0x51   : > { %3100 = vmatprep.subr.bf16.mxu1 %v3810_v1  ;;  %3094 = vmatprep.mubr.msk.bf16.mxu0 %vm3811_vm0, %v3810_v1 }
  0x52   : > { %3110 = vmatprep.mubr.msk.bf16.mxu1 %vm3811_vm0, %v3810_v1 }
  0x53   : > { %3085 = vmatpush3.bf16.msra.mxu0 %v3861_v3 }
  0x54   : > { %3101 = vmatpush3.bf16.msra.mxu1 %v3870_v4  ;;  %3086 = vmatprep.subr.bf16.mxu0 %v3810_v1 }
  0x55   : > { %3102 = vmatprep.subr.bf16.mxu1 %v3810_v1 }
  0x57   : > { %3087 = vmatpush3.bf16.msra.mxu0 %v3879_v5 }
  0x58   : > { %3103 = vmatpush3.bf16.msra.mxu1 %v3886_v6  ;;  %3088 = vmatprep.subr.bf16.mxu0 %v3810_v1 }
  0x59   : > { %3104 = vmatprep.subr.bf16.mxu1 %v3810_v1 }
  0x5b   : > { %3089 = vmatpush3.bf16.msra.mxu0 %v3895_v7 }
  0x5c   : > { %3105 = vmatpush3.bf16.msra.mxu1 %v3902_v8  ;;  %3090 = vmatprep.subr.bf16.mxu0 %v3810_v1 }
  0x5d   : > { %3106 = vmatprep.subr.bf16.mxu1 %v3810_v1 }
  0x5f   : > { %3091 = vmatpush3.bf16.msra.mxu0 %v3913_v9 }
  0x60   : > { %3107 = vmatpush3.bf16.msra.mxu1 %v3920_v10  ;;  %3092 = vmatprep.subr.bf16.mxu0 %v3810_v1 }
  0x61   : > { %3108 = vmatprep.subr.bf16.mxu1 %v3810_v1 }
  0x63   : > { %3093 = vmatpush3.bf16.msra.mxu0 %v3928_v11 }
  0x64   : > { %3109 = vmatpush3.bf16.msra.mxu1 %v3935_v12  ;;  %3114 = vmatprep.subr.bf16.mxu0 %v3810_v1 }
  0x65   : > { %3130 = vmatprep.subr.bf16.mxu1 %v3810_v1 }
  0x66   : > { %3095 = vmatmul.mubr.msk.bf16.vlgmr.msra.gmra.mrb[12].mxu0 %vm332_vm1, %v4019_v21 }
  0x67   : > { %3111 = vmatmul.mubr.msk.bf16.vlgmr.msra.gmra.mrb[12].mxu1 %vm332_vm1, %v3947_v13  ;;  %3115 = vmatpush3.bf16.msra.mxu0 %v3952_v14 }
  0x68   : > { %3131 = vmatpush3.bf16.msra.mxu1 %v3848_v0  ;;  %3116 = vmatprep.subr.bf16.mxu0 %v3810_v1 }
  0x69   : > { %3132 = vmatprep.subr.bf16.mxu1 %v3810_v1  ;;  %3126 = vmatprep.mubr.msk.bf16.mxu0 %vm3811_vm0, %v3810_v1 }
  0x6a   : > { %3142 = vmatprep.mubr.msk.bf16.mxu1 %vm3811_vm0, %v3810_v1 }
  0x6b   : > { %3117 = vmatpush3.bf16.msra.mxu0 %v3965_v16 }
  0x6c   : > { %3133 = vmatpush3.bf16.msra.mxu1 %v3861_v3  ;;  %3118 = vmatprep.subr.bf16.mxu0 %v3810_v1 }
  0x6d   : > { %3134 = vmatprep.subr.bf16.mxu1 %v3810_v1 }
  0x6f   : > { %3119 = vmatpush3.bf16.msra.mxu0 %v3978_v17 }
  0x70   : > { %3135 = vmatpush3.bf16.msra.mxu1 %v3879_v5  ;;  %3120 = vmatprep.subr.bf16.mxu0 %v3810_v1 }
  0x71   : > { %3136 = vmatprep.subr.bf16.mxu1 %v3810_v1 }
  0x73   : > { %3121 = vmatpush3.bf16.msra.mxu0 %v3987_v18 }
  0x74   : > { %3137 = vmatpush3.bf16.msra.mxu1 %v3895_v7  ;;  %3122 = vmatprep.subr.bf16.mxu0 %v3810_v1 }
  0x75   : > { %3138 = vmatprep.subr.bf16.mxu1 %v3810_v1 }
  0x77   : > { %3123 = vmatpush3.bf16.msra.mxu0 %v3996_v19 }
  0x78   : > { %3139 = vmatpush3.bf16.msra.mxu1 %v3913_v9  ;;  %3124 = vmatprep.subr.bf16.mxu0 %v3810_v1 }
  0x79   : > { %3140 = vmatprep.subr.bf16.mxu1 %v3810_v1 }
  0x7b   : > { %3125 = vmatpush3.bf16.msra.mxu0 %v4005_v20 }
  0x7c   : > { %3141 = vmatpush3.bf16.msra.mxu1 %v3928_v11  ;;  %3146 = vmatprep.subr.bf16.mxu0 %v3810_v1 }
  0x7d   : > { %3162 = vmatprep.subr.bf16.mxu1 %v3810_v1 }
  0x7e   : > { %3127 = vmatmul.mubr.msk.bf16.vlgmr.msra.gmra.mrb[16].mxu0 %vm332_vm1, %v4124_v25 }
  0x7f   : > { %3143 = vmatmul.mubr.msk.bf16.vlgmr.msra.gmra.mrb[16].mxu1 %vm332_vm1, %v4059_v24  ;;  %3147 = vmatpush3.bf16.msra.mxu0 %v3855_v2 }
  0x80   : > { %3163 = vmatpush3.bf16.msra.mxu1 %v3952_v14  ;;  %3148 = vmatprep.subr.bf16.mxu0 %v3810_v1 }
  0x81   : > { %3164 = vmatprep.subr.bf16.mxu1 %v3810_v1  ;;  %3158 = vmatprep.mubr.msk.bf16.mxu0 %vm3811_vm0, %v3810_v1 }
  0x82   : > { %3174 = vmatprep.mubr.msk.bf16.mxu1 %vm3811_vm0, %v3810_v1 }
  0x83   : > { %3149 = vmatpush3.bf16.msra.mxu0 %v3870_v4 }
  0x84   : > { %3165 = vmatpush3.bf16.msra.mxu1 %v3965_v16  ;;  %3150 = vmatprep.subr.bf16.mxu0 %v3810_v1 }
  0x85   : > { %3166 = vmatprep.subr.bf16.mxu1 %v3810_v1 }
  0x87   : > { %3151 = vmatpush3.bf16.msra.mxu0 %v3886_v6 }
  0x88   : > { %3167 = vmatpush3.bf16.msra.mxu1 %v3978_v17  ;;  %3152 = vmatprep.subr.bf16.mxu0 %v3810_v1 }
  0x89   : > { %3168 = vmatprep.subr.bf16.mxu1 %v3810_v1 }
  0x8b   : > { %3153 = vmatpush3.bf16.msra.mxu0 %v3902_v8 }
  0x8c   : > { %3169 = vmatpush3.bf16.msra.mxu1 %v3987_v18  ;;  %3154 = vmatprep.subr.bf16.mxu0 %v3810_v1 }
  0x8d   : > { %3170 = vmatprep.subr.bf16.mxu1 %v3810_v1 }
  0x8f   : > { %3155 = vmatpush3.bf16.msra.mxu0 %v3920_v10 }
  0x90   : > { %3171 = vmatpush3.bf16.msra.mxu1 %v3996_v19  ;;  %3156 = vmatprep.subr.bf16.mxu0 %v3810_v1 }
  0x91   : > { %3172 = vmatprep.subr.bf16.mxu1 %v3810_v1 }
  0x93   : > { %3157 = vmatpush3.bf16.msra.mxu0 %v3935_v12 }
  0x94   : > { %3173 = vmatpush3.bf16.msra.mxu1 %v4005_v20  ;;  %3178 = vmatprep.subr.bf16.mxu0 %v3810_v1 }
  0x95   : > { %3194 = vmatprep.subr.bf16.mxu1 %v3810_v1 }
  0x96   : > { %3159 = vmatmul.mubr.msk.bf16.vlgmr.msra.gmra.mrb[20].mxu0 %vm332_vm1, %v4023_v22 }
  0x97   : > { %3175 = vmatmul.mubr.msk.bf16.vlgmr.msra.gmra.mrb[20].mxu1 %vm332_vm1, %v4160_v26  ;;  %3179 = vmatpush3.bf16.msra.mxu0 %v3848_v0 }
  0x98   : > { %3195 = vmatpush3.bf16.msra.mxu1 %v3855_v2  ;;  %3180 = vmatprep.subr.bf16.mxu0 %v3810_v1 }
  0x99   : > { %3196 = vmatprep.subr.bf16.mxu1 %v3810_v1  ;;  %3190 = vmatprep.mubr.msk.bf16.mxu0 %vm3811_vm0, %v3810_v1 }
  0x9a   : > { %3206 = vmatprep.mubr.msk.bf16.mxu1 %vm3811_vm0, %v3810_v1 }
  0x9b   : > { %3181 = vmatpush3.bf16.msra.mxu0 %v3861_v3 }
  0x9c   : > { %3197 = vmatpush3.bf16.msra.mxu1 %v3870_v4  ;;  %3182 = vmatprep.subr.bf16.mxu0 %v3810_v1 }
  0x9d   : > { %3198 = vmatprep.subr.bf16.mxu1 %v3810_v1 }
  0x9f   : > { %3183 = vmatpush3.bf16.msra.mxu0 %v3879_v5 }
  0xa0   : > { %3199 = vmatpush3.bf16.msra.mxu1 %v3886_v6  ;;  %3184 = vmatprep.subr.bf16.mxu0 %v3810_v1 }
  0xa1   : > { %3200 = vmatprep.subr.bf16.mxu1 %v3810_v1 }
  0xa3   : > { %3185 = vmatpush3.bf16.msra.mxu0 %v3895_v7 }
  0xa4   : > { %3201 = vmatpush3.bf16.msra.mxu1 %v3902_v8  ;;  %3186 = vmatprep.subr.bf16.mxu0 %v3810_v1 }
  0xa5   : > { %3202 = vmatprep.subr.bf16.mxu1 %v3810_v1 }
  0xa7   : > { %3187 = vmatpush3.bf16.msra.mxu0 %v3913_v9 }
  0xa8   : > { %3203 = vmatpush3.bf16.msra.mxu1 %v3920_v10  ;;  %3188 = vmatprep.subr.bf16.mxu0 %v3810_v1 }
  0xa9   : > { %3204 = vmatprep.subr.bf16.mxu1 %v3810_v1 }
  0xab   : > { %3189 = vmatpush3.bf16.msra.mxu0 %v3928_v11 }
  0xac   : > { %3205 = vmatpush3.bf16.msra.mxu1 %v3935_v12  ;;  %3210 = vmatprep.subr.bf16.mxu0 %v3810_v1 }
  0xad   : > { %3226 = vmatprep.subr.bf16.mxu1 %v3810_v1 }
  0xae   : > { %3191 = vmatmul.mubr.msk.bf16.vlgmr.msra.gmra.mrb[24].mxu0 %vm332_vm1, %v4124_v25 }
  0xaf   : > { %3207 = vmatmul.mubr.msk.bf16.vlgmr.msra.gmra.mrb[24].mxu1 %vm332_vm1, %v4019_v21  ;;  %3211 = vmatpush3.bf16.msra.mxu0 %v3952_v14 }
  0xb0   : > { %3227 = vmatpush3.bf16.msra.mxu1 %v3848_v0  ;;  %3212 = vmatprep.subr.bf16.mxu0 %v3810_v1 }
  0xb1   : > { %3228 = vmatprep.subr.bf16.mxu1 %v3810_v1  ;;  %3222 = vmatprep.mubr.msk.bf16.mxu0 %vm3811_vm0, %v3810_v1 }
  0xb2   : > { %3238 = vmatprep.mubr.msk.bf16.mxu1 %vm3811_vm0, %v3810_v1 }
  0xb3   : > { %3213 = vmatpush3.bf16.msra.mxu0 %v3965_v16 }
  0xb4   : > { %3229 = vmatpush3.bf16.msra.mxu1 %v3861_v3  ;;  %3214 = vmatprep.subr.bf16.mxu0 %v3810_v1 }
  0xb5   : > { %3230 = vmatprep.subr.bf16.mxu1 %v3810_v1 }
  0xb7   : > { %3215 = vmatpush3.bf16.msra.mxu0 %v3978_v17 }
  0xb8   : > { %3231 = vmatpush3.bf16.msra.mxu1 %v3879_v5  ;;  %3216 = vmatprep.subr.bf16.mxu0 %v3810_v1 }
  0xb9   : > { %3232 = vmatprep.subr.bf16.mxu1 %v3810_v1 }
  0xbb   : > { %3217 = vmatpush3.bf16.msra.mxu0 %v3987_v18 }
  0xbc   : > { %3233 = vmatpush3.bf16.msra.mxu1 %v3895_v7  ;;  %3218 = vmatprep.subr.bf16.mxu0 %v3810_v1 }
  0xbd   : > { %3234 = vmatprep.subr.bf16.mxu1 %v3810_v1 }
  0xbf   : > { %3219 = vmatpush3.bf16.msra.mxu0 %v3996_v19 }
  0xc0   : > { %3235 = vmatpush3.bf16.msra.mxu1 %v3913_v9  ;;  %3220 = vmatprep.subr.bf16.mxu0 %v3810_v1 }
  0xc1   : > { %3236 = vmatprep.subr.bf16.mxu1 %v3810_v1 }
  0xc3   : > { %3221 = vmatpush3.bf16.msra.mxu0 %v4005_v20 }
  0xc4   : > { %3237 = vmatpush3.bf16.msra.mxu1 %v3928_v11  ;;  %3242 = vmatprep.subr.bf16.mxu0 %v3810_v1 }
  0xc5   : > { %3258 = vmatprep.subr.bf16.mxu1 %v3810_v1 }
  0xc6   : > { %3223 = vmatmul.mubr.msk.bf16.vlgmr.msra.gmra.mrb[28].mxu0 %vm332_vm1, %v4226_v27 }
  0xc7   : > { %3239 = vmatmul.mubr.msk.bf16.vlgmr.msra.gmra.mrb[28].mxu1 %vm332_vm1, %v4160_v26  ;;  %3243 = vmatpush3.bf16.msra.mxu0 %v3855_v2 }
  0xc8   : > { %3259 = vmatpush3.bf16.msra.mxu1 %v3952_v14  ;;  %3244 = vmatprep.subr.bf16.mxu0 %v3810_v1 }
  0xc9   : > { %3260 = vmatprep.subr.bf16.mxu1 %v3810_v1  ;;  %3254 = vmatprep.mubr.msk.bf16.mxu0 %vm3811_vm0, %v3810_v1 }
  0xca   : > { %3270 = vmatprep.mubr.msk.bf16.mxu1 %vm3811_vm0, %v3810_v1 }
  0xcb   : > { %3245 = vmatpush3.bf16.msra.mxu0 %v3870_v4 }
  0xcc   : > { %3261 = vmatpush3.bf16.msra.mxu1 %v3965_v16  ;;  %3246 = vmatprep.subr.bf16.mxu0 %v3810_v1 }
  0xcd   : > { %3262 = vmatprep.subr.bf16.mxu1 %v3810_v1 }
  0xcf   : > { %3247 = vmatpush3.bf16.msra.mxu0 %v3886_v6 }
  0xd0   : > { %3263 = vmatpush3.bf16.msra.mxu1 %v3978_v17  ;;  %3248 = vmatprep.subr.bf16.mxu0 %v3810_v1 }
  0xd1   : > { %3264 = vmatprep.subr.bf16.mxu1 %v3810_v1 }
  0xd3   : > { %3249 = vmatpush3.bf16.msra.mxu0 %v3902_v8 }
  0xd4   : > { %3265 = vmatpush3.bf16.msra.mxu1 %v3987_v18  ;;  %3250 = vmatprep.subr.bf16.mxu0 %v3810_v1 }
  0xd5   : > { %3266 = vmatprep.subr.bf16.mxu1 %v3810_v1 }
  0xd7   : > { %3251 = vmatpush3.bf16.msra.mxu0 %v3920_v10 }
  0xd8   : > { %3267 = vmatpush3.bf16.msra.mxu1 %v3996_v19  ;;  %3252 = vmatprep.subr.bf16.mxu0 %v3810_v1 }
  0xd9   : > { %3268 = vmatprep.subr.bf16.mxu1 %v3810_v1 }
  0xdb   : > { %3253 = vmatpush3.bf16.msra.mxu0 %v3935_v12 }
  0xdc   : > { %3269 = vmatpush3.bf16.msra.mxu1 %v4005_v20  ;;  %3274 = vmatprep.subr.bf16.mxu0 %v3810_v1 }
  0xdd   : > { %3290 = vmatprep.subr.bf16.mxu1 %v3810_v1 }
  0xde   : > { %3255 = vmatmul.mubr.msk.bf16.vlgmr.msra.gmra.mrb[32].mxu0 %vm332_vm1, %v4059_v24 }
  0xdf   : > { %3271 = vmatmul.mubr.msk.bf16.vlgmr.msra.gmra.mrb[32].mxu1 %vm332_vm1, %v4262_v28  ;;  %3275 = vmatpush3.bf16.msra.mxu0 %v3848_v0 }
  0xe0   : > { %3291 = vmatpush3.bf16.msra.mxu1 %v3855_v2  ;;  %3276 = vmatprep.subr.bf16.mxu0 %v3810_v1 }
  0xe1   : > { %3292 = vmatprep.subr.bf16.mxu1 %v3810_v1  ;;  %3286 = vmatprep.mubr.msk.bf16.mxu0 %vm3811_vm0, %v3810_v1 }
  0xe2   : > { %3302 = vmatprep.mubr.msk.bf16.mxu1 %vm3811_vm0, %v3810_v1 }
  0xe3   : > { %3277 = vmatpush3.bf16.msra.mxu0 %v3861_v3 }
  0xe4   : > { %3293 = vmatpush3.bf16.msra.mxu1 %v3870_v4  ;;  %3278 = vmatprep.subr.bf16.mxu0 %v3810_v1 }
  0xe5   : > { %3294 = vmatprep.subr.bf16.mxu1 %v3810_v1 }
  0xe7   : > { %3279 = vmatpush3.bf16.msra.mxu0 %v3879_v5 }
  0xe8   : > { %3295 = vmatpush3.bf16.msra.mxu1 %v3886_v6  ;;  %3280 = vmatprep.subr.bf16.mxu0 %v3810_v1 }
  0xe9   : > { %3296 = vmatprep.subr.bf16.mxu1 %v3810_v1 }
  0xeb   : > { %3281 = vmatpush3.bf16.msra.mxu0 %v3895_v7 }
  0xec   : > { %3297 = vmatpush3.bf16.msra.mxu1 %v3902_v8  ;;  %3282 = vmatprep.subr.bf16.mxu0 %v3810_v1 }
  0xed   : > { %3298 = vmatprep.subr.bf16.mxu1 %v3810_v1 }
  0xef   : > { %3283 = vmatpush3.bf16.msra.mxu0 %v3913_v9 }
  0xf0   : > { %3299 = vmatpush3.bf16.msra.mxu1 %v3920_v10  ;;  %3284 = vmatprep.subr.bf16.mxu0 %v3810_v1 }
  0xf1   : > { %v370_v29 = vpop.f32.mrb[0].mxu0  ;;  %3300 = vmatprep.subr.bf16.mxu1 %v3810_v1 }
  0xf2   : > { %v449_v30 = vpop.f32.mrb[0].mxu1  ;;  %v3000_v31 = vpop.f32.mrb[1].mxu0 }
  0xf3   : > { %v450_v32 = vadd.f32 %v449_v30, %v370_v29  ;;  %v3016_v33 = vpop.f32.mrb[1].mxu1  ;;  %v373_v34 = vpop.f32.mrb[2].mxu0  ;;  %3285 = vmatpush3.bf16.msra.mxu0 %v3928_v11 }
  0xf4   : > { %v452_v35 = vpop.f32.mrb[2].mxu1  ;;  %3301 = vmatpush3.bf16.msra.mxu1 %v3935_v12  ;;  %v3001_v36 = vpop.f32.mrb[3].mxu0  ;;  %3306 = vmatprep.subr.bf16.mxu0 %v3810_v1  ;;  %v4451_v34 = vld [vmem:[%s4913_s2] sm:$0xff]  }
  0xf5   : > { %v3017_v37 = vpop.f32.mrb[3].mxu1  ;;  %3322 = vmatprep.subr.bf16.mxu1 %v3810_v1  ;;  %v4481_v35 = vld [vmem:[%s4015_s9 + $0xc] sm:$0x3] }
  0xf6   : > { %3287 = vmatmul.mubr.msk.bf16.vlgmr.msra.gmra.mrb[36].mxu0 %vm332_vm1, %v4226_v27 }
  0xf7   : > { %3303 = vmatmul.mubr.msk.bf16.vlgmr.msra.gmra.mrb[36].mxu1 %vm332_vm1, %v4124_v25  ;;  %3307 = vmatpush3.bf16.msra.mxu0 %v3952_v14 }
  0xf8   : > { %3323 = vmatpush3.bf16.msra.mxu1 %v3848_v0  ;;  %3308 = vmatprep.subr.bf16.mxu0 %v3810_v1 }
  0xf9   : > { %3324 = vmatprep.subr.bf16.mxu1 %v3810_v1  ;;  %3318 = vmatprep.mubr.msk.bf16.mxu0 %vm3811_vm0, %v3810_v1 }
  0xfa   : > { %3334 = vmatprep.mubr.msk.bf16.mxu1 %vm3811_vm0, %v3810_v1 }
  0xfb   : > { %3309 = vmatpush3.bf16.msra.mxu0 %v3965_v16 }
  0xfc   : > { %3325 = vmatpush3.bf16.msra.mxu1 %v3861_v3  ;;  %3310 = vmatprep.subr.bf16.mxu0 %v3810_v1 }
  0xfd   : > { %3326 = vmatprep.subr.bf16.mxu1 %v3810_v1 }
  0xff   : > { %3311 = vmatpush3.bf16.msra.mxu0 %v3978_v17 }
 0x100   : > { %3327 = vmatpush3.bf16.msra.mxu1 %v3879_v5  ;;  %3312 = vmatprep.subr.bf16.mxu0 %v3810_v1 }
 0x101   : > { %3328 = vmatprep.subr.bf16.mxu1 %v3810_v1 }
 0x103   : > { %3313 = vmatpush3.bf16.msra.mxu0 %v3987_v18 }
 0x104   : > { %3329 = vmatpush3.bf16.msra.mxu1 %v3895_v7  ;;  %3314 = vmatprep.subr.bf16.mxu0 %v3810_v1 }
 0x105   : > { %3330 = vmatprep.subr.bf16.mxu1 %v3810_v1 }
 0x107   : > { %3315 = vmatpush3.bf16.msra.mxu0 %v3996_v19 }
 0x108   : > { %3331 = vmatpush3.bf16.msra.mxu1 %v3913_v9  ;;  %3316 = vmatprep.subr.bf16.mxu0 %v3810_v1 }
 0x109   : > { %v528_v38 = vpop.f32.mrb[4].mxu0  ;;  %3332 = vmatprep.subr.bf16.mxu1 %v3810_v1 }
 0x10a   : > { %v534_v39 = vadd.f32 %v528_v38, %v450_v32  ;;  %v580_v40 = vpop.f32.mrb[4].mxu1  ;;  %v3032_v41 = vpop.f32.mrb[5].mxu0 }
 0x10b   : > { %v3048_v42 = vpop.f32.mrb[5].mxu1  ;;  %v531_v43 = vpop.f32.mrb[6].mxu0  ;;  %3317 = vmatpush3.bf16.msra.mxu0 %v4005_v20  ;;  %v4519_v41 = vld [vmem:[%s4913_s2 + $0x8] sm:$0xff]  }
 0x10c   : > { %v583_v45 = vpop.f32.mrb[6].mxu1  ;;  %3333 = vmatpush3.bf16.msra.mxu1 %v3928_v11  ;;  %v3033_v46 = vpop.f32.mrb[7].mxu0  ;;  %3338 = vmatprep.subr.bf16.mxu0 %v3810_v1  ;;  %v541_v55 = vadd.f32 %v4363_v48, %v534_v39  ;;  %v4512_v39 = vld [vmem:[%s4913_s2 + $0x38] sm:$0xff]   ;;  %v4529_v42 = vld [vmem:[%s4913_s2 + $0x40] sm:$0xff]   ;;  %v4535_v43 = vld [vmem:[%s4913_s2 + $0x10] sm:$0xff]  }
 0x10d   : > { %v3049_v47 = vpop.f32.mrb[7].mxu1  ;;  %3354 = vmatprep.subr.bf16.mxu1 %v3810_v1  ;;  %v4543_v45 = vld [vmem:[%s4913_s2 + $0x48] sm:$0xff]   ;;  %v4549_v46 = vld [vmem:[%s4913_s2 + $0x18] sm:$0xff]  }
 0x10e   : > { %3319 = vmatmul.mubr.msk.bf16.vlgmr.msra.gmra.mrb[40].mxu0 %vm332_vm1, %v4328_v44  ;;  %v542_v62 = vmax.f32 %v541_v55, 0.0  ;;  %v4557_v47 = vld [vmem:[%s4913_s2 + $0x50] sm:$0xff]  }
 0x10f   : > { %3335 = vmatmul.mubr.msk.bf16.vlgmr.msra.gmra.mrb[40].mxu1 %vm332_vm1, %v4262_v28  ;;  %3339 = vmatpush3.bf16.msra.mxu0 %v3855_v2 }
 0x110   : > { %3355 = vmatpush3.bf16.msra.mxu1 %v3952_v14  ;;  %3340 = vmatprep.subr.bf16.mxu0 %v3810_v1 }
 0x111   : > { %3356 = vmatprep.subr.bf16.mxu1 %v3810_v1  ;;  %3350 = vmatprep.mubr.msk.bf16.mxu0 %vm3811_vm0, %v3810_v1 }
 0x112   : > { %3366 = vmatprep.mubr.msk.bf16.mxu1 %vm3811_vm0, %v3810_v1 }
 0x113   : > { %3341 = vmatpush3.bf16.msra.mxu0 %v3870_v4 }
 0x114   : > { %3357 = vmatpush3.bf16.msra.mxu1 %v3965_v16  ;;  %3342 = vmatprep.subr.bf16.mxu0 %v3810_v1 }
 0x115   : > { %3358 = vmatprep.subr.bf16.mxu1 %v3810_v1 }
 0x117   : > { %3343 = vmatpush3.bf16.msra.mxu0 %v3886_v6 }
 0x118   : > { %3359 = vmatpush3.bf16.msra.mxu1 %v3978_v17  ;;  %3344 = vmatprep.subr.bf16.mxu0 %v3810_v1 }
 0x119   : > { %3360 = vmatprep.subr.bf16.mxu1 %v3810_v1 }
 0x11b   : > { %3345 = vmatpush3.bf16.msra.mxu0 %v3902_v8 }
 0x11c   : > { %3361 = vmatpush3.bf16.msra.mxu1 %v3987_v18  ;;  %3346 = vmatprep.subr.bf16.mxu0 %v3810_v1 }
 0x11d   : > { %3362 = vmatprep.subr.bf16.mxu1 %v3810_v1 }
 0x11f   : > { %3347 = vmatpush3.bf16.msra.mxu0 %v3920_v10 }
 0x120   : > { %3363 = vmatpush3.bf16.msra.mxu1 %v3996_v19  ;;  %3348 = vmatprep.subr.bf16.mxu0 %v3810_v1 }
 0x121   : > { %v623_v49 = vpop.f32.mrb[8].mxu0  ;;  %3364 = vmatprep.subr.bf16.mxu1 %v3810_v1 }
 0x122   : > { %v624_v50 = vadd.f32 %v623_v49, %v580_v40  ;;  %v666_v51 = vpop.f32.mrb[8].mxu1  ;;  %v3064_v52 = vpop.f32.mrb[9].mxu0  ;;  %v4563_v49 = vld [vmem:[%s4913_s2 + $0x20] sm:$0xff]  }
 0x123   : > { %v3080_v53 = vpop.f32.mrb[9].mxu1  ;;  %v626_v54 = vpop.f32.mrb[10].mxu0  ;;  %3349 = vmatpush3.bf16.msra.mxu0 %v3935_v12 }
 0x124   : > { %v672_v56 = vadd.f32 %v666_v51, %v624_v50  ;;  %v669_v57 = vpop.f32.mrb[10].mxu1  ;;  %3365 = vmatpush3.bf16.msra.mxu1 %v4005_v20  ;;  %v3065_v58 = vpop.f32.mrb[11].mxu0  ;;  %3370 = vmatprep.subr.bf16.mxu0 %v3810_v1 }
 0x125   : > { %v3081_v60 = vpop.f32.mrb[11].mxu1  ;;  %3386 = vmatprep.subr.bf16.mxu1 %v3810_v1  ;;  %v4577_v58 = vld [vmem:[%s4913_s2 + $0x28] sm:$0xff]  }
 0x126   : > { %v673_v61 = vadd.f32 %v4363_v48, %v672_v56  ;;  %3351 = vmatmul.mubr.msk.bf16.vlgmr.msra.gmra.mrb[44].mxu0 %vm332_vm1, %v4160_v26  ;;  %v4571_v56 = vld [vmem:[%s4913_s2 + $0x58] sm:$0xff]  }
 0x127   : > { %3367 = vmatmul.mubr.msk.bf16.vlgmr.msra.gmra.mrb[44].mxu1 %vm332_vm1, %v4370_v59  ;;  %3371 = vmatpush3.bf16.msra.mxu0 %v3848_v0 }
 0x128   : > { %v674_v63 = vmax.f32 %v673_v61, 0.0  ;;  %3387 = vmatpush3.bf16.msra.mxu1 %v3855_v2  ;;  %3372 = vmatprep.subr.bf16.mxu0 %v3810_v1 }
 0x129   : > { %3388 = vmatprep.subr.bf16.mxu1 %v3810_v1  ;;  %3382 = vmatprep.mubr.msk.bf16.mxu0 %vm3811_vm0, %v3810_v1 }
 0x12a   : > { %v4385_v13 = vmax.f32 %v542_v62, %v674_v63  ;;  %3398 = vmatprep.mubr.msk.bf16.mxu1 %vm3811_vm0, %v3810_v1  ;;  %v4589_v62 = vld [vmem:[%s4913_s2 + $0x60] sm:$0xff]   ;;  %v4611_v63 = vld [vmem:[%s4913_s2 + $0x70] sm:$0xff]  }
 0x12b   : > { %3373 = vmatpush3.bf16.msra.mxu0 %v3861_v3 }
 0x12c   : > { %3389 = vmatpush3.bf16.msra.mxu1 %v3870_v4  ;;  %3374 = vmatprep.subr.bf16.mxu0 %v3810_v1 }
 0x12d   : > { %3390 = vmatprep.subr.bf16.mxu1 %v3810_v1 }
 0x12f   : > { %3375 = vmatpush3.bf16.msra.mxu0 %v3879_v5 }
 0x130   : > { %3391 = vmatpush3.bf16.msra.mxu1 %v3886_v6  ;;  %3376 = vmatprep.subr.bf16.mxu0 %v3810_v1 }
 0x131   : > { %3392 = vmatprep.subr.bf16.mxu1 %v3810_v1 }
 0x133   : > { %3377 = vmatpush3.bf16.msra.mxu0 %v3895_v7 }
 0x134   : > { %3393 = vmatpush3.bf16.msra.mxu1 %v3902_v8  ;;  %3378 = vmatprep.subr.bf16.mxu0 %v3810_v1 }
 0x135   : > { %3394 = vmatprep.subr.bf16.mxu1 %v3810_v1 }
 0x137   : > { %3379 = vmatpush3.bf16.msra.mxu0 %v3913_v9 }
 0x138   : > { %3395 = vmatpush3.bf16.msra.mxu1 %v3920_v10  ;;  %3380 = vmatprep.subr.bf16.mxu0 %v3810_v1 }
 0x139   : > { %v709_v2 = vpop.f32.mrb[12].mxu0  ;;  %3396 = vmatprep.subr.bf16.mxu1 %v3810_v1 }
 0x13a   : > { %v749_v15 = vpop.f32.mrb[12].mxu1  ;;  %v3096_v21 = vpop.f32.mrb[13].mxu0 }
 0x13b   : > { %v750_v22 = vadd.f32 %v749_v15, %v709_v2  ;;  %v3112_v23 = vpop.f32.mrb[13].mxu1  ;;  %v712_v24 = vpop.f32.mrb[14].mxu0  ;;  %3381 = vmatpush3.bf16.msra.mxu0 %v3928_v11  ;;  %v4629_v2 = vld [vmem:[%s4913_s2 + $0x80] sm:$0xff]  }
 0x13c   : > { %v752_v25 = vpop.f32.mrb[14].mxu1  ;;  %3397 = vmatpush3.bf16.msra.mxu1 %v3935_v12  ;;  %v3097_v26 = vpop.f32.mrb[15].mxu0  ;;  %3402 = vmatprep.subr.bf16.mxu0 %v3810_v1 }
 0x13d   : > { %v3113_v29 = vpop.f32.mrb[15].mxu1  ;;  %3418 = vmatprep.subr.bf16.mxu1 %v3810_v1  ;;  %v4638_v26 = vld [vmem:[%s4913_s2 + $0x88] sm:$0xff]  }
 0x13e   : > { %3383 = vmatmul.mubr.msk.bf16.vlgmr.msra.gmra.mrb[48].mxu0 %vm332_vm1, %v4328_v44  ;;  %v4642_v29 = vld [vmem:[%s3942_s20 + $0xe] sm:$0x3] }
 0x13f   : > { %3399 = vmatmul.mubr.msk.bf16.vlgmr.msra.gmra.mrb[48].mxu1 %vm332_vm1, %v4226_v27  ;;  %3403 = vmatpush3.bf16.msra.mxu0 %v3952_v14 }
 0x140   : > { %3419 = vmatpush3.bf16.msra.mxu1 %v3848_v0  ;;  %3404 = vmatprep.subr.bf16.mxu0 %v3810_v1 }
 0x141   : > { %3420 = vmatprep.subr.bf16.mxu1 %v3810_v1  ;;  %3414 = vmatprep.mubr.msk.bf16.mxu0 %vm3811_vm0, %v3810_v1 }
 0x142   : > { %3430 = vmatprep.mubr.msk.bf16.mxu1 %vm3811_vm0, %v3810_v1 }
 0x143   : > { %3405 = vmatpush3.bf16.msra.mxu0 %v3965_v16 }
 0x144   : > { %3421 = vmatpush3.bf16.msra.mxu1 %v3861_v3  ;;  %3406 = vmatprep.subr.bf16.mxu0 %v3810_v1 }
 0x145   : > { %3422 = vmatprep.subr.bf16.mxu1 %v3810_v1 }
 0x147   : > { %3407 = vmatpush3.bf16.msra.mxu0 %v3978_v17 }
 0x148   : > { %3423 = vmatpush3.bf16.msra.mxu1 %v3879_v5  ;;  %3408 = vmatprep.subr.bf16.mxu0 %v3810_v1 }
 0x149   : > { %3424 = vmatprep.subr.bf16.mxu1 %v3810_v1 }
 0x14b   : > { %3409 = vmatpush3.bf16.msra.mxu0 %v3987_v18 }
 0x14c   : > { %3425 = vmatpush3.bf16.msra.mxu1 %v3895_v7  ;;  %3410 = vmatprep.subr.bf16.mxu0 %v3810_v1  ;;  %v4439_v7 = vld [vmem:[%s3942_s20 + $0xc] sm:$0x3] }
 0x14d   : > { %3426 = vmatprep.subr.bf16.mxu1 %v3810_v1 }
 0x14f   : > { %3411 = vmatpush3.bf16.msra.mxu0 %v3996_v19 }
 0x150   : > { %3427 = vmatpush3.bf16.msra.mxu1 %v3913_v9  ;;  %3412 = vmatprep.subr.bf16.mxu0 %v3810_v1 }
 0x151   : > { %v792_v0 = vpop.f32.mrb[16].mxu0  ;;  %3428 = vmatprep.subr.bf16.mxu1 %v3810_v1 }
 0x152   : > { %v798_v3 = vadd.f32 %v792_v0, %v750_v22  ;;  %v835_v5 = vpop.f32.mrb[16].mxu1  ;;  %v3128_v27 = vpop.f32.mrb[17].mxu0 }
 0x153   : > { %v3144_v30 = vpop.f32.mrb[17].mxu1  ;;  %v795_v31 = vpop.f32.mrb[18].mxu0  ;;  %3413 = vmatpush3.bf16.msra.mxu0 %v4005_v20 }
 0x154   : > { %v838_v32 = vpop.f32.mrb[18].mxu1  ;;  %3429 = vmatpush3.bf16.msra.mxu1 %v3928_v11  ;;  %v3129_v33 = vpop.f32.mrb[19].mxu0  ;;  %3434 = vmatprep.subr.bf16.mxu0 %v3810_v1 }
 0x155   : > { %v3145_v9 = vpop.f32.mrb[19].mxu1  ;;  %3450 = vmatprep.subr.bf16.mxu1 %v3810_v1 }
 0x156   : > { %3415 = vmatmul.mubr.msk.bf16.vlgmr.msra.gmra.mrb[52].mxu0 %vm332_vm1, %v4439_v7 }
 0x157   : > { %3431 = vmatmul.mubr.msk.bf16.vlgmr.msra.gmra.mrb[52].mxu1 %vm332_vm1, %v4370_v59  ;;  %3435 = vmatpush3.bf16.msra.mxu0 %v4451_v34 }
 0x158   : > { %3451 = vmatpush3.bf16.msra.mxu1 %v3952_v14  ;;  %3436 = vmatprep.subr.bf16.mxu0 %v3810_v1 }
 0x159   : > { %3452 = vmatprep.subr.bf16.mxu1 %v3810_v1  ;;  %3446 = vmatprep.mubr.msk.bf16.mxu0 %vm3811_vm0, %v3810_v1 }
 0x15a   : > { %3462 = vmatprep.mubr.msk.bf16.mxu1 %vm3811_vm0, %v3810_v1 }
 0x15b   : > { %3437 = vmatpush3.bf16.msra.mxu0 %v3870_v4 }
 0x15c   : > { %3453 = vmatpush3.bf16.msra.mxu1 %v3965_v16  ;;  %3438 = vmatprep.subr.bf16.mxu0 %v3810_v1 }
 0x15d   : > { %3454 = vmatprep.subr.bf16.mxu1 %v3810_v1 }
 0x15f   : > { %3439 = vmatpush3.bf16.msra.mxu0 %v3886_v6 }
 0x160   : > { %3455 = vmatpush3.bf16.msra.mxu1 %v3978_v17  ;;  %3440 = vmatprep.subr.bf16.mxu0 %v3810_v1  ;;  %v799_v17 = vadd.f32 %v4363_v48, %v798_v3 }
 0x161   : > { %3456 = vmatprep.subr.bf16.mxu1 %v3810_v1 }
 0x163   : > { %3441 = vmatpush3.bf16.msra.mxu0 %v3902_v8 }
 0x164   : > { %3457 = vmatpush3.bf16.msra.mxu1 %v3987_v18  ;;  %3442 = vmatprep.subr.bf16.mxu0 %v3810_v1 }
 0x165   : > { %3458 = vmatprep.subr.bf16.mxu1 %v3810_v1 }
 0x167   : > { %3443 = vmatpush3.bf16.msra.mxu0 %v3920_v10 }
 0x168   : > { %3459 = vmatpush3.bf16.msra.mxu1 %v3996_v19  ;;  %3444 = vmatprep.subr.bf16.mxu0 %v3810_v1 }
 0x169   : > { %v875_v4 = vpop.f32.mrb[20].mxu0  ;;  %3460 = vmatprep.subr.bf16.mxu1 %v3810_v1 }
 0x16a   : > { %v876_v6 = vadd.f32 %v875_v4, %v835_v5  ;;  %v918_v11 = vpop.f32.mrb[20].mxu1  ;;  %v3160_v14 = vpop.f32.mrb[21].mxu0 }
 0x16b   : > { %v3176_v8 = vpop.f32.mrb[21].mxu1  ;;  %v878_v16 = vpop.f32.mrb[22].mxu0  ;;  %3445 = vmatpush3.bf16.msra.mxu0 %v3935_v12  ;;  %v4493_v12 = vld [vmem:[%s4913_s2 + $0x30] sm:$0xff]  }
 0x16c   : > { %v924_v18 = vadd.f32 %v918_v11, %v876_v6  ;;  %v921_v10 = vpop.f32.mrb[22].mxu1  ;;  %3461 = vmatpush3.bf16.msra.mxu1 %v4005_v20  ;;  %v3161_v19 = vpop.f32.mrb[23].mxu0  ;;  %3466 = vmatprep.subr.bf16.mxu0 %v3810_v1  ;;  %v800_v20 = vmax.f32 %v799_v17, 0.0  ;;  %v4679_v8 = vld [vmem:[%s4015_s9 + $0xe] sm:$0x3] }
 0x16d   : > { %v3177_v36 = vpop.f32.mrb[23].mxu1  ;;  %3482 = vmatprep.subr.bf16.mxu1 %v3810_v1 }
 0x16e   : > { %v925_v37 = vadd.f32 %v4363_v48, %v924_v18  ;;  %3447 = vmatmul.mubr.msk.bf16.vlgmr.msra.gmra.mrb[56].mxu0 %vm332_vm1, %v4262_v28 }
 0x16f   : > { %3463 = vmatmul.mubr.msk.bf16.vlgmr.msra.gmra.mrb[56].mxu1 %vm332_vm1, %v4481_v35  ;;  %3467 = vmatpush3.bf16.msra.mxu0 %v4493_v12 }
 0x170   : > { %v926_v38 = vmax.f32 %v925_v37, 0.0  ;;  %3483 = vmatpush3.bf16.msra.mxu1 %v4451_v34  ;;  %3468 = vmatprep.subr.bf16.mxu0 %v3810_v1 }
 0x171   : > { %3484 = vmatprep.subr.bf16.mxu1 %v3810_v1  ;;  %3478 = vmatprep.mubr.msk.bf16.mxu0 %vm3811_vm0, %v3810_v1 }
 0x172   : > { %v928_v28 = vmax.f32 %v800_v20, %v926_v38  ;;  %3494 = vmatprep.mubr.msk.bf16.mxu1 %vm3811_vm0, %v3810_v1 }
 0x173   : > { %3469 = vmatpush3.bf16.msra.mxu0 %v4512_v39 }
 0x174   : > { %v929_v40 = vmax.f32 %v4385_v13, %v928_v28  ;;  %3485 = vmatpush3.bf16.msra.mxu1 %v4519_v41  ;;  %3470 = vmatprep.subr.bf16.mxu0 %v3810_v1  ;;  %v4620_v13 = vld [vmem:[%s4913_s2 + $0x78] sm:$0xff]  }
 0x175   : > { %3486 = vmatprep.subr.bf16.mxu1 %v3810_v1 }
 0x176   : > { %931 = vst.msk [vmem:[%s4507_s22] sm:$0xf] %vm930_vm2, %v929_v40 }
 0x177   : > { %3471 = vmatpush3.bf16.msra.mxu0 %v4529_v42 }
 0x178   : > { %3487 = vmatpush3.bf16.msra.mxu1 %v4535_v43  ;;  %3472 = vmatprep.subr.bf16.mxu0 %v3810_v1 }
 0x179   : > { %3488 = vmatprep.subr.bf16.mxu1 %v3810_v1 }
 0x17b   : > { %3473 = vmatpush3.bf16.msra.mxu0 %v4543_v45 }
 0x17c   : > { %3489 = vmatpush3.bf16.msra.mxu1 %v4549_v46  ;;  %3474 = vmatprep.subr.bf16.mxu0 %v3810_v1 }
 0x17d   : > { %3490 = vmatprep.subr.bf16.mxu1 %v3810_v1 }
 0x17f   : > { %3475 = vmatpush3.bf16.msra.mxu0 %v4557_v47 }
 0x180   : > { %3491 = vmatpush3.bf16.msra.mxu1 %v4563_v49  ;;  %3476 = vmatprep.subr.bf16.mxu0 %v3810_v1 }
 0x181   : > { %v966_v50 = vpop.f32.mrb[24].mxu0  ;;  %3492 = vmatprep.subr.bf16.mxu1 %v3810_v1 }
 0x182   : > { %v1006_v51 = vpop.f32.mrb[24].mxu1  ;;  %v3192_v52 = vpop.f32.mrb[25].mxu0 }
 0x183   : > { %v1007_v53 = vadd.f32 %v1006_v51, %v966_v50  ;;  %v3208_v54 = vpop.f32.mrb[25].mxu1  ;;  %v969_v55 = vpop.f32.mrb[26].mxu0  ;;  %3477 = vmatpush3.bf16.msra.mxu0 %v4571_v56 }
 0x184   : > { %v1009_v57 = vpop.f32.mrb[26].mxu1  ;;  %3493 = vmatpush3.bf16.msra.mxu1 %v4577_v58  ;;  %v3193_v60 = vpop.f32.mrb[27].mxu0  ;;  %3498 = vmatprep.subr.bf16.mxu0 %v3810_v1 }
 0x185   : > { %v3209_v61 = vpop.f32.mrb[27].mxu1  ;;  %3514 = vmatprep.subr.bf16.mxu1 %v3810_v1  ;;  %v4748_v60 = vld [vmem:[%s3942_s20 + $0x10] sm:$0x3] }
 0x186   : > { %3479 = vmatmul.mubr.msk.bf16.vlgmr.msra.gmra.mrb[60].mxu0 %vm332_vm1, %v4439_v7 }
 0x187   : > { %3495 = vmatmul.mubr.msk.bf16.vlgmr.msra.gmra.mrb[60].mxu1 %vm332_vm1, %v4328_v44  ;;  %3499 = vmatpush3.bf16.msra.mxu0 %v4589_v62  ;;  %v4602_v44 = vld [vmem:[%s4913_s2 + $0x68] sm:$0xff]  }
 0x188   : > { %3515 = vmatpush3.bf16.msra.mxu1 %v4493_v12  ;;  %3500 = vmatprep.subr.bf16.mxu0 %v3810_v1 }
 0x189   : > { %3516 = vmatprep.subr.bf16.mxu1 %v3810_v1  ;;  %3510 = vmatprep.mubr.msk.bf16.mxu0 %vm3811_vm0, %v3810_v1 }
 0x18a   : > { %3526 = vmatprep.mubr.msk.bf16.mxu1 %vm3811_vm0, %v3810_v1 }
 0x18b   : > { %3501 = vmatpush3.bf16.msra.mxu0 %v4602_v44 }
 0x18c   : > { %3517 = vmatpush3.bf16.msra.mxu1 %v4512_v39  ;;  %3502 = vmatprep.subr.bf16.mxu0 %v3810_v1 }
 0x18d   : > { %3518 = vmatprep.subr.bf16.mxu1 %v3810_v1 }
 0x18f   : > { %3503 = vmatpush3.bf16.msra.mxu0 %v4611_v63 }
 0x190   : > { %3519 = vmatpush3.bf16.msra.mxu1 %v4529_v42  ;;  %3504 = vmatprep.subr.bf16.mxu0 %v3810_v1 }
 0x191   : > { %3520 = vmatprep.subr.bf16.mxu1 %v3810_v1 }
 0x193   : > { %3505 = vmatpush3.bf16.msra.mxu0 %v4620_v13 }
 0x194   : > { %3521 = vmatpush3.bf16.msra.mxu1 %v4543_v45  ;;  %3506 = vmatprep.subr.bf16.mxu0 %v3810_v1 }
 0x195   : > { %3522 = vmatprep.subr.bf16.mxu1 %v3810_v1 }
 0x197   : > { %3507 = vmatpush3.bf16.msra.mxu0 %v4629_v2 }
 0x198   : > { %3523 = vmatpush3.bf16.msra.mxu1 %v4557_v47  ;;  %3508 = vmatprep.subr.bf16.mxu0 %v3810_v1 }
 0x199   : > { %v1049_v15 = vpop.f32.mrb[28].mxu0  ;;  %3524 = vmatprep.subr.bf16.mxu1 %v3810_v1 }
 0x19a   : > { %v1055_v21 = vadd.f32 %v1049_v15, %v1007_v53  ;;  %v1092_v22 = vpop.f32.mrb[28].mxu1  ;;  %v3224_v23 = vpop.f32.mrb[29].mxu0 }
 0x19b   : > { %v3240_v24 = vpop.f32.mrb[29].mxu1  ;;  %v1052_v25 = vpop.f32.mrb[30].mxu0  ;;  %3509 = vmatpush3.bf16.msra.mxu0 %v4638_v26 }
 0x19c   : > { %v1095_v0 = vpop.f32.mrb[30].mxu1  ;;  %3525 = vmatpush3.bf16.msra.mxu1 %v4571_v56  ;;  %v3225_v3 = vpop.f32.mrb[31].mxu0  ;;  %3530 = vmatprep.subr.bf16.mxu0 %v3810_v1  ;;  %v1056_v4 = vadd.f32 %v4363_v48, %v1055_v21 }
 0x19d   : > { %v3241_v5 = vpop.f32.mrb[31].mxu1  ;;  %3546 = vmatprep.subr.bf16.mxu1 %v3810_v1 }
 0x19e   : > { %3511 = vmatmul.mubr.msk.bf16.vlgmr.msra.gmra.mrb[64].mxu0 %vm332_vm1, %v4642_v29  ;;  %v1057_v18 = vmax.f32 %v1056_v4, 0.0 }
 0x19f   : > { %3527 = vmatmul.mubr.msk.bf16.vlgmr.msra.gmra.mrb[64].mxu1 %vm332_vm1, %v4481_v35  ;;  %3531 = vmatpush3.bf16.msra.mxu0 %v4451_v34 }
 0x1a0   : > { %3547 = vmatpush3.bf16.msra.mxu1 %v4589_v62  ;;  %3532 = vmatprep.subr.bf16.mxu0 %v3810_v1 }
 0x1a1   : > { %3548 = vmatprep.subr.bf16.mxu1 %v3810_v1  ;;  %3542 = vmatprep.mubr.msk.bf16.mxu0 %vm3811_vm0, %v3810_v1 }
 0x1a2   : > { %3558 = vmatprep.mubr.msk.bf16.mxu1 %vm3811_vm0, %v3810_v1 }
 0x1a3   : > { %3533 = vmatpush3.bf16.msra.mxu0 %v4519_v41 }
 0x1a4   : > { %3549 = vmatpush3.bf16.msra.mxu1 %v4602_v44  ;;  %3534 = vmatprep.subr.bf16.mxu0 %v3810_v1 }
 0x1a5   : > { %3550 = vmatprep.subr.bf16.mxu1 %v3810_v1 }
 0x1a7   : > { %3535 = vmatpush3.bf16.msra.mxu0 %v4535_v43 }
 0x1a8   : > { %3551 = vmatpush3.bf16.msra.mxu1 %v4611_v63  ;;  %3536 = vmatprep.subr.bf16.mxu0 %v3810_v1 }
 0x1a9   : > { %3552 = vmatprep.subr.bf16.mxu1 %v3810_v1 }
 0x1ab   : > { %3537 = vmatpush3.bf16.msra.mxu0 %v4549_v46 }
 0x1ac   : > { %3553 = vmatpush3.bf16.msra.mxu1 %v4620_v13  ;;  %3538 = vmatprep.subr.bf16.mxu0 %v3810_v1 }
 0x1ad   : > { %3554 = vmatprep.subr.bf16.mxu1 %v3810_v1 }
 0x1af   : > { %3539 = vmatpush3.bf16.msra.mxu0 %v4563_v49 }
 0x1b0   : > { %3555 = vmatpush3.bf16.msra.mxu1 %v4629_v2  ;;  %3540 = vmatprep.subr.bf16.mxu0 %v3810_v1 }
 0x1b1   : > { %v1132_v27 = vpop.f32.mrb[32].mxu0  ;;  %3556 = vmatprep.subr.bf16.mxu1 %v3810_v1 }
 0x1b2   : > { %v1133_v30 = vadd.f32 %v1132_v27, %v1092_v22  ;;  %v1175_v31 = vpop.f32.mrb[32].mxu1  ;;  %v3256_v32 = vpop.f32.mrb[33].mxu0 }
 0x1b3   : > { %v3272_v33 = vpop.f32.mrb[33].mxu1  ;;  %v1135_v9 = vpop.f32.mrb[34].mxu0  ;;  %3541 = vmatpush3.bf16.msra.mxu0 %v4577_v58  ;;  %v4785_v32 = vld [vmem:[%s4015_s9 + $0x10] sm:$0x3] }
 0x1b4   : > { %v1181_v6 = vadd.f32 %v1175_v31, %v1133_v30  ;;  %v1178_v11 = vpop.f32.mrb[34].mxu1  ;;  %3557 = vmatpush3.bf16.msra.mxu1 %v4638_v26  ;;  %v3257_v14 = vpop.f32.mrb[35].mxu0  ;;  %3562 = vmatprep.subr.bf16.mxu0 %v3810_v1 }
 0x1b5   : > { %v3273_v16 = vpop.f32.mrb[35].mxu1  ;;  %3578 = vmatprep.subr.bf16.mxu1 %v3810_v1 }
 0x1b6   : > { %v1182_v17 = vadd.f32 %v4363_v48, %v1181_v6  ;;  %3543 = vmatmul.mubr.msk.bf16.vlgmr.msra.gmra.mrb[68].mxu0 %vm332_vm1, %v4370_v59 }
 0x1b7   : > { %3559 = vmatmul.mubr.msk.bf16.vlgmr.msra.gmra.mrb[68].mxu1 %vm332_vm1, %v4679_v8  ;;  %3563 = vmatpush3.bf16.msra.mxu0 %v4493_v12 }
 0x1b8   : > { %v1183_v10 = vmax.f32 %v1182_v17, 0.0  ;;  %3579 = vmatpush3.bf16.msra.mxu1 %v4451_v34  ;;  %3564 = vmatprep.subr.bf16.mxu0 %v3810_v1 }
 0x1b9   : > { %3580 = vmatprep.subr.bf16.mxu1 %v3810_v1  ;;  %3574 = vmatprep.mubr.msk.bf16.mxu0 %vm3811_vm0, %v3810_v1 }
 0x1ba   : > { %v4694_v19 = vmax.f32 %v1057_v18, %v1183_v10  ;;  %3590 = vmatprep.mubr.msk.bf16.mxu1 %vm3811_vm0, %v3810_v1 }
 0x1bb   : > { %3565 = vmatpush3.bf16.msra.mxu0 %v4512_v39 }
 0x1bc   : > { %3581 = vmatpush3.bf16.msra.mxu1 %v4519_v41  ;;  %3566 = vmatprep.subr.bf16.mxu0 %v3810_v1 }
 0x1bd   : > { %3582 = vmatprep.subr.bf16.mxu1 %v3810_v1 }
 0x1bf   : > { %3567 = vmatpush3.bf16.msra.mxu0 %v4529_v42 }
 0x1c0   : > { %3583 = vmatpush3.bf16.msra.mxu1 %v4535_v43  ;;  %3568 = vmatprep.subr.bf16.mxu0 %v3810_v1 }
 0x1c1   : > { %3584 = vmatprep.subr.bf16.mxu1 %v3810_v1 }
 0x1c3   : > { %3569 = vmatpush3.bf16.msra.mxu0 %v4543_v45 }
 0x1c4   : > { %3585 = vmatpush3.bf16.msra.mxu1 %v4549_v46  ;;  %3570 = vmatprep.subr.bf16.mxu0 %v3810_v1 }
 0x1c5   : > { %3586 = vmatprep.subr.bf16.mxu1 %v3810_v1 }
 0x1c7   : > { %3571 = vmatpush3.bf16.msra.mxu0 %v4557_v47 }
 0x1c8   : > { %3587 = vmatpush3.bf16.msra.mxu1 %v4563_v49  ;;  %3572 = vmatprep.subr.bf16.mxu0 %v3810_v1 }
 0x1c9   : > { %v1218_v59 = vpop.f32.mrb[36].mxu0  ;;  %3588 = vmatprep.subr.bf16.mxu1 %v3810_v1 }
 0x1ca   : > { %v1258_v36 = vpop.f32.mrb[36].mxu1  ;;  %v3288_v37 = vpop.f32.mrb[37].mxu0 }
 0x1cb   : > { %v1259_v20 = vadd.f32 %v1258_v36, %v1218_v59  ;;  %v3304_v38 = vpop.f32.mrb[37].mxu1  ;;  %v1221_v28 = vpop.f32.mrb[38].mxu0  ;;  %3573 = vmatpush3.bf16.msra.mxu0 %v4571_v56 }
 0x1cc   : > { %v1261_v40 = vpop.f32.mrb[38].mxu1  ;;  %3589 = vmatpush3.bf16.msra.mxu1 %v4577_v58  ;;  %v3289_v50 = vpop.f32.mrb[39].mxu0  ;;  %3594 = vmatprep.subr.bf16.mxu0 %v3810_v1 }
 0x1cd   : > { %v3305_v51 = vpop.f32.mrb[39].mxu1  ;;  %3610 = vmatprep.subr.bf16.mxu1 %v3810_v1 }
 0x1ce   : > { %3575 = vmatmul.mubr.msk.bf16.vlgmr.msra.gmra.mrb[72].mxu0 %vm332_vm1, %v4642_v29 }
 0x1cf   : > { %3591 = vmatmul.mubr.msk.bf16.vlgmr.msra.gmra.mrb[72].mxu1 %vm332_vm1, %v4439_v7  ;;  %3595 = vmatpush3.bf16.msra.mxu0 %v4589_v62 }
 0x1d0   : > { %3611 = vmatpush3.bf16.msra.mxu1 %v4493_v12  ;;  %3596 = vmatprep.subr.bf16.mxu0 %v3810_v1 }
 0x1d1   : > { %3612 = vmatprep.subr.bf16.mxu1 %v3810_v1  ;;  %3606 = vmatprep.mubr.msk.bf16.mxu0 %vm3811_vm0, %v3810_v1 }
 0x1d2   : > { %3622 = vmatprep.mubr.msk.bf16.mxu1 %vm3811_vm0, %v3810_v1 }
 0x1d3   : > { %3597 = vmatpush3.bf16.msra.mxu0 %v4602_v44 }
 0x1d4   : > { %3613 = vmatpush3.bf16.msra.mxu1 %v4512_v39  ;;  %3598 = vmatprep.subr.bf16.mxu0 %v3810_v1 }
 0x1d5   : > { %3614 = vmatprep.subr.bf16.mxu1 %v3810_v1 }
 0x1d7   : > { %3599 = vmatpush3.bf16.msra.mxu0 %v4611_v63 }
 0x1d8   : > { %3615 = vmatpush3.bf16.msra.mxu1 %v4529_v42  ;;  %3600 = vmatprep.subr.bf16.mxu0 %v3810_v1 }
 0x1d9   : > { %3616 = vmatprep.subr.bf16.mxu1 %v3810_v1 }
 0x1db   : > { %3601 = vmatpush3.bf16.msra.mxu0 %v4620_v13 }
 0x1dc   : > { %3617 = vmatpush3.bf16.msra.mxu1 %v4543_v45  ;;  %3602 = vmatprep.subr.bf16.mxu0 %v3810_v1 }
 0x1dd   : > { %3618 = vmatprep.subr.bf16.mxu1 %v3810_v1 }
 0x1df   : > { %3603 = vmatpush3.bf16.msra.mxu0 %v4629_v2 }
 0x1e0   : > { %3619 = vmatpush3.bf16.msra.mxu1 %v4557_v47  ;;  %3604 = vmatprep.subr.bf16.mxu0 %v3810_v1 }
 0x1e1   : > { %v1301_v7 = vpop.f32.mrb[40].mxu0  ;;  %3620 = vmatprep.subr.bf16.mxu1 %v3810_v1 }
 0x1e2   : > { %v1307_v52 = vadd.f32 %v1301_v7, %v1259_v20  ;;  %v1344_v53 = vpop.f32.mrb[40].mxu1  ;;  %v3320_v54 = vpop.f32.mrb[41].mxu0 }
 0x1e3   : > { %v3336_v55 = vpop.f32.mrb[41].mxu1  ;;  %v1304_v57 = vpop.f32.mrb[42].mxu0  ;;  %3605 = vmatpush3.bf16.msra.mxu0 %v4638_v26 }
 0x1e4   : > { %v1347_v61 = vpop.f32.mrb[42].mxu1  ;;  %3621 = vmatpush3.bf16.msra.mxu1 %v4571_v56  ;;  %v3321_v15 = vpop.f32.mrb[43].mxu0  ;;  %3626 = vmatprep.subr.bf16.mxu0 %v3810_v1  ;;  %v1308_v5 = vadd.f32 %v4363_v48, %v1307_v52 }
 0x1e5   : > { %v3337_v21 = vpop.f32.mrb[43].mxu1  ;;  %3642 = vmatprep.subr.bf16.mxu1 %v3810_v1 }
 0x1e6   : > { %3607 = vmatmul.mubr.msk.bf16.vlgmr.msra.gmra.mrb[76].mxu0 %vm332_vm1, %v4748_v60  ;;  %v1309_v4 = vmax.f32 %v1308_v5, 0.0 }
 0x1e7   : > { %3623 = vmatmul.mubr.msk.bf16.vlgmr.msra.gmra.mrb[76].mxu1 %vm332_vm1, %v4679_v8  ;;  %3627 = vmatpush3.bf16.msra.mxu0 %v4451_v34 }
 0x1e8   : > { %3643 = vmatpush3.bf16.msra.mxu1 %v4589_v62  ;;  %3628 = vmatprep.subr.bf16.mxu0 %v3810_v1 }
 0x1e9   : > { %3644 = vmatprep.subr.bf16.mxu1 %v3810_v1  ;;  %3638 = vmatprep.mubr.msk.bf16.mxu0 %vm3811_vm0, %v3810_v1 }
 0x1ea   : > { %3654 = vmatprep.mubr.msk.bf16.mxu1 %vm3811_vm0, %v3810_v1 }
 0x1eb   : > { %3629 = vmatpush3.bf16.msra.mxu0 %v4519_v41 }
 0x1ec   : > { %3645 = vmatpush3.bf16.msra.mxu1 %v4602_v44  ;;  %3630 = vmatprep.subr.bf16.mxu0 %v3810_v1 }
 0x1ed   : > { %3646 = vmatprep.subr.bf16.mxu1 %v3810_v1 }
 0x1ef   : > { %3631 = vmatpush3.bf16.msra.mxu0 %v4535_v43 }
 0x1f0   : > { %3647 = vmatpush3.bf16.msra.mxu1 %v4611_v63  ;;  %3632 = vmatprep.subr.bf16.mxu0 %v3810_v1 }
 0x1f1   : > { %3648 = vmatprep.subr.bf16.mxu1 %v3810_v1 }
 0x1f3   : > { %3633 = vmatpush3.bf16.msra.mxu0 %v4549_v46 }
 0x1f4   : > { %3649 = vmatpush3.bf16.msra.mxu1 %v4620_v13  ;;  %3634 = vmatprep.subr.bf16.mxu0 %v3810_v1 }
 0x1f5   : > { %3650 = vmatprep.subr.bf16.mxu1 %v3810_v1 }
 0x1f7   : > { %3635 = vmatpush3.bf16.msra.mxu0 %v4563_v49 }
 0x1f8   : > { %3651 = vmatpush3.bf16.msra.mxu1 %v4629_v2  ;;  %3636 = vmatprep.subr.bf16.mxu0 %v3810_v1 }
 0x1f9   : > { %v1384_v22 = vpop.f32.mrb[44].mxu0  ;;  %3652 = vmatprep.subr.bf16.mxu1 %v3810_v1 }
 0x1fa   : > { %v1385_v23 = vadd.f32 %v1384_v22, %v1344_v53  ;;  %v1427_v24 = vpop.f32.mrb[44].mxu1  ;;  %v3352_v25 = vpop.f32.mrb[45].mxu0 }
 0x1fb   : > { %v3368_v0 = vpop.f32.mrb[45].mxu1  ;;  %v1387_v3 = vpop.f32.mrb[46].mxu0  ;;  %3637 = vmatpush3.bf16.msra.mxu0 %v4577_v58 }
 0x1fc   : > { %v1433_v27 = vadd.f32 %v1427_v24, %v1385_v23  ;;  %v1430_v30 = vpop.f32.mrb[46].mxu1  ;;  %3653 = vmatpush3.bf16.msra.mxu1 %v4638_v26  ;;  %v3353_v31 = vpop.f32.mrb[47].mxu0  ;;  %3658 = vmatprep.subr.bf16.mxu0 %v3810_v1 }
 0x1fd   : > { %v3369_v33 = vpop.f32.mrb[47].mxu1  ;;  %3674 = vmatprep.subr.bf16.mxu1 %v3810_v1 }
 0x1fe   : > { %v1434_v9 = vadd.f32 %v4363_v48, %v1433_v27  ;;  %3639 = vmatmul.mubr.msk.bf16.vlgmr.msra.gmra.mrb[80].mxu0 %vm332_vm1, %v4481_v35 }
 0x1ff   : > { %3655 = vmatmul.mubr.msk.bf16.vlgmr.msra.gmra.mrb[80].mxu1 %vm332_vm1, %v4785_v32  ;;  %3659 = vmatpush3.bf16.msra.mxu0 %v4493_v12 }
 0x200   : > { %v1435_v6 = vmax.f32 %v1434_v9, 0.0  ;;  %3675 = vmatpush3.bf16.msra.mxu1 %v4451_v34  ;;  %3660 = vmatprep.subr.bf16.mxu0 %v3810_v1  ;;  %v4896_v9 = vld [vmem:[%s4914_s3] ss:$0 sm:$0xff] }
 0x201   : > { %3676 = vmatprep.subr.bf16.mxu1 %v3810_v1  ;;  %3670 = vmatprep.mubr.msk.bf16.mxu0 %vm3811_vm0, %v3810_v1 }
 0x202   : > { %v1437_v11 = vmax.f32 %v1309_v4, %v1435_v6  ;;  %3686 = vmatprep.mubr.msk.bf16.mxu1 %vm3811_vm0, %v3810_v1 }
 0x203   : > { %3661 = vmatpush3.bf16.msra.mxu0 %v4512_v39 }
 0x204   : > { %v1438_v35 = vmax.f32 %v4694_v19, %v1437_v11  ;;  %3677 = vmatpush3.bf16.msra.mxu1 %v4519_v41  ;;  %3662 = vmatprep.subr.bf16.mxu0 %v3810_v1 }
 0x205   : > { %3678 = vmatprep.subr.bf16.mxu1 %v3810_v1 }
 0x206   : > { %2620 = vst.msk [vmem:[%s4507_s22 + $0x4] sm:$0xf] %vm930_vm2, %v1438_v35 }
 0x207   : > { %3663 = vmatpush3.bf16.msra.mxu0 %v4529_v42 }
 0x208   : > { %3679 = vmatpush3.bf16.msra.mxu1 %v4535_v43  ;;  %3664 = vmatprep.subr.bf16.mxu0 %v3810_v1 }
 0x209   : > { %3680 = vmatprep.subr.bf16.mxu1 %v3810_v1 }
 0x20b   : > { %3665 = vmatpush3.bf16.msra.mxu0 %v4543_v45 }
 0x20c   : > { %3681 = vmatpush3.bf16.msra.mxu1 %v4549_v46  ;;  %3666 = vmatprep.subr.bf16.mxu0 %v3810_v1 }
 0x20d   : > { %3682 = vmatprep.subr.bf16.mxu1 %v3810_v1 }
 0x20f   : > { %3667 = vmatpush3.bf16.msra.mxu0 %v4557_v47 }
 0x210   : > { %3683 = vmatpush3.bf16.msra.mxu1 %v4563_v49  ;;  %3668 = vmatprep.subr.bf16.mxu0 %v3810_v1 }
 0x211   : > { %v1475_v14 = vpop.f32.mrb[48].mxu0  ;;  %3684 = vmatprep.subr.bf16.mxu1 %v3810_v1 }
 0x212   : > { %v1515_v16 = vpop.f32.mrb[48].mxu1  ;;  %v3384_v17 = vpop.f32.mrb[49].mxu0 }
 0x213   : > { %v1516_v18 = vadd.f32 %v1515_v16, %v1475_v14  ;;  %v3400_v10 = vpop.f32.mrb[49].mxu1  ;;  %v1478_v19 = vpop.f32.mrb[50].mxu0  ;;  %3669 = vmatpush3.bf16.msra.mxu0 %v4571_v56 }
 0x214   : > { %v1518_v59 = vpop.f32.mrb[50].mxu1  ;;  %3685 = vmatpush3.bf16.msra.mxu1 %v4577_v58  ;;  %v3385_v36 = vpop.f32.mrb[51].mxu0  ;;  %3690 = vmatprep.subr.bf16.mxu0 %v3810_v1 }
 0x215   : > { %v3401_v37 = vpop.f32.mrb[51].mxu1  ;;  %3706 = vmatprep.subr.bf16.mxu1 %v3810_v1 }
 0x216   : > { %3671 = vmatmul.mubr.msk.bf16.vlgmr.msra.gmra.mrb[84].mxu0 %vm332_vm1, %v4748_v60 }
 0x217   : > { %3687 = vmatmul.mubr.msk.bf16.vlgmr.msra.gmra.mrb[84].mxu1 %vm332_vm1, %v4642_v29  ;;  %3691 = vmatpush3.bf16.msra.mxu0 %v4589_v62 }
 0x218   : > { %3707 = vmatpush3.bf16.msra.mxu1 %v4493_v12  ;;  %3692 = vmatprep.subr.bf16.mxu0 %v3810_v1 }
 0x219   : > { %3708 = vmatprep.subr.bf16.mxu1 %v3810_v1  ;;  %3702 = vmatprep.mubr.msk.bf16.mxu0 %vm3811_vm0, %v3810_v1 }
 0x21a   : > { %3718 = vmatprep.mubr.msk.bf16.mxu1 %vm3811_vm0, %v3810_v1 }
 0x21b   : > { %3693 = vmatpush3.bf16.msra.mxu0 %v4602_v44 }
 0x21c   : > { %3709 = vmatpush3.bf16.msra.mxu1 %v4512_v39  ;;  %3694 = vmatprep.subr.bf16.mxu0 %v3810_v1 }
 0x21d   : > { %3710 = vmatprep.subr.bf16.mxu1 %v3810_v1 }
 0x21f   : > { %3695 = vmatpush3.bf16.msra.mxu0 %v4611_v63 }
 0x220   : > { %3711 = vmatpush3.bf16.msra.mxu1 %v4529_v42  ;;  %3696 = vmatprep.subr.bf16.mxu0 %v3810_v1 }
 0x221   : > { %3712 = vmatprep.subr.bf16.mxu1 %v3810_v1 }
 0x223   : > { %3697 = vmatpush3.bf16.msra.mxu0 %v4620_v13 }
 0x224   : > { %3713 = vmatpush3.bf16.msra.mxu1 %v4543_v45  ;;  %3698 = vmatprep.subr.bf16.mxu0 %v3810_v1  ;;  %v2567_v45 = vld [vmem:[%s3942_s20 + $0x12] sm:$0x3] }
 0x225   : > { %3714 = vmatprep.subr.bf16.mxu1 %v3810_v1 }
 0x227   : > { %3699 = vmatpush3.bf16.msra.mxu0 %v4629_v2 }
 0x228   : > { %3715 = vmatpush3.bf16.msra.mxu1 %v4557_v47  ;;  %3700 = vmatprep.subr.bf16.mxu0 %v3810_v1 }
 0x229   : > { %v1558_v12 = vpop.f32.mrb[52].mxu0  ;;  %3716 = vmatprep.subr.bf16.mxu1 %v3810_v1 }
 0x22a   : > { %v1564_v39 = vadd.f32 %v1558_v12, %v1516_v18  ;;  %v1601_v42 = vpop.f32.mrb[52].mxu1  ;;  %v3416_v29 = vpop.f32.mrb[53].mxu0 }
 0x22b   : > { %v3432_v20 = vpop.f32.mrb[53].mxu1  ;;  %v1561_v38 = vpop.f32.mrb[54].mxu0  ;;  %3701 = vmatpush3.bf16.msra.mxu0 %v4638_v26 }
 0x22c   : > { %v1604_v28 = vpop.f32.mrb[54].mxu1  ;;  %3717 = vmatpush3.bf16.msra.mxu1 %v4571_v56  ;;  %v3417_v40 = vpop.f32.mrb[55].mxu0  ;;  %3722 = vmatprep.subr.bf16.mxu0 %v3810_v1 }
 0x22d   : > { %v3433_v47 = vpop.f32.mrb[55].mxu1  ;;  %3738 = vmatprep.subr.bf16.mxu1 %v3810_v1 }
 0x22e   : > { %3703 = vmatmul.mubr.msk.bf16.vlgmr.msra.gmra.mrb[88].mxu0 %vm332_vm1, %v2567_v45 }
 0x22f   : > { %3719 = vmatmul.mubr.msk.bf16.vlgmr.msra.gmra.mrb[88].mxu1 %vm332_vm1, %v4785_v32  ;;  %3723 = vmatpush3.bf16.msra.mxu0 %v4451_v34 }
 0x230   : > { %3739 = vmatpush3.bf16.msra.mxu1 %v4589_v62  ;;  %3724 = vmatprep.subr.bf16.mxu0 %v3810_v1 }
 0x231   : > { %3740 = vmatprep.subr.bf16.mxu1 %v3810_v1  ;;  %3734 = vmatprep.mubr.msk.bf16.mxu0 %vm3811_vm0, %v3810_v1 }
 0x232   : > { %3750 = vmatprep.mubr.msk.bf16.mxu1 %vm3811_vm0, %v3810_v1 }
 0x233   : > { %3725 = vmatpush3.bf16.msra.mxu0 %v4519_v41 }
 0x234   : > { %3741 = vmatpush3.bf16.msra.mxu1 %v4602_v44  ;;  %3726 = vmatprep.subr.bf16.mxu0 %v3810_v1  ;;  %v1565_v44 = vadd.f32 %v4363_v48, %v1564_v39 }
 0x235   : > { %3742 = vmatprep.subr.bf16.mxu1 %v3810_v1 }
 0x237   : > { %3727 = vmatpush3.bf16.msra.mxu0 %v4535_v43 }
 0x238   : > { %3743 = vmatpush3.bf16.msra.mxu1 %v4611_v63  ;;  %3728 = vmatprep.subr.bf16.mxu0 %v3810_v1 }
 0x239   : > { %3744 = vmatprep.subr.bf16.mxu1 %v3810_v1 }
 0x23b   : > { %3729 = vmatpush3.bf16.msra.mxu0 %v4549_v46 }
 0x23c   : > { %3745 = vmatpush3.bf16.msra.mxu1 %v4620_v13  ;;  %3730 = vmatprep.subr.bf16.mxu0 %v3810_v1 }
 0x23d   : > { %3746 = vmatprep.subr.bf16.mxu1 %v3810_v1 }
 0x23f   : > { %3731 = vmatpush3.bf16.msra.mxu0 %v4563_v49 }
 0x240   : > { %3747 = vmatpush3.bf16.msra.mxu1 %v4629_v2  ;;  %3732 = vmatprep.subr.bf16.mxu0 %v3810_v1  ;;  %v2576_v2 = vld [vmem:[%s4015_s9 + $0x12] sm:$0x3] }
 0x241   : > { %v1641_v34 = vpop.f32.mrb[56].mxu0  ;;  %3748 = vmatprep.subr.bf16.mxu1 %v3810_v1  ;;  %v1566_v1 = vmax.f32 %v1565_v44, 0.0 }
 0x242   : > { %v1642_v41 = vadd.f32 %v1641_v34, %v1601_v42  ;;  %v1684_v43 = vpop.f32.mrb[56].mxu1  ;;  %v3448_v56 = vpop.f32.mrb[57].mxu0 }
 0x243   : > { %v3464_v46 = vpop.f32.mrb[57].mxu1  ;;  %v1644_v62 = vpop.f32.mrb[58].mxu0  ;;  %3733 = vmatpush3.bf16.msra.mxu0 %v4577_v58 }
 0x244   : > { %v1690_v63 = vadd.f32 %v1684_v43, %v1642_v41  ;;  %v1687_v13 = vpop.f32.mrb[58].mxu1  ;;  %3749 = vmatpush3.bf16.msra.mxu1 %v4638_v26  ;;  %v3449_v49 = vpop.f32.mrb[59].mxu0 }
 0x245   : > { %v3465_v50 = vpop.f32.mrb[59].mxu1 }
 0x246   : > { %v1691_v51 = vadd.f32 %v4363_v48, %v1690_v63  ;;  %3735 = vmatmul.mubr.msk.bf16.vlgmr.msra.gmra.mrb[92].mxu0 %vm332_vm1, %v4679_v8 }
 0x247   : > { %3751 = vmatmul.mubr.msk.bf16.vlgmr.msra.gmra.mrb[92].mxu1 %vm332_vm1, %v2576_v2 }
 0x248   : > { %v1692_v7 = vmax.f32 %v1691_v51, 0.0 }
 0x24a   : > { %v1945_v52 = vmax.f32 %v1566_v1, %v1692_v7 }
 0x259   : > { %v1727_v58 = vpop.f32.mrb[60].mxu0 }
 0x25a   : > { %v1767_v53 = vpop.f32.mrb[60].mxu1  ;;  %v3480_v54 = vpop.f32.mrb[61].mxu0 }
 0x25b   : > { %v1768_v55 = vadd.f32 %v1767_v53, %v1727_v58  ;;  %v3496_v57 = vpop.f32.mrb[61].mxu1  ;;  %v1730_v60 = vpop.f32.mrb[62].mxu0 }
 0x25c   : > { %v1770_v26 = vpop.f32.mrb[62].mxu1  ;;  %v3481_v61 = vpop.f32.mrb[63].mxu0 }
 0x25d   : > { %v3497_v15 = vpop.f32.mrb[63].mxu1 }
 0x271   : > { %v1810_v21 = vpop.f32.mrb[64].mxu0 }
 0x272   : > { %v1816_v22 = vadd.f32 %v1810_v21, %v1768_v55  ;;  %v1853_v48 = vpop.f32.mrb[64].mxu1  ;;  %v3512_v23 = vpop.f32.mrb[65].mxu0 }
 0x273   : > { %v3528_v24 = vpop.f32.mrb[65].mxu1  ;;  %v1813_v8 = vpop.f32.mrb[66].mxu0 }
 0x274   : > { %v1856_v25 = vpop.f32.mrb[66].mxu1  ;;  %v3513_v0 = vpop.f32.mrb[67].mxu0  ;;  %v1817_v4 = vadd.f32 %v4896_v9, %v1816_v22 }
 0x275   : > { %v3529_v3 = vpop.f32.mrb[67].mxu1 }
 0x276   : > { %v1818_v17 = vmax.f32 %v1817_v4, 0.0 }
 0x289   : > { %v1893_v5 = vpop.f32.mrb[68].mxu0 }
 0x28a   : > { %v1894_v27 = vadd.f32 %v1893_v5, %v1853_v48  ;;  %v1936_v30 = vpop.f32.mrb[68].mxu1  ;;  %v3544_v31 = vpop.f32.mrb[69].mxu0 }
 0x28b   : > { %v3560_v32 = vpop.f32.mrb[69].mxu1  ;;  %v1896_v33 = vpop.f32.mrb[70].mxu0 }
 0x28c   : > { %v1942_v6 = vadd.f32 %v1936_v30, %v1894_v27  ;;  %v1939_v11 = vpop.f32.mrb[70].mxu1  ;;  %v3545_v35 = vpop.f32.mrb[71].mxu0 }
 0x28d   : > { %v3561_v14 = vpop.f32.mrb[71].mxu1 }
 0x28e   : > { %v1943_v16 = vadd.f32 %v4896_v9, %v1942_v6 }
 0x290   : > { %v1944_v18 = vmax.f32 %v1943_v16, 0.0 }
 0x292   : > { %v1946_v10 = vmax.f32 %v1818_v17, %v1944_v18 }
 0x294   : > { %v1947_v19 = vmax.f32 %v1945_v52, %v1946_v10 }
 0x296   : > { %2633 = vst.msk [vmem:[%s4507_s22 + $0x8] sm:$0xf] %vm930_vm2, %v1947_v19 }
 0x2a1   : > { %v1984_v59 = vpop.f32.mrb[72].mxu0 }
 0x2a2   : > { %v2024_v36 = vpop.f32.mrb[72].mxu1  ;;  %v3576_v37 = vpop.f32.mrb[73].mxu0 }
 0x2a3   : > { %v2025_v12 = vadd.f32 %v2024_v36, %v1984_v59  ;;  %v3592_v39 = vpop.f32.mrb[73].mxu1  ;;  %v1987_v42 = vpop.f32.mrb[74].mxu0 }
 0x2a4   : > { %v2027_v29 = vpop.f32.mrb[74].mxu1  ;;  %v3577_v20 = vpop.f32.mrb[75].mxu0 }
 0x2a5   : > { %v3593_v38 = vpop.f32.mrb[75].mxu1 }
 0x2b9   : > { %v2067_v45 = vpop.f32.mrb[76].mxu0 }
 0x2ba   : > { %v2073_v28 = vadd.f32 %v2067_v45, %v2025_v12  ;;  %v2110_v40 = vpop.f32.mrb[76].mxu1  ;;  %v3608_v47 = vpop.f32.mrb[77].mxu0 }
 0x2bb   : > { %v3624_v34 = vpop.f32.mrb[77].mxu1  ;;  %v2070_v41 = vpop.f32.mrb[78].mxu0 }
 0x2bc   : > { %v2113_v43 = vpop.f32.mrb[78].mxu1  ;;  %v3609_v56 = vpop.f32.mrb[79].mxu0  ;;  %v2074_v50 = vadd.f32 %v4896_v9, %v2073_v28 }
 0x2bd   : > { %v3625_v46 = vpop.f32.mrb[79].mxu1 }
 0x2be   : > { %v2075_v53 = vmax.f32 %v2074_v50, 0.0 }
 0x2d1   : > { %v2150_v62 = vpop.f32.mrb[80].mxu0 }
 0x2d2   : > { %v2151_v44 = vadd.f32 %v2150_v62, %v2110_v40  ;;  %v2193_v63 = vpop.f32.mrb[80].mxu1  ;;  %v3640_v13 = vpop.f32.mrb[81].mxu0 }
 0x2d3   : > { %v3656_v49 = vpop.f32.mrb[81].mxu1  ;;  %v2153_v2 = vpop.f32.mrb[82].mxu0 }
 0x2d4   : > { %v2199_v51 = vadd.f32 %v2193_v63, %v2151_v44  ;;  %v2196_v1 = vpop.f32.mrb[82].mxu1  ;;  %v3641_v7 = vpop.f32.mrb[83].mxu0 }
 0x2d5   : > { %v3657_v52 = vpop.f32.mrb[83].mxu1 }
 0x2d6   : > { %v2200_v58 = vadd.f32 %v4896_v9, %v2199_v51 }
 0x2d8   : > { %v2201_v54 = vmax.f32 %v2200_v58, 0.0 }
 0x2da   : > { %v2454_v55 = vmax.f32 %v2075_v53, %v2201_v54 }
 0x2e9   : > { %v2236_v57 = vpop.f32.mrb[84].mxu0 }
 0x2ea   : > { %v2276_v60 = vpop.f32.mrb[84].mxu1  ;;  %v3672_v26 = vpop.f32.mrb[85].mxu0 }
 0x2eb   : > { %v2277_v61 = vadd.f32 %v2276_v60, %v2236_v57  ;;  %v3688_v15 = vpop.f32.mrb[85].mxu1  ;;  %v2239_v21 = vpop.f32.mrb[86].mxu0 }
 0x2ec   : > { %v2279_v22 = vpop.f32.mrb[86].mxu1  ;;  %v3673_v48 = vpop.f32.mrb[87].mxu0 }
 0x2ed   : > { %v3689_v23 = vpop.f32.mrb[87].mxu1 }
 0x301   : > { %v2319_v24 = vpop.f32.mrb[88].mxu0 }
 0x302   : > { %v2325_v8 = vadd.f32 %v2319_v24, %v2277_v61  ;;  %v2362_v25 = vpop.f32.mrb[88].mxu1  ;;  %v3704_v0 = vpop.f32.mrb[89].mxu0 }
 0x303   : > { %v3720_v3 = vpop.f32.mrb[89].mxu1  ;;  %v2322_v5 = vpop.f32.mrb[90].mxu0 }
 0x304   : > { %v2365_v27 = vpop.f32.mrb[90].mxu1  ;;  %v3705_v30 = vpop.f32.mrb[91].mxu0  ;;  %v2326_v14 = vadd.f32 %v4896_v9, %v2325_v8 }
 0x305   : > { %v3721_v31 = vpop.f32.mrb[91].mxu1 }
 0x306   : > { %v2327_v59 = vmax.f32 %v2326_v14, 0.0 }
 0x319   : > { %v2402_v32 = vpop.f32.mrb[92].mxu0 }
 0x31a   : > { %v2403_v33 = vadd.f32 %v2402_v32, %v2362_v25  ;;  %v2445_v4 = vpop.f32.mrb[92].mxu1  ;;  %v3736_v6 = vpop.f32.mrb[93].mxu0 }
 0x31b   : > { %v3752_v11 = vpop.f32.mrb[93].mxu1  ;;  %v2405_v35 = vpop.f32.mrb[94].mxu0 }
 0x31c   : > { %v2451_v16 = vadd.f32 %v2445_v4, %v2403_v33  ;;  %v2448_v17 = vpop.f32.mrb[94].mxu1  ;;  %v3737_v18 = vpop.f32.mrb[95].mxu0 }
 0x31d   : > { %v3753_v10 = vpop.f32.mrb[95].mxu1 }
 0x31e   : > { %v2452_v19 = vadd.f32 %v4896_v9, %v2451_v16 }
 0x320   : > { %v2453_v36 = vmax.f32 %v2452_v19, 0.0 }
 0x322   : > { %v2455_v37 = vmax.f32 %v2327_v59, %v2453_v36 }
 0x324   : > { %v2456_v12 = vmax.f32 %v2454_v55, %v2455_v37 }
 0x326   : > { %2646 = vst.msk [vmem:[%s4507_s22 + $0xc] sm:$0xf] %vm930_vm2, %v2456_v12 }
 0x327 PF: > { %s14_s15 = sadd.s32 1, %s3808_s15  }
 0x328   : > { %p11_p4 = scmp.ge.s32.totalorder %s14_s15, 4  }
 0x32a   :  { %13 = sbr.rel (!%p11_p4) target bundleno = 1 (0x1), region = 92 }

// kernel: crnn_forward.7
= control target key start
LH: loop header
LB: loop body
LE: loop exit
PB: predicated region body
PF: predicated region fallthrough
CT: control target
= control target key end

     0   :  { %s1028_s12 = smov 0   ;;  %s1030_s13 = smov 0   ;;  %s1207_s0 = inlined_call_operand.vmem [shape: bf16[8,256], index: 0, kind: input, shape index: {}]   ;;  %s1208_s1 = inlined_call_operand.vmem [shape: bf16[256,768], index: 1, kind: input, shape index: {}]   ;;  %s1209_s2 = inlined_call_operand.vmem [shape: f32[1,768], index: 2, kind: input, shape index: {}]   ;;  %s1210_s3 = inlined_call_operand.vmem [shape: bf16[8,768], index: 3, kind: output, shape index: {}]  }
   0x1   :  { %s1032_s14 = smov 0   ;;  %s1034_s15 = smov 0  }
   0x2   :  { %s1036_s16 = smov 0  }
   0x3 LB: > { %s28_s17 = sadd.s32 1, %s1002_s15  ;;  %p76_p1 = scmp.ne.s32.totalorder %s994_s13, %s990_s12  ;;  %s1006_s16 = sphi %s1036_s16, %s13_s16   ;;  %s1002_s15 = sphi %s1034_s15, %s1214_s15   ;;  %s998_s14 = sphi %s1032_s14, %s1213_s14   ;;  %s994_s13 = sphi %s1030_s13, %s1212_s13   ;;  %s990_s12 = sphi %s1028_s12, %s1211_s12  }
   0x4   : > { %p30_p0 = scmp.ge.s32.totalorder %s28_s17, 3  ;;  %p77_p2 = scmp.eq.s32.totalorder %s1006_s16, 0 }
   0x5   : > { %s69_s19 = sadd.s32 1, %s994_s13  ;;  %p830_p5 = scmp.ge.s32.totalorder %s1006_s16, 3 }
   0x6   : > { %s1216_s17 = smov (%p30_p0, %s28_s17), 0  ;;  %p78_p3 = por %p77_p2, %p76_p1 }
   0x7   : > { %s65_s18 = ssub.s32 %s1002_s15, %s1216_s17  ;;  %169 = sbr.rel (%p830_p5) target bundleno = 34 (0x22), region = 20 }
   0x8   : > { %p67_p4 = scmp.eq.s32.totalorder %s65_s18, 0 }
   0xa   : > { %s1063_s20 = scalar_select %p67_p4, %s994_s13, %s69_s19  }
   0xe   : > { %172 = sbr.rel (!%p78_p3) target bundleno = 34 (0x22), region = 24  ;;  %s174_s21 = sand.u32 (%p78_p3), 1, %s994_s13  }
   0xf   : > { %s876_s22 = sshll.u32 (%p78_p3), %s1002_s15, 3  ;;  %s831_s23 = sshll.u32 (%p78_p3), %s174_s21, 8 }
  0x10   : > { %s1071_s26 = scalar_lea.vmem (%p78_p3), %s1208_s1, %s876_s22  ;;  %s1076_s27 = scalar_lea.vmem (%p78_p3), [#allocation3], %s831_s23 }
  0x11   : > { %v272_v0 = vld [vmem:[%s1071_s26] sm:$0xff] (%p78_p3)  ;;  %v274_v1 = vld [vmem:[%s1071_s26 + $0x18] sm:$0xff] (%p78_p3)  ;;  %v276_v2 = vld [vmem:[%s1071_s26 + $0x30] sm:$0xff] (%p78_p3) }
  0x12   : > { %273 = vst [vmem:[%s1076_s27] sm:$0xff] (%p78_p3), %v272_v0  ;;  %275 = vst [vmem:[%s1076_s27 + $0x8] sm:$0xff] (%p78_p3), %v274_v1  ;;  %v278_v3 = vld [vmem:[%s1071_s26 + $0x48] sm:$0xff] (%p78_p3)  ;;  %v280_v4 = vld [vmem:[%s1071_s26 + $0x60] sm:$0xff] (%p78_p3) }
  0x13   : > { %277 = vst [vmem:[%s1076_s27 + $0x10] sm:$0xff] (%p78_p3), %v276_v2  ;;  %v282_v5 = vld [vmem:[%s1071_s26 + $0x78] sm:$0xff] (%p78_p3)  ;;  %279 = vst [vmem:[%s1076_s27 + $0x18] sm:$0xff] (%p78_p3), %v278_v3  ;;  %v284_v6 = vld [vmem:[%s1071_s26 + $0x90] sm:$0xff] (%p78_p3) }
  0x14   : > { %281 = vst [vmem:[%s1076_s27 + $0x20] sm:$0xff] (%p78_p3), %v280_v4  ;;  %283 = vst [vmem:[%s1076_s27 + $0x28] sm:$0xff] (%p78_p3), %v282_v5  ;;  %v286_v7 = vld [vmem:[%s1071_s26 + $0xa8] sm:$0xff] (%p78_p3)  ;;  %v288_v8 = vld [vmem:[%s1071_s26 + $0xc0] sm:$0xff] (%p78_p3) }
  0x15   : > { %285 = vst [vmem:[%s1076_s27 + $0x30] sm:$0xff] %v284_v6  ;;  %287 = vst [vmem:[%s1076_s27 + $0x38] sm:$0xff] %v286_v7  ;;  %v290_v9 = vld [vmem:[%s1071_s26 + $0xd8] sm:$0xff]  ;;  %v292_v10 = vld [vmem:[%s1071_s26 + $0xf0] sm:$0xff] }
  0x16   : > { %289 = vst [vmem:[%s1076_s27 + $0x40] sm:$0xff] %v288_v8  ;;  %v294_v11 = vld [vmem:[%s1071_s26 + $0x108] sm:$0xff]  ;;  %291 = vst [vmem:[%s1076_s27 + $0x48] sm:$0xff] %v290_v9  ;;  %v296_v12 = vld [vmem:[%s1071_s26 + $0x120] sm:$0xff] }
  0x17   : > { %293 = vst [vmem:[%s1076_s27 + $0x50] sm:$0xff] %v292_v10  ;;  %295 = vst [vmem:[%s1076_s27 + $0x58] sm:$0xff] %v294_v11  ;;  %v298_v13 = vld [vmem:[%s1071_s26 + $0x138] sm:$0xff]  ;;  %v300_v14 = vld [vmem:[%s1071_s26 + $0x150] sm:$0xff] }
  0x18   : > { %297 = vst [vmem:[%s1076_s27 + $0x60] sm:$0xff] %v296_v12  ;;  %299 = vst [vmem:[%s1076_s27 + $0x68] sm:$0xff] %v298_v13  ;;  %v302_v15 = vld [vmem:[%s1071_s26 + $0x168] sm:$0xff]  ;;  %v304_v16 = vld [vmem:[%s1071_s26 + $0x180] sm:$0xff] }
  0x19   : > { %301 = vst [vmem:[%s1076_s27 + $0x70] sm:$0xff] %v300_v14  ;;  %v306_v17 = vld [vmem:[%s1071_s26 + $0x198] sm:$0xff]  ;;  %303 = vst [vmem:[%s1076_s27 + $0x78] sm:$0xff] %v302_v15  ;;  %v308_v18 = vld [vmem:[%s1071_s26 + $0x1b0] sm:$0xff] }
  0x1a   : > { %305 = vst [vmem:[%s1076_s27 + $0x80] sm:$0xff] %v304_v16  ;;  %307 = vst [vmem:[%s1076_s27 + $0x88] sm:$0xff] %v306_v17  ;;  %v310_v19 = vld [vmem:[%s1071_s26 + $0x1c8] sm:$0xff]  ;;  %v312_v20 = vld [vmem:[%s1071_s26 + $0x1e0] sm:$0xff] }
  0x1b   : > { %309 = vst [vmem:[%s1076_s27 + $0x90] sm:$0xff] %v308_v18  ;;  %311 = vst [vmem:[%s1076_s27 + $0x98] sm:$0xff] %v310_v19  ;;  %v314_v21 = vld [vmem:[%s1071_s26 + $0x1f8] sm:$0xff]  ;;  %v316_v22 = vld [vmem:[%s1071_s26 + $0x210] sm:$0xff] }
  0x1c   : > { %313 = vst [vmem:[%s1076_s27 + $0xa0] sm:$0xff] %v312_v20  ;;  %v318_v23 = vld [vmem:[%s1071_s26 + $0x228] sm:$0xff]  ;;  %315 = vst [vmem:[%s1076_s27 + $0xa8] sm:$0xff] %v314_v21  ;;  %v320_v24 = vld [vmem:[%s1071_s26 + $0x240] sm:$0xff] }
  0x1d   : > { %317 = vst [vmem:[%s1076_s27 + $0xb0] sm:$0xff] %v316_v22  ;;  %319 = vst [vmem:[%s1076_s27 + $0xb8] sm:$0xff] %v318_v23  ;;  %v322_v25 = vld [vmem:[%s1071_s26 + $0x258] sm:$0xff]  ;;  %v324_v26 = vld [vmem:[%s1071_s26 + $0x270] sm:$0xff] }
  0x1e   : > { %321 = vst [vmem:[%s1076_s27 + $0xc0] sm:$0xff] %v320_v24  ;;  %323 = vst [vmem:[%s1076_s27 + $0xc8] sm:$0xff] %v322_v25  ;;  %v326_v27 = vld [vmem:[%s1071_s26 + $0x288] sm:$0xff]  ;;  %v328_v28 = vld [vmem:[%s1071_s26 + $0x2a0] sm:$0xff] }
  0x1f   : > { %325 = vst [vmem:[%s1076_s27 + $0xd0] sm:$0xff] %v324_v26  ;;  %v330_v29 = vld [vmem:[%s1071_s26 + $0x2b8] sm:$0xff]  ;;  %327 = vst [vmem:[%s1076_s27 + $0xd8] sm:$0xff] %v326_v27  ;;  %v332_v30 = vld [vmem:[%s1071_s26 + $0x2d0] sm:$0xff] }
  0x20   : > { %329 = vst [vmem:[%s1076_s27 + $0xe0] sm:$0xff] %v328_v28  ;;  %331 = vst [vmem:[%s1076_s27 + $0xe8] sm:$0xff] %v330_v29  ;;  %v334_v31 = vld [vmem:[%s1071_s26 + $0x2e8] sm:$0xff] }
  0x21   : > { %333 = vst [vmem:[%s1076_s27 + $0xf0] sm:$0xff] %v332_v30  ;;  %335 = vst [vmem:[%s1076_s27 + $0xf8] sm:$0xff] %v334_v31 }
  0x22 PF: > { %p834_p6 = scmp.ge.s32.totalorder %s1006_s16, 1  ;;  %p348_p7 = scmp.lt.s32.totalorder %s1006_s16, 4 }
  0x24   : > { %p349_p8 = pnand %p834_p6, %p348_p7 }
  0x25   : > { %s355_s28 = sand.u32 (!%p349_p8), 1, %s990_s12   ;;  %v1145_v32 = vld [vmem:[%s1207_s0] sm:$0xff] (!%p349_p8)  ;;  %s836_s6 = sshll.u32 (!%p349_p8), %s998_s14, 1  ;;  %v682_v3 = vlaneseq (!%p349_p8) }
  0x26   : > { %352 = sbr.rel (%p349_p8) target bundleno = 323 (0x143), region = 66  ;;  %s835_s4 = sshll.u32 (!%p349_p8), %s355_s28, 8  ;;  %v840_v33 = vcombine.high (!%p349_p8), %v1145_v32, %v1145_v32  ;;  %v839_v2 = vcombine.low (!%p349_p8), %v1145_v32, %v1145_v32 }
  0x27   : > { %s1149_s5 = scalar_lea.vmem (!%p349_p8), [#allocation3], %s835_s4  ;;  %p408_p9 = scmp.lt.s32.totalorder (!%p349_p8), %s836_s6, 5  ;;  %v683_v4 = vshrl.u32 (!%p349_p8), %v682_v3, 7 }
  0x28   : > { %v918_v34 = vld [vmem:[%s1149_s5 + $0x4] ss:$8 sps:$4 sm:$0xff] (!%p349_p8)   ;;  %662 = vmatprep.mubr.bf16.mxu0 (!%p349_p8), %v840_v33  ;;  %v920_v35 = vld [vmem:[%s1149_s5] ss:$8 sps:$4 sm:$0xff] (!%p349_p8)   ;;  %v921_v36 = vld [vmem:[%s1149_s5 + $0x14] ss:$8 sps:$4 sm:$0xff] (!%p349_p8)  }
  0x29   : > { %630 = vmatprep.subr.bf16.mxu0 (!%p349_p8), %v918_v34  ;;  %v923_v37 = vld [vmem:[%s1149_s5 + $0x10] ss:$8 sps:$4 sm:$0xff] (!%p349_p8)   ;;  %v924_v38 = vld [vmem:[%s1149_s5 + $0x24] ss:$8 sps:$4 sm:$0xff] (!%p349_p8)   ;;  %v926_v39 = vld [vmem:[%s1149_s5 + $0x20] ss:$8 sps:$4 sm:$0xff] (!%p349_p8)  }
  0x2a   : > { %631 = vmatpush1.bf16.msra.mxu0 (!%p349_p8), %v920_v35  ;;  %v927_v40 = vld [vmem:[%s1149_s5 + $0x34] ss:$8 sps:$4 sm:$0xff] (!%p349_p8)   ;;  %v929_v41 = vld [vmem:[%s1149_s5 + $0x30] ss:$8 sps:$4 sm:$0xff] (!%p349_p8)   ;;  %v930_v42 = vld [vmem:[%s1149_s5 + $0x44] ss:$8 sps:$4 sm:$0xff] (!%p349_p8)  }
  0x2b   : > { %632 = vmatprep.subr.bf16.mxu0 (!%p349_p8), %v921_v36  ;;  %v932_v43 = vld [vmem:[%s1149_s5 + $0x40] ss:$8 sps:$4 sm:$0xff] (!%p349_p8)   ;;  %v933_v44 = vld [vmem:[%s1149_s5 + $0x54] ss:$8 sps:$4 sm:$0xff] (!%p349_p8)   ;;  %v935_v45 = vld [vmem:[%s1149_s5 + $0x50] ss:$8 sps:$4 sm:$0xff] (!%p349_p8)  }
  0x2c   : > { %v936_v46 = vld [vmem:[%s1149_s5 + $0x64] ss:$8 sps:$4 sm:$0xff] (!%p349_p8)   ;;  %v938_v47 = vld [vmem:[%s1149_s5 + $0x60] ss:$8 sps:$4 sm:$0xff] (!%p349_p8)   ;;  %v939_v48 = vld [vmem:[%s1149_s5 + $0x74] ss:$8 sps:$4 sm:$0xff] (!%p349_p8)  }
  0x2d   : > { %v941_v49 = vld [vmem:[%s1149_s5 + $0x70] ss:$8 sps:$4 sm:$0xff]   ;;  %v942_v50 = vld [vmem:[%s1149_s5 + $0x84] ss:$8 sps:$4 sm:$0xff]   ;;  %v944_v51 = vld [vmem:[%s1149_s5 + $0x80] ss:$8 sps:$4 sm:$0xff]  }
  0x2e   : > { %633 = vmatpush1.bf16.msra.mxu0 %v923_v37  ;;  %v945_v52 = vld [vmem:[%s1149_s5 + $0x94] ss:$8 sps:$4 sm:$0xff]   ;;  %v947_v53 = vld [vmem:[%s1149_s5 + $0x90] ss:$8 sps:$4 sm:$0xff]   ;;  %v948_v54 = vld [vmem:[%s1149_s5 + $0xa4] ss:$8 sps:$4 sm:$0xff]  }
  0x2f   : > { %634 = vmatprep.subr.bf16.mxu0 %v924_v38  ;;  %v950_v55 = vld [vmem:[%s1149_s5 + $0xa0] ss:$8 sps:$4 sm:$0xff]   ;;  %v951_v56 = vld [vmem:[%s1149_s5 + $0xb4] ss:$8 sps:$4 sm:$0xff]   ;;  %v953_v57 = vld [vmem:[%s1149_s5 + $0xb0] ss:$8 sps:$4 sm:$0xff]  }
  0x30   : > { %v954_v58 = vld [vmem:[%s1149_s5 + $0xc4] ss:$8 sps:$4 sm:$0xff]   ;;  %v956_v59 = vld [vmem:[%s1149_s5 + $0xc0] ss:$8 sps:$4 sm:$0xff]   ;;  %v957_v60 = vld [vmem:[%s1149_s5 + $0xd4] ss:$8 sps:$4 sm:$0xff]  }
  0x31   : > { %v959_v61 = vld [vmem:[%s1149_s5 + $0xd0] ss:$8 sps:$4 sm:$0xff]   ;;  %v960_v62 = vld [vmem:[%s1149_s5 + $0xe4] ss:$8 sps:$4 sm:$0xff]   ;;  %v962_v63 = vld [vmem:[%s1149_s5 + $0xe0] ss:$8 sps:$4 sm:$0xff]  }
  0x32   : > { %635 = vmatpush1.bf16.msra.mxu0 %v926_v39  ;;  %v963_v0 = vld [vmem:[%s1149_s5 + $0xf4] ss:$8 sps:$4 sm:$0xff]   ;;  %v965_v1 = vld [vmem:[%s1149_s5 + $0xf0] ss:$8 sps:$4 sm:$0xff]   ;;  %s1218_s6 = smov (!%p408_p9, %s836_s6), 5  ;;  %v684_v5 = vsub.s32 0, %v683_v4 }
  0x33   : > { %636 = vmatprep.subr.bf16.mxu0 %v927_v40  ;;  %s410_s9 = scalar_lea.vmem %s1209_s2, %s1218_s6  ;;  %v688_v7 = vsub.s32 1, %v683_v4  ;;  %s838_s10 = sshll.u32 %s1218_s6, 2 }
  0x34   : > { %v680_v6 = vld [vmem:[%s410_s9] sm:$0x3]  ;;  %s420_s14 = scalar_lea.vmem %s1210_s3, %s838_s10 }
  0x35   : > { %v685_v8 = vrot.slane %v680_v6, %v684_v5  ;;  %v689_v9 = vrot.slane %v680_v6, %v688_v7 }
  0x36   : > { %637 = vmatpush1.bf16.msra.mxu0 %v929_v41 }
  0x37   : > { %638 = vmatprep.subr.bf16.mxu0 %v930_v42 }
  0x3a   : > { %639 = vmatpush1.bf16.msra.mxu0 %v932_v43 }
  0x3b   : > { %640 = vmatprep.subr.bf16.mxu0 %v933_v44 }
  0x3e   : > { %641 = vmatpush1.bf16.msra.mxu0 %v935_v45 }
  0x3f   : > { %642 = vmatprep.subr.bf16.mxu0 %v936_v46 }
  0x42   : > { %643 = vmatpush1.bf16.msra.mxu0 %v938_v47 }
  0x43   : > { %644 = vmatprep.subr.bf16.mxu0 %v939_v48 }
  0x46   : > { %645 = vmatpush1.bf16.msra.mxu0 %v941_v49 }
  0x47   : > { %646 = vmatprep.subr.bf16.mxu0 %v942_v50 }
  0x4a   : > { %647 = vmatpush1.bf16.msra.mxu0 %v944_v51 }
  0x4b   : > { %648 = vmatprep.subr.bf16.mxu0 %v945_v52 }
  0x4e   : > { %649 = vmatpush1.bf16.msra.mxu0 %v947_v53 }
  0x4f   : > { %650 = vmatprep.subr.bf16.mxu0 %v948_v54 }
  0x52   : > { %651 = vmatpush1.bf16.msra.mxu0 %v950_v55 }
  0x53   : > { %652 = vmatprep.subr.bf16.mxu0 %v951_v56 }
  0x56   : > { %653 = vmatpush1.bf16.msra.mxu0 %v953_v57 }
  0x57   : > { %654 = vmatprep.subr.bf16.mxu0 %v954_v58 }
  0x5a   : > { %655 = vmatpush1.bf16.msra.mxu0 %v956_v59 }
  0x5b   : > { %656 = vmatprep.subr.bf16.mxu0 %v957_v60 }
  0x5e   : > { %657 = vmatpush1.bf16.msra.mxu0 %v959_v61 }
  0x5f   : > { %658 = vmatprep.subr.bf16.mxu0 %v960_v62 }
  0x62   : > { %659 = vmatpush1.bf16.msra.mxu0 %v962_v63 }
  0x63   : > { %660 = vmatprep.subr.bf16.mxu0 %v963_v0 }
  0x66   : > { %661 = vmatpush1.bf16.msra.mxu0 %v965_v1 }
  0x69   : > { %663 = vmatmul.mubr.bf16.vlgmr.msra.gmra.mrb[0].mxu0 %v839_v2 }
 0x13c   : > { %v664_v10 = vpop.f32.mrb[0].mxu0 }
 0x13d   : > { %v692_v11 = vadd.f32 %v685_v8, %v664_v10  ;;  %v666_v12 = vpop.f32.mrb[1].mxu0 }
 0x13e   : > { %v693_v13 = vadd.f32 %v689_v9, %v666_v12  ;;  %v668_v14 = vpop.f32.mrb[2].mxu0 }
 0x13f   : > { %v669_v15 = vpop.f32.mrb[3].mxu0 }
 0x140   : > { %v877_v16 = vpack.c.bf16 %v693_v13, %v692_v11 }
 0x142   : > { %702 = vst [vmem:[%s420_s14] sm:$0xff] %v877_v16 }
 0x143 PF: > { %s13_s16 = sadd.s32 1, %s1006_s16   ;;  %s1211_s12 = smov %s994_s13 }
 0x144   : > { %p10_p10 = scmp.ge.s32.totalorder %s13_s16, 5   ;;  %s1212_s13 = smov %s1063_s20 }
 0x145   : > { %s1213_s14 = smov %s1002_s15  ;;  %s1214_s15 = smov %s1216_s17 }
 0x146   :  { %12 = sbr.rel (!%p10_p10) target bundleno = 3 (0x3), region = 119 }

// kernel: crnn_forward.5
= control target key start
LH: loop header
LB: loop body
LE: loop exit
PB: predicated region body
PF: predicated region fallthrough
CT: control target
= control target key end

     0   :  { %s5435_s15 = smov 0   ;;  %s6128_s0 = inlined_call_operand.vmem [shape: bf16[2,18,8,3], index: 0, kind: input, shape index: {}]   ;;  %s6129_s1 = inlined_call_operand.vmem [shape: bf16[2,18,8,3], index: 1, kind: input, shape index: {}]   ;;  %s6130_s2 = inlined_call_operand.vmem [shape: bf16[3,3,32], index: 2, kind: input, shape index: {}]   ;;  %s6131_s3 = inlined_call_operand.vmem [shape: f32[1,32], index: 3, kind: input, shape index: {}]   ;;  %s6132_s4 = inlined_call_operand.vmem [shape: f32[2,8,8,32], index: 4, kind: output, shape index: {}]  }
   0x1 LB: > { %s4466_s16 = sadd.s32 4294967295, %s5405_s15   ;;  %p4470_p0 = scmp.ge.s32.totalorder %s5405_s15, 1  ;;  %s5405_s15 = sphi %s5435_s15, %s14_s15  }
   0x2   : > { %p172_p1 = scmp.lt.s32.totalorder %s5405_s15, 3 }
   0x4   : > { %p173_p2 = pnand %p4470_p0, %p172_p1 }
   0x5   : > { %v4475_v0 = vld [vmem:[%s6130_s2 + $0x2] sm:$0x3] (!%p173_p2)  ;;  %vm299_vm0 = vcmask (!%p173_p2), 1040384   ;;  %vm300_vm1 = vcmask (!%p173_p2), 1041408   ;;  %v5407_v1 = vmov (!%p173_p2), 0.0   ;;  %v5408_v2 = vmov (!%p173_p2), 65535  }
   0x6   : > { %176 = sbr.rel (%p173_p2) target bundleno = 619 (0x26b), region = 36  ;;  %4810 = vmatprep.subr.bf16.mxu0 (!%p173_p2), %v5407_v1  ;;  %4816 = vmatprep.subr.bf16.mxu1 (!%p173_p2), %v5407_v1  ;;  %v301_v3 = vsel (!%p173_p2), %vm299_vm0, 4294967295, %v5408_v2  ;;  %v219_v4 = vld [vmem:[%s6130_s2] sm:$0x3] (!%p173_p2)  ;;  %p203_p3 = scmp.lt.s32.totalorder (!%p173_p2), %s4466_s16, 1  ;;  %vm5409_vm2 = vmmov (!%p173_p2), 0  }
   0x7   : > { %v302_v5 = vsel (!%p173_p2), %vm300_vm1, %v301_v3, 0  ;;  %4812 = vmatprep.mubr.msk.bf16.mxu0 (!%p173_p2), %vm5409_vm2, %v5407_v1  ;;  %4818 = vmatprep.mubr.msk.bf16.mxu1 (!%p173_p2), %vm5409_vm2, %v5407_v1  ;;  %v4476_v8 = vld [vmem:[%s6130_s2 + $0x4] sm:$0x3] (!%p173_p2)  ;;  %vm295_vm3 = vcmask (!%p173_p2), 23552   ;;  %v5810_v51 = vld [vmem:[%s6131_s3] ss:$0 sm:$0xff] (!%p173_p2) }
   0x8   : > { %v5455_v6 = vand.u32 (!%p173_p2), %v4475_v0, %v302_v5  ;;  %v5457_v7 = vand.u32 (!%p173_p2), %v302_v5, %v219_v4  ;;  %v5468_v9 = vand.u32 (!%p173_p2), %v4476_v8, %v302_v5  ;;  %vm834_vm4 = vcmask (!%p173_p2), 261120  }
   0xa   : > { %4811 = vmatpush3.bf16.msra.mxu0 (!%p173_p2), %v5455_v6  ;;  %4817 = vmatpush3.bf16.msra.mxu1 (!%p173_p2), %v5457_v7 }
   0xb   : > { %4822 = vmatprep.subr.bf16.mxu0 (!%p173_p2), %v5407_v1  ;;  %4828 = vmatprep.subr.bf16.mxu1 (!%p173_p2), %v5407_v1 }
   0xd   : > { %s6134_s16 = smov (!%p203_p3, %s4466_s16), 1 }
   0xe   : > { %s5386_s23 = smul.u32 72, %s6134_s16  ;;  %s4617_s6 = sshll.u32 %s6134_s16, 6 }
   0xf   : > { %s5881_s9 = scalar_lea.vmem %s6132_s4, %s4617_s6 }
  0x10   : > { %s5474_s26 = scalar_lea.vmem %s6128_s0, %s5386_s23  ;;  %s5489_s29 = scalar_lea.vmem %s6129_s1, %s5386_s23 }
  0x11   : > { %v4477_v10 = vld [vmem:[%s5474_s26 + $0x4] sm:$0xf]  ;;  %v225_v11 = vld [vmem:[%s5474_s26] sm:$0xf]  ;;  %v4478_v12 = vld [vmem:[%s5474_s26 + $0x8] sm:$0xf] }
  0x12   : > { %4813 = vmatmul.mubr.msk.bf16.vlgmr.msra.gmra.mrb[0].mxu0 %vm295_vm3, %v4477_v10  ;;  %4819 = vmatmul.mubr.msk.bf16.vlgmr.msra.gmra.mrb[0].mxu1 %vm295_vm3, %v225_v11  ;;  %v4494_v13 = vld [vmem:[%s5489_s29 + $0x4] sm:$0xf]  ;;  %v260_v14 = vld [vmem:[%s5489_s29] sm:$0xf]  ;;  %v4495_v15 = vld [vmem:[%s5489_s29 + $0x8] sm:$0xf] }
  0x13   : > { %4823 = vmatpush3.bf16.msra.mxu0 %v5468_v9  ;;  %4829 = vmatpush3.bf16.msra.mxu1 %v5455_v6  ;;  %v4479_v16 = vld [vmem:[%s5474_s26 + $0xc] sm:$0xf]  ;;  %v4480_v18 = vld [vmem:[%s5474_s26 + $0x10] sm:$0xf]  ;;  %v4481_v20 = vld [vmem:[%s5474_s26 + $0x14] sm:$0xf] }
  0x14   : > { %4824 = vmatprep.mubr.msk.bf16.mxu0 %vm5409_vm2, %v5407_v1  ;;  %4830 = vmatprep.mubr.msk.bf16.mxu1 %vm5409_vm2, %v5407_v1  ;;  %v4496_v17 = vld [vmem:[%s5489_s29 + $0xc] sm:$0xf]  ;;  %v4497_v19 = vld [vmem:[%s5489_s29 + $0x10] sm:$0xf]  ;;  %v4498_v21 = vld [vmem:[%s5489_s29 + $0x14] sm:$0xf] }
  0x15   : > { %4834 = vmatprep.subr.bf16.mxu0 %v5407_v1  ;;  %4840 = vmatprep.subr.bf16.mxu1 %v5407_v1  ;;  %v4482_v22 = vld [vmem:[%s5474_s26 + $0x18] sm:$0xf]  ;;  %v4483_v24 = vld [vmem:[%s5474_s26 + $0x1c] sm:$0xf]  ;;  %v4484_v26 = vld [vmem:[%s5474_s26 + $0x20] sm:$0xf] }
  0x16   : > { %v4499_v23 = vld [vmem:[%s5489_s29 + $0x18] sm:$0xf]  ;;  %v4500_v25 = vld [vmem:[%s5489_s29 + $0x1c] sm:$0xf]  ;;  %v4501_v27 = vld [vmem:[%s5489_s29 + $0x20] sm:$0xf] }
  0x17   : > { %v4485_v28 = vld [vmem:[%s5474_s26 + $0x24] sm:$0xf]  ;;  %v5755_v30 = vld [vmem:[%s5474_s26 + $0x28] sm:$0xf]  ;;  %v5795_v48 = vld [vmem:[%s5474_s26 + $0x2c] sm:$0xf] }
  0x18   : > { %v5731_v29 = vld [vmem:[%s5489_s29 + $0x24] sm:$0xf]  ;;  %v5770_v31 = vld [vmem:[%s5489_s29 + $0x28] sm:$0xf]  ;;  %v5815_v59 = vld [vmem:[%s5489_s29 + $0x2c] sm:$0xf] }
  0x1a   : > { %4825 = vmatmul.mubr.msk.bf16.vlgmr.msra.gmra.mrb[4].mxu0 %vm295_vm3, %v4478_v12  ;;  %4831 = vmatmul.mubr.msk.bf16.vlgmr.msra.gmra.mrb[4].mxu1 %vm295_vm3, %v4494_v13 }
  0x1b   : > { %4835 = vmatpush3.bf16.msra.mxu0 %v5457_v7  ;;  %4841 = vmatpush3.bf16.msra.mxu1 %v5468_v9 }
  0x1c   : > { %4836 = vmatprep.mubr.msk.bf16.mxu0 %vm5409_vm2, %v5407_v1  ;;  %4842 = vmatprep.mubr.msk.bf16.mxu1 %vm5409_vm2, %v5407_v1 }
  0x1d   : > { %4846 = vmatprep.subr.bf16.mxu0 %v5407_v1  ;;  %4852 = vmatprep.subr.bf16.mxu1 %v5407_v1 }
  0x22   : > { %4837 = vmatmul.mubr.msk.bf16.vlgmr.msra.gmra.mrb[8].mxu0 %vm295_vm3, %v260_v14  ;;  %4843 = vmatmul.mubr.msk.bf16.vlgmr.msra.gmra.mrb[8].mxu1 %vm295_vm3, %v4495_v15 }
  0x23   : > { %4847 = vmatpush3.bf16.msra.mxu0 %v5455_v6  ;;  %4853 = vmatpush3.bf16.msra.mxu1 %v5457_v7 }
  0x24   : > { %4848 = vmatprep.mubr.msk.bf16.mxu0 %vm5409_vm2, %v5407_v1  ;;  %4854 = vmatprep.mubr.msk.bf16.mxu1 %vm5409_vm2, %v5407_v1 }
  0x25   : > { %4858 = vmatprep.subr.bf16.mxu0 %v5407_v1  ;;  %4864 = vmatprep.subr.bf16.mxu1 %v5407_v1 }
  0x2a   : > { %4849 = vmatmul.mubr.msk.bf16.vlgmr.msra.gmra.mrb[12].mxu0 %vm295_vm3, %v4478_v12  ;;  %4855 = vmatmul.mubr.msk.bf16.vlgmr.msra.gmra.mrb[12].mxu1 %vm295_vm3, %v4477_v10 }
  0x2b   : > { %4859 = vmatpush3.bf16.msra.mxu0 %v5468_v9  ;;  %4865 = vmatpush3.bf16.msra.mxu1 %v5455_v6 }
  0x2c   : > { %4860 = vmatprep.mubr.msk.bf16.mxu0 %vm5409_vm2, %v5407_v1  ;;  %4866 = vmatprep.mubr.msk.bf16.mxu1 %vm5409_vm2, %v5407_v1 }
  0x2d   : > { %4870 = vmatprep.subr.bf16.mxu0 %v5407_v1  ;;  %4876 = vmatprep.subr.bf16.mxu1 %v5407_v1 }
  0x32   : > { %4861 = vmatmul.mubr.msk.bf16.vlgmr.msra.gmra.mrb[16].mxu0 %vm295_vm3, %v4479_v16  ;;  %4867 = vmatmul.mubr.msk.bf16.vlgmr.msra.gmra.mrb[16].mxu1 %vm295_vm3, %v4495_v15 }
  0x33   : > { %4871 = vmatpush3.bf16.msra.mxu0 %v5457_v7  ;;  %4877 = vmatpush3.bf16.msra.mxu1 %v5468_v9 }
  0x34   : > { %4872 = vmatprep.mubr.msk.bf16.mxu0 %vm5409_vm2, %v5407_v1  ;;  %4878 = vmatprep.mubr.msk.bf16.mxu1 %vm5409_vm2, %v5407_v1 }
  0x35   : > { %4882 = vmatprep.subr.bf16.mxu0 %v5407_v1  ;;  %4888 = vmatprep.subr.bf16.mxu1 %v5407_v1 }
  0x3a   : > { %4873 = vmatmul.mubr.msk.bf16.vlgmr.msra.gmra.mrb[20].mxu0 %vm295_vm3, %v4494_v13  ;;  %4879 = vmatmul.mubr.msk.bf16.vlgmr.msra.gmra.mrb[20].mxu1 %vm295_vm3, %v4496_v17 }
  0x3b   : > { %4883 = vmatpush3.bf16.msra.mxu0 %v5455_v6  ;;  %4889 = vmatpush3.bf16.msra.mxu1 %v5457_v7 }
  0x3c   : > { %4884 = vmatprep.mubr.msk.bf16.mxu0 %vm5409_vm2, %v5407_v1  ;;  %4890 = vmatprep.mubr.msk.bf16.mxu1 %vm5409_vm2, %v5407_v1 }
  0x3d   : > { %4894 = vmatprep.subr.bf16.mxu0 %v5407_v1  ;;  %4900 = vmatprep.subr.bf16.mxu1 %v5407_v1 }
  0x42   : > { %4885 = vmatmul.mubr.msk.bf16.vlgmr.msra.gmra.mrb[24].mxu0 %vm295_vm3, %v4479_v16  ;;  %4891 = vmatmul.mubr.msk.bf16.vlgmr.msra.gmra.mrb[24].mxu1 %vm295_vm3, %v4478_v12 }
  0x43   : > { %4895 = vmatpush3.bf16.msra.mxu0 %v5468_v9  ;;  %4901 = vmatpush3.bf16.msra.mxu1 %v5455_v6 }
  0x44   : > { %4896 = vmatprep.mubr.msk.bf16.mxu0 %vm5409_vm2, %v5407_v1  ;;  %4902 = vmatprep.mubr.msk.bf16.mxu1 %vm5409_vm2, %v5407_v1 }
  0x45   : > { %4906 = vmatprep.subr.bf16.mxu0 %v5407_v1  ;;  %4912 = vmatprep.subr.bf16.mxu1 %v5407_v1 }
  0x4a   : > { %4897 = vmatmul.mubr.msk.bf16.vlgmr.msra.gmra.mrb[28].mxu0 %vm295_vm3, %v4480_v18  ;;  %4903 = vmatmul.mubr.msk.bf16.vlgmr.msra.gmra.mrb[28].mxu1 %vm295_vm3, %v4496_v17 }
  0x4b   : > { %4907 = vmatpush3.bf16.msra.mxu0 %v5457_v7  ;;  %4913 = vmatpush3.bf16.msra.mxu1 %v5468_v9 }
  0x4c   : > { %4908 = vmatprep.mubr.msk.bf16.mxu0 %vm5409_vm2, %v5407_v1  ;;  %4914 = vmatprep.mubr.msk.bf16.mxu1 %vm5409_vm2, %v5407_v1 }
  0x4d   : > { %4918 = vmatprep.subr.bf16.mxu0 %v5407_v1  ;;  %4924 = vmatprep.subr.bf16.mxu1 %v5407_v1 }
  0x52   : > { %4909 = vmatmul.mubr.msk.bf16.vlgmr.msra.gmra.mrb[32].mxu0 %vm295_vm3, %v4495_v15  ;;  %4915 = vmatmul.mubr.msk.bf16.vlgmr.msra.gmra.mrb[32].mxu1 %vm295_vm3, %v4497_v19 }
  0x53   : > { %4919 = vmatpush3.bf16.msra.mxu0 %v5455_v6  ;;  %4925 = vmatpush3.bf16.msra.mxu1 %v5457_v7 }
  0x54   : > { %4920 = vmatprep.mubr.msk.bf16.mxu0 %vm5409_vm2, %v5407_v1  ;;  %4926 = vmatprep.mubr.msk.bf16.mxu1 %vm5409_vm2, %v5407_v1 }
  0x55   : > { %4930 = vmatprep.subr.bf16.mxu0 %v5407_v1  ;;  %4936 = vmatprep.subr.bf16.mxu1 %v5407_v1 }
  0x5a   : > { %4921 = vmatmul.mubr.msk.bf16.vlgmr.msra.gmra.mrb[36].mxu0 %vm295_vm3, %v4480_v18  ;;  %4927 = vmatmul.mubr.msk.bf16.vlgmr.msra.gmra.mrb[36].mxu1 %vm295_vm3, %v4479_v16 }
  0x5b   : > { %4931 = vmatpush3.bf16.msra.mxu0 %v5468_v9  ;;  %4937 = vmatpush3.bf16.msra.mxu1 %v5455_v6 }
  0x5c   : > { %4932 = vmatprep.mubr.msk.bf16.mxu0 %vm5409_vm2, %v5407_v1  ;;  %4938 = vmatprep.mubr.msk.bf16.mxu1 %vm5409_vm2, %v5407_v1 }
  0x5d   : > { %4942 = vmatprep.subr.bf16.mxu0 %v5407_v1  ;;  %4948 = vmatprep.subr.bf16.mxu1 %v5407_v1 }
  0x62   : > { %4933 = vmatmul.mubr.msk.bf16.vlgmr.msra.gmra.mrb[40].mxu0 %vm295_vm3, %v4481_v20  ;;  %4939 = vmatmul.mubr.msk.bf16.vlgmr.msra.gmra.mrb[40].mxu1 %vm295_vm3, %v4497_v19 }
  0x63   : > { %4943 = vmatpush3.bf16.msra.mxu0 %v5457_v7  ;;  %4949 = vmatpush3.bf16.msra.mxu1 %v5468_v9 }
  0x64   : > { %4944 = vmatprep.mubr.msk.bf16.mxu0 %vm5409_vm2, %v5407_v1  ;;  %4950 = vmatprep.mubr.msk.bf16.mxu1 %vm5409_vm2, %v5407_v1 }
  0x65   : > { %4954 = vmatprep.subr.bf16.mxu0 %v5407_v1  ;;  %4960 = vmatprep.subr.bf16.mxu1 %v5407_v1 }
  0x6a   : > { %4945 = vmatmul.mubr.msk.bf16.vlgmr.msra.gmra.mrb[44].mxu0 %vm295_vm3, %v4496_v17  ;;  %4951 = vmatmul.mubr.msk.bf16.vlgmr.msra.gmra.mrb[44].mxu1 %vm295_vm3, %v4498_v21 }
  0x6b   : > { %4955 = vmatpush3.bf16.msra.mxu0 %v5455_v6  ;;  %4961 = vmatpush3.bf16.msra.mxu1 %v5457_v7 }
  0x6c   : > { %4956 = vmatprep.mubr.msk.bf16.mxu0 %vm5409_vm2, %v5407_v1  ;;  %4962 = vmatprep.mubr.msk.bf16.mxu1 %vm5409_vm2, %v5407_v1 }
  0x6d   : > { %4966 = vmatprep.subr.bf16.mxu0 %v5407_v1  ;;  %4972 = vmatprep.subr.bf16.mxu1 %v5407_v1 }
  0x72   : > { %4957 = vmatmul.mubr.msk.bf16.vlgmr.msra.gmra.mrb[48].mxu0 %vm295_vm3, %v4481_v20  ;;  %4963 = vmatmul.mubr.msk.bf16.vlgmr.msra.gmra.mrb[48].mxu1 %vm295_vm3, %v4480_v18 }
  0x73   : > { %4967 = vmatpush3.bf16.msra.mxu0 %v5468_v9  ;;  %4973 = vmatpush3.bf16.msra.mxu1 %v5455_v6 }
  0x74   : > { %4968 = vmatprep.mubr.msk.bf16.mxu0 %vm5409_vm2, %v5407_v1  ;;  %4974 = vmatprep.mubr.msk.bf16.mxu1 %vm5409_vm2, %v5407_v1 }
  0x75   : > { %4978 = vmatprep.subr.bf16.mxu0 %v5407_v1  ;;  %4984 = vmatprep.subr.bf16.mxu1 %v5407_v1 }
  0x7a   : > { %4969 = vmatmul.mubr.msk.bf16.vlgmr.msra.gmra.mrb[52].mxu0 %vm295_vm3, %v4482_v22  ;;  %4975 = vmatmul.mubr.msk.bf16.vlgmr.msra.gmra.mrb[52].mxu1 %vm295_vm3, %v4498_v21 }
  0x7b   : > { %4979 = vmatpush3.bf16.msra.mxu0 %v5457_v7  ;;  %4985 = vmatpush3.bf16.msra.mxu1 %v5468_v9 }
  0x7c   : > { %4980 = vmatprep.mubr.msk.bf16.mxu0 %vm5409_vm2, %v5407_v1  ;;  %4986 = vmatprep.mubr.msk.bf16.mxu1 %vm5409_vm2, %v5407_v1 }
  0x7d   : > { %4990 = vmatprep.subr.bf16.mxu0 %v5407_v1  ;;  %4996 = vmatprep.subr.bf16.mxu1 %v5407_v1 }
  0x82   : > { %4981 = vmatmul.mubr.msk.bf16.vlgmr.msra.gmra.mrb[56].mxu0 %vm295_vm3, %v4497_v19  ;;  %4987 = vmatmul.mubr.msk.bf16.vlgmr.msra.gmra.mrb[56].mxu1 %vm295_vm3, %v4499_v23 }
  0x83   : > { %4991 = vmatpush3.bf16.msra.mxu0 %v5455_v6  ;;  %4997 = vmatpush3.bf16.msra.mxu1 %v5457_v7 }
  0x84   : > { %4992 = vmatprep.mubr.msk.bf16.mxu0 %vm5409_vm2, %v5407_v1  ;;  %4998 = vmatprep.mubr.msk.bf16.mxu1 %vm5409_vm2, %v5407_v1 }
  0x85   : > { %5002 = vmatprep.subr.bf16.mxu0 %v5407_v1  ;;  %5008 = vmatprep.subr.bf16.mxu1 %v5407_v1 }
  0x8a   : > { %4993 = vmatmul.mubr.msk.bf16.vlgmr.msra.gmra.mrb[60].mxu0 %vm295_vm3, %v4482_v22  ;;  %4999 = vmatmul.mubr.msk.bf16.vlgmr.msra.gmra.mrb[60].mxu1 %vm295_vm3, %v4481_v20 }
  0x8b   : > { %5003 = vmatpush3.bf16.msra.mxu0 %v5468_v9  ;;  %5009 = vmatpush3.bf16.msra.mxu1 %v5455_v6 }
  0x8c   : > { %5004 = vmatprep.mubr.msk.bf16.mxu0 %vm5409_vm2, %v5407_v1  ;;  %5010 = vmatprep.mubr.msk.bf16.mxu1 %vm5409_vm2, %v5407_v1 }
  0x8d   : > { %5014 = vmatprep.subr.bf16.mxu0 %v5407_v1  ;;  %5020 = vmatprep.subr.bf16.mxu1 %v5407_v1 }
  0x92   : > { %5005 = vmatmul.mubr.msk.bf16.vlgmr.msra.gmra.mrb[64].mxu0 %vm295_vm3, %v4483_v24  ;;  %5011 = vmatmul.mubr.msk.bf16.vlgmr.msra.gmra.mrb[64].mxu1 %vm295_vm3, %v4499_v23 }
  0x93   : > { %5015 = vmatpush3.bf16.msra.mxu0 %v5457_v7  ;;  %5021 = vmatpush3.bf16.msra.mxu1 %v5468_v9 }
  0x94   : > { %5016 = vmatprep.mubr.msk.bf16.mxu0 %vm5409_vm2, %v5407_v1  ;;  %5022 = vmatprep.mubr.msk.bf16.mxu1 %vm5409_vm2, %v5407_v1 }
  0x95   : > { %5026 = vmatprep.subr.bf16.mxu0 %v5407_v1  ;;  %5032 = vmatprep.subr.bf16.mxu1 %v5407_v1 }
  0x9a   : > { %5017 = vmatmul.mubr.msk.bf16.vlgmr.msra.gmra.mrb[68].mxu0 %vm295_vm3, %v4498_v21  ;;  %5023 = vmatmul.mubr.msk.bf16.vlgmr.msra.gmra.mrb[68].mxu1 %vm295_vm3, %v4500_v25 }
  0x9b   : > { %5027 = vmatpush3.bf16.msra.mxu0 %v5455_v6  ;;  %5033 = vmatpush3.bf16.msra.mxu1 %v5457_v7 }
  0x9c   : > { %5028 = vmatprep.mubr.msk.bf16.mxu0 %vm5409_vm2, %v5407_v1  ;;  %5034 = vmatprep.mubr.msk.bf16.mxu1 %vm5409_vm2, %v5407_v1 }
  0x9d   : > { %5038 = vmatprep.subr.bf16.mxu0 %v5407_v1  ;;  %5044 = vmatprep.subr.bf16.mxu1 %v5407_v1 }
  0xa2   : > { %5029 = vmatmul.mubr.msk.bf16.vlgmr.msra.gmra.mrb[72].mxu0 %vm295_vm3, %v4483_v24  ;;  %5035 = vmatmul.mubr.msk.bf16.vlgmr.msra.gmra.mrb[72].mxu1 %vm295_vm3, %v4482_v22 }
  0xa3   : > { %5039 = vmatpush3.bf16.msra.mxu0 %v5468_v9  ;;  %5045 = vmatpush3.bf16.msra.mxu1 %v5455_v6 }
  0xa4   : > { %5040 = vmatprep.mubr.msk.bf16.mxu0 %vm5409_vm2, %v5407_v1  ;;  %5046 = vmatprep.mubr.msk.bf16.mxu1 %vm5409_vm2, %v5407_v1 }
  0xa5   : > { %5050 = vmatprep.subr.bf16.mxu0 %v5407_v1  ;;  %5056 = vmatprep.subr.bf16.mxu1 %v5407_v1 }
  0xaa   : > { %5041 = vmatmul.mubr.msk.bf16.vlgmr.msra.gmra.mrb[76].mxu0 %vm295_vm3, %v4484_v26  ;;  %5047 = vmatmul.mubr.msk.bf16.vlgmr.msra.gmra.mrb[76].mxu1 %vm295_vm3, %v4500_v25 }
  0xab   : > { %5051 = vmatpush3.bf16.msra.mxu0 %v5457_v7  ;;  %5057 = vmatpush3.bf16.msra.mxu1 %v5468_v9 }
  0xac   : > { %5052 = vmatprep.mubr.msk.bf16.mxu0 %vm5409_vm2, %v5407_v1  ;;  %5058 = vmatprep.mubr.msk.bf16.mxu1 %vm5409_vm2, %v5407_v1 }
  0xad   : > { %5062 = vmatprep.subr.bf16.mxu0 %v5407_v1  ;;  %5068 = vmatprep.subr.bf16.mxu1 %v5407_v1 }
  0xb2   : > { %5053 = vmatmul.mubr.msk.bf16.vlgmr.msra.gmra.mrb[80].mxu0 %vm295_vm3, %v4499_v23  ;;  %5059 = vmatmul.mubr.msk.bf16.vlgmr.msra.gmra.mrb[80].mxu1 %vm295_vm3, %v4501_v27 }
  0xb3   : > { %5063 = vmatpush3.bf16.msra.mxu0 %v5455_v6  ;;  %5069 = vmatpush3.bf16.msra.mxu1 %v5457_v7 }
  0xb4   : > { %5064 = vmatprep.mubr.msk.bf16.mxu0 %vm5409_vm2, %v5407_v1  ;;  %5070 = vmatprep.mubr.msk.bf16.mxu1 %vm5409_vm2, %v5407_v1 }
  0xb5   : > { %5074 = vmatprep.subr.bf16.mxu0 %v5407_v1  ;;  %5080 = vmatprep.subr.bf16.mxu1 %v5407_v1 }
  0xba   : > { %5065 = vmatmul.mubr.msk.bf16.vlgmr.msra.gmra.mrb[84].mxu0 %vm295_vm3, %v4484_v26  ;;  %5071 = vmatmul.mubr.msk.bf16.vlgmr.msra.gmra.mrb[84].mxu1 %vm295_vm3, %v4483_v24  ;;  %v5846_v24 = vld [vmem:[%s5474_s26 + $0x30] sm:$0xf] }
  0xbb   : > { %5075 = vmatpush3.bf16.msra.mxu0 %v5468_v9  ;;  %5081 = vmatpush3.bf16.msra.mxu1 %v5455_v6 }
  0xbc   : > { %5076 = vmatprep.mubr.msk.bf16.mxu0 %vm5409_vm2, %v5407_v1  ;;  %5082 = vmatprep.mubr.msk.bf16.mxu1 %vm5409_vm2, %v5407_v1 }
  0xbd   : > { %5086 = vmatprep.subr.bf16.mxu0 %v5407_v1  ;;  %5092 = vmatprep.subr.bf16.mxu1 %v5407_v1 }
  0xc2   : > { %5077 = vmatmul.mubr.msk.bf16.vlgmr.msra.gmra.mrb[88].mxu0 %vm295_vm3, %v4485_v28  ;;  %5083 = vmatmul.mubr.msk.bf16.vlgmr.msra.gmra.mrb[88].mxu1 %vm295_vm3, %v4501_v27 }
  0xc3   : > { %5087 = vmatpush3.bf16.msra.mxu0 %v5457_v7  ;;  %5093 = vmatpush3.bf16.msra.mxu1 %v5468_v9 }
  0xc4   : > { %5088 = vmatprep.mubr.msk.bf16.mxu0 %vm5409_vm2, %v5407_v1  ;;  %5094 = vmatprep.mubr.msk.bf16.mxu1 %vm5409_vm2, %v5407_v1 }
  0xc5   : > { %5098 = vmatprep.subr.bf16.mxu0 %v5407_v1  ;;  %5104 = vmatprep.subr.bf16.mxu1 %v5407_v1 }
  0xca   : > { %5089 = vmatmul.mubr.msk.bf16.vlgmr.msra.gmra.mrb[92].mxu0 %vm295_vm3, %v4500_v25  ;;  %5095 = vmatmul.mubr.msk.bf16.vlgmr.msra.gmra.mrb[92].mxu1 %vm295_vm3, %v5731_v29 }
  0xcb   : > { %5099 = vmatpush3.bf16.msra.mxu0 %v5455_v6  ;;  %5105 = vmatpush3.bf16.msra.mxu1 %v5457_v7 }
  0xcc   : > { %5100 = vmatprep.mubr.msk.bf16.mxu0 %vm5409_vm2, %v5407_v1  ;;  %5106 = vmatprep.mubr.msk.bf16.mxu1 %vm5409_vm2, %v5407_v1 }
  0xcd   : > { %5110 = vmatprep.subr.bf16.mxu0 %v5407_v1  ;;  %5116 = vmatprep.subr.bf16.mxu1 %v5407_v1 }
  0xd2   : > { %5101 = vmatmul.mubr.msk.bf16.vlgmr.msra.gmra.mrb[96].mxu0 %vm295_vm3, %v4485_v28  ;;  %5107 = vmatmul.mubr.msk.bf16.vlgmr.msra.gmra.mrb[96].mxu1 %vm295_vm3, %v4484_v26 }
  0xd3   : > { %5111 = vmatpush3.bf16.msra.mxu0 %v5468_v9  ;;  %5117 = vmatpush3.bf16.msra.mxu1 %v5455_v6 }
  0xd4   : > { %5112 = vmatprep.mubr.msk.bf16.mxu0 %vm5409_vm2, %v5407_v1  ;;  %5118 = vmatprep.mubr.msk.bf16.mxu1 %vm5409_vm2, %v5407_v1 }
  0xd5   : > { %5122 = vmatprep.subr.bf16.mxu0 %v5407_v1  ;;  %5128 = vmatprep.subr.bf16.mxu1 %v5407_v1 }
  0xda   : > { %5113 = vmatmul.mubr.msk.bf16.vlgmr.msra.gmra.mrb[100].mxu0 %vm295_vm3, %v5755_v30  ;;  %5119 = vmatmul.mubr.msk.bf16.vlgmr.msra.gmra.mrb[100].mxu1 %vm295_vm3, %v5731_v29 }
  0xdb   : > { %5123 = vmatpush3.bf16.msra.mxu0 %v5457_v7  ;;  %5129 = vmatpush3.bf16.msra.mxu1 %v5468_v9 }
  0xdc   : > { %5124 = vmatprep.mubr.msk.bf16.mxu0 %vm5409_vm2, %v5407_v1  ;;  %5130 = vmatprep.mubr.msk.bf16.mxu1 %vm5409_vm2, %v5407_v1 }
  0xdd   : > { %5134 = vmatprep.subr.bf16.mxu0 %v5407_v1  ;;  %5140 = vmatprep.subr.bf16.mxu1 %v5407_v1 }
  0xe2   : > { %5125 = vmatmul.mubr.msk.bf16.vlgmr.msra.gmra.mrb[104].mxu0 %vm295_vm3, %v4501_v27  ;;  %5131 = vmatmul.mubr.msk.bf16.vlgmr.msra.gmra.mrb[104].mxu1 %vm295_vm3, %v5770_v31 }
  0xe3   : > { %5135 = vmatpush3.bf16.msra.mxu0 %v5455_v6  ;;  %5141 = vmatpush3.bf16.msra.mxu1 %v5457_v7 }
  0xe4   : > { %5136 = vmatprep.mubr.msk.bf16.mxu0 %vm5409_vm2, %v5407_v1  ;;  %5142 = vmatprep.mubr.msk.bf16.mxu1 %vm5409_vm2, %v5407_v1 }
  0xe5   : > { %v340_v32 = vpop.f32.mrb[0].mxu0  ;;  %v386_v33 = vpop.f32.mrb[0].mxu1  ;;  %5146 = vmatprep.subr.bf16.mxu0 %v5407_v1  ;;  %5152 = vmatprep.subr.bf16.mxu1 %v5407_v1 }
  0xe6   : > { %v387_v34 = vadd.f32 %v386_v33, %v340_v32  ;;  %v4814_v35 = vpop.f32.mrb[1].mxu0  ;;  %v4820_v36 = vpop.f32.mrb[1].mxu1 }
  0xe7   : > { %v343_v37 = vpop.f32.mrb[2].mxu0  ;;  %v389_v38 = vpop.f32.mrb[2].mxu1  ;;  %v5861_v35 = vld [vmem:[%s5489_s29 + $0x30] sm:$0xf] }
  0xe8   : > { %v4815_v39 = vpop.f32.mrb[3].mxu0  ;;  %v4821_v40 = vpop.f32.mrb[3].mxu1 }
  0xea   : > { %5137 = vmatmul.mubr.msk.bf16.vlgmr.msra.gmra.mrb[108].mxu0 %vm295_vm3, %v5755_v30  ;;  %5143 = vmatmul.mubr.msk.bf16.vlgmr.msra.gmra.mrb[108].mxu1 %vm295_vm3, %v4485_v28 }
  0xeb   : > { %5147 = vmatpush3.bf16.msra.mxu0 %v5468_v9  ;;  %5153 = vmatpush3.bf16.msra.mxu1 %v5455_v6 }
  0xec   : > { %5148 = vmatprep.mubr.msk.bf16.mxu0 %vm5409_vm2, %v5407_v1  ;;  %5154 = vmatprep.mubr.msk.bf16.mxu1 %vm5409_vm2, %v5407_v1 }
  0xed   : > { %v432_v41 = vpop.f32.mrb[4].mxu0  ;;  %v484_v42 = vpop.f32.mrb[4].mxu1  ;;  %5158 = vmatprep.subr.bf16.mxu0 %v5407_v1  ;;  %5164 = vmatprep.subr.bf16.mxu1 %v5407_v1 }
  0xee   : > { %v438_v43 = vadd.f32 %v432_v41, %v387_v34  ;;  %v4826_v44 = vpop.f32.mrb[5].mxu0  ;;  %v4832_v45 = vpop.f32.mrb[5].mxu1 }
  0xef   : > { %v435_v46 = vpop.f32.mrb[6].mxu0  ;;  %v487_v47 = vpop.f32.mrb[6].mxu1 }
  0xf0   : > { %v4827_v49 = vpop.f32.mrb[7].mxu0  ;;  %v4833_v50 = vpop.f32.mrb[7].mxu1  ;;  %v445_v60 = vadd.f32 %v5810_v51, %v438_v43 }
  0xf2   : > { %5149 = vmatmul.mubr.msk.bf16.vlgmr.msra.gmra.mrb[112].mxu0 %vm295_vm3, %v5795_v48  ;;  %5155 = vmatmul.mubr.msk.bf16.vlgmr.msra.gmra.mrb[112].mxu1 %vm295_vm3, %v5770_v31  ;;  %v446_v2 = vmax.f32 %v445_v60, 0.0 }
  0xf3   : > { %5159 = vmatpush3.bf16.msra.mxu0 %v5457_v7  ;;  %5165 = vmatpush3.bf16.msra.mxu1 %v5468_v9 }
  0xf4   : > { %5160 = vmatprep.mubr.msk.bf16.mxu0 %vm5409_vm2, %v5407_v1  ;;  %5166 = vmatprep.mubr.msk.bf16.mxu1 %vm5409_vm2, %v5407_v1 }
  0xf5   : > { %v527_v52 = vpop.f32.mrb[8].mxu0  ;;  %v570_v53 = vpop.f32.mrb[8].mxu1  ;;  %5170 = vmatprep.subr.bf16.mxu0 %v5407_v1  ;;  %5176 = vmatprep.subr.bf16.mxu1 %v5407_v1 }
  0xf6   : > { %v528_v54 = vadd.f32 %v527_v52, %v484_v42  ;;  %v4838_v55 = vpop.f32.mrb[9].mxu0  ;;  %v4844_v56 = vpop.f32.mrb[9].mxu1 }
  0xf7   : > { %v530_v57 = vpop.f32.mrb[10].mxu0  ;;  %v573_v58 = vpop.f32.mrb[10].mxu1 }
  0xf8   : > { %v576_v61 = vadd.f32 %v570_v53, %v528_v54  ;;  %v4839_v62 = vpop.f32.mrb[11].mxu0  ;;  %v4845_v63 = vpop.f32.mrb[11].mxu1 }
  0xf9   : > { %v5899_v62 = vld [vmem:[%s5474_s26 + $0x34] sm:$0xf] }
  0xfa   : > { %v577_v0 = vadd.f32 %v5810_v51, %v576_v61  ;;  %5161 = vmatmul.mubr.msk.bf16.vlgmr.msra.gmra.mrb[116].mxu0 %vm295_vm3, %v5731_v29  ;;  %5167 = vmatmul.mubr.msk.bf16.vlgmr.msra.gmra.mrb[116].mxu1 %vm295_vm3, %v5815_v59 }
  0xfb   : > { %5171 = vmatpush3.bf16.msra.mxu0 %v5455_v6  ;;  %5177 = vmatpush3.bf16.msra.mxu1 %v5457_v7 }
  0xfc   : > { %v578_v3 = vmax.f32 %v577_v0, 0.0  ;;  %5172 = vmatprep.mubr.msk.bf16.mxu0 %vm5409_vm2, %v5407_v1  ;;  %5178 = vmatprep.mubr.msk.bf16.mxu1 %vm5409_vm2, %v5407_v1 }
  0xfd   : > { %v613_v4 = vpop.f32.mrb[12].mxu0  ;;  %v653_v5 = vpop.f32.mrb[12].mxu1  ;;  %5182 = vmatprep.subr.bf16.mxu0 %v5407_v1  ;;  %5188 = vmatprep.subr.bf16.mxu1 %v5407_v1 }
  0xfe   : > { %v5831_v8 = vmax.f32 %v446_v2, %v578_v3  ;;  %v654_v10 = vadd.f32 %v653_v5, %v613_v4  ;;  %v4850_v11 = vpop.f32.mrb[13].mxu0  ;;  %v4856_v12 = vpop.f32.mrb[13].mxu1 }
  0xff   : > { %v616_v13 = vpop.f32.mrb[14].mxu0  ;;  %v656_v14 = vpop.f32.mrb[14].mxu1  ;;  %v5914_v12 = vld [vmem:[%s5489_s29 + $0x34] sm:$0xf] }
 0x100   : > { %v4851_v15 = vpop.f32.mrb[15].mxu0  ;;  %v4857_v16 = vpop.f32.mrb[15].mxu1 }
 0x102   : > { %5173 = vmatmul.mubr.msk.bf16.vlgmr.msra.gmra.mrb[120].mxu0 %vm295_vm3, %v5795_v48  ;;  %5179 = vmatmul.mubr.msk.bf16.vlgmr.msra.gmra.mrb[120].mxu1 %vm295_vm3, %v5755_v30 }
 0x103   : > { %5183 = vmatpush3.bf16.msra.mxu0 %v5468_v9  ;;  %5189 = vmatpush3.bf16.msra.mxu1 %v5455_v6 }
 0x104   : > { %5184 = vmatprep.mubr.msk.bf16.mxu0 %vm5409_vm2, %v5407_v1  ;;  %5190 = vmatprep.mubr.msk.bf16.mxu1 %vm5409_vm2, %v5407_v1 }
 0x105   : > { %v696_v17 = vpop.f32.mrb[16].mxu0  ;;  %v739_v18 = vpop.f32.mrb[16].mxu1  ;;  %5194 = vmatprep.subr.bf16.mxu0 %v5407_v1  ;;  %5200 = vmatprep.subr.bf16.mxu1 %v5407_v1 }
 0x106   : > { %v702_v19 = vadd.f32 %v696_v17, %v654_v10  ;;  %v4862_v20 = vpop.f32.mrb[17].mxu0  ;;  %v4868_v21 = vpop.f32.mrb[17].mxu1 }
 0x107   : > { %v699_v22 = vpop.f32.mrb[18].mxu0  ;;  %v742_v23 = vpop.f32.mrb[18].mxu1 }
 0x108   : > { %v4863_v25 = vpop.f32.mrb[19].mxu0  ;;  %v4869_v26 = vpop.f32.mrb[19].mxu1  ;;  %v703_v36 = vadd.f32 %v5810_v51, %v702_v19 }
 0x10a   : > { %5185 = vmatmul.mubr.msk.bf16.vlgmr.msra.gmra.mrb[124].mxu0 %vm295_vm3, %v5846_v24  ;;  %5191 = vmatmul.mubr.msk.bf16.vlgmr.msra.gmra.mrb[124].mxu1 %vm295_vm3, %v5815_v59  ;;  %v704_v41 = vmax.f32 %v703_v36, 0.0 }
 0x10b   : > { %5195 = vmatpush3.bf16.msra.mxu0 %v5457_v7  ;;  %5201 = vmatpush3.bf16.msra.mxu1 %v5468_v9 }
 0x10c   : > { %5196 = vmatprep.mubr.msk.bf16.mxu0 %vm5409_vm2, %v5407_v1  ;;  %5202 = vmatprep.mubr.msk.bf16.mxu1 %vm5409_vm2, %v5407_v1 }
 0x10d   : > { %v779_v27 = vpop.f32.mrb[20].mxu0  ;;  %v822_v28 = vpop.f32.mrb[20].mxu1  ;;  %5206 = vmatprep.subr.bf16.mxu0 %v5407_v1  ;;  %5212 = vmatprep.subr.bf16.mxu1 %v5407_v1 }
 0x10e   : > { %v780_v29 = vadd.f32 %v779_v27, %v739_v18  ;;  %v4874_v30 = vpop.f32.mrb[21].mxu0  ;;  %v4880_v32 = vpop.f32.mrb[21].mxu1 }
 0x10f   : > { %v782_v33 = vpop.f32.mrb[22].mxu0  ;;  %v825_v34 = vpop.f32.mrb[22].mxu1 }
 0x110   : > { %v828_v37 = vadd.f32 %v822_v28, %v780_v29  ;;  %v4875_v38 = vpop.f32.mrb[23].mxu0  ;;  %v4881_v39 = vpop.f32.mrb[23].mxu1 }
 0x111   : > { %v5945_v38 = vld [vmem:[%s5474_s26 + $0x38] sm:$0xf] }
 0x112   : > { %v829_v40 = vadd.f32 %v5810_v51, %v828_v37  ;;  %5197 = vmatmul.mubr.msk.bf16.vlgmr.msra.gmra.mrb[128].mxu0 %vm295_vm3, %v5770_v31  ;;  %5203 = vmatmul.mubr.msk.bf16.vlgmr.msra.gmra.mrb[128].mxu1 %vm295_vm3, %v5861_v35 }
 0x113   : > { %5207 = vmatpush3.bf16.msra.mxu0 %v5455_v6  ;;  %5213 = vmatpush3.bf16.msra.mxu1 %v5457_v7 }
 0x114   : > { %v830_v42 = vmax.f32 %v829_v40, 0.0  ;;  %5208 = vmatprep.mubr.msk.bf16.mxu0 %vm5409_vm2, %v5407_v1  ;;  %5214 = vmatprep.mubr.msk.bf16.mxu1 %vm5409_vm2, %v5407_v1 }
 0x115   : > { %v870_v43 = vpop.f32.mrb[24].mxu0  ;;  %v910_v44 = vpop.f32.mrb[24].mxu1  ;;  %5218 = vmatprep.subr.bf16.mxu0 %v5407_v1  ;;  %5224 = vmatprep.subr.bf16.mxu1 %v5407_v1 }
 0x116   : > { %v832_v31 = vmax.f32 %v704_v41, %v830_v42  ;;  %v911_v45 = vadd.f32 %v910_v44, %v870_v43  ;;  %v4886_v46 = vpop.f32.mrb[25].mxu0  ;;  %v4892_v47 = vpop.f32.mrb[25].mxu1 }
 0x117   : > { %v873_v49 = vpop.f32.mrb[26].mxu0  ;;  %v913_v50 = vpop.f32.mrb[26].mxu1  ;;  %v5960_v47 = vld [vmem:[%s5489_s29 + $0x38] sm:$0xf] }
 0x118   : > { %v833_v52 = vmax.f32 %v5831_v8, %v832_v31  ;;  %v4887_v53 = vpop.f32.mrb[27].mxu0  ;;  %v4893_v54 = vpop.f32.mrb[27].mxu1 }
 0x11a   : > { %835 = vst.msk [vmem:[%s5881_s9] sm:$0xff] %vm834_vm4, %v833_v52  ;;  %5209 = vmatmul.mubr.msk.bf16.vlgmr.msra.gmra.mrb[132].mxu0 %vm295_vm3, %v5846_v24  ;;  %5215 = vmatmul.mubr.msk.bf16.vlgmr.msra.gmra.mrb[132].mxu1 %vm295_vm3, %v5795_v48 }
 0x11b   : > { %5219 = vmatpush3.bf16.msra.mxu0 %v5468_v9  ;;  %5225 = vmatpush3.bf16.msra.mxu1 %v5455_v6 }
 0x11c   : > { %5220 = vmatprep.mubr.msk.bf16.mxu0 %vm5409_vm2, %v5407_v1  ;;  %5226 = vmatprep.mubr.msk.bf16.mxu1 %vm5409_vm2, %v5407_v1 }
 0x11d   : > { %v953_v55 = vpop.f32.mrb[28].mxu0  ;;  %v996_v56 = vpop.f32.mrb[28].mxu1  ;;  %5230 = vmatprep.subr.bf16.mxu0 %v5407_v1  ;;  %5236 = vmatprep.subr.bf16.mxu1 %v5407_v1 }
 0x11e   : > { %v959_v57 = vadd.f32 %v953_v55, %v911_v45  ;;  %v4898_v58 = vpop.f32.mrb[29].mxu0  ;;  %v4904_v60 = vpop.f32.mrb[29].mxu1 }
 0x11f   : > { %v956_v48 = vpop.f32.mrb[30].mxu0  ;;  %v999_v61 = vpop.f32.mrb[30].mxu1 }
 0x120   : > { %v4899_v63 = vpop.f32.mrb[31].mxu0  ;;  %v4905_v0 = vpop.f32.mrb[31].mxu1  ;;  %v960_v13 = vadd.f32 %v5810_v51, %v959_v57 }
 0x122   : > { %5221 = vmatmul.mubr.msk.bf16.vlgmr.msra.gmra.mrb[136].mxu0 %vm295_vm3, %v5899_v62  ;;  %5227 = vmatmul.mubr.msk.bf16.vlgmr.msra.gmra.mrb[136].mxu1 %vm295_vm3, %v5861_v35  ;;  %v961_v18 = vmax.f32 %v960_v13, 0.0 }
 0x123   : > { %5231 = vmatpush3.bf16.msra.mxu0 %v5457_v7  ;;  %5237 = vmatpush3.bf16.msra.mxu1 %v5468_v9 }
 0x124   : > { %5232 = vmatprep.mubr.msk.bf16.mxu0 %vm5409_vm2, %v5407_v1  ;;  %5238 = vmatprep.mubr.msk.bf16.mxu1 %vm5409_vm2, %v5407_v1 }
 0x125   : > { %v1036_v2 = vpop.f32.mrb[32].mxu0  ;;  %v1079_v3 = vpop.f32.mrb[32].mxu1  ;;  %5242 = vmatprep.subr.bf16.mxu0 %v5407_v1  ;;  %5248 = vmatprep.subr.bf16.mxu1 %v5407_v1 }
 0x126   : > { %v1037_v4 = vadd.f32 %v1036_v2, %v996_v56  ;;  %v4910_v5 = vpop.f32.mrb[33].mxu0  ;;  %v4916_v8 = vpop.f32.mrb[33].mxu1 }
 0x127   : > { %v1039_v10 = vpop.f32.mrb[34].mxu0  ;;  %v1082_v11 = vpop.f32.mrb[34].mxu1 }
 0x128   : > { %v1085_v14 = vadd.f32 %v1079_v3, %v1037_v4  ;;  %v4911_v15 = vpop.f32.mrb[35].mxu0  ;;  %v4917_v16 = vpop.f32.mrb[35].mxu1 }
 0x129   : > { %v5992_v15 = vld [vmem:[%s5474_s26 + $0x3c] sm:$0xf] }
 0x12a   : > { %v1086_v17 = vadd.f32 %v5810_v51, %v1085_v14  ;;  %5233 = vmatmul.mubr.msk.bf16.vlgmr.msra.gmra.mrb[140].mxu0 %vm295_vm3, %v5815_v59  ;;  %5239 = vmatmul.mubr.msk.bf16.vlgmr.msra.gmra.mrb[140].mxu1 %vm295_vm3, %v5914_v12 }
 0x12b   : > { %5243 = vmatpush3.bf16.msra.mxu0 %v5455_v6  ;;  %5249 = vmatpush3.bf16.msra.mxu1 %v5457_v7 }
 0x12c   : > { %v1087_v19 = vmax.f32 %v1086_v17, 0.0  ;;  %5244 = vmatprep.mubr.msk.bf16.mxu0 %vm5409_vm2, %v5407_v1  ;;  %5250 = vmatprep.mubr.msk.bf16.mxu1 %vm5409_vm2, %v5407_v1 }
 0x12d   : > { %v1122_v20 = vpop.f32.mrb[36].mxu0  ;;  %v1162_v21 = vpop.f32.mrb[36].mxu1  ;;  %5254 = vmatprep.subr.bf16.mxu0 %v5407_v1  ;;  %5260 = vmatprep.subr.bf16.mxu1 %v5407_v1 }
 0x12e   : > { %v5930_v59 = vmax.f32 %v961_v18, %v1087_v19  ;;  %v1163_v22 = vadd.f32 %v1162_v21, %v1122_v20  ;;  %v4922_v23 = vpop.f32.mrb[37].mxu0  ;;  %v4928_v25 = vpop.f32.mrb[37].mxu1 }
 0x12f   : > { %v1125_v26 = vpop.f32.mrb[38].mxu0  ;;  %v1165_v27 = vpop.f32.mrb[38].mxu1  ;;  %v6007_v25 = vld [vmem:[%s5489_s29 + $0x3c] sm:$0xf] }
 0x130   : > { %v4923_v28 = vpop.f32.mrb[39].mxu0  ;;  %v4929_v29 = vpop.f32.mrb[39].mxu1 }
 0x132   : > { %5245 = vmatmul.mubr.msk.bf16.vlgmr.msra.gmra.mrb[144].mxu0 %vm295_vm3, %v5899_v62  ;;  %5251 = vmatmul.mubr.msk.bf16.vlgmr.msra.gmra.mrb[144].mxu1 %vm295_vm3, %v5846_v24 }
 0x133   : > { %5255 = vmatpush3.bf16.msra.mxu0 %v5468_v9  ;;  %5261 = vmatpush3.bf16.msra.mxu1 %v5455_v6 }
 0x134   : > { %5256 = vmatprep.mubr.msk.bf16.mxu0 %vm5409_vm2, %v5407_v1  ;;  %5262 = vmatprep.mubr.msk.bf16.mxu1 %vm5409_vm2, %v5407_v1 }
 0x135   : > { %v1205_v30 = vpop.f32.mrb[40].mxu0  ;;  %v1248_v32 = vpop.f32.mrb[40].mxu1  ;;  %5266 = vmatprep.subr.bf16.mxu0 %v5407_v1  ;;  %5272 = vmatprep.subr.bf16.mxu1 %v5407_v1 }
 0x136   : > { %v1211_v33 = vadd.f32 %v1205_v30, %v1163_v22  ;;  %v4934_v34 = vpop.f32.mrb[41].mxu0  ;;  %v4940_v36 = vpop.f32.mrb[41].mxu1 }
 0x137   : > { %v1208_v24 = vpop.f32.mrb[42].mxu0  ;;  %v1251_v37 = vpop.f32.mrb[42].mxu1 }
 0x138   : > { %v4935_v39 = vpop.f32.mrb[43].mxu0  ;;  %v4941_v40 = vpop.f32.mrb[43].mxu1  ;;  %v1212_v49 = vadd.f32 %v5810_v51, %v1211_v33 }
 0x13a   : > { %5257 = vmatmul.mubr.msk.bf16.vlgmr.msra.gmra.mrb[148].mxu0 %vm295_vm3, %v5945_v38  ;;  %5263 = vmatmul.mubr.msk.bf16.vlgmr.msra.gmra.mrb[148].mxu1 %vm295_vm3, %v5914_v12  ;;  %v1213_v55 = vmax.f32 %v1212_v49, 0.0 }
 0x13b   : > { %5267 = vmatpush3.bf16.msra.mxu0 %v5457_v7  ;;  %5273 = vmatpush3.bf16.msra.mxu1 %v5468_v9 }
 0x13c   : > { %5268 = vmatprep.mubr.msk.bf16.mxu0 %vm5409_vm2, %v5407_v1  ;;  %5274 = vmatprep.mubr.msk.bf16.mxu1 %vm5409_vm2, %v5407_v1 }
 0x13d   : > { %v1288_v41 = vpop.f32.mrb[44].mxu0  ;;  %v1331_v42 = vpop.f32.mrb[44].mxu1  ;;  %5278 = vmatprep.subr.bf16.mxu0 %v5407_v1  ;;  %5284 = vmatprep.subr.bf16.mxu1 %v5407_v1 }
 0x13e   : > { %v1289_v43 = vadd.f32 %v1288_v41, %v1248_v32  ;;  %v4946_v44 = vpop.f32.mrb[45].mxu0  ;;  %v4952_v31 = vpop.f32.mrb[45].mxu1 }
 0x13f   : > { %v1291_v45 = vpop.f32.mrb[46].mxu0  ;;  %v1334_v46 = vpop.f32.mrb[46].mxu1 }
 0x140   : > { %v1337_v50 = vadd.f32 %v1331_v42, %v1289_v43  ;;  %v4947_v52 = vpop.f32.mrb[47].mxu0  ;;  %v4953_v53 = vpop.f32.mrb[47].mxu1 }
 0x141   : > { %v4492_v52 = vld [vmem:[%s5474_s26 + $0x40] sm:$0xf] }
 0x142   : > { %v1338_v54 = vadd.f32 %v5810_v51, %v1337_v50  ;;  %5269 = vmatmul.mubr.msk.bf16.vlgmr.msra.gmra.mrb[152].mxu0 %vm295_vm3, %v5861_v35  ;;  %5275 = vmatmul.mubr.msk.bf16.vlgmr.msra.gmra.mrb[152].mxu1 %vm295_vm3, %v5960_v47 }
 0x143   : > { %5279 = vmatpush3.bf16.msra.mxu0 %v5455_v6  ;;  %5285 = vmatpush3.bf16.msra.mxu1 %v5457_v7 }
 0x144   : > { %v1339_v56 = vmax.f32 %v1338_v54, 0.0  ;;  %5280 = vmatprep.mubr.msk.bf16.mxu0 %vm5409_vm2, %v5407_v1  ;;  %5286 = vmatprep.mubr.msk.bf16.mxu1 %vm5409_vm2, %v5407_v1 }
 0x145   : > { %v1379_v57 = vpop.f32.mrb[48].mxu0  ;;  %v1419_v58 = vpop.f32.mrb[48].mxu1  ;;  %5290 = vmatprep.subr.bf16.mxu0 %v5407_v1  ;;  %5296 = vmatprep.subr.bf16.mxu1 %v5407_v1 }
 0x146   : > { %v1341_v35 = vmax.f32 %v1213_v55, %v1339_v56  ;;  %v1420_v60 = vadd.f32 %v1419_v58, %v1379_v57  ;;  %v4958_v48 = vpop.f32.mrb[49].mxu0  ;;  %v4964_v61 = vpop.f32.mrb[49].mxu1 }
 0x147   : > { %v1382_v63 = vpop.f32.mrb[50].mxu0  ;;  %v1422_v0 = vpop.f32.mrb[50].mxu1  ;;  %v4509_v61 = vld [vmem:[%s5489_s29 + $0x40] sm:$0xf] }
 0x148   : > { %v1342_v2 = vmax.f32 %v5930_v59, %v1341_v35  ;;  %v4959_v3 = vpop.f32.mrb[51].mxu0  ;;  %v4965_v4 = vpop.f32.mrb[51].mxu1 }
 0x14a   : > { %4536 = vst.msk [vmem:[%s5881_s9 + $0x8] sm:$0xff] %vm834_vm4, %v1342_v2  ;;  %5281 = vmatmul.mubr.msk.bf16.vlgmr.msra.gmra.mrb[156].mxu0 %vm295_vm3, %v5945_v38  ;;  %5287 = vmatmul.mubr.msk.bf16.vlgmr.msra.gmra.mrb[156].mxu1 %vm295_vm3, %v5899_v62 }
 0x14b   : > { %5291 = vmatpush3.bf16.msra.mxu0 %v5468_v9  ;;  %5297 = vmatpush3.bf16.msra.mxu1 %v5455_v6 }
 0x14c   : > { %5292 = vmatprep.mubr.msk.bf16.mxu0 %vm5409_vm2, %v5407_v1  ;;  %5298 = vmatprep.mubr.msk.bf16.mxu1 %vm5409_vm2, %v5407_v1 }
 0x14d   : > { %v1462_v5 = vpop.f32.mrb[52].mxu0  ;;  %v1505_v8 = vpop.f32.mrb[52].mxu1  ;;  %5302 = vmatprep.subr.bf16.mxu0 %v5407_v1  ;;  %5308 = vmatprep.subr.bf16.mxu1 %v5407_v1 }
 0x14e   : > { %v1468_v10 = vadd.f32 %v1462_v5, %v1420_v60  ;;  %v4970_v11 = vpop.f32.mrb[53].mxu0  ;;  %v4976_v13 = vpop.f32.mrb[53].mxu1 }
 0x14f   : > { %v1465_v62 = vpop.f32.mrb[54].mxu0  ;;  %v1508_v14 = vpop.f32.mrb[54].mxu1 }
 0x150   : > { %v4971_v16 = vpop.f32.mrb[55].mxu0  ;;  %v4977_v17 = vpop.f32.mrb[55].mxu1  ;;  %v1469_v26 = vadd.f32 %v5810_v51, %v1468_v10 }
 0x152   : > { %5293 = vmatmul.mubr.msk.bf16.vlgmr.msra.gmra.mrb[160].mxu0 %vm295_vm3, %v5992_v15  ;;  %5299 = vmatmul.mubr.msk.bf16.vlgmr.msra.gmra.mrb[160].mxu1 %vm295_vm3, %v5960_v47  ;;  %v1470_v32 = vmax.f32 %v1469_v26, 0.0 }
 0x153   : > { %5303 = vmatpush3.bf16.msra.mxu0 %v5457_v7  ;;  %5309 = vmatpush3.bf16.msra.mxu1 %v5468_v9 }
 0x154   : > { %5304 = vmatprep.mubr.msk.bf16.mxu0 %vm5409_vm2, %v5407_v1  ;;  %5310 = vmatprep.mubr.msk.bf16.mxu1 %vm5409_vm2, %v5407_v1 }
 0x155   : > { %v1545_v18 = vpop.f32.mrb[56].mxu0  ;;  %v1588_v19 = vpop.f32.mrb[56].mxu1  ;;  %5314 = vmatprep.subr.bf16.mxu0 %v5407_v1  ;;  %5320 = vmatprep.subr.bf16.mxu1 %v5407_v1 }
 0x156   : > { %v1546_v20 = vadd.f32 %v1545_v18, %v1505_v8  ;;  %v4982_v21 = vpop.f32.mrb[57].mxu0  ;;  %v4988_v59 = vpop.f32.mrb[57].mxu1 }
 0x157   : > { %v1548_v22 = vpop.f32.mrb[58].mxu0  ;;  %v1591_v23 = vpop.f32.mrb[58].mxu1 }
 0x158   : > { %v1594_v27 = vadd.f32 %v1588_v19, %v1546_v20  ;;  %v4983_v28 = vpop.f32.mrb[59].mxu0  ;;  %v4989_v29 = vpop.f32.mrb[59].mxu1 }
 0x159   : > { %v4493_v28 = vld [vmem:[%s5474_s26 + $0x44] sm:$0xf] }
 0x15a   : > { %v1595_v30 = vadd.f32 %v5810_v51, %v1594_v27  ;;  %5305 = vmatmul.mubr.msk.bf16.vlgmr.msra.gmra.mrb[164].mxu0 %vm295_vm3, %v5914_v12  ;;  %5311 = vmatmul.mubr.msk.bf16.vlgmr.msra.gmra.mrb[164].mxu1 %vm295_vm3, %v6007_v25 }
 0x15b   : > { %5315 = vmatpush3.bf16.msra.mxu0 %v5455_v6  ;;  %5321 = vmatpush3.bf16.msra.mxu1 %v5457_v7 }
 0x15c   : > { %v1596_v33 = vmax.f32 %v1595_v30, 0.0  ;;  %5316 = vmatprep.mubr.msk.bf16.mxu0 %vm5409_vm2, %v5407_v1  ;;  %5322 = vmatprep.mubr.msk.bf16.mxu1 %vm5409_vm2, %v5407_v1 }
 0x15d   : > { %v1631_v34 = vpop.f32.mrb[60].mxu0  ;;  %v1671_v36 = vpop.f32.mrb[60].mxu1  ;;  %5326 = vmatprep.subr.bf16.mxu0 %v5407_v1  ;;  %5332 = vmatprep.subr.bf16.mxu1 %v5407_v1 }
 0x15e   : > { %v6023_v12 = vmax.f32 %v1470_v32, %v1596_v33  ;;  %v1672_v24 = vadd.f32 %v1671_v36, %v1631_v34  ;;  %v4994_v37 = vpop.f32.mrb[61].mxu0  ;;  %v5000_v39 = vpop.f32.mrb[61].mxu1 }
 0x15f   : > { %v1634_v40 = vpop.f32.mrb[62].mxu0  ;;  %v1674_v41 = vpop.f32.mrb[62].mxu1  ;;  %v4510_v37 = vld [vmem:[%s5489_s29 + $0x44] sm:$0xf] }
 0x160   : > { %v4995_v42 = vpop.f32.mrb[63].mxu0  ;;  %v5001_v43 = vpop.f32.mrb[63].mxu1 }
 0x162   : > { %5317 = vmatmul.mubr.msk.bf16.vlgmr.msra.gmra.mrb[168].mxu0 %vm295_vm3, %v5992_v15  ;;  %5323 = vmatmul.mubr.msk.bf16.vlgmr.msra.gmra.mrb[168].mxu1 %vm295_vm3, %v5945_v38 }
 0x163   : > { %5327 = vmatpush3.bf16.msra.mxu0 %v5468_v9  ;;  %5333 = vmatpush3.bf16.msra.mxu1 %v5455_v6 }
 0x164   : > { %5328 = vmatprep.mubr.msk.bf16.mxu0 %vm5409_vm2, %v5407_v1  ;;  %5334 = vmatprep.mubr.msk.bf16.mxu1 %vm5409_vm2, %v5407_v1 }
 0x165   : > { %v1714_v44 = vpop.f32.mrb[64].mxu0  ;;  %v1757_v31 = vpop.f32.mrb[64].mxu1  ;;  %5338 = vmatprep.subr.bf16.mxu0 %v5407_v1  ;;  %5344 = vmatprep.subr.bf16.mxu1 %v5407_v1 }
 0x166   : > { %v1720_v45 = vadd.f32 %v1714_v44, %v1672_v24  ;;  %v5006_v46 = vpop.f32.mrb[65].mxu0  ;;  %v5012_v49 = vpop.f32.mrb[65].mxu1 }
 0x167   : > { %v1717_v38 = vpop.f32.mrb[66].mxu0  ;;  %v1760_v50 = vpop.f32.mrb[66].mxu1 }
 0x168   : > { %v5007_v53 = vpop.f32.mrb[67].mxu0  ;;  %v5013_v54 = vpop.f32.mrb[67].mxu1  ;;  %v1721_v63 = vadd.f32 %v5810_v51, %v1720_v45 }
 0x16a   : > { %5329 = vmatmul.mubr.msk.bf16.vlgmr.msra.gmra.mrb[172].mxu0 %vm295_vm3, %v4492_v52  ;;  %5335 = vmatmul.mubr.msk.bf16.vlgmr.msra.gmra.mrb[172].mxu1 %vm295_vm3, %v6007_v25  ;;  %v1722_v5 = vmax.f32 %v1721_v63, 0.0 }
 0x16b   : > { %5339 = vmatpush3.bf16.msra.mxu0 %v5457_v7  ;;  %5345 = vmatpush3.bf16.msra.mxu1 %v5468_v9 }
 0x16c   : > { %5340 = vmatprep.mubr.msk.bf16.mxu0 %vm5409_vm2, %v5407_v1  ;;  %5346 = vmatprep.mubr.msk.bf16.mxu1 %vm5409_vm2, %v5407_v1 }
 0x16d   : > { %v1797_v55 = vpop.f32.mrb[68].mxu0  ;;  %v1840_v56 = vpop.f32.mrb[68].mxu1  ;;  %5350 = vmatprep.subr.bf16.mxu0 %v5407_v1  ;;  %5356 = vmatprep.subr.bf16.mxu1 %v5407_v1 }
 0x16e   : > { %v1798_v57 = vadd.f32 %v1797_v55, %v1757_v31  ;;  %v5018_v58 = vpop.f32.mrb[69].mxu0  ;;  %v5024_v35 = vpop.f32.mrb[69].mxu1 }
 0x16f   : > { %v1800_v60 = vpop.f32.mrb[70].mxu0  ;;  %v1843_v48 = vpop.f32.mrb[70].mxu1 }
 0x170   : > { %v1846_v0 = vadd.f32 %v1840_v56, %v1798_v57  ;;  %v5019_v2 = vpop.f32.mrb[71].mxu0  ;;  %v5025_v3 = vpop.f32.mrb[71].mxu1 }
 0x172   : > { %v1847_v4 = vadd.f32 %v5810_v51, %v1846_v0  ;;  %5341 = vmatmul.mubr.msk.bf16.vlgmr.msra.gmra.mrb[176].mxu0 %vm295_vm3, %v5960_v47  ;;  %5347 = vmatmul.mubr.msk.bf16.vlgmr.msra.gmra.mrb[176].mxu1 %vm295_vm3, %v4509_v61 }
 0x173   : > { %5351 = vmatpush3.bf16.msra.mxu0 %v5455_v6  ;;  %5357 = vmatpush3.bf16.msra.mxu1 %v5457_v7 }
 0x174   : > { %v1848_v8 = vmax.f32 %v1847_v4, 0.0  ;;  %5352 = vmatprep.mubr.msk.bf16.mxu0 %vm5409_vm2, %v5407_v1  ;;  %5358 = vmatprep.mubr.msk.bf16.mxu1 %vm5409_vm2, %v5407_v1 }
 0x175   : > { %v1888_v10 = vpop.f32.mrb[72].mxu0  ;;  %v1928_v11 = vpop.f32.mrb[72].mxu1  ;;  %5362 = vmatprep.subr.bf16.mxu0 %v5407_v1  ;;  %5368 = vmatprep.subr.bf16.mxu1 %v5407_v1 }
 0x176   : > { %v1850_v47 = vmax.f32 %v1722_v5, %v1848_v8  ;;  %v1929_v13 = vadd.f32 %v1928_v11, %v1888_v10  ;;  %v5030_v62 = vpop.f32.mrb[73].mxu0  ;;  %v5036_v14 = vpop.f32.mrb[73].mxu1 }
 0x177   : > { %v1891_v16 = vpop.f32.mrb[74].mxu0  ;;  %v1931_v17 = vpop.f32.mrb[74].mxu1 }
 0x178   : > { %v1851_v18 = vmax.f32 %v6023_v12, %v1850_v47  ;;  %v5031_v19 = vpop.f32.mrb[75].mxu0  ;;  %v5037_v20 = vpop.f32.mrb[75].mxu1 }
 0x17a   : > { %4549 = vst.msk [vmem:[%s5881_s9 + $0x10] sm:$0xff] %vm834_vm4, %v1851_v18  ;;  %5353 = vmatmul.mubr.msk.bf16.vlgmr.msra.gmra.mrb[180].mxu0 %vm295_vm3, %v4492_v52  ;;  %5359 = vmatmul.mubr.msk.bf16.vlgmr.msra.gmra.mrb[180].mxu1 %vm295_vm3, %v5992_v15 }
 0x17b   : > { %5363 = vmatpush3.bf16.msra.mxu0 %v5468_v9  ;;  %5369 = vmatpush3.bf16.msra.mxu1 %v5455_v6 }
 0x17c   : > { %5364 = vmatprep.mubr.msk.bf16.mxu0 %vm5409_vm2, %v5407_v1  ;;  %5370 = vmatprep.mubr.msk.bf16.mxu1 %vm5409_vm2, %v5407_v1 }
 0x17d   : > { %v1971_v21 = vpop.f32.mrb[76].mxu0  ;;  %v2014_v59 = vpop.f32.mrb[76].mxu1  ;;  %5374 = vmatprep.subr.bf16.mxu0 %v5407_v1  ;;  %5380 = vmatprep.subr.bf16.mxu1 %v5407_v1 }
 0x17e   : > { %v1977_v22 = vadd.f32 %v1971_v21, %v1929_v13  ;;  %v5042_v23 = vpop.f32.mrb[77].mxu0  ;;  %v5048_v26 = vpop.f32.mrb[77].mxu1 }
 0x17f   : > { %v1974_v15 = vpop.f32.mrb[78].mxu0  ;;  %v2017_v27 = vpop.f32.mrb[78].mxu1 }
 0x180   : > { %v5043_v6 = vpop.f32.mrb[79].mxu0  ;;  %v5049_v29 = vpop.f32.mrb[79].mxu1  ;;  %v1978_v39 = vadd.f32 %v5810_v51, %v1977_v22 }
 0x182   : > { %5365 = vmatmul.mubr.msk.bf16.vlgmr.msra.gmra.mrb[184].mxu0 %vm295_vm3, %v4493_v28  ;;  %5371 = vmatmul.mubr.msk.bf16.vlgmr.msra.gmra.mrb[184].mxu1 %vm295_vm3, %v4509_v61 }
 0x183   : > { %5375 = vmatpush3.bf16.msra.mxu0 %v5457_v7  ;;  %5381 = vmatpush3.bf16.msra.mxu1 %v5468_v9 }
 0x184   : > { %5376 = vmatprep.mubr.msk.bf16.mxu0 %vm5409_vm2, %v5407_v1  ;;  %5382 = vmatprep.mubr.msk.bf16.mxu1 %vm5409_vm2, %v5407_v1  ;;  %v1979_v1 = vmax.f32 %v1978_v39, 0.0 }
 0x185   : > { %v2054_v30 = vpop.f32.mrb[80].mxu0  ;;  %v2097_v32 = vpop.f32.mrb[80].mxu1 }
 0x186   : > { %v2055_v33 = vadd.f32 %v2054_v30, %v2014_v59  ;;  %v5054_v34 = vpop.f32.mrb[81].mxu0  ;;  %v5060_v36 = vpop.f32.mrb[81].mxu1 }
 0x187   : > { %v2057_v12 = vpop.f32.mrb[82].mxu0  ;;  %v2100_v24 = vpop.f32.mrb[82].mxu1 }
 0x188   : > { %v2103_v40 = vadd.f32 %v2097_v32, %v2055_v33  ;;  %v5055_v7 = vpop.f32.mrb[83].mxu0  ;;  %v5061_v41 = vpop.f32.mrb[83].mxu1 }
 0x18a   : > { %v2104_v9 = vadd.f32 %v5810_v51, %v2103_v40  ;;  %5377 = vmatmul.mubr.msk.bf16.vlgmr.msra.gmra.mrb[188].mxu0 %vm295_vm3, %v6007_v25  ;;  %5383 = vmatmul.mubr.msk.bf16.vlgmr.msra.gmra.mrb[188].mxu1 %vm295_vm3, %v4510_v37 }
 0x18c   : > { %v2105_v42 = vmax.f32 %v2104_v9, 0.0 }
 0x18d   : > { %v2140_v43 = vpop.f32.mrb[84].mxu0  ;;  %v2180_v44 = vpop.f32.mrb[84].mxu1 }
 0x18e   : > { %v2358_v31 = vmax.f32 %v1979_v1, %v2105_v42  ;;  %v2181_v45 = vadd.f32 %v2180_v44, %v2140_v43  ;;  %v5066_v46 = vpop.f32.mrb[85].mxu0  ;;  %v5072_v49 = vpop.f32.mrb[85].mxu1 }
 0x18f   : > { %v2143_v38 = vpop.f32.mrb[86].mxu0  ;;  %v2183_v50 = vpop.f32.mrb[86].mxu1 }
 0x190   : > { %v5067_v52 = vpop.f32.mrb[87].mxu0  ;;  %v5073_v53 = vpop.f32.mrb[87].mxu1 }
 0x195   : > { %v2223_v54 = vpop.f32.mrb[88].mxu0  ;;  %v2266_v55 = vpop.f32.mrb[88].mxu1 }
 0x196   : > { %v2229_v56 = vadd.f32 %v2223_v54, %v2181_v45  ;;  %v5078_v57 = vpop.f32.mrb[89].mxu0  ;;  %v5084_v58 = vpop.f32.mrb[89].mxu1 }
 0x197   : > { %v2226_v25 = vpop.f32.mrb[90].mxu0  ;;  %v2269_v35 = vpop.f32.mrb[90].mxu1 }
 0x198   : > { %v5079_v60 = vpop.f32.mrb[91].mxu0  ;;  %v5085_v48 = vpop.f32.mrb[91].mxu1  ;;  %v2230_v8 = vadd.f32 %v5810_v51, %v2229_v56 }
 0x19a   : > { %v2231_v62 = vmax.f32 %v2230_v8, 0.0 }
 0x19d   : > { %v2306_v61 = vpop.f32.mrb[92].mxu0  ;;  %v2349_v63 = vpop.f32.mrb[92].mxu1 }
 0x19e   : > { %v2307_v0 = vadd.f32 %v2306_v61, %v2266_v55  ;;  %v5090_v2 = vpop.f32.mrb[93].mxu0  ;;  %v5096_v3 = vpop.f32.mrb[93].mxu1 }
 0x19f   : > { %v2309_v4 = vpop.f32.mrb[94].mxu0  ;;  %v2352_v5 = vpop.f32.mrb[94].mxu1 }
 0x1a0   : > { %v2355_v10 = vadd.f32 %v2349_v63, %v2307_v0  ;;  %v5091_v11 = vpop.f32.mrb[95].mxu0  ;;  %v5097_v47 = vpop.f32.mrb[95].mxu1 }
 0x1a2   : > { %v2356_v13 = vadd.f32 %v5810_v51, %v2355_v10 }
 0x1a4   : > { %v2357_v14 = vmax.f32 %v2356_v13, 0.0 }
 0x1a5   : > { %v2397_v16 = vpop.f32.mrb[96].mxu0  ;;  %v2437_v17 = vpop.f32.mrb[96].mxu1 }
 0x1a6   : > { %v2359_v18 = vmax.f32 %v2231_v62, %v2357_v14  ;;  %v2438_v19 = vadd.f32 %v2437_v17, %v2397_v16  ;;  %v5102_v20 = vpop.f32.mrb[97].mxu0  ;;  %v5108_v21 = vpop.f32.mrb[97].mxu1 }
 0x1a7   : > { %v2400_v59 = vpop.f32.mrb[98].mxu0  ;;  %v2440_v22 = vpop.f32.mrb[98].mxu1 }
 0x1a8   : > { %v2360_v23 = vmax.f32 %v2358_v31, %v2359_v18  ;;  %v5103_v26 = vpop.f32.mrb[99].mxu0  ;;  %v5109_v15 = vpop.f32.mrb[99].mxu1 }
 0x1aa   : > { %4562 = vst.msk [vmem:[%s5881_s9 + $0x18] sm:$0xff] %vm834_vm4, %v2360_v23 }
 0x1ad   : > { %v2480_v27 = vpop.f32.mrb[100].mxu0  ;;  %v2523_v28 = vpop.f32.mrb[100].mxu1 }
 0x1ae   : > { %v2486_v6 = vadd.f32 %v2480_v27, %v2438_v19  ;;  %v5114_v29 = vpop.f32.mrb[101].mxu0  ;;  %v5120_v30 = vpop.f32.mrb[101].mxu1 }
 0x1af   : > { %v2483_v32 = vpop.f32.mrb[102].mxu0  ;;  %v2526_v33 = vpop.f32.mrb[102].mxu1 }
 0x1b0   : > { %v5115_v34 = vpop.f32.mrb[103].mxu0  ;;  %v5121_v36 = vpop.f32.mrb[103].mxu1  ;;  %v2487_v9 = vadd.f32 %v5810_v51, %v2486_v6 }
 0x1b2   : > { %v2488_v31 = vmax.f32 %v2487_v9, 0.0 }
 0x1b5   : > { %v2563_v12 = vpop.f32.mrb[104].mxu0  ;;  %v2606_v24 = vpop.f32.mrb[104].mxu1 }
 0x1b6   : > { %v2564_v37 = vadd.f32 %v2563_v12, %v2523_v28  ;;  %v5126_v39 = vpop.f32.mrb[105].mxu0  ;;  %v5132_v40 = vpop.f32.mrb[105].mxu1 }
 0x1b7   : > { %v2566_v7 = vpop.f32.mrb[106].mxu0  ;;  %v2609_v41 = vpop.f32.mrb[106].mxu1 }
 0x1b8   : > { %v2612_v1 = vadd.f32 %v2606_v24, %v2564_v37  ;;  %v5127_v42 = vpop.f32.mrb[107].mxu0  ;;  %v5133_v43 = vpop.f32.mrb[107].mxu1 }
 0x1ba   : > { %v2613_v44 = vadd.f32 %v5810_v51, %v2612_v1 }
 0x1bc   : > { %v2614_v45 = vmax.f32 %v2613_v44, 0.0 }
 0x1bd   : > { %v2649_v46 = vpop.f32.mrb[108].mxu0  ;;  %v2689_v49 = vpop.f32.mrb[108].mxu1 }
 0x1be   : > { %v2867_v38 = vmax.f32 %v2488_v31, %v2614_v45  ;;  %v2690_v50 = vadd.f32 %v2689_v49, %v2649_v46  ;;  %v5138_v52 = vpop.f32.mrb[109].mxu0  ;;  %v5144_v53 = vpop.f32.mrb[109].mxu1  ;;  %v6106_v49 = vld [vmem:[%s6131_s3] ss:$0 sm:$0xff] }
 0x1bf   : > { %v2652_v54 = vpop.f32.mrb[110].mxu0  ;;  %v2692_v55 = vpop.f32.mrb[110].mxu1 }
 0x1c0   : > { %v5139_v56 = vpop.f32.mrb[111].mxu0  ;;  %v5145_v57 = vpop.f32.mrb[111].mxu1 }
 0x1c5   : > { %v2732_v58 = vpop.f32.mrb[112].mxu0  ;;  %v2775_v25 = vpop.f32.mrb[112].mxu1 }
 0x1c6   : > { %v2738_v35 = vadd.f32 %v2732_v58, %v2690_v50  ;;  %v5150_v60 = vpop.f32.mrb[113].mxu0  ;;  %v5156_v48 = vpop.f32.mrb[113].mxu1 }
 0x1c7   : > { %v2735_v61 = vpop.f32.mrb[114].mxu0  ;;  %v2778_v63 = vpop.f32.mrb[114].mxu1 }
 0x1c8   : > { %v5151_v0 = vpop.f32.mrb[115].mxu0  ;;  %v5157_v2 = vpop.f32.mrb[115].mxu1  ;;  %v2739_v13 = vadd.f32 %v5810_v51, %v2738_v35 }
 0x1ca   : > { %v2740_v18 = vmax.f32 %v2739_v13, 0.0 }
 0x1cd   : > { %v2815_v3 = vpop.f32.mrb[116].mxu0  ;;  %v2858_v4 = vpop.f32.mrb[116].mxu1 }
 0x1ce   : > { %v2816_v5 = vadd.f32 %v2815_v3, %v2775_v25  ;;  %v5162_v8 = vpop.f32.mrb[117].mxu0  ;;  %v5168_v10 = vpop.f32.mrb[117].mxu1 }
 0x1cf   : > { %v2818_v11 = vpop.f32.mrb[118].mxu0  ;;  %v2861_v47 = vpop.f32.mrb[118].mxu1 }
 0x1d0   : > { %v2864_v62 = vadd.f32 %v2858_v4, %v2816_v5  ;;  %v5163_v14 = vpop.f32.mrb[119].mxu0  ;;  %v5169_v16 = vpop.f32.mrb[119].mxu1 }
 0x1d2   : > { %v2865_v17 = vadd.f32 %v5810_v51, %v2864_v62 }
 0x1d4   : > { %v2866_v19 = vmax.f32 %v2865_v17, 0.0 }
 0x1d5   : > { %v2906_v20 = vpop.f32.mrb[120].mxu0  ;;  %v2946_v21 = vpop.f32.mrb[120].mxu1 }
 0x1d6   : > { %v2868_v59 = vmax.f32 %v2740_v18, %v2866_v19  ;;  %v2947_v22 = vadd.f32 %v2946_v21, %v2906_v20  ;;  %v5174_v23 = vpop.f32.mrb[121].mxu0  ;;  %v5180_v26 = vpop.f32.mrb[121].mxu1 }
 0x1d7   : > { %v2909_v15 = vpop.f32.mrb[122].mxu0  ;;  %v2949_v27 = vpop.f32.mrb[122].mxu1 }
 0x1d8   : > { %v2869_v28 = vmax.f32 %v2867_v38, %v2868_v59  ;;  %v5175_v6 = vpop.f32.mrb[123].mxu0  ;;  %v5181_v29 = vpop.f32.mrb[123].mxu1 }
 0x1da   : > { %4575 = vst.msk [vmem:[%s5881_s9 + $0x20] sm:$0xff] %vm834_vm4, %v2869_v28 }
 0x1dd   : > { %v2989_v30 = vpop.f32.mrb[124].mxu0  ;;  %v3032_v32 = vpop.f32.mrb[124].mxu1 }
 0x1de   : > { %v2995_v33 = vadd.f32 %v2989_v30, %v2947_v22  ;;  %v5186_v34 = vpop.f32.mrb[125].mxu0  ;;  %v5192_v36 = vpop.f32.mrb[125].mxu1 }
 0x1df   : > { %v2992_v12 = vpop.f32.mrb[126].mxu0  ;;  %v3035_v24 = vpop.f32.mrb[126].mxu1 }
 0x1e0   : > { %v5187_v37 = vpop.f32.mrb[127].mxu0  ;;  %v5193_v39 = vpop.f32.mrb[127].mxu1  ;;  %v2996_v44 = vadd.f32 %v5810_v51, %v2995_v33 }
 0x1e2   : > { %v2997_v50 = vmax.f32 %v2996_v44, 0.0 }
 0x1e5   : > { %v3072_v40 = vpop.f32.mrb[128].mxu0  ;;  %v3115_v7 = vpop.f32.mrb[128].mxu1 }
 0x1e6   : > { %v3073_v41 = vadd.f32 %v3072_v40, %v3032_v32  ;;  %v5198_v9 = vpop.f32.mrb[129].mxu0  ;;  %v5204_v1 = vpop.f32.mrb[129].mxu1 }
 0x1e7   : > { %v3075_v42 = vpop.f32.mrb[130].mxu0  ;;  %v3118_v43 = vpop.f32.mrb[130].mxu1 }
 0x1e8   : > { %v3121_v31 = vadd.f32 %v3115_v7, %v3073_v41  ;;  %v5199_v45 = vpop.f32.mrb[131].mxu0  ;;  %v5205_v46 = vpop.f32.mrb[131].mxu1 }
 0x1ea   : > { %v3122_v38 = vadd.f32 %v6106_v49, %v3121_v31 }
 0x1ec   : > { %v3123_v52 = vmax.f32 %v3122_v38, 0.0 }
 0x1ed   : > { %v3158_v53 = vpop.f32.mrb[132].mxu0  ;;  %v3198_v54 = vpop.f32.mrb[132].mxu1 }
 0x1ee   : > { %v3376_v55 = vmax.f32 %v2997_v50, %v3123_v52  ;;  %v3199_v56 = vadd.f32 %v3198_v54, %v3158_v53  ;;  %v5210_v57 = vpop.f32.mrb[133].mxu0  ;;  %v5216_v58 = vpop.f32.mrb[133].mxu1 }
 0x1ef   : > { %v3161_v25 = vpop.f32.mrb[134].mxu0  ;;  %v3201_v51 = vpop.f32.mrb[134].mxu1 }
 0x1f0   : > { %v5211_v35 = vpop.f32.mrb[135].mxu0  ;;  %v5217_v60 = vpop.f32.mrb[135].mxu1 }
 0x1f5   : > { %v3241_v48 = vpop.f32.mrb[136].mxu0  ;;  %v3284_v61 = vpop.f32.mrb[136].mxu1 }
 0x1f6   : > { %v3247_v63 = vadd.f32 %v3241_v48, %v3199_v56  ;;  %v5222_v0 = vpop.f32.mrb[137].mxu0  ;;  %v5228_v2 = vpop.f32.mrb[137].mxu1 }
 0x1f7   : > { %v3244_v3 = vpop.f32.mrb[138].mxu0  ;;  %v3287_v4 = vpop.f32.mrb[138].mxu1 }
 0x1f8   : > { %v5223_v5 = vpop.f32.mrb[139].mxu0  ;;  %v5229_v8 = vpop.f32.mrb[139].mxu1  ;;  %v3248_v17 = vadd.f32 %v6106_v49, %v3247_v63 }
 0x1fa   : > { %v3249_v59 = vmax.f32 %v3248_v17, 0.0 }
 0x1fd   : > { %v3324_v10 = vpop.f32.mrb[140].mxu0  ;;  %v3367_v11 = vpop.f32.mrb[140].mxu1 }
 0x1fe   : > { %v3325_v47 = vadd.f32 %v3324_v10, %v3284_v61  ;;  %v5234_v13 = vpop.f32.mrb[141].mxu0  ;;  %v5240_v62 = vpop.f32.mrb[141].mxu1 }
 0x1ff   : > { %v3327_v14 = vpop.f32.mrb[142].mxu0  ;;  %v3370_v16 = vpop.f32.mrb[142].mxu1 }
 0x200   : > { %v3373_v18 = vadd.f32 %v3367_v11, %v3325_v47  ;;  %v5235_v19 = vpop.f32.mrb[143].mxu0  ;;  %v5241_v20 = vpop.f32.mrb[143].mxu1 }
 0x202   : > { %v3374_v21 = vadd.f32 %v6106_v49, %v3373_v18 }
 0x204   : > { %v3375_v22 = vmax.f32 %v3374_v21, 0.0 }
 0x205   : > { %v3415_v23 = vpop.f32.mrb[144].mxu0  ;;  %v3455_v26 = vpop.f32.mrb[144].mxu1 }
 0x206   : > { %v3377_v15 = vmax.f32 %v3249_v59, %v3375_v22  ;;  %v3456_v27 = vadd.f32 %v3455_v26, %v3415_v23  ;;  %v5246_v28 = vpop.f32.mrb[145].mxu0  ;;  %v5252_v6 = vpop.f32.mrb[145].mxu1 }
 0x207   : > { %v3418_v29 = vpop.f32.mrb[146].mxu0  ;;  %v3458_v30 = vpop.f32.mrb[146].mxu1 }
 0x208   : > { %v3378_v32 = vmax.f32 %v3376_v55, %v3377_v15  ;;  %v5247_v33 = vpop.f32.mrb[147].mxu0  ;;  %v5253_v34 = vpop.f32.mrb[147].mxu1 }
 0x20a   : > { %4588 = vst.msk [vmem:[%s5881_s9 + $0x28] sm:$0xff] %vm834_vm4, %v3378_v32 }
 0x20d   : > { %v3498_v36 = vpop.f32.mrb[148].mxu0  ;;  %v3541_v12 = vpop.f32.mrb[148].mxu1 }
 0x20e   : > { %v3504_v24 = vadd.f32 %v3498_v36, %v3456_v27  ;;  %v5258_v37 = vpop.f32.mrb[149].mxu0  ;;  %v5264_v39 = vpop.f32.mrb[149].mxu1 }
 0x20f   : > { %v3501_v40 = vpop.f32.mrb[150].mxu0  ;;  %v3544_v7 = vpop.f32.mrb[150].mxu1 }
 0x210   : > { %v5259_v41 = vpop.f32.mrb[151].mxu0  ;;  %v5265_v9 = vpop.f32.mrb[151].mxu1  ;;  %v3505_v38 = vadd.f32 %v6106_v49, %v3504_v24 }
 0x212   : > { %v3506_v55 = vmax.f32 %v3505_v38, 0.0 }
 0x215   : > { %v3581_v1 = vpop.f32.mrb[152].mxu0  ;;  %v3624_v42 = vpop.f32.mrb[152].mxu1 }
 0x216   : > { %v3582_v43 = vadd.f32 %v3581_v1, %v3541_v12  ;;  %v5270_v44 = vpop.f32.mrb[153].mxu0  ;;  %v5276_v31 = vpop.f32.mrb[153].mxu1 }
 0x217   : > { %v3584_v45 = vpop.f32.mrb[154].mxu0  ;;  %v3627_v46 = vpop.f32.mrb[154].mxu1 }
 0x218   : > { %v3630_v50 = vadd.f32 %v3624_v42, %v3582_v43  ;;  %v5271_v52 = vpop.f32.mrb[155].mxu0  ;;  %v5277_v53 = vpop.f32.mrb[155].mxu1 }
 0x21a   : > { %v3631_v54 = vadd.f32 %v6106_v49, %v3630_v50 }
 0x21c   : > { %v3632_v56 = vmax.f32 %v3631_v54, 0.0 }
 0x21d   : > { %v3667_v57 = vpop.f32.mrb[156].mxu0  ;;  %v3707_v58 = vpop.f32.mrb[156].mxu1 }
 0x21e   : > { %v3885_v25 = vmax.f32 %v3506_v55, %v3632_v56  ;;  %v3708_v51 = vadd.f32 %v3707_v58, %v3667_v57  ;;  %v5282_v35 = vpop.f32.mrb[157].mxu0  ;;  %v5288_v60 = vpop.f32.mrb[157].mxu1 }
 0x21f   : > { %v3670_v48 = vpop.f32.mrb[158].mxu0  ;;  %v3710_v61 = vpop.f32.mrb[158].mxu1 }
 0x220   : > { %v5283_v63 = vpop.f32.mrb[159].mxu0  ;;  %v5289_v0 = vpop.f32.mrb[159].mxu1 }
 0x225   : > { %v3750_v2 = vpop.f32.mrb[160].mxu0  ;;  %v3793_v3 = vpop.f32.mrb[160].mxu1 }
 0x226   : > { %v3756_v4 = vadd.f32 %v3750_v2, %v3708_v51  ;;  %v5294_v5 = vpop.f32.mrb[161].mxu0  ;;  %v5300_v8 = vpop.f32.mrb[161].mxu1 }
 0x227   : > { %v3753_v10 = vpop.f32.mrb[162].mxu0  ;;  %v3796_v11 = vpop.f32.mrb[162].mxu1 }
 0x228   : > { %v5295_v47 = vpop.f32.mrb[163].mxu0  ;;  %v5301_v13 = vpop.f32.mrb[163].mxu1  ;;  %v3757_v21 = vadd.f32 %v6106_v49, %v3756_v4 }
 0x22a   : > { %v3758_v15 = vmax.f32 %v3757_v21, 0.0 }
 0x22d   : > { %v3833_v62 = vpop.f32.mrb[164].mxu0  ;;  %v3876_v14 = vpop.f32.mrb[164].mxu1 }
 0x22e   : > { %v3834_v16 = vadd.f32 %v3833_v62, %v3793_v3  ;;  %v5306_v17 = vpop.f32.mrb[165].mxu0  ;;  %v5312_v18 = vpop.f32.mrb[165].mxu1 }
 0x22f   : > { %v3836_v19 = vpop.f32.mrb[166].mxu0  ;;  %v3879_v20 = vpop.f32.mrb[166].mxu1 }
 0x230   : > { %v3882_v59 = vadd.f32 %v3876_v14, %v3834_v16  ;;  %v5307_v22 = vpop.f32.mrb[167].mxu0  ;;  %v5313_v23 = vpop.f32.mrb[167].mxu1 }
 0x232   : > { %v3883_v26 = vadd.f32 %v6106_v49, %v3882_v59 }
 0x234   : > { %v3884_v27 = vmax.f32 %v3883_v26, 0.0 }
 0x235   : > { %v3924_v28 = vpop.f32.mrb[168].mxu0  ;;  %v3964_v6 = vpop.f32.mrb[168].mxu1 }
 0x236   : > { %v3886_v29 = vmax.f32 %v3758_v15, %v3884_v27  ;;  %v3965_v30 = vadd.f32 %v3964_v6, %v3924_v28  ;;  %v5318_v32 = vpop.f32.mrb[169].mxu0  ;;  %v5324_v33 = vpop.f32.mrb[169].mxu1 }
 0x237   : > { %v3927_v34 = vpop.f32.mrb[170].mxu0  ;;  %v3967_v36 = vpop.f32.mrb[170].mxu1 }
 0x238   : > { %v3887_v12 = vmax.f32 %v3885_v25, %v3886_v29  ;;  %v5319_v24 = vpop.f32.mrb[171].mxu0  ;;  %v5325_v37 = vpop.f32.mrb[171].mxu1 }
 0x23a   : > { %4601 = vst.msk [vmem:[%s5881_s9 + $0x30] sm:$0xff] %vm834_vm4, %v3887_v12 }
 0x23d   : > { %v4007_v39 = vpop.f32.mrb[172].mxu0  ;;  %v4050_v40 = vpop.f32.mrb[172].mxu1 }
 0x23e   : > { %v4013_v7 = vadd.f32 %v4007_v39, %v3965_v30  ;;  %v5330_v41 = vpop.f32.mrb[173].mxu0  ;;  %v5336_v9 = vpop.f32.mrb[173].mxu1 }
 0x23f   : > { %v4010_v1 = vpop.f32.mrb[174].mxu0  ;;  %v4053_v42 = vpop.f32.mrb[174].mxu1 }
 0x240   : > { %v5331_v43 = vpop.f32.mrb[175].mxu0  ;;  %v5337_v44 = vpop.f32.mrb[175].mxu1  ;;  %v4014_v54 = vadd.f32 %v6106_v49, %v4013_v7 }
 0x242   : > { %v4015_v25 = vmax.f32 %v4014_v54, 0.0 }
 0x245   : > { %v4090_v31 = vpop.f32.mrb[176].mxu0  ;;  %v4133_v45 = vpop.f32.mrb[176].mxu1 }
 0x246   : > { %v4091_v46 = vadd.f32 %v4090_v31, %v4050_v40  ;;  %v5342_v38 = vpop.f32.mrb[177].mxu0  ;;  %v5348_v50 = vpop.f32.mrb[177].mxu1 }
 0x247   : > { %v4093_v52 = vpop.f32.mrb[178].mxu0  ;;  %v4136_v53 = vpop.f32.mrb[178].mxu1 }
 0x248   : > { %v4139_v55 = vadd.f32 %v4133_v45, %v4091_v46  ;;  %v5343_v56 = vpop.f32.mrb[179].mxu0  ;;  %v5349_v57 = vpop.f32.mrb[179].mxu1 }
 0x24a   : > { %v4140_v58 = vadd.f32 %v6106_v49, %v4139_v55 }
 0x24c   : > { %v4141_v51 = vmax.f32 %v4140_v58, 0.0 }
 0x24d   : > { %v4176_v35 = vpop.f32.mrb[180].mxu0  ;;  %v4216_v60 = vpop.f32.mrb[180].mxu1 }
 0x24e   : > { %v4394_v48 = vmax.f32 %v4015_v25, %v4141_v51  ;;  %v4217_v61 = vadd.f32 %v4216_v60, %v4176_v35  ;;  %v5354_v63 = vpop.f32.mrb[181].mxu0  ;;  %v5360_v0 = vpop.f32.mrb[181].mxu1 }
 0x24f   : > { %v4179_v2 = vpop.f32.mrb[182].mxu0  ;;  %v4219_v3 = vpop.f32.mrb[182].mxu1 }
 0x250   : > { %v5355_v4 = vpop.f32.mrb[183].mxu0  ;;  %v5361_v5 = vpop.f32.mrb[183].mxu1 }
 0x255   : > { %v4259_v8 = vpop.f32.mrb[184].mxu0  ;;  %v4302_v10 = vpop.f32.mrb[184].mxu1 }
 0x256   : > { %v4265_v11 = vadd.f32 %v4259_v8, %v4217_v61  ;;  %v5366_v47 = vpop.f32.mrb[185].mxu0  ;;  %v5372_v13 = vpop.f32.mrb[185].mxu1 }
 0x257   : > { %v4262_v62 = vpop.f32.mrb[186].mxu0  ;;  %v4305_v14 = vpop.f32.mrb[186].mxu1 }
 0x258   : > { %v5367_v16 = vpop.f32.mrb[187].mxu0  ;;  %v5373_v17 = vpop.f32.mrb[187].mxu1  ;;  %v4266_v26 = vadd.f32 %v6106_v49, %v4265_v11 }
 0x25a   : > { %v4267_v29 = vmax.f32 %v4266_v26, 0.0 }
 0x25d   : > { %v4342_v18 = vpop.f32.mrb[188].mxu0  ;;  %v4385_v19 = vpop.f32.mrb[188].mxu1 }
 0x25e   : > { %v4343_v20 = vadd.f32 %v4342_v18, %v4302_v10  ;;  %v5378_v21 = vpop.f32.mrb[189].mxu0  ;;  %v5384_v59 = vpop.f32.mrb[189].mxu1 }
 0x25f   : > { %v4345_v22 = vpop.f32.mrb[190].mxu0  ;;  %v4388_v23 = vpop.f32.mrb[190].mxu1 }
 0x260   : > { %v4391_v15 = vadd.f32 %v4385_v19, %v4343_v20  ;;  %v5379_v27 = vpop.f32.mrb[191].mxu0  ;;  %v5385_v28 = vpop.f32.mrb[191].mxu1 }
 0x262   : > { %v4392_v6 = vadd.f32 %v6106_v49, %v4391_v15 }
 0x264   : > { %v4393_v30 = vmax.f32 %v4392_v6, 0.0 }
 0x266   : > { %v4395_v32 = vmax.f32 %v4267_v29, %v4393_v30 }
 0x268   : > { %v4396_v33 = vmax.f32 %v4394_v48, %v4395_v32 }
 0x26a   : > { %4614 = vst.msk [vmem:[%s5881_s9 + $0x38] sm:$0xff] %vm834_vm4, %v4396_v33 }
 0x26b PF: > { %s14_s15 = sadd.s32 1, %s5405_s15  }
 0x26c   : > { %p11_p4 = scmp.ge.s32.totalorder %s14_s15, 4  }
 0x26e   :  { %13 = sbr.rel (!%p11_p4) target bundleno = 1 (0x1), region = 112 }

// kernel: crnn_forward.9
= control target key start
LH: loop header
LB: loop body
LE: loop exit
PB: predicated region body
PF: predicated region fallthrough
CT: control target
= control target key end

     0   :  { %s398_s0 = inlined_call_operand.vmem [shape: bf16[8,256], index: 0, kind: input, shape index: {}]   ;;  %s399_s1 = inlined_call_operand.vmem [shape: bf16[256,128], index: 1, kind: input, shape index: {}]   ;;  %s400_s2 = inlined_call_operand.vmem [shape: f32[1,128], index: 2, kind: input, shape index: {}]   ;;  %s401_s3 = inlined_call_operand.hbm [shape: f32[8,128], index: 3, kind: output, shape index: {}]  }
   0x1   :  { %v269_v0 = vld [vmem:[%s399_s1 + $0x40] sm:$0xff]   ;;  %v271_v2 = vld [vmem:[%s399_s1 + $0x48] sm:$0xff]   ;;  %v273_v4 = vld [vmem:[%s399_s1 + $0x50] sm:$0xff]  }
   0x2   :  { %v270_v1 = vld [vmem:[%s399_s1] sm:$0xff]   ;;  %246 = vmatprep.subr.bf16.mxu0 %v269_v0  ;;  %v272_v3 = vld [vmem:[%s399_s1 + $0x8] sm:$0xff]   ;;  %v274_v5 = vld [vmem:[%s399_s1 + $0x10] sm:$0xff]  }
   0x3   :  { %247 = vmatpush3.bf16.msra.mxu0 %v270_v1  ;;  %v275_v6 = vld [vmem:[%s399_s1 + $0x58] sm:$0xff]   ;;  %v277_v8 = vld [vmem:[%s399_s1 + $0x60] sm:$0xff]   ;;  %v279_v10 = vld [vmem:[%s399_s1 + $0x68] sm:$0xff]  }
   0x4   :  { %248 = vmatprep.subr.bf16.mxu0 %v271_v2  ;;  %v276_v7 = vld [vmem:[%s399_s1 + $0x18] sm:$0xff]   ;;  %v278_v9 = vld [vmem:[%s399_s1 + $0x20] sm:$0xff]  }
   0x5   :  { %v22_v11 = vld [vmem:[%s398_s0] sm:$0xff] }
   0x7   :  { %249 = vmatpush3.bf16.msra.mxu0 %v272_v3 }
   0x8   :  { %250 = vmatprep.subr.bf16.mxu0 %v273_v4 }
   0xb   :  { %251 = vmatpush3.bf16.msra.mxu0 %v274_v5 }
   0xc   :  { %252 = vmatprep.subr.bf16.mxu0 %v275_v6 }
   0xf   :  { %253 = vmatpush3.bf16.msra.mxu0 %v276_v7 }
  0x10   :  { %254 = vmatprep.subr.bf16.mxu0 %v277_v8 }
  0x11   :  { %8 = vsyncpa [#allocation4], 0  ;;  %v228_v12 = vcombine.high %v22_v11, %v22_v11  ;;  %v280_v13 = vld [vmem:[%s399_s1 + $0x28] sm:$0xff]   ;;  %v281_v14 = vld [vmem:[%s399_s1 + $0x70] sm:$0xff]   ;;  %v227_v18 = vcombine.low %v22_v11, %v22_v11  ;;  %s311_s20 = smov [#allocation3]  }
  0x12   :  { %v282_v15 = vld [vmem:[%s399_s1 + $0x30] sm:$0xff]   ;;  %v283_v16 = vld [vmem:[%s399_s1 + $0x78] sm:$0xff]   ;;  %v245_v21 = vld [vmem:[%s400_s2] ss:$0 sm:$0xff]  ;;  %s219_s21 = sshll.u32 %s311_s20, 4  ;;  %s220_s21 = int_to_ptr.vmem [resolvable:$true] %s219_s21 }
  0x13   :  { %255 = vmatpush3.bf16.msra.mxu0 %v278_v9  ;;  %190 = vmatprep.mubr.bf16.mxu0 %v228_v12  ;;  %v284_v17 = vld [vmem:[%s399_s1 + $0x38] sm:$0xff]   ;;  %s287_s22 = scalar_lea.vmem %s220_s21, 128  ;;  %p292_p1 = scmp.lt.s32.totalorder %s220_s21, %s220_s21 }
  0x14   :  { %256 = vmatprep.subr.bf16.mxu0 %v279_v10  ;;  %p288_p0 = scmp.ne.s32.totalorder %s220_s21, %s287_s22  ;;  %p293_p2 = scmp.lt.s32.totalorder %s287_s22, %s287_s22 }
  0x16   :  { %p294_p3 = por %p293_p2, %p292_p1 }
  0x17   :  { %257 = vmatpush3.bf16.msra.mxu0 %v280_v13 }
  0x18   :  { %258 = vmatprep.subr.bf16.mxu0 %v281_v14  ;;  %p295_p4 = pnand %p294_p3, %p288_p0 }
  0x1b   :  { %259 = vmatpush3.bf16.msra.mxu0 %v282_v15 }
  0x1c   :  { %260 = vmatprep.subr.bf16.mxu0 %v283_v16 }
  0x1f   :  { %261 = vmatpush3.bf16.msra.mxu0 %v284_v17 }
  0x22   :  { %191 = vmatmul.mubr.bf16.vlgmr.msra.gmra.mrb[0].mxu0 %v227_v18 }
  0xf5   :  { %v262_v19 = vpop.f32.mrb[0].mxu0 }
  0xf6   :  { %v263_v20 = vpop.f32.mrb[1].mxu0 }
  0xf7   :  { %v264_v22 = vadd.f32 %v263_v20, %v262_v19  ;;  %v265_v23 = vpop.f32.mrb[2].mxu0 }
  0xf8   :  { %v266_v24 = vpop.f32.mrb[3].mxu0 }
  0xf9   :  { %v211_v25 = vadd.f32 %v264_v22, %v245_v21 }
  0xfb   :  { %212 = vst [vmem:[#allocation3] sm:$0xff] %v211_v25 }
  0xfc   :  { %298 = shalt.err (!%p295_p4)
}
  0xfd   :  { %s299_s24 = scalar_lea.hbm %s401_s3, 128 }
  0xfe   :  { %p300_p5 = scmp.ne.s32.totalorder %s401_s3, %s299_s24  ;;  %p303_p6 = scmp.lt.u32.totalorder %s299_s24, %s401_s3 }
 0x100   :  { %p305_p7 = pnand %p303_p6, %p300_p5 }
 0x102   :  { %308 = shalt.err (!%p305_p7)
}
 0x103   :  { %222 = dma.vmem_to_hbm [thread:$0]  %s220_s21, 128, %s401_s3, [#allocation4]  }
 0x104   :  { %309 = dma.done.wait [#allocation4], 128  }
 0x105   :  { %310 = vsyncadd [#allocation4], 4294967168 }
 0x106   :  { %226 = vsyncpa [#allocation4], 1 }

// kernel: crnn_forward.8
= control target key start
LH: loop header
LB: loop body
LE: loop exit
PB: predicated region body
PF: predicated region fallthrough
CT: control target
= control target key end

     0   :  { %v3424_v2 = vmov 0.0   ;;  %v3422_v3 = vmov 0   ;;  %vm2516_vm0 = vmmov 0   ;;  %v210_v58 = vlaneseq  ;;  %s3416_s0 = inlined_call_operand.vmem [shape: bf16[2,4,768], index: 0, kind: input, shape index: {}, may-alias: {0,1}]   ;;  %s3417_s1 = inlined_call_operand.vmem [shape: bf16[2,4,768], index: 1, kind: input, shape index: {}, may-alias: {0,1}]   ;;  %s3418_s2 = inlined_call_operand.vmem [shape: bf16[2,128,384], index: 2, kind: input, shape index: {}]   ;;  %s3419_s3 = inlined_call_operand.vmem [shape: f32[2,1,384], index: 3, kind: input, shape index: {}]   ;;  %s3420_s4 = inlined_call_operand.vmem [shape: f32[2,4,128], index: 4, kind: output, shape index: {0}]   ;;  %s3421_s5 = inlined_call_operand.vmem [shape: f32[2,4,128], index: 5, kind: output, shape index: {1}]  }
   0x1   :  { %v2550_v0 = vld [vmem:[%s3418_s2 + $0x4] ss:$12 sps:$4 sm:$0xff]   ;;  %v2555_v1 = vld [vmem:[%s3418_s2] ss:$12 sps:$4 sm:$0xff]   ;;  %2079 = vmatprep.subr.bf16.mxu1 %v3424_v2  ;;  %131 = vst [vmem:[#allocation2] sm:$0x3] %v3424_v2  ;;  %385 = vmatprep.mubr.bf16.mxu0 %v3422_v3 }
   0x2   :  { %132 = vst [vmem:[#allocation3] sm:$0x3] %v3424_v2  ;;  %353 = vmatprep.subr.bf16.mxu0 %v2550_v0  ;;  %v2565_v4 = vld [vmem:[%s3418_s2 + $0x1c] ss:$12 sps:$4 sm:$0xff]   ;;  %2095 = vmatprep.mubr.msk.bf16.mxu1 %vm2516_vm0, %v3424_v2  ;;  %v2573_v5 = vld [vmem:[%s3418_s2 + $0x18] ss:$12 sps:$4 sm:$0xff]  }
   0x3   :  { %354 = vmatpush1.bf16.msra.mxu0 %v2555_v1  ;;  %v2579_v6 = vld [vmem:[%s3418_s2 + $0x34] ss:$12 sps:$4 sm:$0xff]   ;;  %v2585_v7 = vld [vmem:[%s3418_s2 + $0x30] ss:$12 sps:$4 sm:$0xff]   ;;  %v2591_v8 = vld [vmem:[%s3418_s2 + $0x4c] ss:$12 sps:$4 sm:$0xff]  }
   0x4   :  { %355 = vmatprep.subr.bf16.mxu0 %v2565_v4  ;;  %3454 = vst [vmem:[#allocation6_spill] sm:$0xff] %v2585_v7  ;;  %3455 = vst [vmem:[#allocation7_spill] sm:$0xff] %v2591_v8  ;;  %v2596_v9 = vld [vmem:[%s3418_s2 + $0x8] ss:$12 sps:$4 sm:$0xff]   ;;  %v2608_v11 = vld [vmem:[%s3418_s2 + $0x64] ss:$12 sps:$4 sm:$0xff]  }
   0x5   :  { %v2602_v10 = vld [vmem:[%s3418_s2 + $0x48] ss:$12 sps:$4 sm:$0xff]   ;;  %3457 = vst [vmem:[#allocation9_spill] sm:$0xff] %v2608_v11  ;;  %2080 = vmatpush3.bf16.msra.mxu1 %v2596_v9  ;;  %v2614_v12 = vld [vmem:[%s3418_s2 + $0x20] ss:$12 sps:$4 sm:$0xff]   ;;  %v2916_v59 = vshrl.u32 %v210_v58, 7 }
   0x6   :  { %3456 = vst [vmem:[#allocation8_spill] sm:$0xff] %v2602_v10  ;;  %2081 = vmatprep.subr.bf16.mxu1 %v3424_v2  ;;  %v2621_v13 = vld [vmem:[%s3418_s2 + $0x60] ss:$12 sps:$4 sm:$0xff]   ;;  %v2627_v14 = vld [vmem:[%s3418_s2 + $0x7c] ss:$12 sps:$4 sm:$0xff]   ;;  %vm508_vm1 = vcmask 1041409  }
   0x7   :  { %356 = vmatpush1.bf16.msra.mxu0 %v2573_v5  ;;  %3458 = vst [vmem:[#allocation10_spill] sm:$0xff] %v2621_v13  ;;  %3459 = vst [vmem:[#allocation11_spill] sm:$0xff] %v2627_v14  ;;  %v2633_v15 = vld [vmem:[%s3418_s2 + $0x38] ss:$12 sps:$4 sm:$0xff]   ;;  %v2645_v17 = vld [vmem:[%s3418_s2 + $0x94] ss:$12 sps:$4 sm:$0xff]  }
   0x8   :  { %357 = vmatprep.subr.bf16.mxu0 %v2579_v6  ;;  %3460 = vst [vmem:[#allocation12_spill] sm:$0xff] %v2633_v15  ;;  %v2639_v16 = vld [vmem:[%s3418_s2 + $0x78] ss:$12 sps:$4 sm:$0xff]   ;;  %3462 = vst [vmem:[#allocation14_spill] sm:$0xff] %v2645_v17  ;;  %v2652_v18 = vld [vmem:[%s3418_s2 + $0x50] ss:$12 sps:$4 sm:$0xff]  }
   0x9   :  { %2082 = vmatpush3.bf16.msra.mxu1 %v2614_v12  ;;  %3461 = vst [vmem:[#allocation13_spill] sm:$0xff] %v2639_v16  ;;  %3463 = vst [vmem:[#allocation15_spill] sm:$0xff] %v2652_v18  ;;  %v2659_v19 = vld [vmem:[%s3418_s2 + $0x90] ss:$12 sps:$4 sm:$0xff]   ;;  %v2664_v20 = vld [vmem:[%s3418_s2 + $0xac] ss:$12 sps:$4 sm:$0xff]  }
   0xa   :  { %2083 = vmatprep.subr.bf16.mxu1 %v3424_v2  ;;  %3464 = vst [vmem:[#allocation16_spill] sm:$0xff] %v2659_v19  ;;  %3465 = vst [vmem:[#allocation17_spill] sm:$0xff] %v2664_v20  ;;  %v2671_v21 = vld [vmem:[%s3418_s2 + $0x68] ss:$12 sps:$4 sm:$0xff]   ;;  %v2679_v23 = vld [vmem:[#allocation2] sm:$0x3] }
   0xb   :  { %358 = vmatpush1.bf16.msra.mxu0 %v2585_v7  ;;  %3466 = vst [vmem:[#allocation18_spill] sm:$0xff] %v2671_v21  ;;  %v2676_v22 = vld [vmem:[%s3418_s2 + $0xa8] ss:$12 sps:$4 sm:$0xff]   ;;  %v2685_v24 = vld [vmem:[%s3418_s2 + $0xc4] ss:$12 sps:$4 sm:$0xff]   ;;  %v208_v26 = vpack.c.bf16 %v2679_v23, %v2679_v23  ;;  %v2919_v60 = vsub.s32 0, %v2916_v59 }
   0xc   :  { %359 = vmatprep.subr.bf16.mxu0 %v2591_v8  ;;  %3467 = vst [vmem:[#allocation19_spill] sm:$0xff] %v2676_v22  ;;  %3468 = vst [vmem:[#allocation20_spill] sm:$0xff] %v2685_v24  ;;  %v2692_v25 = vld [vmem:[%s3418_s2 + $0x80] ss:$12 sps:$4 sm:$0xff]   ;;  %v2706_v28 = vld [vmem:[%s3418_s2 + $0xdc] ss:$12 sps:$4 sm:$0xff]  }
   0xd   :  { %2084 = vmatpush3.bf16.msra.mxu1 %v2633_v15  ;;  %3469 = vst [vmem:[#allocation21_spill] sm:$0xff] %v2692_v25  ;;  %v2701_v27 = vld [vmem:[%s3418_s2 + $0xc0] ss:$12 sps:$4 sm:$0xff]   ;;  %v2713_v29 = vld [vmem:[%s3418_s2 + $0x98] ss:$12 sps:$4 sm:$0xff]   ;;  %v2925_v62 = vsub.s32 1, %v2916_v59 }
   0xe   :  { %2085 = vmatprep.subr.bf16.mxu1 %v3424_v2  ;;  %3470 = vst [vmem:[#allocation22_spill] sm:$0xff] %v2713_v29  ;;  %v2719_v30 = vld [vmem:[%s3418_s2 + $0xd8] ss:$12 sps:$4 sm:$0xff]   ;;  %v2725_v31 = vld [vmem:[%s3418_s2 + $0xf4] ss:$12 sps:$4 sm:$0xff]   ;;  %vm825_vm2 = vcmask 1044484  }
   0xf   :  { %360 = vmatpush1.bf16.msra.mxu0 %v2602_v10  ;;  %v2733_v32 = vld [vmem:[%s3418_s2 + $0xb0] ss:$12 sps:$4 sm:$0xff]   ;;  %v28_v33 = vld [vmem:[%s3416_s0] sm:$0x3f]  ;;  %v2752_v36 = vld [vmem:[%s3418_s2 + $0x10c] ss:$12 sps:$4 sm:$0xff]  }
  0x10   :  { %361 = vmatprep.subr.bf16.mxu0 %v2608_v11  ;;  %3471 = vst [vmem:[#allocation23_spill] sm:$0xff] %v2733_v32  ;;  %v30_v34 = vld [vmem:[%s3416_s0 + $0xc] sm:$0x3f]  ;;  %29 = vst [vmem:[#allocation4] sm:$0x3f] %v28_v33  ;;  %vm994_vm3 = vcmask 1042434  }
  0x11   :  { %2086 = vmatpush3.bf16.msra.mxu1 %v2652_v18  ;;  %v2746_v35 = vld [vmem:[%s3418_s2 + $0xf0] ss:$12 sps:$4 sm:$0xff]   ;;  %31 = vst [vmem:[#allocation4 + $0x6] sm:$0x3f] %v30_v34  ;;  %v2758_v37 = vld [vmem:[%s3418_s2 + $0xc8] ss:$12 sps:$4 sm:$0xff]  }
  0x12   :  { %2087 = vmatprep.subr.bf16.mxu1 %v3424_v2  ;;  %v2765_v38 = vld [vmem:[%s3418_s2 + $0x108] ss:$12 sps:$4 sm:$0xff]   ;;  %v2771_v39 = vld [vmem:[%s3418_s2 + $0x124] ss:$12 sps:$4 sm:$0xff]   ;;  %v2777_v40 = vld [vmem:[%s3418_s2 + $0xe0] ss:$12 sps:$4 sm:$0xff]  }
  0x13   :  { %362 = vmatpush1.bf16.msra.mxu0 %v2621_v13  ;;  %v2786_v41 = vld [vmem:[%s3418_s2 + $0x120] ss:$12 sps:$4 sm:$0xff]   ;;  %v2792_v42 = vld [vmem:[%s3418_s2 + $0x13c] ss:$12 sps:$4 sm:$0xff]   ;;  %v2798_v43 = vld [vmem:[%s3418_s2 + $0xf8] ss:$12 sps:$4 sm:$0xff]  }
  0x14   :  { %363 = vmatprep.subr.bf16.mxu0 %v2627_v14  ;;  %v2805_v44 = vld [vmem:[%s3418_s2 + $0x138] ss:$12 sps:$4 sm:$0xff]   ;;  %v2811_v45 = vld [vmem:[%s3418_s2 + $0x154] ss:$12 sps:$4 sm:$0xff]   ;;  %v2817_v46 = vld [vmem:[%s3418_s2 + $0x110] ss:$12 sps:$4 sm:$0xff]  }
  0x15   :  { %2088 = vmatpush3.bf16.msra.mxu1 %v2671_v21  ;;  %v2824_v47 = vld [vmem:[%s3418_s2 + $0x150] ss:$12 sps:$4 sm:$0xff]   ;;  %v2830_v48 = vld [vmem:[%s3418_s2 + $0x16c] ss:$12 sps:$4 sm:$0xff]   ;;  %v2836_v49 = vld [vmem:[%s3418_s2 + $0x128] ss:$12 sps:$4 sm:$0xff]  }
  0x16   :  { %2089 = vmatprep.subr.bf16.mxu1 %v3424_v2  ;;  %v2843_v50 = vld [vmem:[%s3418_s2 + $0x168] ss:$12 sps:$4 sm:$0xff]   ;;  %v2845_v51 = vld [vmem:[#allocation3] sm:$0x3]  ;;  %v2862_v54 = vld [vmem:[%s3418_s2 + $0x158] ss:$12 sps:$4 sm:$0xff]  }
  0x17   :  { %364 = vmatpush1.bf16.msra.mxu0 %v2639_v16  ;;  %v2852_v52 = vld [vmem:[%s3418_s2 + $0x140] ss:$12 sps:$4 sm:$0xff]   ;;  %v521_v53 = vpack.c.bf16 %v2845_v51, %v2845_v51  ;;  %v2872_v55 = vld [vmem:[%s3418_s2 + $0x170] ss:$12 sps:$4 sm:$0xff]   ;;  %v1892_v56 = vld [vmem:[%s3417_s1 + $0x6] sm:$0x3f] }
  0x18   :  { %365 = vmatprep.subr.bf16.mxu0 %v2645_v17  ;;  %v1893_v57 = vld [vmem:[%s3417_s1 + $0x12] sm:$0x3f]  ;;  %79 = vst [vmem:[#allocation5] sm:$0x3f] %v1892_v56  ;;  %v198_v61 = vld [vmem:[%s3419_s3] sm:$0x7] }
  0x19   :  { %2090 = vmatpush3.bf16.msra.mxu1 %v2692_v25  ;;  %81 = vst [vmem:[#allocation5 + $0x6] sm:$0x3f] %v1893_v57  ;;  %3472 = vst [vmem:[#allocation24_spill] sm:$0xff] %v2925_v62  ;;  %v2927_v63 = vld [vmem:[#allocation4] sm:$0x15]  ;;  %v2932_v33 = vrot.slane %v198_v61, %v2919_v60  ;;  %vm1167_vm4 = vcmask 1043459  }
  0x1a   :  { %2091 = vmatprep.subr.bf16.mxu1 %v3424_v2  ;;  %v204_v34 = vunpack.c.l.bf16 %v2927_v63 }
  0x1b   :  { %366 = vmatpush1.bf16.msra.mxu0 %v2659_v19  ;;  %3473 = vst [vmem:[#allocation25_spill] sm:$0xff] %v2932_v33 }
  0x1c   :  { %367 = vmatprep.subr.bf16.mxu0 %v2664_v20 }
  0x1d   :  { %2092 = vmatpush3.bf16.msra.mxu1 %v2713_v29 }
  0x1e   :  { %2093 = vmatprep.subr.bf16.mxu1 %v3424_v2 }
  0x1f   :  { %368 = vmatpush1.bf16.msra.mxu0 %v2676_v22 }
  0x20   :  { %666 = vmatprep.subr.bf16.mxu0 %v2685_v24 }
  0x21   :  { %2094 = vmatpush3.bf16.msra.mxu1 %v2733_v32 }
  0x22   :  { %386 = vmatmul.mubr.bf16.vlgmr.msra.gmra.mrb[0].mxu0 %v208_v26  ;;  %2099 = vmatprep.subr.bf16.mxu1 %v3424_v2 }
  0x23   :  { %667 = vmatpush1.bf16.msra.mxu0 %v2701_v27  ;;  %698 = vmatprep.mubr.bf16.mxu0 %v3422_v3 }
  0x24   :  { %668 = vmatprep.subr.bf16.mxu0 %v2706_v28  ;;  %2096 = vmatmul.mubr.bf16.vlgmr.msra.gmra.mrb[0].mxu1 %v208_v26  ;;  %v2929_v26 = vld [vmem:[#allocation4 + $0x6] sm:$0x15] }
  0x25   :  { %2100 = vmatpush3.bf16.msra.mxu1 %v2758_v37  ;;  %2115 = vmatprep.mubr.msk.bf16.mxu1 %vm2516_vm0, %v3424_v2  ;;  %v206_v56 = vunpack.c.l.bf16 %v2929_v26 }
  0x26   :  { %2101 = vmatprep.subr.bf16.mxu1 %v3424_v2 }
  0x27   :  { %669 = vmatpush1.bf16.msra.mxu0 %v2719_v30 }
  0x28   :  { %670 = vmatprep.subr.bf16.mxu0 %v2725_v31 }
  0x29   :  { %2102 = vmatpush3.bf16.msra.mxu1 %v2777_v40 }
  0x2a   :  { %2103 = vmatprep.subr.bf16.mxu1 %v3424_v2 }
  0x2b   :  { %671 = vmatpush1.bf16.msra.mxu0 %v2746_v35 }
  0x2c   :  { %672 = vmatprep.subr.bf16.mxu0 %v2752_v36 }
  0x2d   :  { %2104 = vmatpush3.bf16.msra.mxu1 %v2798_v43 }
  0x2e   :  { %2105 = vmatprep.subr.bf16.mxu1 %v3424_v2 }
  0x2f   :  { %673 = vmatpush1.bf16.msra.mxu0 %v2765_v38 }
  0x30   :  { %674 = vmatprep.subr.bf16.mxu0 %v2771_v39 }
  0x31   :  { %2106 = vmatpush3.bf16.msra.mxu1 %v2817_v46 }
  0x32   :  { %2107 = vmatprep.subr.bf16.mxu1 %v3424_v2 }
  0x33   :  { %675 = vmatpush1.bf16.msra.mxu0 %v2786_v41 }
  0x34   :  { %676 = vmatprep.subr.bf16.mxu0 %v2792_v42 }
  0x35   :  { %2108 = vmatpush3.bf16.msra.mxu1 %v2836_v49 }
  0x36   :  { %2109 = vmatprep.subr.bf16.mxu1 %v3424_v2 }
  0x37   :  { %677 = vmatpush1.bf16.msra.mxu0 %v2805_v44 }
  0x38   :  { %678 = vmatprep.subr.bf16.mxu0 %v2811_v45 }
  0x39   :  { %2110 = vmatpush3.bf16.msra.mxu1 %v2852_v52 }
  0x3a   :  { %2111 = vmatprep.subr.bf16.mxu1 %v3424_v2 }
  0x3b   :  { %679 = vmatpush1.bf16.msra.mxu0 %v2824_v47 }
  0x3c   :  { %680 = vmatprep.subr.bf16.mxu0 %v2830_v48 }
  0x3d   :  { %2112 = vmatpush3.bf16.msra.mxu1 %v2862_v54 }
  0x3e   :  { %2113 = vmatprep.subr.bf16.mxu1 %v3424_v2 }
  0x3f   :  { %681 = vmatpush1.bf16.msra.mxu0 %v2843_v50 }
  0x40   :  { %839 = vmatprep.subr.bf16.mxu0 %v2550_v0 }
  0x41   :  { %2114 = vmatpush3.bf16.msra.mxu1 %v2872_v55 }
  0x42   :  { %699 = vmatmul.mubr.bf16.vlgmr.msra.gmra.mrb[4].mxu0 %v521_v53  ;;  %2119 = vmatprep.subr.bf16.mxu1 %v3424_v2 }
  0x43   :  { %840 = vmatpush1.bf16.msra.mxu0 %v2555_v1  ;;  %871 = vmatprep.mubr.bf16.mxu0 %v3422_v3 }
  0x44   :  { %841 = vmatprep.subr.bf16.mxu0 %v2565_v4  ;;  %2116 = vmatmul.mubr.bf16.vlgmr.msra.gmra.mrb[4].mxu1 %v521_v53  ;;  %v2936_v53 = vrot.slane %v198_v61, %v2925_v62 }
  0x45   :  { %2120 = vmatpush3.bf16.msra.mxu1 %v2596_v9  ;;  %2135 = vmatprep.mubr.msk.bf16.mxu1 %vm2516_vm0, %v3424_v2 }
  0x46   :  { %2121 = vmatprep.subr.bf16.mxu1 %v3424_v2  ;;  %3474 = vst [vmem:[#allocation26_spill] sm:$0xff] %v2936_v53 }
  0x47   :  { %842 = vmatpush1.bf16.msra.mxu0 %v2573_v5 }
  0x48   :  { %843 = vmatprep.subr.bf16.mxu0 %v2579_v6 }
  0x49   :  { %2122 = vmatpush3.bf16.msra.mxu1 %v2614_v12 }
  0x4a   :  { %2123 = vmatprep.subr.bf16.mxu1 %v3424_v2 }
  0x4b   :  { %844 = vmatpush1.bf16.msra.mxu0 %v2585_v7 }
  0x4c   :  { %845 = vmatprep.subr.bf16.mxu0 %v2591_v8 }
  0x4d   :  { %2124 = vmatpush3.bf16.msra.mxu1 %v2633_v15 }
  0x4e   :  { %2125 = vmatprep.subr.bf16.mxu1 %v3424_v2 }
  0x4f   :  { %846 = vmatpush1.bf16.msra.mxu0 %v2602_v10 }
  0x50   :  { %847 = vmatprep.subr.bf16.mxu0 %v2608_v11 }
  0x51   :  { %2126 = vmatpush3.bf16.msra.mxu1 %v2652_v18 }
  0x52   :  { %2127 = vmatprep.subr.bf16.mxu1 %v3424_v2 }
  0x53   :  { %848 = vmatpush1.bf16.msra.mxu0 %v2621_v13 }
  0x54   :  { %849 = vmatprep.subr.bf16.mxu0 %v2627_v14 }
  0x55   :  { %2128 = vmatpush3.bf16.msra.mxu1 %v2671_v21 }
  0x56   :  { %2129 = vmatprep.subr.bf16.mxu1 %v3424_v2 }
  0x57   :  { %850 = vmatpush1.bf16.msra.mxu0 %v2639_v16 }
  0x58   :  { %851 = vmatprep.subr.bf16.mxu0 %v2645_v17 }
  0x59   :  { %2130 = vmatpush3.bf16.msra.mxu1 %v2692_v25 }
  0x5a   :  { %2131 = vmatprep.subr.bf16.mxu1 %v3424_v2 }
  0x5b   :  { %852 = vmatpush1.bf16.msra.mxu0 %v2659_v19  ;;  %v455_v19 = vrot.slane %v206_v56, 4 }
  0x5c   :  { %853 = vmatprep.subr.bf16.mxu0 %v2664_v20 }
  0x5d   :  { %2132 = vmatpush3.bf16.msra.mxu1 %v2713_v29 }
  0x5e   :  { %2133 = vmatprep.subr.bf16.mxu1 %v3424_v2 }
  0x5f   :  { %854 = vmatpush1.bf16.msra.mxu0 %v2676_v22 }
  0x60   :  { %1008 = vmatprep.subr.bf16.mxu0 %v2685_v24  ;;  %v454_v24 = vrot.slane %v204_v34, 4 }
  0x61   :  { %2134 = vmatpush3.bf16.msra.mxu1 %v2733_v32 }
  0x62   :  { %2139 = vmatprep.subr.bf16.mxu1 %v3424_v2 }
  0xf5   :  { %v387_v57 = vpop.f32.mrb[0].mxu0 }
  0xf6   :  { %v388_v58 = vadd.f32 %v387_v57, %v2932_v33  ;;  %v389_v3 = vpop.f32.mrb[1].mxu0 }
  0xf7   :  { %v390_v2 = vadd.f32 %v389_v3, %v2936_v53  ;;  %v391_v32 = vpop.f32.mrb[2].mxu0  ;;  %v428_v11 = vpop.f32.mrb[0].mxu1 }
  0xf8   :  { %v435_v22 = vrot.slane %v388_v58, 1  ;;  %v438_v20 = vadd.f32 %v388_v58, %v204_v34  ;;  %v392_v29 = vpop.f32.mrb[3].mxu0  ;;  %v2097_v57 = vpop.f32.mrb[1].mxu1 }
  0xf9   :  { %v459_v17 = vrot.slane %v390_v2, 1  ;;  %v462_v14 = vadd.f32 %v454_v24, %v390_v2  ;;  %v431_v33 = vpop.f32.mrb[2].mxu1  ;;  %v2942_v29 = vsub.s32 2, %v2916_v59  ;;  %v2954_v24 = vld [vmem:[#allocation5] sm:$0x2a] }
  0xfa   :  { %v439_v25 = vadd.f32 %v435_v22, %v206_v56  ;;  %v1951_v16 = vmul.f32 -1.442695, %v438_v20  ;;  %v2098_v3 = vpop.f32.mrb[3].mxu1  ;;  %v207_v56 = vunpack.c.h.bf16 %v2929_v26 }
  0xfb   :  { %v463_v13 = vadd.f32 %v459_v17, %v455_v19  ;;  %v1953_v18 = vmul.f32 -1.442695, %v462_v14  ;;  %v2945_v2 = vrot.slane %v198_v61, %v2942_v29  ;;  %v205_v19 = vunpack.c.h.bf16 %v2927_v63 }
  0xfc   :  { %2306 = vpow2.f32 %v1951_v16  ;;  %v1952_v21 = vmul.f32 -1.442695, %v439_v25  ;;  %v2956_v25 = vld [vmem:[#allocation5 + $0x6] sm:$0x2a]  ;;  %v517_v63 = vunpack.c.l.bf16 %v2954_v24 }
  0xfd   :  { %v1954_v10 = vmul.f32 -1.442695, %v463_v13  ;;  %3475 = vst [vmem:[#allocation27_spill] sm:$0xff] %v2945_v2  ;;  %v429_v14 = vadd.f32 %v428_v11, %v2945_v2  ;;  %v519_v3 = vunpack.c.l.bf16 %v2956_v25 }
  0xfe   :  { %2308 = vpow2.f32 %v1952_v21 }
  0xff   :  { %2310 = vpow2.f32 %v1953_v18  ;;  %v477_v21 = vrot.slane %v429_v14, 1  ;;  %v769_v53 = vrot.slane %v519_v3, 4 }
 0x100   :  { %2312 = vpow2.f32 %v1954_v10  ;;  %v2951_v10 = vld [vmem:[%s3419_s3 + $0x3] sm:$0x7] }
 0x101   :  { %v2960_v61 = vrot.slane %v2951_v10, %v2919_v60  ;;  %v2964_v33 = vrot.slane %v2951_v10, %v2925_v62 }
 0x103   :  { %3476 = vst [vmem:[#allocation28_spill] sm:$0xff] %v2964_v33 }
 0x106   :  { %v2307_v32 = vpop.eup %2306 }
 0x107   :  { %v446_v34 = vadd.f32 1.0, %v2307_v32 }
 0x108   :  { %v2309_v22 = vpop.eup %2308 }
 0x109   :  { %v447_v20 = vadd.f32 1.0, %v2309_v22  ;;  %2314 = vrcp.f32 %v446_v34  ;;  %v2311_v16 = vpop.eup %2310 }
 0x10a   :  { %v2313_v17 = vpop.eup %2312  ;;  %v470_v13 = vadd.f32 1.0, %v2311_v16 }
 0x10b   :  { %2316 = vrcp.f32 %v447_v20  ;;  %v471_v18 = vadd.f32 1.0, %v2313_v17 }
 0x10c   :  { %2318 = vrcp.f32 %v470_v13 }
 0x10d   :  { %2320 = vrcp.f32 %v471_v18 }
 0x113   :  { %v2315_v11 = vpop.eup %2314 }
 0x114   :  { %v480_v58 = vmul.f32 %v2315_v11, %v429_v14  ;;  %v768_v11 = vrot.slane %v517_v63, 4 }
 0x115   :  { %v2317_v57 = vpop.eup %2316  ;;  %v700_v32 = vpop.f32.mrb[4].mxu0 }
 0x116   :  { %v481_v34 = vmul.f32 %v2317_v57, %v477_v21  ;;  %v482_v22 = vadd.f32 %v480_v58, %v205_v19  ;;  %v701_v20 = vadd.f32 %v700_v32, %v2960_v61  ;;  %v702_v16 = vpop.f32.mrb[5].mxu0  ;;  %v2319_v57 = vpop.eup %2318 }
 0x117   :  { %v703_v17 = vadd.f32 %v702_v16, %v2964_v33  ;;  %v704_v62 = vpop.f32.mrb[6].mxu0  ;;  %v741_v16 = vpop.f32.mrb[4].mxu1 }
 0x118   :  { %v483_v2 = vadd.f32 %v481_v34, %v207_v56  ;;  %2322 = vtanh.f32 %v482_v22  ;;  %v748_v13 = vrot.slane %v701_v20, 5  ;;  %v749_v26 = vrot.slane %v701_v20, 6  ;;  %v705_v14 = vpop.f32.mrb[7].mxu0  ;;  %v2117_v62 = vpop.f32.mrb[5].mxu1 }
 0x119   :  { %v773_v8 = vrot.slane %v703_v17, 5  ;;  %v774_v18 = vrot.slane %v703_v17, 6  ;;  %v2321_v56 = vpop.eup %2320  ;;  %v744_v34 = vpop.f32.mrb[6].mxu1  ;;  %v486_v22 = vsub.f32 1.0, %v2319_v57  ;;  %v491_v20 = vrot.slane %v2679_v23, 1 }
 0x11a   :  { %2324 = vtanh.f32 %v483_v2  ;;  %v752_v15 = vadd.f32 %v748_v13, %v517_v63  ;;  %v753_v7 = vadd.f32 %v749_v26, %v519_v3  ;;  %v2118_v33 = vpop.f32.mrb[7].mxu1  ;;  %v487_v3 = vsub.f32 1.0, %v2321_v56 }
 0x11b   :  { %v777_v58 = vadd.f32 %v773_v8, %v768_v11  ;;  %v778_v32 = vadd.f32 %v774_v18, %v769_v53  ;;  %v495_v17 = vmul.f32 %v2321_v56, %v491_v20 }
 0x11c   :  { %v1979_v21 = vmul.f32 -1.442695, %v752_v15  ;;  %v1980_v19 = vmul.f32 -1.442695, %v753_v7  ;;  %v494_v15 = vmul.f32 %v2319_v57, %v2679_v23 }
 0x11d   :  { %v1981_v14 = vmul.f32 -1.442695, %v777_v58  ;;  %v1982_v63 = vmul.f32 -1.442695, %v778_v32  ;;  %v2983_v58 = vrot.slane %v2951_v10, %v2942_v29 }
 0x11e   :  { %2326 = vpow2.f32 %v1979_v21 }
 0x11f   :  { %2328 = vpow2.f32 %v1980_v19  ;;  %v742_v32 = vadd.f32 %v741_v16, %v2983_v58 }
 0x120   :  { %2330 = vpow2.f32 %v1981_v14 }
 0x121   :  { %2332 = vpow2.f32 %v1982_v63  ;;  %v793_v14 = vrot.slane %v742_v32, 6  ;;  %v518_v63 = vunpack.c.h.bf16 %v2954_v24  ;;  %v3477_v24 = vmov 0.0  }
 0x122   :  { %v2323_v2 = vpop.eup %2322 }
 0x123   :  { %v488_v7 = vmul.f32 %v2323_v2, %v486_v22  ;;  %v792_v22 = vrot.slane %v742_v32, 5 }
 0x124   :  { %v2325_v8 = vpop.eup %2324 }
 0x125   :  { %v489_v13 = vmul.f32 %v2325_v8, %v487_v3  ;;  %v496_v53 = vadd.f32 %v494_v15, %v488_v7  ;;  %v520_v15 = vunpack.c.h.bf16 %v2956_v25 }
 0x127   :  { %v497_v26 = vadd.f32 %v495_v17, %v489_v13  ;;  %512 = vst [vmem:[%s3420_s4] sm:$0x1] %v496_v53  ;;  %v503_v18 = vrot.slane %v496_v53, %v2919_v60  ;;  %v3478_v53 = vmov 0  }
 0x128   :  { %v2327_v11 = vpop.eup %2326 }
 0x129   :  { %v2329_v33 = vpop.eup %2328  ;;  %v507_v21 = vrot.slane %v497_v26, %v2919_v60  ;;  %513 = vst [vmem:[%s3420_s4 + $0x4] sm:$0x1] %v497_v26  ;;  %v760_v23 = vadd.f32 1.0, %v2327_v11  ;;  %v807_v11 = vrot.slane %v2845_v51, 5 }
 0x12a   :  { %v761_v19 = vadd.f32 1.0, %v2329_v33  ;;  %v2331_v62 = vpop.eup %2330  ;;  %v808_v33 = vrot.slane %v2845_v51, 6 }
 0x12b   :  { %v509_v57 = vsel %vm508_vm1, %v507_v21, %v503_v18  ;;  %2334 = vrcp.f32 %v760_v23  ;;  %v2333_v56 = vpop.eup %2332  ;;  %v785_v34 = vadd.f32 1.0, %v2331_v62  ;;  %v3015_v62 = vsub.s32 3, %v2916_v59 }
 0x12c   :  { %511 = vst [vmem:[#allocation2] sm:$0x3] %v509_v57  ;;  %2336 = vrcp.f32 %v761_v19  ;;  %v786_v20 = vadd.f32 1.0, %v2333_v56 }
 0x12d   :  { %2338 = vrcp.f32 %v785_v34 }
 0x12e   :  { %2340 = vrcp.f32 %v786_v20 }
 0x133   :  { %v2987_v2 = vld [vmem:[#allocation2] sm:$0x3] }
 0x134   :  { %v838_v10 = vpack.c.bf16 %v2987_v2, %v2987_v2 }
 0x135   :  { %v2335_v3 = vpop.eup %2334 }
 0x136   :  { %v2337_v7 = vpop.eup %2336  ;;  %v796_v8 = vmul.f32 %v2335_v3, %v792_v22  ;;  %872 = vmatmul.mubr.bf16.vlgmr.msra.gmra.mrb[8].mxu0 %v838_v10  ;;  %2136 = vmatmul.mubr.bf16.vlgmr.msra.gmra.mrb[8].mxu1 %v838_v10  ;;  %v3483_v3 = vld [vmem:[#allocation15_spill] sm:$0xff] }
 0x137   :  { %v797_v16 = vmul.f32 %v2337_v7, %v793_v14  ;;  %1009 = vmatpush1.bf16.msra.mxu0 %v2701_v27  ;;  %2140 = vmatpush3.bf16.msra.mxu1 %v2758_v37  ;;  %v2339_v25 = vpop.eup %2338  ;;  %v3488_v7 = vld [vmem:[#allocation13_spill] sm:$0xff] }
 0x138   :  { %v798_v17 = vadd.f32 %v796_v8, %v518_v63  ;;  %1010 = vmatprep.subr.bf16.mxu0 %v2706_v28  ;;  %2141 = vmatprep.subr.bf16.mxu1 %v3477_v24  ;;  %v2341_v26 = vpop.eup %2340  ;;  %v802_v18 = vsub.f32 1.0, %v2339_v25  ;;  %v811_v57 = vmul.f32 %v2339_v25, %v807_v11  ;;  %v3489_v8 = vld [vmem:[#allocation21_spill] sm:$0xff]  ;;  %v3495_v11 = vld [vmem:[#allocation23_spill] sm:$0xff] }
 0x139   :  { %v799_v13 = vadd.f32 %v797_v16, %v520_v15  ;;  %1040 = vmatprep.mubr.bf16.mxu0 %v3478_v53  ;;  %2155 = vmatprep.mubr.msk.bf16.mxu1 %vm2516_vm0, %v3477_v24  ;;  %v803_v23 = vsub.f32 1.0, %v2341_v26  ;;  %v812_v56 = vmul.f32 %v2341_v26, %v808_v33  ;;  %v3484_v15 = vld [vmem:[#allocation9_spill] sm:$0xff]  ;;  %v3490_v16 = vld [vmem:[#allocation14_spill] sm:$0xff]  ;;  %v3494_v26 = vld [vmem:[#allocation19_spill] sm:$0xff] }
 0x13a   :  { %2342 = vtanh.f32 %v798_v17  ;;  %v3491_v17 = vld [vmem:[#allocation16_spill] sm:$0xff]  ;;  %v3493_v25 = vld [vmem:[#allocation17_spill] sm:$0xff] }
 0x13b   :  { %2344 = vtanh.f32 %v799_v13  ;;  %1011 = vmatpush1.bf16.msra.mxu0 %v2719_v30  ;;  %2142 = vmatpush3.bf16.msra.mxu1 %v2777_v40  ;;  %v3492_v13 = vld [vmem:[#allocation22_spill] sm:$0xff]  ;;  %v3496_v33 = vld [vmem:[#allocation20_spill] sm:$0xff] }
 0x13c   :  { %1012 = vmatprep.subr.bf16.mxu0 %v2725_v31  ;;  %2143 = vmatprep.subr.bf16.mxu1 %v3477_v24 }
 0x13f   :  { %1013 = vmatpush1.bf16.msra.mxu0 %v2746_v35  ;;  %2144 = vmatpush3.bf16.msra.mxu1 %v2798_v43 }
 0x140   :  { %1014 = vmatprep.subr.bf16.mxu0 %v2752_v36  ;;  %2145 = vmatprep.subr.bf16.mxu1 %v3477_v24 }
 0x143   :  { %1015 = vmatpush1.bf16.msra.mxu0 %v2765_v38  ;;  %2146 = vmatpush3.bf16.msra.mxu1 %v2817_v46 }
 0x144   :  { %v2343_v21 = vpop.eup %2342  ;;  %1016 = vmatprep.subr.bf16.mxu0 %v2771_v39  ;;  %2147 = vmatprep.subr.bf16.mxu1 %v3477_v24 }
 0x145   :  { %v2345_v19 = vpop.eup %2344  ;;  %v804_v32 = vmul.f32 %v2343_v21, %v802_v18  ;;  %v833_v18 = vld [vmem:[#allocation4 + $0x6] sm:$0x15]  ;;  %v832_v21 = vld [vmem:[#allocation4] sm:$0x15] }
 0x146   :  { %v805_v34 = vmul.f32 %v2345_v19, %v803_v23  ;;  %v836_v23 = vunpack.c.l.bf16 %v833_v18  ;;  %v834_v19 = vunpack.c.l.bf16 %v832_v21 }
 0x147   :  { %v813_v51 = vadd.f32 %v811_v57, %v804_v32  ;;  %1017 = vmatpush1.bf16.msra.mxu0 %v2786_v41  ;;  %2148 = vmatpush3.bf16.msra.mxu1 %v2836_v49 }
 0x148   :  { %v814_v22 = vadd.f32 %v812_v56, %v805_v34  ;;  %1018 = vmatprep.subr.bf16.mxu0 %v2792_v42  ;;  %2149 = vmatprep.subr.bf16.mxu1 %v3477_v24  ;;  %v3497_v56 = vld [vmem:[#allocation25_spill] sm:$0xff] }
 0x149   :  { %v820_v20 = vrot.slane %v813_v51, %v3015_v62  ;;  %829 = vst [vmem:[%s3421_s5] sm:$0x8] %v813_v51 }
 0x14a   :  { %v824_v59 = vrot.slane %v814_v22, %v3015_v62  ;;  %830 = vst [vmem:[%s3421_s5 + $0x4] sm:$0x8] %v814_v22 }
 0x14b   :  { %1019 = vmatpush1.bf16.msra.mxu0 %v2805_v44  ;;  %2150 = vmatpush3.bf16.msra.mxu1 %v2852_v52 }
 0x14c   :  { %v826_v14 = vsel %vm825_vm2, %v824_v59, %v820_v20  ;;  %1020 = vmatprep.subr.bf16.mxu0 %v2811_v45  ;;  %2151 = vmatprep.subr.bf16.mxu1 %v3477_v24  ;;  %v3498_v20 = vld [vmem:[#allocation26_spill] sm:$0xff] }
 0x14d   :  { %828 = vst [vmem:[#allocation3 - $0x3] sm:$0x18] %v826_v14  ;;  %v941_v14 = vrot.slane %v836_v23, 4 }
 0x14f   :  { %1021 = vmatpush1.bf16.msra.mxu0 %v2824_v47  ;;  %2152 = vmatpush3.bf16.msra.mxu1 %v2862_v54 }
 0x150   :  { %1022 = vmatprep.subr.bf16.mxu0 %v2830_v48  ;;  %2153 = vmatprep.subr.bf16.mxu1 %v3477_v24 }
 0x153   :  { %1023 = vmatpush1.bf16.msra.mxu0 %v2843_v50  ;;  %2154 = vmatpush3.bf16.msra.mxu1 %v2872_v55 }
 0x154   :  { %v3040_v63 = vld [vmem:[#allocation3] sm:$0x3]  ;;  %1181 = vmatprep.subr.bf16.mxu0 %v2550_v0  ;;  %2159 = vmatprep.subr.bf16.mxu1 %v3477_v24 }
 0x155   :  { %v1007_v10 = vpack.c.bf16 %v3040_v63, %v3040_v63  ;;  %v3479_v0 = vld [vmem:[#allocation6_spill] sm:$0xff] }
 0x157   :  { %1041 = vmatmul.mubr.bf16.vlgmr.msra.gmra.mrb[12].mxu0 %v1007_v10  ;;  %2156 = vmatmul.mubr.bf16.vlgmr.msra.gmra.mrb[12].mxu1 %v1007_v10 }
 0x158   :  { %1182 = vmatpush1.bf16.msra.mxu0 %v2555_v1  ;;  %2160 = vmatpush3.bf16.msra.mxu1 %v2596_v9  ;;  %v3480_v1 = vld [vmem:[#allocation12_spill] sm:$0xff] }
 0x159   :  { %1183 = vmatprep.subr.bf16.mxu0 %v2565_v4  ;;  %2161 = vmatprep.subr.bf16.mxu1 %v3477_v24  ;;  %v3481_v4 = vld [vmem:[#allocation7_spill] sm:$0xff]  ;;  %v3482_v9 = vld [vmem:[#allocation8_spill] sm:$0xff] }
 0x15a   :  { %1213 = vmatprep.mubr.bf16.mxu0 %v3478_v53  ;;  %2175 = vmatprep.mubr.msk.bf16.mxu1 %vm2516_vm0, %v3477_v24 }
 0x15c   :  { %1184 = vmatpush1.bf16.msra.mxu0 %v2573_v5  ;;  %2162 = vmatpush3.bf16.msra.mxu1 %v2614_v12  ;;  %v3485_v5 = vld [vmem:[#allocation10_spill] sm:$0xff]  ;;  %v3487_v12 = vld [vmem:[#allocation11_spill] sm:$0xff] }
 0x15d   :  { %1185 = vmatprep.subr.bf16.mxu0 %v2579_v6  ;;  %2163 = vmatprep.subr.bf16.mxu1 %v3477_v24  ;;  %v3486_v6 = vld [vmem:[#allocation18_spill] sm:$0xff] }
 0x160   :  { %1186 = vmatpush1.bf16.msra.mxu0 %v3479_v0  ;;  %2164 = vmatpush3.bf16.msra.mxu1 %v3480_v1 }
 0x161   :  { %1187 = vmatprep.subr.bf16.mxu0 %v3481_v4  ;;  %2165 = vmatprep.subr.bf16.mxu1 %v3477_v24 }
 0x164   :  { %1188 = vmatpush1.bf16.msra.mxu0 %v3482_v9  ;;  %2166 = vmatpush3.bf16.msra.mxu1 %v3483_v3 }
 0x165   :  { %1189 = vmatprep.subr.bf16.mxu0 %v3484_v15  ;;  %2167 = vmatprep.subr.bf16.mxu1 %v3477_v24  ;;  %v940_v15 = vrot.slane %v834_v19, 4 }
 0x168   :  { %1190 = vmatpush1.bf16.msra.mxu0 %v3485_v5  ;;  %2168 = vmatpush3.bf16.msra.mxu1 %v3486_v6 }
 0x169   :  { %1191 = vmatprep.subr.bf16.mxu0 %v3487_v12  ;;  %2169 = vmatprep.subr.bf16.mxu1 %v3477_v24 }
 0x16c   :  { %1192 = vmatpush1.bf16.msra.mxu0 %v3488_v7  ;;  %2170 = vmatpush3.bf16.msra.mxu1 %v3489_v8 }
 0x16d   :  { %1193 = vmatprep.subr.bf16.mxu0 %v3490_v16  ;;  %2171 = vmatprep.subr.bf16.mxu1 %v3477_v24 }
 0x170   :  { %1194 = vmatpush1.bf16.msra.mxu0 %v3491_v17  ;;  %2172 = vmatpush3.bf16.msra.mxu1 %v3492_v13 }
 0x171   :  { %1195 = vmatprep.subr.bf16.mxu0 %v3493_v25  ;;  %2173 = vmatprep.subr.bf16.mxu1 %v3477_v24 }
 0x174   :  { %1196 = vmatpush1.bf16.msra.mxu0 %v3494_v26  ;;  %2174 = vmatpush3.bf16.msra.mxu1 %v3495_v11 }
 0x175   :  { %1353 = vmatprep.subr.bf16.mxu0 %v3496_v33  ;;  %2179 = vmatprep.subr.bf16.mxu1 %v3477_v24 }
 0x209   :  { %v873_v57 = vpop.f32.mrb[8].mxu0  ;;  %v914_v32 = vpop.f32.mrb[8].mxu1 }
 0x20a   :  { %v874_v34 = vadd.f32 %v873_v57, %v3497_v56  ;;  %v875_v51 = vpop.f32.mrb[9].mxu0  ;;  %v2137_v22 = vpop.f32.mrb[9].mxu1 }
 0x20b   :  { %v876_v59 = vadd.f32 %v875_v51, %v3498_v20  ;;  %v877_v10 = vpop.f32.mrb[10].mxu0  ;;  %v917_v0 = vpop.f32.mrb[10].mxu1  ;;  %v837_v22 = vunpack.c.h.bf16 %v833_v18 }
 0x20c   :  { %v921_v1 = vrot.slane %v874_v34, 7  ;;  %v925_v4 = vadd.f32 %v874_v34, %v836_v23  ;;  %v878_v9 = vpop.f32.mrb[11].mxu0  ;;  %v2138_v3 = vpop.f32.mrb[11].mxu1  ;;  %v3499_v34 = vld [vmem:[#allocation27_spill] sm:$0xff]  ;;  %v3084_v10 = vld [vmem:[#allocation5] sm:$0x2a]  ;;  %v835_v0 = vunpack.c.h.bf16 %v832_v21 }
 0x20d   :  { %v945_v5 = vrot.slane %v876_v59, 7  ;;  %v949_v7 = vadd.f32 %v941_v14, %v876_v59  ;;  %v3086_v9 = vld [vmem:[#allocation5 + $0x6] sm:$0x2a] }
 0x20e   :  { %v924_v6 = vadd.f32 %v921_v1, %v834_v19  ;;  %v1984_v12 = vmul.f32 -1.442695, %v925_v4  ;;  %v915_v19 = vadd.f32 %v914_v32, %v3499_v34  ;;  %v1005_v18 = vunpack.c.l.bf16 %v3086_v9 }
 0x20f   :  { %v948_v16 = vadd.f32 %v945_v5, %v940_v15  ;;  %v1986_v17 = vmul.f32 -1.442695, %v949_v7 }
 0x210   :  { %v1983_v8 = vmul.f32 -1.442695, %v924_v6  ;;  %2346 = vpow2.f32 %v1984_v12  ;;  %v963_v1 = vrot.slane %v915_v19, 7  ;;  %v1003_v6 = vunpack.c.l.bf16 %v3084_v10 }
 0x211   :  { %v1985_v13 = vmul.f32 -1.442695, %v948_v16 }
 0x212   :  { %2348 = vpow2.f32 %v1983_v8 }
 0x213   :  { %2350 = vpow2.f32 %v1986_v17  ;;  %v3500_v17 = vld [vmem:[#allocation28_spill] sm:$0xff] }
 0x214   :  { %2352 = vpow2.f32 %v1985_v13 }
 0x21a   :  { %v2347_v25 = vpop.eup %2346 }
 0x21b   :  { %v933_v26 = vadd.f32 1.0, %v2347_v25 }
 0x21c   :  { %v2349_v11 = vpop.eup %2348 }
 0x21d   :  { %v932_v33 = vadd.f32 1.0, %v2349_v11  ;;  %2354 = vrcp.f32 %v933_v26  ;;  %v2351_v23 = vpop.eup %2350 }
 0x21e   :  { %v2353_v57 = vpop.eup %2352  ;;  %v957_v51 = vadd.f32 1.0, %v2351_v23 }
 0x21f   :  { %2356 = vrcp.f32 %v932_v33  ;;  %v956_v59 = vadd.f32 1.0, %v2353_v57 }
 0x220   :  { %2358 = vrcp.f32 %v957_v51 }
 0x221   :  { %2360 = vrcp.f32 %v956_v59 }
 0x227   :  { %v2355_v14 = vpop.eup %2354 }
 0x228   :  { %v967_v4 = vmul.f32 %v2355_v14, %v915_v19  ;;  %v1110_v19 = vrot.slane %v1003_v6, 4  ;;  %v1111_v14 = vrot.slane %v1005_v18, 4 }
 0x229   :  { %v2357_v3 = vpop.eup %2356 }
 0x22a   :  { %v966_v15 = vmul.f32 %v2357_v3, %v963_v1  ;;  %v969_v5 = vadd.f32 %v967_v4, %v837_v22  ;;  %v1042_v12 = vpop.f32.mrb[12].mxu0  ;;  %v1083_v32 = vpop.f32.mrb[12].mxu1 }
 0x22b   :  { %v1043_v7 = vadd.f32 %v1042_v12, %v2960_v61  ;;  %v1044_v8 = vpop.f32.mrb[13].mxu0  ;;  %v2157_v16 = vpop.f32.mrb[13].mxu1 }
 0x22c   :  { %v968_v21 = vadd.f32 %v966_v15, %v835_v0  ;;  %2362 = vtanh.f32 %v969_v5  ;;  %v1045_v13 = vadd.f32 %v1044_v8, %v3500_v17  ;;  %v1046_v25 = vpop.f32.mrb[14].mxu0  ;;  %v1086_v26 = vpop.f32.mrb[14].mxu1 }
 0x22d   :  { %v1090_v11 = vrot.slane %v1043_v7, 6  ;;  %v1091_v33 = vrot.slane %v1043_v7, 7  ;;  %v1047_v23 = vpop.f32.mrb[15].mxu0  ;;  %v2158_v57 = vpop.f32.mrb[15].mxu1  ;;  %v977_v7 = vrot.slane %v2987_v2, 7 }
 0x22e   :  { %2364 = vtanh.f32 %v968_v21  ;;  %v1115_v51 = vrot.slane %v1045_v13, 6  ;;  %v1116_v1 = vrot.slane %v1045_v13, 7  ;;  %v2359_v12 = vpop.eup %2358 }
 0x22f   :  { %v1094_v22 = vadd.f32 %v1090_v11, %v1003_v6  ;;  %v1095_v59 = vadd.f32 %v1091_v33, %v1005_v18  ;;  %v2361_v5 = vpop.eup %2360  ;;  %v973_v8 = vsub.f32 1.0, %v2359_v12  ;;  %v981_v6 = vmul.f32 %v2359_v12, %v2987_v2 }
 0x230   :  { %v1119_v0 = vadd.f32 %v1115_v51, %v1110_v19  ;;  %v1120_v15 = vadd.f32 %v1116_v1, %v1111_v14  ;;  %v972_v21 = vsub.f32 1.0, %v2361_v5  ;;  %v980_v33 = vmul.f32 %v2361_v5, %v977_v7  ;;  %v3501_v51 = vld [vmem:[#allocation24_spill] sm:$0xff] }
 0x231   :  { %v1987_v4 = vmul.f32 -1.442695, %v1094_v22  ;;  %v1988_v3 = vmul.f32 -1.442695, %v1095_v59  ;;  %v1004_v7 = vunpack.c.h.bf16 %v3084_v10 }
 0x232   :  { %v1989_v25 = vmul.f32 -1.442695, %v1119_v0  ;;  %v1990_v11 = vmul.f32 -1.442695, %v1120_v15  ;;  %v1084_v0 = vadd.f32 %v1083_v32, %v2983_v58 }
 0x233   :  { %2366 = vpow2.f32 %v1987_v4 }
 0x234   :  { %2368 = vpow2.f32 %v1988_v3 }
 0x235   :  { %2370 = vpow2.f32 %v1989_v25  ;;  %v1134_v25 = vrot.slane %v1084_v0, 6 }
 0x236   :  { %v2363_v16 = vpop.eup %2362  ;;  %2372 = vpow2.f32 %v1990_v11 }
 0x237   :  { %v975_v26 = vmul.f32 %v2363_v16, %v973_v8 }
 0x238   :  { %v2365_v18 = vpop.eup %2364 }
 0x239   :  { %v974_v13 = vmul.f32 %v2365_v18, %v972_v21  ;;  %v983_v23 = vadd.f32 %v981_v6, %v975_v26  ;;  %v1006_v26 = vunpack.c.h.bf16 %v3086_v9  ;;  %v1135_v6 = vrot.slane %v1084_v0, 7  ;;  %v2484_v0 = vld [vmem:[%s3418_s2 + $0x94] ss:$12 sps:$4 sm:$0xff]  }
 0x23b   :  { %v982_v57 = vadd.f32 %v980_v33, %v974_v13  ;;  %999 = vst [vmem:[%s3420_s4 + $0x4] sm:$0x2] %v983_v23  ;;  %v993_v59 = vrot.slane %v983_v23, %v3501_v51 }
 0x23d   :  { %v2367_v19 = vpop.eup %2366  ;;  %v989_v22 = vrot.slane %v982_v57, %v3501_v51  ;;  %998 = vst [vmem:[%s3420_s4] sm:$0x2] %v982_v57  ;;  %v2474_v57 = vld [vmem:[%s3418_s2 + $0x38] ss:$12 sps:$4 sm:$0xff]  }
 0x23e   :  { %v2369_v2 = vpop.eup %2368  ;;  %v1102_v14 = vadd.f32 1.0, %v2367_v19  ;;  %v2475_v19 = vld [vmem:[%s3418_s2 + $0x4c] ss:$12 sps:$4 sm:$0xff]  }
 0x23f   :  { %v995_v1 = vsel %vm994_vm3, %v993_v59, %v989_v22  ;;  %v1103_v4 = vadd.f32 1.0, %v2369_v2  ;;  %v2371_v3 = vpop.eup %2370  ;;  %v2476_v22 = vld [vmem:[%s3418_s2 + $0x48] ss:$12 sps:$4 sm:$0xff]   ;;  %v2477_v59 = vld [vmem:[%s3418_s2 + $0x50] ss:$12 sps:$4 sm:$0xff]  }
 0x240   :  { %997 = vst [vmem:[#allocation2 - $0x1] sm:$0x6] %v995_v1  ;;  %2374 = vrcp.f32 %v1102_v14  ;;  %v2373_v12 = vpop.eup %2372  ;;  %v1127_v15 = vadd.f32 1.0, %v2371_v3  ;;  %v2478_v2 = vld [vmem:[%s3418_s2 + $0x64] ss:$12 sps:$4 sm:$0xff]  }
 0x241   :  { %2376 = vrcp.f32 %v1103_v4  ;;  %v1128_v8 = vadd.f32 1.0, %v2373_v12  ;;  %v2479_v14 = vld [vmem:[%s3418_s2 + $0x60] ss:$12 sps:$4 sm:$0xff]   ;;  %v2480_v1 = vld [vmem:[%s3418_s2 + $0x68] ss:$12 sps:$4 sm:$0xff]  }
 0x242   :  { %2378 = vrcp.f32 %v1127_v15  ;;  %v2481_v4 = vld [vmem:[%s3418_s2 + $0x7c] ss:$12 sps:$4 sm:$0xff]   ;;  %v2482_v3 = vld [vmem:[%s3418_s2 + $0x78] ss:$12 sps:$4 sm:$0xff]   ;;  %v2483_v12 = vld [vmem:[%s3418_s2 + $0x80] ss:$12 sps:$4 sm:$0xff]  }
 0x243   :  { %2380 = vrcp.f32 %v1128_v8  ;;  %v2485_v15 = vld [vmem:[%s3418_s2 + $0x90] ss:$12 sps:$4 sm:$0xff]   ;;  %v2486_v8 = vld [vmem:[%s3418_s2 + $0x98] ss:$12 sps:$4 sm:$0xff]  }
 0x247   :  { %v3104_v5 = vld [vmem:[#allocation2] sm:$0x3] }
 0x248   :  { %v1180_v16 = vpack.c.bf16 %v3104_v5, %v3104_v5 }
 0x24a   :  { %v2375_v21 = vpop.eup %2374  ;;  %1214 = vmatmul.mubr.bf16.vlgmr.msra.gmra.mrb[16].mxu0 %v1180_v16  ;;  %2176 = vmatmul.mubr.bf16.vlgmr.msra.gmra.mrb[16].mxu1 %v1180_v16  ;;  %v2487_v16 = vld [vmem:[%s3418_s2 + $0xac] ss:$12 sps:$4 sm:$0xff]  }
 0x24b   :  { %v2377_v11 = vpop.eup %2376  ;;  %v1138_v18 = vmul.f32 %v2375_v21, %v1134_v25  ;;  %1354 = vmatpush1.bf16.msra.mxu0 %v2701_v27  ;;  %2180 = vmatpush3.bf16.msra.mxu1 %v2758_v37  ;;  %v1149_v37 = vrot.slane %v3040_v63, 6  ;;  %v2489_v25 = vld [vmem:[%s3418_s2 + $0xb0] ss:$12 sps:$4 sm:$0xff]  }
 0x24c   :  { %v1139_v32 = vmul.f32 %v2377_v11, %v1135_v6  ;;  %1355 = vmatprep.subr.bf16.mxu0 %v2706_v28  ;;  %2181 = vmatprep.subr.bf16.mxu1 %v3477_v24  ;;  %v2379_v27 = vpop.eup %2378  ;;  %v2490_v21 = vld [vmem:[%s3418_s2 + $0xc4] ss:$12 sps:$4 sm:$0xff]   ;;  %v3245_v6 = vld [vmem:[#allocation4 + $0x6] sm:$0x2a] }
 0x24d   :  { %v1140_v10 = vadd.f32 %v1138_v18, %v1004_v7  ;;  %1385 = vmatprep.mubr.bf16.mxu0 %v3478_v53  ;;  %2195 = vmatprep.mubr.msk.bf16.mxu1 %vm2516_vm0, %v3477_v24  ;;  %v2381_v28 = vpop.eup %2380  ;;  %v1153_v13 = vmul.f32 %v2379_v27, %v1149_v37  ;;  %v2488_v7 = vld [vmem:[%s3418_s2 + $0xa8] ss:$12 sps:$4 sm:$0xff]  }
 0x24e   :  { %v1141_v9 = vadd.f32 %v1139_v32, %v1006_v26  ;;  %v1174_v26 = vld [vmem:[#allocation4] sm:$0x2a] }
 0x24f   :  { %2382 = vtanh.f32 %v1140_v10  ;;  %1356 = vmatpush1.bf16.msra.mxu0 %v2719_v30  ;;  %2182 = vmatpush3.bf16.msra.mxu1 %v2777_v40  ;;  %v1144_v30 = vsub.f32 1.0, %v2379_v27  ;;  %v1150_v40 = vrot.slane %v3040_v63, 7  ;;  %v1176_v11 = vunpack.c.l.bf16 %v1174_v26 }
 0x250   :  { %2384 = vtanh.f32 %v1141_v9  ;;  %1357 = vmatprep.subr.bf16.mxu0 %v2725_v31  ;;  %2183 = vmatprep.subr.bf16.mxu1 %v3477_v24  ;;  %v1178_v10 = vunpack.c.l.bf16 %v3245_v6 }
 0x251   :  { %v1154_v23 = vmul.f32 %v2381_v28, %v1150_v40 }
 0x253   :  { %1358 = vmatpush1.bf16.msra.mxu0 %v2746_v35  ;;  %2184 = vmatpush3.bf16.msra.mxu1 %v2798_v43  ;;  %v1145_v35 = vsub.f32 1.0, %v2381_v28 }
 0x254   :  { %1359 = vmatprep.subr.bf16.mxu0 %v2752_v36  ;;  %2185 = vmatprep.subr.bf16.mxu1 %v3477_v24 }
 0x257   :  { %1360 = vmatpush1.bf16.msra.mxu0 %v2765_v38  ;;  %2186 = vmatpush3.bf16.msra.mxu1 %v2817_v46 }
 0x258   :  { %1361 = vmatprep.subr.bf16.mxu0 %v2771_v39  ;;  %2187 = vmatprep.subr.bf16.mxu1 %v3477_v24 }
 0x259   :  { %v2383_v31 = vpop.eup %2382 }
 0x25a   :  { %v2385_v36 = vpop.eup %2384  ;;  %v1146_v43 = vmul.f32 %v2383_v31, %v1144_v30 }
 0x25b   :  { %v1147_v33 = vmul.f32 %v2385_v36, %v1145_v35  ;;  %1362 = vmatpush1.bf16.msra.mxu0 %v2786_v41  ;;  %2188 = vmatpush3.bf16.msra.mxu1 %v2836_v49  ;;  %v2469_v49 = vld [vmem:[%s3418_s2 + $0x1c] ss:$12 sps:$4 sm:$0xff]  }
 0x25c   :  { %v1155_v38 = vadd.f32 %v1153_v13, %v1146_v43  ;;  %1363 = vmatprep.subr.bf16.mxu0 %v2792_v42  ;;  %2189 = vmatprep.subr.bf16.mxu1 %v3477_v24  ;;  %v2466_v42 = vld [vmem:[%s3418_s2 + $0x4] ss:$12 sps:$4 sm:$0xff]   ;;  %v1283_v13 = vrot.slane %v1176_v11, 4 }
 0x25d   :  { %v1156_v39 = vadd.f32 %v1154_v23, %v1147_v33 }
 0x25e   :  { %v1162_v46 = vrot.slane %v1155_v38, %v2942_v29  ;;  %1171 = vst [vmem:[%s3421_s5] sm:$0x4] %v1155_v38 }
 0x25f   :  { %v1166_v63 = vrot.slane %v1156_v39, %v2942_v29  ;;  %1172 = vst [vmem:[%s3421_s5 + $0x4] sm:$0x4] %v1156_v39  ;;  %1364 = vmatpush1.bf16.msra.mxu0 %v2805_v44  ;;  %2190 = vmatpush3.bf16.msra.mxu1 %v2852_v52  ;;  %v2471_v52 = vld [vmem:[%s3418_s2 + $0x20] ss:$12 sps:$4 sm:$0xff]   ;;  %v1284_v39 = vrot.slane %v1178_v10, 4 }
 0x260   :  { %1365 = vmatprep.subr.bf16.mxu0 %v2811_v45  ;;  %2191 = vmatprep.subr.bf16.mxu1 %v3477_v24 }
 0x261   :  { %v1168_v41 = vsel %vm1167_vm4, %v1166_v63, %v1162_v46 }
 0x262   :  { %1170 = vst [vmem:[#allocation3 - $0x2] sm:$0xc] %v1168_v41 }
 0x263   :  { %1366 = vmatpush1.bf16.msra.mxu0 %v2824_v47  ;;  %2192 = vmatpush3.bf16.msra.mxu1 %v2862_v54  ;;  %v2467_v47 = vld [vmem:[%s3418_s2] ss:$12 sps:$4 sm:$0xff]  }
 0x264   :  { %1367 = vmatprep.subr.bf16.mxu0 %v2830_v48  ;;  %2193 = vmatprep.subr.bf16.mxu1 %v3477_v24  ;;  %v2468_v48 = vld [vmem:[%s3418_s2 + $0x8] ss:$12 sps:$4 sm:$0xff]  }
 0x265   :  { %v2472_v54 = vld [vmem:[%s3418_s2 + $0x34] ss:$12 sps:$4 sm:$0xff]  }
 0x267   :  { %1368 = vmatpush1.bf16.msra.mxu0 %v2843_v50  ;;  %2194 = vmatpush3.bf16.msra.mxu1 %v2872_v55  ;;  %v2470_v50 = vld [vmem:[%s3418_s2 + $0x18] ss:$12 sps:$4 sm:$0xff]   ;;  %v2473_v55 = vld [vmem:[%s3418_s2 + $0x30] ss:$12 sps:$4 sm:$0xff]  }
 0x268   :  { %1521 = vmatprep.subr.bf16.mxu0 %v2466_v42  ;;  %2199 = vmatprep.subr.bf16.mxu1 %v3477_v24 }
 0x269   :  { %v3158_v44 = vld [vmem:[#allocation3] sm:$0x3] }
 0x26a   :  { %v1352_v45 = vpack.c.bf16 %v3158_v44, %v3158_v44 }
 0x26c   :  { %1386 = vmatmul.mubr.bf16.vlgmr.msra.gmra.mrb[20].mxu0 %v1352_v45  ;;  %2196 = vmatmul.mubr.bf16.vlgmr.msra.gmra.mrb[20].mxu1 %v1352_v45 }
 0x26d   :  { %1522 = vmatpush1.bf16.msra.mxu0 %v2467_v47  ;;  %2200 = vmatpush3.bf16.msra.mxu1 %v2468_v48 }
 0x26e   :  { %1523 = vmatprep.subr.bf16.mxu0 %v2469_v49  ;;  %2201 = vmatprep.subr.bf16.mxu1 %v3477_v24 }
 0x26f   :  { %1553 = vmatprep.mubr.bf16.mxu0 %v3478_v53  ;;  %2215 = vmatprep.mubr.msk.bf16.mxu1 %vm2516_vm0, %v3477_v24 }
 0x271   :  { %1524 = vmatpush1.bf16.msra.mxu0 %v2470_v50  ;;  %2202 = vmatpush3.bf16.msra.mxu1 %v2471_v52 }
 0x272   :  { %1525 = vmatprep.subr.bf16.mxu0 %v2472_v54  ;;  %2203 = vmatprep.subr.bf16.mxu1 %v3477_v24 }
 0x275   :  { %1526 = vmatpush1.bf16.msra.mxu0 %v2473_v55  ;;  %2204 = vmatpush3.bf16.msra.mxu1 %v2474_v57 }
 0x276   :  { %1527 = vmatprep.subr.bf16.mxu0 %v2475_v19  ;;  %2205 = vmatprep.subr.bf16.mxu1 %v3477_v24 }
 0x279   :  { %1528 = vmatpush1.bf16.msra.mxu0 %v2476_v22  ;;  %2206 = vmatpush3.bf16.msra.mxu1 %v2477_v59  ;;  %v3251_v59 = vld [vmem:[#allocation5 + $0x6] sm:$0x15] }
 0x27a   :  { %1529 = vmatprep.subr.bf16.mxu0 %v2478_v2  ;;  %2207 = vmatprep.subr.bf16.mxu1 %v3477_v24 }
 0x27d   :  { %1530 = vmatpush1.bf16.msra.mxu0 %v2479_v14  ;;  %2208 = vmatpush3.bf16.msra.mxu1 %v2480_v1  ;;  %v1177_v14 = vunpack.c.h.bf16 %v1174_v26 }
 0x27e   :  { %1531 = vmatprep.subr.bf16.mxu0 %v2481_v4  ;;  %2209 = vmatprep.subr.bf16.mxu1 %v3477_v24  ;;  %v3253_v4 = vld [vmem:[#allocation5] sm:$0x15] }
 0x281   :  { %1532 = vmatpush1.bf16.msra.mxu0 %v2482_v3  ;;  %2210 = vmatpush3.bf16.msra.mxu1 %v2483_v12  ;;  %v1179_v12 = vunpack.c.h.bf16 %v3245_v6 }
 0x282   :  { %1533 = vmatprep.subr.bf16.mxu0 %v2484_v0  ;;  %2211 = vmatprep.subr.bf16.mxu1 %v3477_v24 }
 0x285   :  { %1534 = vmatpush1.bf16.msra.mxu0 %v2485_v15  ;;  %2212 = vmatpush3.bf16.msra.mxu1 %v2486_v8  ;;  %v1350_v15 = vunpack.c.l.bf16 %v3251_v59 }
 0x286   :  { %1535 = vmatprep.subr.bf16.mxu0 %v2487_v16  ;;  %2213 = vmatprep.subr.bf16.mxu1 %v3477_v24 }
 0x289   :  { %1536 = vmatpush1.bf16.msra.mxu0 %v2488_v7  ;;  %2214 = vmatpush3.bf16.msra.mxu1 %v2489_v25  ;;  %v1348_v25 = vunpack.c.l.bf16 %v3253_v4 }
 0x28a   :  { %1693 = vmatprep.subr.bf16.mxu0 %v2490_v21  ;;  %2219 = vmatprep.subr.bf16.mxu1 %v3477_v24 }
 0x31d   :  { %v1215_v18 = vpop.f32.mrb[16].mxu0  ;;  %v1256_v32 = vpop.f32.mrb[16].mxu1 }
 0x31e   :  { %v1216_v9 = vadd.f32 %v1215_v18, %v3497_v56  ;;  %v1217_v27 = vpop.f32.mrb[17].mxu0  ;;  %v2177_v28 = vpop.f32.mrb[17].mxu1  ;;  %v1257_v19 = vadd.f32 %v1256_v32, %v3499_v34 }
 0x31f   :  { %v1218_v30 = vadd.f32 %v1217_v27, %v3498_v20  ;;  %v1219_v37 = vpop.f32.mrb[18].mxu0  ;;  %v1259_v31 = vpop.f32.mrb[18].mxu1  ;;  %v1455_v27 = vrot.slane %v1350_v15, 4 }
 0x320   :  { %v1263_v35 = vrot.slane %v1216_v9, 6  ;;  %v1264_v40 = vrot.slane %v1216_v9, 7  ;;  %v1220_v36 = vpop.f32.mrb[19].mxu0  ;;  %v2178_v43 = vpop.f32.mrb[19].mxu1  ;;  %v1307_v1 = vrot.slane %v1257_v19, 6  ;;  %v1308_v0 = vrot.slane %v1257_v19, 7 }
 0x321   :  { %v1288_v33 = vrot.slane %v1218_v30, 6  ;;  %v1289_v46 = vrot.slane %v1218_v30, 7  ;;  %v1454_v36 = vrot.slane %v1348_v25, 4 }
 0x322   :  { %v1267_v23 = vadd.f32 %v1263_v35, %v1176_v11  ;;  %v1268_v38 = vadd.f32 %v1264_v40, %v1178_v10 }
 0x323   :  { %v1292_v42 = vadd.f32 %v1288_v33, %v1283_v13  ;;  %v1293_v45 = vadd.f32 %v1289_v46, %v1284_v39 }
 0x324   :  { %v1991_v63 = vmul.f32 -1.442695, %v1267_v23  ;;  %v1992_v41 = vmul.f32 -1.442695, %v1268_v38 }
 0x325   :  { %v1993_v47 = vmul.f32 -1.442695, %v1292_v42  ;;  %v1994_v48 = vmul.f32 -1.442695, %v1293_v45  ;;  %v1322_v42 = vrot.slane %v3104_v5, 6 }
 0x326   :  { %2386 = vpow2.f32 %v1991_v63 }
 0x327   :  { %2388 = vpow2.f32 %v1992_v41 }
 0x328   :  { %2390 = vpow2.f32 %v1993_v47 }
 0x329   :  { %2392 = vpow2.f32 %v1994_v48 }
 0x330   :  { %v2387_v49 = vpop.eup %2386 }
 0x331   :  { %v2389_v50 = vpop.eup %2388  ;;  %v1275_v52 = vadd.f32 1.0, %v2387_v49  ;;  %v1323_v49 = vrot.slane %v3104_v5, 7 }
 0x332   :  { %v1276_v54 = vadd.f32 1.0, %v2389_v50  ;;  %v2391_v55 = vpop.eup %2390 }
 0x333   :  { %2394 = vrcp.f32 %v1275_v52  ;;  %v2393_v57 = vpop.eup %2392  ;;  %v1300_v22 = vadd.f32 1.0, %v2391_v55 }
 0x334   :  { %2396 = vrcp.f32 %v1276_v54  ;;  %v1301_v2 = vadd.f32 1.0, %v2393_v57 }
 0x335   :  { %2398 = vrcp.f32 %v1300_v22 }
 0x336   :  { %2400 = vrcp.f32 %v1301_v2 }
 0x33d   :  { %v2395_v3 = vpop.eup %2394 }
 0x33e   :  { %v2397_v8 = vpop.eup %2396  ;;  %v1311_v16 = vmul.f32 %v2395_v3, %v1307_v1 }
 0x33f   :  { %v1312_v7 = vmul.f32 %v2397_v8, %v1308_v0  ;;  %v1387_v21 = vpop.f32.mrb[20].mxu0  ;;  %v1428_v11 = vpop.f32.mrb[20].mxu1 }
 0x340   :  { %v1313_v18 = vadd.f32 %v1311_v16, %v1177_v14  ;;  %v1388_v26 = vadd.f32 %v1387_v21, %v2960_v61  ;;  %v1389_v32 = vpop.f32.mrb[21].mxu0  ;;  %v2197_v10 = vpop.f32.mrb[21].mxu1  ;;  %v1351_v21 = vunpack.c.h.bf16 %v3251_v59  ;;  %v2491_v59 = vld [vmem:[%s3418_s2 + $0xc0] ss:$12 sps:$4 sm:$0xff]  }
 0x341   :  { %v1314_v9 = vadd.f32 %v1312_v7, %v1179_v12  ;;  %v1391_v6 = vpop.f32.mrb[22].mxu0  ;;  %v1431_v28 = vpop.f32.mrb[22].mxu1  ;;  %v1390_v31 = vadd.f32 %v1389_v32, %v3500_v17  ;;  %v1429_v7 = vadd.f32 %v1428_v11, %v2983_v58  ;;  %v1349_v10 = vunpack.c.h.bf16 %v3253_v4  ;;  %v2493_v4 = vld [vmem:[%s3418_s2 + $0xdc] ss:$12 sps:$4 sm:$0xff]  }
 0x342   :  { %2402 = vtanh.f32 %v1313_v18  ;;  %v1435_v30 = vrot.slane %v1388_v26, 7  ;;  %v1439_v37 = vadd.f32 %v1388_v26, %v1350_v15  ;;  %v1392_v35 = vpop.f32.mrb[23].mxu0  ;;  %v2198_v40 = vpop.f32.mrb[23].mxu1 }
 0x343   :  { %2404 = vtanh.f32 %v1314_v9  ;;  %v1459_v33 = vrot.slane %v1390_v31, 7  ;;  %v1463_v23 = vadd.f32 %v1455_v27, %v1390_v31  ;;  %v2399_v46 = vpop.eup %2398  ;;  %v1477_v9 = vrot.slane %v1429_v7, 7  ;;  %v2494_v31 = vld [vmem:[%s3418_s2 + $0xd8] ss:$12 sps:$4 sm:$0xff]   ;;  %v2495_v35 = vld [vmem:[%s3418_s2 + $0xe0] ss:$12 sps:$4 sm:$0xff]  }
 0x344   :  { %v1438_v43 = vadd.f32 %v1435_v30, %v1348_v25  ;;  %v1996_v13 = vmul.f32 -1.442695, %v1439_v37  ;;  %v2401_v63 = vpop.eup %2400  ;;  %v1317_v45 = vsub.f32 1.0, %v2399_v46  ;;  %v1326_v55 = vmul.f32 %v2399_v46, %v1322_v42  ;;  %v2492_v30 = vld [vmem:[%s3418_s2 + $0xc8] ss:$12 sps:$4 sm:$0xff]  }
 0x345   :  { %v1462_v39 = vadd.f32 %v1459_v33, %v1454_v36  ;;  %v1998_v41 = vmul.f32 -1.442695, %v1463_v23  ;;  %v1318_v50 = vsub.f32 1.0, %v2401_v63  ;;  %v1327_v19 = vmul.f32 %v2401_v63, %v1323_v49  ;;  %v2496_v40 = vld [vmem:[%s3418_s2 + $0xf4] ss:$12 sps:$4 sm:$0xff]  }
 0x346   :  { %v1995_v38 = vmul.f32 -1.442695, %v1438_v43  ;;  %2406 = vpow2.f32 %v1996_v13  ;;  %v2497_v36 = vld [vmem:[%s3418_s2 + $0xf0] ss:$12 sps:$4 sm:$0xff]   ;;  %v2498_v43 = vld [vmem:[%s3418_s2 + $0xf8] ss:$12 sps:$4 sm:$0xff]  }
 0x347   :  { %v1997_v47 = vmul.f32 -1.442695, %v1462_v39  ;;  %v2499_v13 = vld [vmem:[%s3418_s2 + $0x10c] ss:$12 sps:$4 sm:$0xff]   ;;  %v2500_v39 = vld [vmem:[%s3418_s2 + $0x108] ss:$12 sps:$4 sm:$0xff]  }
 0x348   :  { %2408 = vpow2.f32 %v1995_v38  ;;  %v2501_v46 = vld [vmem:[%s3418_s2 + $0x110] ss:$12 sps:$4 sm:$0xff]   ;;  %v1491_v63 = vrot.slane %v3158_v44, 7 }
 0x349   :  { %2410 = vpow2.f32 %v1998_v41 }
 0x34a   :  { %2412 = vpow2.f32 %v1997_v47  ;;  %v2502_v47 = vld [vmem:[%s3418_s2 + $0x124] ss:$12 sps:$4 sm:$0xff]  }
 0x34c   :  { %v2403_v48 = vpop.eup %2402 }
 0x34d   :  { %v2405_v52 = vpop.eup %2404  ;;  %v1319_v54 = vmul.f32 %v2403_v48, %v1317_v45 }
 0x34e   :  { %v1320_v57 = vmul.f32 %v2405_v52, %v1318_v50 }
 0x34f   :  { %v1328_v22 = vadd.f32 %v1326_v55, %v1319_v54  ;;  %v2503_v54 = vld [vmem:[%s3418_s2 + $0x120] ss:$12 sps:$4 sm:$0xff]  }
 0x350   :  { %v2407_v2 = vpop.eup %2406  ;;  %v1329_v14 = vadd.f32 %v1327_v19, %v1320_v57  ;;  %v2505_v57 = vld [vmem:[%s3418_s2 + $0x13c] ss:$12 sps:$4 sm:$0xff]  }
 0x351   :  { %v1335_v1 = vrot.slane %v1328_v22, %v2942_v29  ;;  %1343 = vst [vmem:[%s3420_s4] sm:$0x4] %v1328_v22  ;;  %v1447_v3 = vadd.f32 1.0, %v2407_v2  ;;  %v2506_v2 = vld [vmem:[%s3418_s2 + $0x138] ss:$12 sps:$4 sm:$0xff]  }
 0x352   :  { %v2409_v12 = vpop.eup %2408  ;;  %v1339_v5 = vrot.slane %v1329_v14, %v2942_v29  ;;  %1344 = vst [vmem:[%s3420_s4 + $0x4] sm:$0x4] %v1329_v14  ;;  %v2507_v14 = vld [vmem:[%s3418_s2 + $0x140] ss:$12 sps:$4 sm:$0xff]  }
 0x353   :  { %v1446_v0 = vadd.f32 1.0, %v2409_v12  ;;  %2414 = vrcp.f32 %v1447_v3  ;;  %v2411_v8 = vpop.eup %2410  ;;  %v2509_v3 = vld [vmem:[%s3418_s2 + $0x150] ss:$12 sps:$4 sm:$0xff]   ;;  %v2510_v12 = vld [vmem:[%s3418_s2 + $0x158] ss:$12 sps:$4 sm:$0xff]  }
 0x354   :  { %v1340_v15 = vsel %vm1167_vm4, %v1339_v5, %v1335_v1  ;;  %v2413_v16 = vpop.eup %2412  ;;  %v1471_v25 = vadd.f32 1.0, %v2411_v8  ;;  %v2511_v5 = vld [vmem:[%s3418_s2 + $0x16c] ss:$12 sps:$4 sm:$0xff]  }
 0x355   :  { %1342 = vst [vmem:[#allocation2 - $0x2] sm:$0xc] %v1340_v15  ;;  %2416 = vrcp.f32 %v1446_v0  ;;  %v1470_v18 = vadd.f32 1.0, %v2413_v16  ;;  %v2512_v0 = vld [vmem:[%s3418_s2 + $0x168] ss:$12 sps:$4 sm:$0xff]  }
 0x356   :  { %2418 = vrcp.f32 %v1471_v25  ;;  %v2513_v15 = vld [vmem:[%s3418_s2 + $0x170] ss:$12 sps:$4 sm:$0xff]  }
 0x357   :  { %2420 = vrcp.f32 %v1470_v18 }
 0x35c   :  { %v3273_v26 = vld [vmem:[#allocation2] sm:$0x3] }
 0x35d   :  { %v2415_v29 = vpop.eup %2414  ;;  %v1520_v32 = vpack.c.bf16 %v3273_v26, %v3273_v26 }
 0x35e   :  { %v1481_v27 = vmul.f32 %v2415_v29, %v1429_v7  ;;  %v3372_v7 = vld [vmem:[#allocation4] sm:$0x2a] }
 0x35f   :  { %v2417_v6 = vpop.eup %2416  ;;  %1554 = vmatmul.mubr.bf16.vlgmr.msra.gmra.mrb[24].mxu0 %v1520_v32  ;;  %2216 = vmatmul.mubr.bf16.vlgmr.msra.gmra.mrb[24].mxu1 %v1520_v32  ;;  %v1516_v25 = vunpack.c.l.bf16 %v3372_v7 }
 0x360   :  { %v1480_v28 = vmul.f32 %v2417_v6, %v1477_v9  ;;  %v1483_v11 = vadd.f32 %v1481_v27, %v1351_v21  ;;  %1694 = vmatpush1.bf16.msra.mxu0 %v2491_v59  ;;  %2220 = vmatpush3.bf16.msra.mxu1 %v2492_v30 }
 0x361   :  { %1695 = vmatprep.subr.bf16.mxu0 %v2493_v4  ;;  %2221 = vmatprep.subr.bf16.mxu1 %v3477_v24 }
 0x362   :  { %v1482_v37 = vadd.f32 %v1480_v28, %v1349_v10  ;;  %2422 = vtanh.f32 %v1483_v11  ;;  %1725 = vmatprep.mubr.bf16.mxu0 %v3478_v53  ;;  %2235 = vmatprep.mubr.msk.bf16.mxu1 %vm2516_vm0, %v3477_v24  ;;  %v2419_v53 = vpop.eup %2418 }
 0x363   :  { %v2421_v33 = vpop.eup %2420  ;;  %v1487_v23 = vsub.f32 1.0, %v2419_v53  ;;  %v1495_v45 = vmul.f32 %v2419_v53, %v3158_v44  ;;  %v2504_v44 = vld [vmem:[%s3418_s2 + $0x128] ss:$12 sps:$4 sm:$0xff]  }
 0x364   :  { %2424 = vtanh.f32 %v1482_v37  ;;  %1696 = vmatpush1.bf16.msra.mxu0 %v2494_v31  ;;  %2222 = vmatpush3.bf16.msra.mxu1 %v2495_v35  ;;  %v1486_v41 = vsub.f32 1.0, %v2421_v33  ;;  %v1494_v50 = vmul.f32 %v2421_v33, %v1491_v63  ;;  %v1623_v37 = vrot.slane %v1516_v25, 4 }
 0x365   :  { %1697 = vmatprep.subr.bf16.mxu0 %v2496_v40  ;;  %2223 = vmatprep.subr.bf16.mxu1 %v3477_v24 }
 0x368   :  { %1698 = vmatpush1.bf16.msra.mxu0 %v2497_v36  ;;  %2224 = vmatpush3.bf16.msra.mxu1 %v2498_v43 }
 0x369   :  { %1699 = vmatprep.subr.bf16.mxu0 %v2499_v13  ;;  %2225 = vmatprep.subr.bf16.mxu1 %v3477_v24 }
 0x36c   :  { %v2423_v38 = vpop.eup %2422  ;;  %1700 = vmatpush1.bf16.msra.mxu0 %v2500_v39  ;;  %2226 = vmatpush3.bf16.msra.mxu1 %v2501_v46 }
 0x36d   :  { %v1489_v42 = vmul.f32 %v2423_v38, %v1487_v23  ;;  %1701 = vmatprep.subr.bf16.mxu0 %v2502_v47  ;;  %2227 = vmatprep.subr.bf16.mxu1 %v3477_v24 }
 0x36e   :  { %v2425_v48 = vpop.eup %2424 }
 0x36f   :  { %v1488_v49 = vmul.f32 %v2425_v48, %v1486_v41  ;;  %v1497_v52 = vadd.f32 %v1495_v45, %v1489_v42  ;;  %v3381_v48 = vld [vmem:[#allocation5] sm:$0x15] }
 0x370   :  { %1702 = vmatpush1.bf16.msra.mxu0 %v2503_v54  ;;  %2228 = vmatpush3.bf16.msra.mxu1 %v2504_v44 }
 0x371   :  { %v1496_v55 = vadd.f32 %v1494_v50, %v1488_v49  ;;  %1512 = vst [vmem:[%s3421_s5 + $0x4] sm:$0x2] %v1497_v52  ;;  %1703 = vmatprep.subr.bf16.mxu0 %v2505_v57  ;;  %2229 = vmatprep.subr.bf16.mxu1 %v3477_v24  ;;  %v1507_v22 = vrot.slane %v1497_v52, %v3501_v51  ;;  %v3383_v50 = vld [vmem:[#allocation5 + $0x6] sm:$0x15]  ;;  %v1517_v52 = vunpack.c.h.bf16 %v3372_v7 }
 0x373   :  { %v1503_v19 = vrot.slane %v1496_v55, %v3501_v51  ;;  %1511 = vst [vmem:[%s3421_s5] sm:$0x2] %v1496_v55  ;;  %v2508_v51 = vld [vmem:[%s3418_s2 + $0x154] ss:$12 sps:$4 sm:$0xff]  }
 0x374   :  { %1704 = vmatpush1.bf16.msra.mxu0 %v2506_v2  ;;  %2230 = vmatpush3.bf16.msra.mxu1 %v2507_v14 }
 0x375   :  { %v1508_v1 = vsel %vm994_vm3, %v1507_v22, %v1503_v19  ;;  %1705 = vmatprep.subr.bf16.mxu0 %v2508_v51  ;;  %2231 = vmatprep.subr.bf16.mxu1 %v3477_v24  ;;  %v1688_v19 = vunpack.c.l.bf16 %v3381_v48 }
 0x376   :  { %1510 = vst [vmem:[#allocation3 - $0x1] sm:$0x6] %v1508_v1 }
 0x378   :  { %1706 = vmatpush1.bf16.msra.mxu0 %v2509_v3  ;;  %2232 = vmatpush3.bf16.msra.mxu1 %v2510_v12 }
 0x379   :  { %1707 = vmatprep.subr.bf16.mxu0 %v2511_v5  ;;  %2233 = vmatprep.subr.bf16.mxu1 %v3477_v24  ;;  %v3374_v24 = vld [vmem:[#allocation4 + $0x6] sm:$0x2a] }
 0x37a   :  { %v1518_v29 = vunpack.c.l.bf16 %v3374_v24  ;;  %v1519_v55 = vunpack.c.h.bf16 %v3374_v24 }
 0x37c   :  { %1708 = vmatpush1.bf16.msra.mxu0 %v2512_v0  ;;  %2234 = vmatpush3.bf16.msra.mxu1 %v2513_v15  ;;  %v1624_v53 = vrot.slane %v1518_v29, 4 }
 0x37d   :  { %v3368_v8 = vld [vmem:[#allocation3] sm:$0x3] }
 0x37e   :  { %v1692_v16 = vpack.c.bf16 %v3368_v8, %v3368_v8 }
 0x380   :  { %1726 = vmatmul.mubr.bf16.vlgmr.msra.gmra.mrb[28].mxu0 %v1692_v16  ;;  %2236 = vmatmul.mubr.bf16.vlgmr.msra.gmra.mrb[28].mxu1 %v1692_v16 }
 0x432   :  { %v1555_v21 = vpop.f32.mrb[24].mxu0  ;;  %v1596_v18 = vpop.f32.mrb[24].mxu1 }
 0x433   :  { %v1556_v32 = vadd.f32 %v1555_v21, %v3497_v56  ;;  %v1557_v10 = vpop.f32.mrb[25].mxu0  ;;  %v2217_v9 = vpop.f32.mrb[25].mxu1  ;;  %v1597_v45 = vadd.f32 %v1596_v18, %v3499_v34  ;;  %v1690_v34 = vunpack.c.l.bf16 %v3383_v50  ;;  %v1794_v21 = vrot.slane %v1688_v19, 4 }
 0x434   :  { %v1558_v27 = vadd.f32 %v1557_v10, %v3498_v20  ;;  %v1559_v6 = vpop.f32.mrb[26].mxu0  ;;  %v1599_v28 = vpop.f32.mrb[26].mxu1 }
 0x435   :  { %v1603_v11 = vrot.slane %v1556_v32, 5  ;;  %v1604_v59 = vrot.slane %v1556_v32, 6  ;;  %v1560_v30 = vpop.f32.mrb[27].mxu0  ;;  %v2218_v4 = vpop.f32.mrb[27].mxu1  ;;  %v1647_v54 = vrot.slane %v1597_v45, 5  ;;  %v1648_v57 = vrot.slane %v1597_v45, 6 }
 0x436   :  { %v1628_v31 = vrot.slane %v1558_v27, 5  ;;  %v1629_v36 = vrot.slane %v1558_v27, 6  ;;  %v1795_v10 = vrot.slane %v1690_v34, 4 }
 0x437   :  { %v1607_v35 = vadd.f32 %v1603_v11, %v1516_v25  ;;  %v1608_v40 = vadd.f32 %v1604_v59, %v1518_v29 }
 0x438   :  { %v1632_v33 = vadd.f32 %v1628_v31, %v1623_v37  ;;  %v1633_v56 = vadd.f32 %v1629_v36, %v1624_v53  ;;  %v1662_v37 = vrot.slane %v3273_v26, 5 }
 0x439   :  { %v1999_v43 = vmul.f32 -1.442695, %v1607_v35  ;;  %v2000_v13 = vmul.f32 -1.442695, %v1608_v40  ;;  %v1663_v40 = vrot.slane %v3273_v26, 6 }
 0x43a   :  { %v2001_v23 = vmul.f32 -1.442695, %v1632_v33  ;;  %v2002_v20 = vmul.f32 -1.442695, %v1633_v56 }
 0x43b   :  { %2426 = vpow2.f32 %v1999_v43 }
 0x43c   :  { %2428 = vpow2.f32 %v2000_v13 }
 0x43d   :  { %2430 = vpow2.f32 %v2001_v23 }
 0x43e   :  { %2432 = vpow2.f32 %v2002_v20 }
 0x445   :  { %v2427_v38 = vpop.eup %2426 }
 0x446   :  { %v2429_v39 = vpop.eup %2428  ;;  %v1615_v46 = vadd.f32 1.0, %v2427_v38 }
 0x447   :  { %v1616_v63 = vadd.f32 1.0, %v2429_v39  ;;  %v2431_v41 = vpop.eup %2430 }
 0x448   :  { %2434 = vrcp.f32 %v1615_v46  ;;  %v2433_v42 = vpop.eup %2432  ;;  %v1640_v47 = vadd.f32 1.0, %v2431_v41 }
 0x449   :  { %2436 = vrcp.f32 %v1616_v63  ;;  %v1641_v49 = vadd.f32 1.0, %v2433_v42 }
 0x44a   :  { %2438 = vrcp.f32 %v1640_v47 }
 0x44b   :  { %2440 = vrcp.f32 %v1641_v49 }
 0x452   :  { %v2435_v44 = vpop.eup %2434 }
 0x453   :  { %v2437_v22 = vpop.eup %2436  ;;  %v1651_v2 = vmul.f32 %v2435_v44, %v1647_v54  ;;  %v1727_v14 = vpop.f32.mrb[28].mxu0  ;;  %v1689_v44 = vunpack.c.h.bf16 %v3381_v48 }
 0x454   :  { %v1768_v1 = vpop.f32.mrb[28].mxu1  ;;  %v1652_v51 = vmul.f32 %v2437_v22, %v1648_v57  ;;  %v1728_v3 = vadd.f32 %v1727_v14, %v2960_v61  ;;  %v1729_v12 = vpop.f32.mrb[29].mxu0 }
 0x455   :  { %v2237_v5 = vpop.f32.mrb[29].mxu1  ;;  %v1653_v0 = vadd.f32 %v1651_v2, %v1517_v52  ;;  %v1730_v15 = vadd.f32 %v1729_v12, %v3500_v17  ;;  %v1731_v16 = vpop.f32.mrb[30].mxu0  ;;  %v1769_v49 = vadd.f32 %v1768_v1, %v2983_v58  ;;  %v1831_v12 = vrot.slane %v3368_v8, 1 }
 0x456   :  { %v1771_v7 = vpop.f32.mrb[30].mxu1  ;;  %v1654_v24 = vadd.f32 %v1652_v51, %v1519_v55  ;;  %v1775_v25 = vrot.slane %v1728_v3, 1  ;;  %v1732_v18 = vpop.f32.mrb[31].mxu0  ;;  %v1778_v32 = vadd.f32 %v1728_v3, %v1688_v19 }
 0x457   :  { %v2238_v29 = vpop.f32.mrb[31].mxu1  ;;  %2442 = vtanh.f32 %v1653_v0  ;;  %v1799_v9 = vrot.slane %v1730_v15, 1  ;;  %v1802_v28 = vadd.f32 %v1794_v21, %v1730_v15  ;;  %v2439_v17 = vpop.eup %2438  ;;  %v1817_v57 = vrot.slane %v1769_v49, 1 }
 0x458   :  { %2444 = vtanh.f32 %v1654_v24  ;;  %v1779_v27 = vadd.f32 %v1775_v25, %v1690_v34  ;;  %v2003_v6 = vmul.f32 -1.442695, %v1778_v32  ;;  %v2441_v59 = vpop.eup %2440  ;;  %v1657_v31 = vsub.f32 1.0, %v2439_v17 }
 0x459   :  { %v1803_v11 = vadd.f32 %v1799_v9, %v1795_v10  ;;  %v2005_v30 = vmul.f32 -1.442695, %v1802_v28  ;;  %v1658_v53 = vsub.f32 1.0, %v2441_v59  ;;  %v1666_v13 = vmul.f32 %v2439_v17, %v1662_v37 }
 0x45a   :  { %v2004_v61 = vmul.f32 -1.442695, %v1779_v27  ;;  %2446 = vpow2.f32 %v2003_v6  ;;  %v1667_v56 = vmul.f32 %v2441_v59, %v1663_v40 }
 0x45b   :  { %v2006_v4 = vmul.f32 -1.442695, %v1803_v11 }
 0x45c   :  { %2448 = vpow2.f32 %v2004_v61 }
 0x45d   :  { %2450 = vpow2.f32 %v2005_v30 }
 0x45e   :  { %2452 = vpow2.f32 %v2006_v4 }
 0x461   :  { %v2443_v35 = vpop.eup %2442 }
 0x462   :  { %v2445_v36 = vpop.eup %2444  ;;  %v1659_v43 = vmul.f32 %v2443_v35, %v1657_v31 }
 0x463   :  { %v1660_v33 = vmul.f32 %v2445_v36, %v1658_v53 }
 0x464   :  { %v1668_v23 = vadd.f32 %v1666_v13, %v1659_v43  ;;  %v2447_v20 = vpop.eup %2446 }
 0x465   :  { %v1669_v38 = vadd.f32 %v1667_v56, %v1660_v33  ;;  %v1786_v63 = vadd.f32 1.0, %v2447_v20 }
 0x466   :  { %v2449_v39 = vpop.eup %2448  ;;  %v1675_v46 = vrot.slane %v1668_v23, %v3015_v62  ;;  %1683 = vst [vmem:[%s3420_s4] sm:$0x8] %v1668_v23 }
 0x467   :  { %v1679_v26 = vrot.slane %v1669_v38, %v3015_v62  ;;  %1684 = vst [vmem:[%s3420_s4 + $0x4] sm:$0x8] %v1669_v38  ;;  %v1787_v41 = vadd.f32 1.0, %v2449_v39  ;;  %2454 = vrcp.f32 %v1786_v63  ;;  %v2451_v45 = vpop.eup %2450  ;;  %v1691_v62 = vunpack.c.h.bf16 %v3383_v50 }
 0x468   :  { %v2453_v47 = vpop.eup %2452  ;;  %v1810_v52 = vadd.f32 1.0, %v2451_v45 }
 0x469   :  { %v1680_v42 = vsel %vm825_vm2, %v1679_v26, %v1675_v46  ;;  %2456 = vrcp.f32 %v1787_v41  ;;  %v1811_v54 = vadd.f32 1.0, %v2453_v47 }
 0x46a   :  { %1682 = vst [vmem:[#allocation2 - $0x3] sm:$0x18] %v1680_v42  ;;  %2458 = vrcp.f32 %v1810_v52 }
 0x46b   :  { %2460 = vrcp.f32 %v1811_v54 }
 0x471   :  { %v2455_v55 = vpop.eup %2454 }
 0x472   :  { %v1820_v22 = vmul.f32 %v2455_v55, %v1769_v49 }
 0x473   :  { %v2457_v19 = vpop.eup %2456 }
 0x474   :  { %v1821_v2 = vmul.f32 %v2457_v19, %v1817_v57  ;;  %v1822_v34 = vadd.f32 %v1820_v22, %v1689_v44  ;;  %v2459_v51 = vpop.eup %2458 }
 0x475   :  { %v2461_v3 = vpop.eup %2460  ;;  %v1826_v58 = vsub.f32 1.0, %v2459_v51  ;;  %v1834_v50 = vmul.f32 %v2459_v51, %v3368_v8 }
 0x476   :  { %v1823_v14 = vadd.f32 %v1821_v2, %v1691_v62  ;;  %2462 = vtanh.f32 %v1822_v34  ;;  %v1827_v48 = vsub.f32 1.0, %v2461_v3  ;;  %v1835_v16 = vmul.f32 %v2461_v3, %v1831_v12 }
 0x478   :  { %2464 = vtanh.f32 %v1823_v14 }
 0x480   :  { %v2463_v1 = vpop.eup %2462 }
 0x481   :  { %v1828_v0 = vmul.f32 %v2463_v1, %v1826_v58 }
 0x482   :  { %v2465_v5 = vpop.eup %2464 }
 0x483   :  { %v1829_v15 = vmul.f32 %v2465_v5, %v1827_v48  ;;  %v1836_v7 = vadd.f32 %v1834_v50, %v1828_v0 }
 0x485   :  { %v1837_v24 = vadd.f32 %v1835_v16, %v1829_v15  ;;  %1851 = vst [vmem:[%s3421_s5] sm:$0x1] %v1836_v7  ;;  %v1843_v25 = vrot.slane %v1836_v7, %v2919_v60 }
 0x487   :  { %v1847_v21 = vrot.slane %v1837_v24, %v2919_v60  ;;  %1852 = vst [vmem:[%s3421_s5 + $0x4] sm:$0x1] %v1837_v24 }
 0x489   :  { %v1848_v18 = vsel %vm508_vm1, %v1847_v21, %v1843_v25 }
 0x48a   :  { %1850 = vst [vmem:[#allocation3] sm:$0x3] %v1848_v18 }

</bundles_post_ra>
